<compile_context>
chip_gen: v5e
topology: v5e:2x2
jax: 0.10.0
libtpu: 0.0.40
codegen_flags: <defaults>
</compile_context>

<pallas_src>
import functools

import jax
import jax.numpy as jnp
import numpy as np
from jax.experimental import pallas as pl
from jax.experimental.pallas import tpu as pltpu


# ---------------------------------------------------------------------------
# Fused Pallas kernel: full BoostNetFMD forward for one image per grid step.
# ---------------------------------------------------------------------------
def _boostnet_kernel(x_ref, xng_ref, xg_ref,
                     hw_ref, hb_ref,
                     w1_ref, b1_ref, w2_ref, b2_ref,
                     ow_ref, ob_ref,
                     o_ref,
                     pad_ref, slab_ref, cur_ref, headk_ref,
                     *, H, W, F, B):
    """Per grid step (one image), L = H * (W + 2):

      x_ref / xng_ref / xg_ref : (1, 1, L)        f32
      hw_ref                   : (F, 72)          bf16  head conv (9 taps * 8 ch, ch 3..7 zero)
      hb_ref                   : (F, 1)           f32
      w1_ref / w2_ref          : (B, F, 9F)       bf16  res-block convs (tap-major K)
      b1_ref / b2_ref          : (B, F, 1)        f32
      ow_ref                   : (8, 9F)          bf16  out conv (row 0 real, rows 1..7 zero)
      ob_ref                   : (1, 1)           f32
      o_ref                    : (1, 1, L)        f32
      pad_ref                  : (F, (H+3)*(W+2)) bf16  flattened zero-padded activation
      slab_ref                 : (9F, L)          bf16  im2col slab
      cur_ref / headk_ref      : (F, L)           f32   skip copies (block input / head)
    """
    Wp = W + 2
    L = H * Wp
    C0 = Wp + 1                       # flat offset of padded pixel (1, 1)

    # Lanes whose (q mod Wp) >= W are wrap-around "junk" columns; they are
    # masked to zero on every write-back so the halo columns of `pad` stay 0.
    lane = jax.lax.broadcasted_iota(jnp.int32, (1, L), 1)
    valid = (lane % Wp) < W

    # ---- halo-only zeroing (top halo row + row-1 left halo, bottom halo +
    # ---- slack row).  Interiors are always fully overwritten before reads.
    zrow = jnp.zeros((F, 2 * Wp), jnp.bfloat16)
    pad_ref[:, 0:2 * Wp] = zrow
    pad_ref[:, (H + 1) * Wp:(H + 3) * Wp] = zrow

    # ---- in-kernel channel concat of (x, x_noGan, x_gan); channels 3..7 are
    # ---- zero so the head's im2col can copy aligned 8-row groups.
    inp8 = jnp.concatenate(
        [x_ref[0], xng_ref[0], xg_ref[0], jnp.zeros((5, L), jnp.float32)],
        axis=0)
    pad_ref[0:8, C0:C0 + L] = inp8.astype(jnp.bfloat16)

    taps = [(kh, kw) for kh in range(3) for kw in range(3)]

    def im2col(rows_per_tap):
        # 9 contiguous, lane-shifted copies out of the flattened padded buffer.
        for t, (kh, kw) in enumerate(taps):
            off = kh * Wp + kw
            slab_ref[t * rows_per_tap:(t + 1) * rows_per_tap, :] = (
                pad_ref[0:rows_per_tap, off:off + L])

    def write_interior(val):
        # Zero the wrap lanes, then store the whole interior as one
        # contiguous lane-dense bf16 slab.  Returns the masked f32 value.
        masked = jnp.where(valid, val, 0.0)
        pad_ref[:, C0:C0 + L] = masked.astype(jnp.bfloat16)
        return masked

    # ---------------- head: 3x3 conv (3 -> F) + bias + ReLU -----------------
    im2col(8)                                                 # K = 9 * 8 = 72
    head = jnp.dot(hw_ref[...], slab_ref[0:72, :],
                   preferred_element_type=jnp.float32)        # (F, L)
    head = jnp.maximum(head + hb_ref[...], 0.0)
    head = write_interior(head)
    cur_ref[...] = head
    headk_ref[...] = head

    # ------------- body: B x (conv -> ReLU -> conv, + skip) -----------------
    for i in range(B):                                        # static unroll
        im2col(F)
        h = jnp.dot(w1_ref[i], slab_ref[...],
                    preferred_element_type=jnp.float32)       # (F, L), K = 9F
        h = jnp.maximum(h + b1_ref[i], 0.0)                   # Dropout(p=0) no-op
        write_interior(h)

        im2col(F)
        h = jnp.dot(w2_ref[i], slab_ref[...],
                    preferred_element_type=jnp.float32)
        h = h + b2_ref[i] + cur_ref[...]                      # res-block skip
        if i == B - 1:
            h = h + headk_ref[...]                            # fused body + head
        h = write_interior(h)
        if i < B - 1:
            cur_ref[...] = h

    # -------- out: 3x3 conv (F -> 1) + bias, then '+ x' input residual ------
    im2col(F)
    out8 = jnp.dot(ow_ref[...], slab_ref[...],
                   preferred_element_type=jnp.float32)        # (8, L), rows 1..7 zero wts
    o_ref[0] = out8[0:1, :] + ob_ref[...] + x_ref[0]


# ---------------------------------------------------------------------------
# Parameter init (HWIO, mirrors BoostNetFMD's conv stack) + packing.
# ---------------------------------------------------------------------------
def init_params(key, num_input_channels=3, num_mid_blocks=2, num_feature_maps=32):
    def conv_params(k, cin, cout):
        kw_, kb_ = jax.random.split(k)
        scale = 1.0 / jnp.sqrt(jnp.float32(cin * 9))
        w = jax.random.normal(kw_, (3, 3, cin, cout), jnp.float32) * scale
        b = jax.random.normal(kb_, (cout,), jnp.float32) * scale
        return w, b

    keys = jax.random.split(key, 2 + 2 * num_mid_blocks)
    params = {"head": conv_params(keys[0], num_input_channels, num_feature_maps)}
    blocks = []
    for i in range(num_mid_blocks):
        w1, b1 = conv_params(keys[1 + 2 * i], num_feature_maps, num_feature_maps)
        w2, b2 = conv_params(keys[2 + 2 * i], num_feature_maps, num_feature_maps)
        blocks.append((w1, b1, w2, b2))
    params["blocks"] = blocks
    params["out"] = conv_params(keys[-1], num_feature_maps, 1)
    return params


def pack_params(params):
    """Pack / cast parameters into the layouts the fused kernel expects."""
    hw, hb = params["head"]                     # (3,3,3,F), (F,)
    F = hw.shape[-1]
    blocks = params["blocks"]
    B = len(blocks)
    assert B >= 1

    def pack_w(w):
        # HWIO (3,3,Cin,Cout) -> (Cout, 9*Cin), tap-major contraction axis.
        cout, cin = w.shape[-1], w.shape[-2]
        return w.transpose(3, 0, 1, 2).reshape(cout, 9 * cin)

    # Head: pad Cin 3 -> 8 (zero weight columns) so its im2col groups are
    # 8-row aligned in the shared slab; K = 9 * 8 = 72.
    hw_t = hw.transpose(3, 0, 1, 2).reshape(F, 9, 3)
    hw_p = jnp.pad(hw_t, ((0, 0), (0, 0), (0, 5))).reshape(F, 72)

    w1 = jnp.stack([pack_w(blk[0]) for blk in blocks])        # (B, F, 9F)
    w2 = jnp.stack([pack_w(blk[2]) for blk in blocks])
    b1 = jnp.stack([blk[1] for blk in blocks]).reshape(B, F, 1)
    b2 = jnp.stack([blk[3] for blk in blocks]).reshape(B, F, 1)

    ow, ob = params["out"]                      # (3,3,F,1), (1,)
    ow_p = jnp.pad(pack_w(ow), ((0, 7), (0, 0)))              # (8, 9F), rows 1..7 zero

    return {
        "hw": hw_p.astype(jnp.bfloat16),
        "hb": hb.reshape(F, 1).astype(jnp.float32),
        "w1": w1.astype(jnp.bfloat16),
        "b1": b1.astype(jnp.float32),
        "w2": w2.astype(jnp.bfloat16),
        "b2": b2.astype(jnp.float32),
        "ow": ow_p.astype(jnp.bfloat16),
        "ob": ob.reshape(1, 1).astype(jnp.float32),
    }


# ---------------------------------------------------------------------------
# Forward wrapper: one pallas_call over a (N,) parallel grid.
# ---------------------------------------------------------------------------
@jax.jit
def boostnet_fmd_forward(packed, x, x_noGan, x_gan):
    """x / x_noGan / x_gan: (N, H, W, 1) f32  ->  (N, H, W, 1) f32."""
    N, H, W, _ = x.shape
    F = packed["hb"].shape[0]
    B = packed["b1"].shape[0]
    assert F % 8 == 0 and F >= 8 and B >= 1
    Wp = W + 2
    L = H * Wp
    PL = (H + 3) * Wp

    def to_wide(img):  # (N,H,W,1) -> (N,1,L): each row right-padded by 2 zero cols
        return jnp.pad(img[..., 0], ((0, 0), (0, 0), (0, 2))).reshape(N, 1, L)

    xw, nw, gw = to_wide(x), to_wide(x_noGan), to_wide(x_gan)

    img_spec = pl.BlockSpec((1, 1, L), lambda n: (n, 0, 0))
    full2 = lambda n: (0, 0)
    full3 = lambda n: (0, 0, 0)

    # flops / bytes hint for XLA's scheduler; VMEM budget with 2x headroom.
    flops = N * (2 * L * F * 72 + B * 4 * L * 9 * F * F + 2 * L * 8 * 9 * F)
    weight_bytes = ((F * 72 + 2 * B * F * 9 * F + 8 * 9 * F) * 2
                    + (2 * B * F + F + 1) * 4)
    bytes_accessed = N * 4 * L * 4 + weight_bytes
    scratch_bytes = F * PL * 2 + 9 * F * L * 2 + 2 * F * L * 4
    vmem_limit = int(min(64 * 2 ** 20,
                         max(8 * 2 ** 20,
                             2 * (scratch_bytes + 2 * weight_bytes + 16 * L * 4))))

    kernel = functools.partial(_boostnet_kernel, H=H, W=W, F=F, B=B)

    out_wide = pl.pallas_call(
        kernel,
        out_shape=jax.ShapeDtypeStruct((N, 1, L), jnp.float32),
        grid=(N,),
        in_specs=[
            img_spec, img_spec, img_spec,                 # x, x_noGan, x_gan
            pl.BlockSpec((F, 72), full2),                 # head conv weights (bf16)
            pl.BlockSpec((F, 1), full2),                  # head bias
            pl.BlockSpec((B, F, 9 * F), full3),           # block conv1 weights
            pl.BlockSpec((B, F, 1), full3),               # block conv1 biases
            pl.BlockSpec((B, F, 9 * F), full3),           # block conv2 weights
            pl.BlockSpec((B, F, 1), full3),               # block conv2 biases
            pl.BlockSpec((8, 9 * F), full2),              # out conv weights (row 0 real)
            pl.BlockSpec((1, 1), full2),                  # out conv bias
        ],
        out_specs=img_spec,
        scratch_shapes=[
            pltpu.VMEM((F, PL), jnp.bfloat16),            # flattened padded activation
            pltpu.VMEM((9 * F, L), jnp.bfloat16),         # im2col slab
            pltpu.VMEM((F, L), jnp.float32),              # block-input skip copy
            pltpu.VMEM((F, L), jnp.float32),              # head copy (body + head)
        ],
        compiler_params=pltpu.CompilerParams(
            dimension_semantics=("parallel",),
            vmem_limit_bytes=vmem_limit,
        ),
        cost_estimate=pl.CostEstimate(
            flops=int(flops),
            transcendentals=0,
            bytes_accessed=int(bytes_accessed)),
    )(xw, nw, gw,
      packed["hw"], packed["hb"],
      packed["w1"], packed["b1"], packed["w2"], packed["b2"],
      packed["ow"], packed["ob"])

    # Drop the two wrap columns per row (layout plumbing back to NHWC).
    return out_wide.reshape(N, H, Wp)[:, :, :W][..., None]


# ---------------------------------------------------------------------------
# Pure-JAX f32 reference (matches the PyTorch module's forward).
# ---------------------------------------------------------------------------
def _ref_forward(params, x, x_noGan, x_gan):
    def conv2d(v, w, b):
        y = jax.lax.conv_general_dilated(
            v, w, window_strides=(1, 1), padding="SAME",
            dimension_numbers=("NHWC", "HWIO", "NHWC"))
        return y + b

    inp = jnp.concatenate([x, x_noGan, x_gan], axis=-1)
    hw, hb = params["head"]
    head = jax.nn.relu(conv2d(inp, hw, hb))
    h = head
    for (w1, b1, w2, b2) in params["blocks"]:
        r = jax.nn.relu(conv2d(h, w1, b1))      # Dropout(p=0) is a no-op
        r = conv2d(r, w2, b2)
        h = h + r
    h = h + head
    ow, ob = params["out"]
    return conv2d(h, ow, ob) + x


if __name__ == "__main__":
    key = jax.random.PRNGKey(0)
    k_p, k_x, k_n, k_g = jax.random.split(key, 4)

    # Small demo shapes: N=2 images, 16x16, 1 channel per input (concat -> 3),
    # num_feature_maps=32, num_mid_blocks=2.
    N, H, W = 2, 16, 16
    F, B = 32, 2

    x = jax.random.normal(k_x, (N, H, W, 1), jnp.float32)
    x_noGan = jax.random.normal(k_n, (N, H, W, 1), jnp.float32)
    x_gan = jax.random.normal(k_g, (N, H, W, 1), jnp.float32)

    params = init_params(k_p, num_input_channels=3,
                         num_mid_blocks=B, num_feature_maps=F)
    packed = pack_params(params)

    out = boostnet_fmd_forward(packed, x, x_noGan, x_gan)
    out = jax.block_until_ready(out)
    assert out.shape == (N, H, W, 1) and out.dtype == jnp.float32

    # Numerical check vs. the f32 reference (kernel uses bf16 MXU operands,
    # so allow a small tolerance).
    ref = jax.block_until_ready(_ref_forward(params, x, x_noGan, x_gan))
    np.testing.assert_allclose(np.asarray(out), np.asarray(ref),
                               rtol=1e-1, atol=1e-1)

    print("KERNEL_OK")
</pallas_src>

<mosaic_0001>
module attributes {stable_mosaic.version = 11 : i64} {
  func.func @_boostnet_kernel(%arg0: i32, %arg1: memref<1x1x288xf32, #tpu.memory_space<vmem>>, %arg2: memref<1x1x288xf32, #tpu.memory_space<vmem>>, %arg3: memref<1x1x288xf32, #tpu.memory_space<vmem>>, %arg4: memref<32x72xbf16, #tpu.memory_space<vmem>>, %arg5: memref<32x1xf32, #tpu.memory_space<vmem>>, %arg6: memref<2x32x288xbf16, #tpu.memory_space<vmem>>, %arg7: memref<2x32x1xf32, #tpu.memory_space<vmem>>, %arg8: memref<2x32x288xbf16, #tpu.memory_space<vmem>>, %arg9: memref<2x32x1xf32, #tpu.memory_space<vmem>>, %arg10: memref<8x288xbf16, #tpu.memory_space<vmem>>, %arg11: memref<1x1xf32, #tpu.memory_space<vmem>>, %arg12: memref<1x1x288xf32, #tpu.memory_space<vmem>>, %arg13: memref<32x342xbf16, #tpu.memory_space<vmem>>, %arg14: memref<288x288xbf16, #tpu.memory_space<vmem>>, %arg15: memref<32x288xf32, #tpu.memory_space<vmem>>, %arg16: memref<32x288xf32, #tpu.memory_space<vmem>>) attributes {dimension_semantics = [#tpu.dimension_semantics<parallel>], iteration_bounds = array<i64: 2>, scalar_prefetch = 0 : i64, scratch_operands = 4 : i64, tpu.core_type = #tpu.core_type<tc>, window_params = [{transform_indices = @transform_0, window_bounds = array<i64: 1, 1, 288>}, {transform_indices = @transform_1, window_bounds = array<i64: 1, 1, 288>}, {transform_indices = @transform_2, window_bounds = array<i64: 1, 1, 288>}, {pipeline_mode = #tpu.pipeline_mode<synchronous>, transform_indices = @transform_3, window_bounds = array<i64: 32, 72>}, {pipeline_mode = #tpu.pipeline_mode<synchronous>, transform_indices = @transform_4, window_bounds = array<i64: 32, 1>}, {pipeline_mode = #tpu.pipeline_mode<synchronous>, transform_indices = @transform_5, window_bounds = array<i64: 2, 32, 288>}, {pipeline_mode = #tpu.pipeline_mode<synchronous>, transform_indices = @transform_6, window_bounds = array<i64: 2, 32, 1>}, {pipeline_mode = #tpu.pipeline_mode<synchronous>, transform_indices = @transform_7, window_bounds = array<i64: 2, 32, 288>}, {pipeline_mode = #tpu.pipeline_mode<synchronous>, transform_indices = @transform_8, window_bounds = array<i64: 2, 32, 1>}, {pipeline_mode = #tpu.pipeline_mode<synchronous>, transform_indices = @transform_9, window_bounds = array<i64: 8, 288>}, {pipeline_mode = #tpu.pipeline_mode<synchronous>, transform_indices = @transform_10, window_bounds = array<i64: 1, 1>}, {transform_indices = @transform_11, window_bounds = array<i64: 1, 1, 288>}]} {
    %0 = tpu.iota {dimensions = array<i32: 1>} : vector<1x288xi32>
    %c18_i32 = arith.constant 18 : i32
    %c0_i32 = arith.constant 0 : i32
    %1 = arith.cmpi eq, %c18_i32, %c0_i32 : i32
    %c1_i32 = arith.constant 1 : i32
    %2 = arith.select %1, %c1_i32, %c18_i32 : i32
    %3 = vector.broadcast %2 : i32 to vector<1x288xi32>
    %4 = arith.remsi %0, %3 : vector<1x288xi32>
    %c0_i32_0 = arith.constant 0 : i32
    %5 = vector.broadcast %c0_i32_0 : i32 to vector<1x288xi32>
    %6 = arith.cmpi ne, %4, %5 : vector<1x288xi32>
    %c0_i32_1 = arith.constant 0 : i32
    %7 = vector.broadcast %c0_i32_1 : i32 to vector<1x288xi32>
    %8 = arith.cmpi slt, %4, %7 : vector<1x288xi32>
    %c0_i32_2 = arith.constant 0 : i32
    %9 = arith.cmpi slt, %2, %c0_i32_2 : i32
    %10 = vector.broadcast %9 : i1 to vector<1x288xi1>
    %11 = vector.broadcast %10 : vector<1x288xi1> to vector<1x288xi1>
    %12 = arith.xori %8, %11 : vector<1x288xi1>
    %13 = arith.andi %12, %6 : vector<1x288xi1>
    %14 = vector.broadcast %2 : i32 to vector<1x288xi32>
    %15 = arith.addi %4, %14 : vector<1x288xi32>
    %16 = arith.select %13, %15, %4 : vector<1x288xi1>, vector<1x288xi32>
    %c16_i32 = arith.constant 16 : i32
    %17 = vector.broadcast %c16_i32 : i32 to vector<1x288xi32>
    %18 = arith.cmpi slt, %16, %17 : vector<1x288xi32>
    %cst = arith.constant 0.000000e+00 : bf16
    %19 = vector.broadcast %cst : bf16 to vector<32x36xbf16>
    %c0 = arith.constant 0 : index
    %c0_3 = arith.constant 0 : index
    %20 = vector.load %arg13[%c0, %c0_3] : memref<32x342xbf16, #tpu.memory_space<vmem>>, vector<32x36xbf16>
    tpu.vector_store %arg13[%c0, %c0_3], %19 {strides = array<i32>} : memref<32x342xbf16, #tpu.memory_space<vmem>>, vector<32x36xbf16>,
    %c0_4 = arith.constant 0 : index
    %c306 = arith.constant 306 : index
    %21 = vector.load %arg13[%c0_4, %c306] : memref<32x342xbf16, #tpu.memory_space<vmem>>, vector<32x36xbf16>
    tpu.vector_store %arg13[%c0_4, %c306], %19 {strides = array<i32>} : memref<32x342xbf16, #tpu.memory_space<vmem>>, vector<32x36xbf16>,
    %c0_5 = arith.constant 0 : index
    %c0_6 = arith.constant 0 : index
    %c0_7 = arith.constant 0 : index
    %22 = vector.load %arg1[%c0_5, %c0_6, %c0_7] : memref<1x1x288xf32, #tpu.memory_space<vmem>>, vector<1x1x288xf32>
    %23 = vector.shape_cast %22 : vector<1x1x288xf32> to vector<1x288xf32>
    %c0_8 = arith.constant 0 : index
    %c0_9 = arith.constant 0 : index
    %c0_10 = arith.constant 0 : index
    %24 = vector.load %arg2[%c0_8, %c0_9, %c0_10] : memref<1x1x288xf32, #tpu.memory_space<vmem>>, vector<1x1x288xf32>
    %25 = vector.shape_cast %24 : vector<1x1x288xf32> to vector<1x288xf32>
    %c0_11 = arith.constant 0 : index
    %c0_12 = arith.constant 0 : index
    %c0_13 = arith.constant 0 : index
    %26 = vector.load %arg3[%c0_11, %c0_12, %c0_13] : memref<1x1x288xf32, #tpu.memory_space<vmem>>, vector<1x1x288xf32>
    %27 = vector.shape_cast %26 : vector<1x1x288xf32> to vector<1x288xf32>
    %cst_14 = arith.constant 0.000000e+00 : f32
    %28 = vector.broadcast %cst_14 : f32 to vector<5x288xf32>
    %29 = tpu.concatenate %23, %25, %27, %28 in 0 : vector<1x288xf32>, vector<1x288xf32>, vector<1x288xf32>, vector<5x288xf32> -> vector<8x288xf32>
    %30 = arith.truncf %29 : vector<8x288xf32> to vector<8x288xbf16>
    %c0_15 = arith.constant 0 : index
    %c19 = arith.constant 19 : index
    %31 = vector.load %arg13[%c0_15, %c19] : memref<32x342xbf16, #tpu.memory_space<vmem>>, vector<8x288xbf16>
    tpu.vector_store %arg13[%c0_15, %c19], %30 {strides = array<i32>} : memref<32x342xbf16, #tpu.memory_space<vmem>>, vector<8x288xbf16>,
    %c0_16 = arith.constant 0 : index
    %c0_17 = arith.constant 0 : index
    %32 = vector.load %arg13[%c0_16, %c0_17] : memref<32x342xbf16, #tpu.memory_space<vmem>>, vector<8x288xbf16>
    %c0_18 = arith.constant 0 : index
    %c0_19 = arith.constant 0 : index
    %33 = vector.load %arg14[%c0_18, %c0_19] : memref<288x288xbf16, #tpu.memory_space<vmem>>, vector<8x288xbf16>
    tpu.vector_store %arg14[%c0_18, %c0_19], %32 {strides = array<i32>} : memref<288x288xbf16, #tpu.memory_space<vmem>>, vector<8x288xbf16>,
    %c0_20 = arith.constant 0 : index
    %c1 = arith.constant 1 : index
    %34 = vector.load %arg13[%c0_20, %c1] : memref<32x342xbf16, #tpu.memory_space<vmem>>, vector<8x288xbf16>
    %c8 = arith.constant 8 : index
    %c0_21 = arith.constant 0 : index
    %35 = vector.load %arg14[%c8, %c0_21] : memref<288x288xbf16, #tpu.memory_space<vmem>>, vector<8x288xbf16>
    tpu.vector_store %arg14[%c8, %c0_21], %34 {strides = array<i32>} : memref<288x288xbf16, #tpu.memory_space<vmem>>, vector<8x288xbf16>,
    %c0_22 = arith.constant 0 : index
    %c2 = arith.constant 2 : index
    %36 = vector.load %arg13[%c0_22, %c2] : memref<32x342xbf16, #tpu.memory_space<vmem>>, vector<8x288xbf16>
    %c16 = arith.constant 16 : index
    %c0_23 = arith.constant 0 : index
    %37 = vector.load %arg14[%c16, %c0_23] : memref<288x288xbf16, #tpu.memory_space<vmem>>, vector<8x288xbf16>
    tpu.vector_store %arg14[%c16, %c0_23], %36 {strides = array<i32>} : memref<288x288xbf16, #tpu.memory_space<vmem>>, vector<8x288xbf16>,
    %c0_24 = arith.constant 0 : index
    %c18 = arith.constant 18 : index
    %38 = vector.load %arg13[%c0_24, %c18] : memref<32x342xbf16, #tpu.memory_space<vmem>>, vector<8x288xbf16>
    %c24 = arith.constant 24 : index
    %c0_25 = arith.constant 0 : index
    %39 = vector.load %arg14[%c24, %c0_25] : memref<288x288xbf16, #tpu.memory_space<vmem>>, vector<8x288xbf16>
    tpu.vector_store %arg14[%c24, %c0_25], %38 {strides = array<i32>} : memref<288x288xbf16, #tpu.memory_space<vmem>>, vector<8x288xbf16>,
    %c0_26 = arith.constant 0 : index
    %c19_27 = arith.constant 19 : index
    %40 = vector.load %arg13[%c0_26, %c19_27] : memref<32x342xbf16, #tpu.memory_space<vmem>>, vector<8x288xbf16>
    %c32 = arith.constant 32 : index
    %c0_28 = arith.constant 0 : index
    %41 = vector.load %arg14[%c32, %c0_28] : memref<288x288xbf16, #tpu.memory_space<vmem>>, vector<8x288xbf16>
    tpu.vector_store %arg14[%c32, %c0_28], %40 {strides = array<i32>} : memref<288x288xbf16, #tpu.memory_space<vmem>>, vector<8x288xbf16>,
    %c0_29 = arith.constant 0 : index
    %c20 = arith.constant 20 : index
    %42 = vector.load %arg13[%c0_29, %c20] : memref<32x342xbf16, #tpu.memory_space<vmem>>, vector<8x288xbf16>
    %c40 = arith.constant 40 : index
    %c0_30 = arith.constant 0 : index
    %43 = vector.load %arg14[%c40, %c0_30] : memref<288x288xbf16, #tpu.memory_space<vmem>>, vector<8x288xbf16>
    tpu.vector_store %arg14[%c40, %c0_30], %42 {strides = array<i32>} : memref<288x288xbf16, #tpu.memory_space<vmem>>, vector<8x288xbf16>,
    %c0_31 = arith.constant 0 : index
    %c36 = arith.constant 36 : index
    %44 = vector.load %arg13[%c0_31, %c36] : memref<32x342xbf16, #tpu.memory_space<vmem>>, vector<8x288xbf16>
    %c48 = arith.constant 48 : index
    %c0_32 = arith.constant 0 : index
    %45 = vector.load %arg14[%c48, %c0_32] : memref<288x288xbf16, #tpu.memory_space<vmem>>, vector<8x288xbf16>
    tpu.vector_store %arg14[%c48, %c0_32], %44 {strides = array<i32>} : memref<288x288xbf16, #tpu.memory_space<vmem>>, vector<8x288xbf16>,
    %c0_33 = arith.constant 0 : index
    %c37 = arith.constant 37 : index
    %46 = vector.load %arg13[%c0_33, %c37] : memref<32x342xbf16, #tpu.memory_space<vmem>>, vector<8x288xbf16>
    %c56 = arith.constant 56 : index
    %c0_34 = arith.constant 0 : index
    %47 = vector.load %arg14[%c56, %c0_34] : memref<288x288xbf16, #tpu.memory_space<vmem>>, vector<8x288xbf16>
    tpu.vector_store %arg14[%c56, %c0_34], %46 {strides = array<i32>} : memref<288x288xbf16, #tpu.memory_space<vmem>>, vector<8x288xbf16>,
    %c0_35 = arith.constant 0 : index
    %c38 = arith.constant 38 : index
    %48 = vector.load %arg13[%c0_35, %c38] : memref<32x342xbf16, #tpu.memory_space<vmem>>, vector<8x288xbf16>
    %c64 = arith.constant 64 : index
    %c0_36 = arith.constant 0 : index
    %49 = vector.load %arg14[%c64, %c0_36] : memref<288x288xbf16, #tpu.memory_space<vmem>>, vector<8x288xbf16>
    tpu.vector_store %arg14[%c64, %c0_36], %48 {strides = array<i32>} : memref<288x288xbf16, #tpu.memory_space<vmem>>, vector<8x288xbf16>,
    %c0_37 = arith.constant 0 : index
    %c0_38 = arith.constant 0 : index
    %50 = vector.load %arg4[%c0_37, %c0_38] : memref<32x72xbf16, #tpu.memory_space<vmem>>, vector<32x72xbf16>
    %c0_39 = arith.constant 0 : index
    %c0_40 = arith.constant 0 : index
    %51 = vector.load %arg14[%c0_39, %c0_40] : memref<288x288xbf16, #tpu.memory_space<vmem>>, vector<72x288xbf16>
    %cst_41 = arith.constant dense<0.000000e+00> : vector<32x288xf32>
    %52 = tpu.matmul %50, %51, %cst_41 {dimension_numbers = #tpu.dot_dimension_numbers<[1], [0], [0], [1], [0, 0, 1, 1], [], []>} : vector<32x72xbf16>, vector<72x288xbf16>, vector<32x288xf32> -> vector<32x288xf32>
    %c0_42 = arith.constant 0 : index
    %c0_43 = arith.constant 0 : index
    %53 = vector.load %arg5[%c0_42, %c0_43] : memref<32x1xf32, #tpu.memory_space<vmem>>, vector<32x1xf32>
    %54 = vector.broadcast %53 : vector<32x1xf32> to vector<32x288xf32>
    %55 = arith.addf %52, %54 : vector<32x288xf32>
    %cst_44 = arith.constant 0.000000e+00 : f32
    %56 = vector.broadcast %cst_44 : f32 to vector<32x288xf32>
    %57 = arith.maximumf %55, %56 : vector<32x288xf32>
    %cst_45 = arith.constant 0.000000e+00 : f32
    %58 = vector.shape_cast %18 : vector<1x288xi1> to vector<1x288xi1>
    %59 = vector.broadcast %58 : vector<1x288xi1> to vector<32x288xi1>
    %60 = vector.broadcast %cst_45 : f32 to vector<32x288xf32>
    %61 = arith.select %59, %57, %60 : vector<32x288xi1>, vector<32x288xf32>
    %62 = arith.truncf %61 : vector<32x288xf32> to vector<32x288xbf16>
    %c0_46 = arith.constant 0 : index
    %c19_47 = arith.constant 19 : index
    %63 = vector.load %arg13[%c0_46, %c19_47] : memref<32x342xbf16, #tpu.memory_space<vmem>>, vector<32x288xbf16>
    tpu.vector_store %arg13[%c0_46, %c19_47], %62 {strides = array<i32>} : memref<32x342xbf16, #tpu.memory_space<vmem>>, vector<32x288xbf16>,
    %c0_48 = arith.constant 0 : index
    %c0_49 = arith.constant 0 : index
    %64 = vector.load %arg15[%c0_48, %c0_49] : memref<32x288xf32, #tpu.memory_space<vmem>>, vector<32x288xf32>
    tpu.vector_store %arg15[%c0_48, %c0_49], %61 {strides = array<i32>} : memref<32x288xf32, #tpu.memory_space<vmem>>, vector<32x288xf32>,
    %c0_50 = arith.constant 0 : index
    %c0_51 = arith.constant 0 : index
    %65 = vector.load %arg16[%c0_50, %c0_51] : memref<32x288xf32, #tpu.memory_space<vmem>>, vector<32x288xf32>
    tpu.vector_store %arg16[%c0_50, %c0_51], %61 {strides = array<i32>} : memref<32x288xf32, #tpu.memory_space<vmem>>, vector<32x288xf32>,
    %c0_52 = arith.constant 0 : index
    %c0_53 = arith.constant 0 : index
    %66 = vector.load %arg13[%c0_52, %c0_53] : memref<32x342xbf16, #tpu.memory_space<vmem>>, vector<32x288xbf16>
    %c0_54 = arith.constant 0 : index
    %c0_55 = arith.constant 0 : index
    %67 = vector.load %arg14[%c0_54, %c0_55] : memref<288x288xbf16, #tpu.memory_space<vmem>>, vector<32x288xbf16>
    tpu.vector_store %arg14[%c0_54, %c0_55], %66 {strides = array<i32>} : memref<288x288xbf16, #tpu.memory_space<vmem>>, vector<32x288xbf16>,
    %c0_56 = arith.constant 0 : index
    %c1_57 = arith.constant 1 : index
    %68 = vector.load %arg13[%c0_56, %c1_57] : memref<32x342xbf16, #tpu.memory_space<vmem>>, vector<32x288xbf16>
    %c32_58 = arith.constant 32 : index
    %c0_59 = arith.constant 0 : index
    %69 = vector.load %arg14[%c32_58, %c0_59] : memref<288x288xbf16, #tpu.memory_space<vmem>>, vector<32x288xbf16>
    tpu.vector_store %arg14[%c32_58, %c0_59], %68 {strides = array<i32>} : memref<288x288xbf16, #tpu.memory_space<vmem>>, vector<32x288xbf16>,
    %c0_60 = arith.constant 0 : index
    %c2_61 = arith.constant 2 : index
    %70 = vector.load %arg13[%c0_60, %c2_61] : memref<32x342xbf16, #tpu.memory_space<vmem>>, vector<32x288xbf16>
    %c64_62 = arith.constant 64 : index
    %c0_63 = arith.constant 0 : index
    %71 = vector.load %arg14[%c64_62, %c0_63] : memref<288x288xbf16, #tpu.memory_space<vmem>>, vector<32x288xbf16>
    tpu.vector_store %arg14[%c64_62, %c0_63], %70 {strides = array<i32>} : memref<288x288xbf16, #tpu.memory_space<vmem>>, vector<32x288xbf16>,
    %c0_64 = arith.constant 0 : index
    %c18_65 = arith.constant 18 : index
    %72 = vector.load %arg13[%c0_64, %c18_65] : memref<32x342xbf16, #tpu.memory_space<vmem>>, vector<32x288xbf16>
    %c96 = arith.constant 96 : index
    %c0_66 = arith.constant 0 : index
    %73 = vector.load %arg14[%c96, %c0_66] : memref<288x288xbf16, #tpu.memory_space<vmem>>, vector<32x288xbf16>
    tpu.vector_store %arg14[%c96, %c0_66], %72 {strides = array<i32>} : memref<288x288xbf16, #tpu.memory_space<vmem>>, vector<32x288xbf16>,
    %c0_67 = arith.constant 0 : index
    %c19_68 = arith.constant 19 : index
    %74 = vector.load %arg13[%c0_67, %c19_68] : memref<32x342xbf16, #tpu.memory_space<vmem>>, vector<32x288xbf16>
    %c128 = arith.constant 128 : index
    %c0_69 = arith.constant 0 : index
    %75 = vector.load %arg14[%c128, %c0_69] : memref<288x288xbf16, #tpu.memory_space<vmem>>, vector<32x288xbf16>
    tpu.vector_store %arg14[%c128, %c0_69], %74 {strides = array<i32>} : memref<288x288xbf16, #tpu.memory_space<vmem>>, vector<32x288xbf16>,
    %c0_70 = arith.constant 0 : index
    %c20_71 = arith.constant 20 : index
    %76 = vector.load %arg13[%c0_70, %c20_71] : memref<32x342xbf16, #tpu.memory_space<vmem>>, vector<32x288xbf16>
    %c160 = arith.constant 160 : index
    %c0_72 = arith.constant 0 : index
    %77 = vector.load %arg14[%c160, %c0_72] : memref<288x288xbf16, #tpu.memory_space<vmem>>, vector<32x288xbf16>
    tpu.vector_store %arg14[%c160, %c0_72], %76 {strides = array<i32>} : memref<288x288xbf16, #tpu.memory_space<vmem>>, vector<32x288xbf16>,
    %c0_73 = arith.constant 0 : index
    %c36_74 = arith.constant 36 : index
    %78 = vector.load %arg13[%c0_73, %c36_74] : memref<32x342xbf16, #tpu.memory_space<vmem>>, vector<32x288xbf16>
    %c192 = arith.constant 192 : index
    %c0_75 = arith.constant 0 : index
    %79 = vector.load %arg14[%c192, %c0_75] : memref<288x288xbf16, #tpu.memory_space<vmem>>, vector<32x288xbf16>
    tpu.vector_store %arg14[%c192, %c0_75], %78 {strides = array<i32>} : memref<288x288xbf16, #tpu.memory_space<vmem>>, vector<32x288xbf16>,
    %c0_76 = arith.constant 0 : index
    %c37_77 = arith.constant 37 : index
    %80 = vector.load %arg13[%c0_76, %c37_77] : memref<32x342xbf16, #tpu.memory_space<vmem>>, vector<32x288xbf16>
    %c224 = arith.constant 224 : index
    %c0_78 = arith.constant 0 : index
    %81 = vector.load %arg14[%c224, %c0_78] : memref<288x288xbf16, #tpu.memory_space<vmem>>, vector<32x288xbf16>
    tpu.vector_store %arg14[%c224, %c0_78], %80 {strides = array<i32>} : memref<288x288xbf16, #tpu.memory_space<vmem>>, vector<32x288xbf16>,
    %c0_79 = arith.constant 0 : index
    %c38_80 = arith.constant 38 : index
    %82 = vector.load %arg13[%c0_79, %c38_80] : memref<32x342xbf16, #tpu.memory_space<vmem>>, vector<32x288xbf16>
    %c256 = arith.constant 256 : index
    %c0_81 = arith.constant 0 : index
    %83 = vector.load %arg14[%c256, %c0_81] : memref<288x288xbf16, #tpu.memory_space<vmem>>, vector<32x288xbf16>
    tpu.vector_store %arg14[%c256, %c0_81], %82 {strides = array<i32>} : memref<288x288xbf16, #tpu.memory_space<vmem>>, vector<32x288xbf16>,
    %c0_82 = arith.constant 0 : index
    %c0_83 = arith.constant 0 : index
    %c0_84 = arith.constant 0 : index
    %84 = vector.load %arg6[%c0_82, %c0_83, %c0_84] : memref<2x32x288xbf16, #tpu.memory_space<vmem>>, vector<1x32x288xbf16>
    %85 = vector.shape_cast %84 : vector<1x32x288xbf16> to vector<32x288xbf16>
    %c0_85 = arith.constant 0 : index
    %c0_86 = arith.constant 0 : index
    %86 = vector.load %arg14[%c0_85, %c0_86] : memref<288x288xbf16, #tpu.memory_space<vmem>>, vector<288x288xbf16>
    %cst_87 = arith.constant dense<0.000000e+00> : vector<32x288xf32>
    %87 = tpu.matmul %85, %86, %cst_87 {dimension_numbers = #tpu.dot_dimension_numbers<[1], [0], [0], [1], [0, 0, 1, 1], [], []>} : vector<32x288xbf16>, vector<288x288xbf16>, vector<32x288xf32> -> vector<32x288xf32>
    %c0_88 = arith.constant 0 : index
    %c0_89 = arith.constant 0 : index
    %c0_90 = arith.constant 0 : index
    %88 = vector.load %arg7[%c0_88, %c0_89, %c0_90] : memref<2x32x1xf32, #tpu.memory_space<vmem>>, vector<1x32x1xf32>
    %89 = vector.shape_cast %88 : vector<1x32x1xf32> to vector<32x1xf32>
    %90 = vector.broadcast %89 : vector<32x1xf32> to vector<32x288xf32>
    %91 = arith.addf %87, %90 : vector<32x288xf32>
    %cst_91 = arith.constant 0.000000e+00 : f32
    %92 = vector.broadcast %cst_91 : f32 to vector<32x288xf32>
    %93 = arith.maximumf %91, %92 : vector<32x288xf32>
    %cst_92 = arith.constant 0.000000e+00 : f32
    %94 = vector.shape_cast %18 : vector<1x288xi1> to vector<1x288xi1>
    %95 = vector.broadcast %94 : vector<1x288xi1> to vector<32x288xi1>
    %96 = vector.broadcast %cst_92 : f32 to vector<32x288xf32>
    %97 = arith.select %95, %93, %96 : vector<32x288xi1>, vector<32x288xf32>
    %98 = arith.truncf %97 : vector<32x288xf32> to vector<32x288xbf16>
    %c0_93 = arith.constant 0 : index
    %c19_94 = arith.constant 19 : index
    %99 = vector.load %arg13[%c0_93, %c19_94] : memref<32x342xbf16, #tpu.memory_space<vmem>>, vector<32x288xbf16>
    tpu.vector_store %arg13[%c0_93, %c19_94], %98 {strides = array<i32>} : memref<32x342xbf16, #tpu.memory_space<vmem>>, vector<32x288xbf16>,
    %c0_95 = arith.constant 0 : index
    %c0_96 = arith.constant 0 : index
    %100 = vector.load %arg13[%c0_95, %c0_96] : memref<32x342xbf16, #tpu.memory_space<vmem>>, vector<32x288xbf16>
    %c0_97 = arith.constant 0 : index
    %c0_98 = arith.constant 0 : index
    %101 = vector.load %arg14[%c0_97, %c0_98] : memref<288x288xbf16, #tpu.memory_space<vmem>>, vector<32x288xbf16>
    tpu.vector_store %arg14[%c0_97, %c0_98], %100 {strides = array<i32>} : memref<288x288xbf16, #tpu.memory_space<vmem>>, vector<32x288xbf16>,
    %c0_99 = arith.constant 0 : index
    %c1_100 = arith.constant 1 : index
    %102 = vector.load %arg13[%c0_99, %c1_100] : memref<32x342xbf16, #tpu.memory_space<vmem>>, vector<32x288xbf16>
    %c32_101 = arith.constant 32 : index
    %c0_102 = arith.constant 0 : index
    %103 = vector.load %arg14[%c32_101, %c0_102] : memref<288x288xbf16, #tpu.memory_space<vmem>>, vector<32x288xbf16>
    tpu.vector_store %arg14[%c32_101, %c0_102], %102 {strides = array<i32>} : memref<288x288xbf16, #tpu.memory_space<vmem>>, vector<32x288xbf16>,
    %c0_103 = arith.constant 0 : index
    %c2_104 = arith.constant 2 : index
    %104 = vector.load %arg13[%c0_103, %c2_104] : memref<32x342xbf16, #tpu.memory_space<vmem>>, vector<32x288xbf16>
    %c64_105 = arith.constant 64 : index
    %c0_106 = arith.constant 0 : index
    %105 = vector.load %arg14[%c64_105, %c0_106] : memref<288x288xbf16, #tpu.memory_space<vmem>>, vector<32x288xbf16>
    tpu.vector_store %arg14[%c64_105, %c0_106], %104 {strides = array<i32>} : memref<288x288xbf16, #tpu.memory_space<vmem>>, vector<32x288xbf16>,
    %c0_107 = arith.constant 0 : index
    %c18_108 = arith.constant 18 : index
    %106 = vector.load %arg13[%c0_107, %c18_108] : memref<32x342xbf16, #tpu.memory_space<vmem>>, vector<32x288xbf16>
    %c96_109 = arith.constant 96 : index
    %c0_110 = arith.constant 0 : index
    %107 = vector.load %arg14[%c96_109, %c0_110] : memref<288x288xbf16, #tpu.memory_space<vmem>>, vector<32x288xbf16>
    tpu.vector_store %arg14[%c96_109, %c0_110], %106 {strides = array<i32>} : memref<288x288xbf16, #tpu.memory_space<vmem>>, vector<32x288xbf16>,
    %c0_111 = arith.constant 0 : index
    %c19_112 = arith.constant 19 : index
    %108 = vector.load %arg13[%c0_111, %c19_112] : memref<32x342xbf16, #tpu.memory_space<vmem>>, vector<32x288xbf16>
    %c128_113 = arith.constant 128 : index
    %c0_114 = arith.constant 0 : index
    %109 = vector.load %arg14[%c128_113, %c0_114] : memref<288x288xbf16, #tpu.memory_space<vmem>>, vector<32x288xbf16>
    tpu.vector_store %arg14[%c128_113, %c0_114], %108 {strides = array<i32>} : memref<288x288xbf16, #tpu.memory_space<vmem>>, vector<32x288xbf16>,
    %c0_115 = arith.constant 0 : index
    %c20_116 = arith.constant 20 : index
    %110 = vector.load %arg13[%c0_115, %c20_116] : memref<32x342xbf16, #tpu.memory_space<vmem>>, vector<32x288xbf16>
    %c160_117 = arith.constant 160 : index
    %c0_118 = arith.constant 0 : index
    %111 = vector.load %arg14[%c160_117, %c0_118] : memref<288x288xbf16, #tpu.memory_space<vmem>>, vector<32x288xbf16>
    tpu.vector_store %arg14[%c160_117, %c0_118], %110 {strides = array<i32>} : memref<288x288xbf16, #tpu.memory_space<vmem>>, vector<32x288xbf16>,
    %c0_119 = arith.constant 0 : index
    %c36_120 = arith.constant 36 : index
    %112 = vector.load %arg13[%c0_119, %c36_120] : memref<32x342xbf16, #tpu.memory_space<vmem>>, vector<32x288xbf16>
    %c192_121 = arith.constant 192 : index
    %c0_122 = arith.constant 0 : index
    %113 = vector.load %arg14[%c192_121, %c0_122] : memref<288x288xbf16, #tpu.memory_space<vmem>>, vector<32x288xbf16>
    tpu.vector_store %arg14[%c192_121, %c0_122], %112 {strides = array<i32>} : memref<288x288xbf16, #tpu.memory_space<vmem>>, vector<32x288xbf16>,
    %c0_123 = arith.constant 0 : index
    %c37_124 = arith.constant 37 : index
    %114 = vector.load %arg13[%c0_123, %c37_124] : memref<32x342xbf16, #tpu.memory_space<vmem>>, vector<32x288xbf16>
    %c224_125 = arith.constant 224 : index
    %c0_126 = arith.constant 0 : index
    %115 = vector.load %arg14[%c224_125, %c0_126] : memref<288x288xbf16, #tpu.memory_space<vmem>>, vector<32x288xbf16>
    tpu.vector_store %arg14[%c224_125, %c0_126], %114 {strides = array<i32>} : memref<288x288xbf16, #tpu.memory_space<vmem>>, vector<32x288xbf16>,
    %c0_127 = arith.constant 0 : index
    %c38_128 = arith.constant 38 : index
    %116 = vector.load %arg13[%c0_127, %c38_128] : memref<32x342xbf16, #tpu.memory_space<vmem>>, vector<32x288xbf16>
    %c256_129 = arith.constant 256 : index
    %c0_130 = arith.constant 0 : index
    %117 = vector.load %arg14[%c256_129, %c0_130] : memref<288x288xbf16, #tpu.memory_space<vmem>>, vector<32x288xbf16>
    tpu.vector_store %arg14[%c256_129, %c0_130], %116 {strides = array<i32>} : memref<288x288xbf16, #tpu.memory_space<vmem>>, vector<32x288xbf16>,
    %c0_131 = arith.constant 0 : index
    %c0_132 = arith.constant 0 : index
    %c0_133 = arith.constant 0 : index
    %118 = vector.load %arg8[%c0_131, %c0_132, %c0_133] : memref<2x32x288xbf16, #tpu.memory_space<vmem>>, vector<1x32x288xbf16>
    %119 = vector.shape_cast %118 : vector<1x32x288xbf16> to vector<32x288xbf16>
    %c0_134 = arith.constant 0 : index
    %c0_135 = arith.constant 0 : index
    %120 = vector.load %arg14[%c0_134, %c0_135] : memref<288x288xbf16, #tpu.memory_space<vmem>>, vector<288x288xbf16>
    %cst_136 = arith.constant dense<0.000000e+00> : vector<32x288xf32>
    %121 = tpu.matmul %119, %120, %cst_136 {dimension_numbers = #tpu.dot_dimension_numbers<[1], [0], [0], [1], [0, 0, 1, 1], [], []>} : vector<32x288xbf16>, vector<288x288xbf16>, vector<32x288xf32> -> vector<32x288xf32>
    %c0_137 = arith.constant 0 : index
    %c0_138 = arith.constant 0 : index
    %c0_139 = arith.constant 0 : index
    %122 = vector.load %arg9[%c0_137, %c0_138, %c0_139] : memref<2x32x1xf32, #tpu.memory_space<vmem>>, vector<1x32x1xf32>
    %123 = vector.shape_cast %122 : vector<1x32x1xf32> to vector<32x1xf32>
    %124 = vector.broadcast %123 : vector<32x1xf32> to vector<32x288xf32>
    %125 = arith.addf %121, %124 : vector<32x288xf32>
    %c0_140 = arith.constant 0 : index
    %c0_141 = arith.constant 0 : index
    %126 = vector.load %arg15[%c0_140, %c0_141] : memref<32x288xf32, #tpu.memory_space<vmem>>, vector<32x288xf32>
    %127 = arith.addf %125, %126 : vector<32x288xf32>
    %cst_142 = arith.constant 0.000000e+00 : f32
    %128 = vector.shape_cast %18 : vector<1x288xi1> to vector<1x288xi1>
    %129 = vector.broadcast %128 : vector<1x288xi1> to vector<32x288xi1>
    %130 = vector.broadcast %cst_142 : f32 to vector<32x288xf32>
    %131 = arith.select %129, %127, %130 : vector<32x288xi1>, vector<32x288xf32>
    %132 = arith.truncf %131 : vector<32x288xf32> to vector<32x288xbf16>
    %c0_143 = arith.constant 0 : index
    %c19_144 = arith.constant 19 : index
    %133 = vector.load %arg13[%c0_143, %c19_144] : memref<32x342xbf16, #tpu.memory_space<vmem>>, vector<32x288xbf16>
    tpu.vector_store %arg13[%c0_143, %c19_144], %132 {strides = array<i32>} : memref<32x342xbf16, #tpu.memory_space<vmem>>, vector<32x288xbf16>,
    %c0_145 = arith.constant 0 : index
    %c0_146 = arith.constant 0 : index
    %134 = vector.load %arg15[%c0_145, %c0_146] : memref<32x288xf32, #tpu.memory_space<vmem>>, vector<32x288xf32>
    tpu.vector_store %arg15[%c0_145, %c0_146], %131 {strides = array<i32>} : memref<32x288xf32, #tpu.memory_space<vmem>>, vector<32x288xf32>,
    %c0_147 = arith.constant 0 : index
    %c0_148 = arith.constant 0 : index
    %135 = vector.load %arg13[%c0_147, %c0_148] : memref<32x342xbf16, #tpu.memory_space<vmem>>, vector<32x288xbf16>
    %c0_149 = arith.constant 0 : index
    %c0_150 = arith.constant 0 : index
    %136 = vector.load %arg14[%c0_149, %c0_150] : memref<288x288xbf16, #tpu.memory_space<vmem>>, vector<32x288xbf16>
    tpu.vector_store %arg14[%c0_149, %c0_150], %135 {strides = array<i32>} : memref<288x288xbf16, #tpu.memory_space<vmem>>, vector<32x288xbf16>,
    %c0_151 = arith.constant 0 : index
    %c1_152 = arith.constant 1 : index
    %137 = vector.load %arg13[%c0_151, %c1_152] : memref<32x342xbf16, #tpu.memory_space<vmem>>, vector<32x288xbf16>
    %c32_153 = arith.constant 32 : index
    %c0_154 = arith.constant 0 : index
    %138 = vector.load %arg14[%c32_153, %c0_154] : memref<288x288xbf16, #tpu.memory_space<vmem>>, vector<32x288xbf16>
    tpu.vector_store %arg14[%c32_153, %c0_154], %137 {strides = array<i32>} : memref<288x288xbf16, #tpu.memory_space<vmem>>, vector<32x288xbf16>,
    %c0_155 = arith.constant 0 : index
    %c2_156 = arith.constant 2 : index
    %139 = vector.load %arg13[%c0_155, %c2_156] : memref<32x342xbf16, #tpu.memory_space<vmem>>, vector<32x288xbf16>
    %c64_157 = arith.constant 64 : index
    %c0_158 = arith.constant 0 : index
    %140 = vector.load %arg14[%c64_157, %c0_158] : memref<288x288xbf16, #tpu.memory_space<vmem>>, vector<32x288xbf16>
    tpu.vector_store %arg14[%c64_157, %c0_158], %139 {strides = array<i32>} : memref<288x288xbf16, #tpu.memory_space<vmem>>, vector<32x288xbf16>,
    %c0_159 = arith.constant 0 : index
    %c18_160 = arith.constant 18 : index
    %141 = vector.load %arg13[%c0_159, %c18_160] : memref<32x342xbf16, #tpu.memory_space<vmem>>, vector<32x288xbf16>
    %c96_161 = arith.constant 96 : index
    %c0_162 = arith.constant 0 : index
    %142 = vector.load %arg14[%c96_161, %c0_162] : memref<288x288xbf16, #tpu.memory_space<vmem>>, vector<32x288xbf16>
    tpu.vector_store %arg14[%c96_161, %c0_162], %141 {strides = array<i32>} : memref<288x288xbf16, #tpu.memory_space<vmem>>, vector<32x288xbf16>,
    %c0_163 = arith.constant 0 : index
    %c19_164 = arith.constant 19 : index
    %143 = vector.load %arg13[%c0_163, %c19_164] : memref<32x342xbf16, #tpu.memory_space<vmem>>, vector<32x288xbf16>
    %c128_165 = arith.constant 128 : index
    %c0_166 = arith.constant 0 : index
    %144 = vector.load %arg14[%c128_165, %c0_166] : memref<288x288xbf16, #tpu.memory_space<vmem>>, vector<32x288xbf16>
    tpu.vector_store %arg14[%c128_165, %c0_166], %143 {strides = array<i32>} : memref<288x288xbf16, #tpu.memory_space<vmem>>, vector<32x288xbf16>,
    %c0_167 = arith.constant 0 : index
    %c20_168 = arith.constant 20 : index
    %145 = vector.load %arg13[%c0_167, %c20_168] : memref<32x342xbf16, #tpu.memory_space<vmem>>, vector<32x288xbf16>
    %c160_169 = arith.constant 160 : index
    %c0_170 = arith.constant 0 : index
    %146 = vector.load %arg14[%c160_169, %c0_170] : memref<288x288xbf16, #tpu.memory_space<vmem>>, vector<32x288xbf16>
    tpu.vector_store %arg14[%c160_169, %c0_170], %145 {strides = array<i32>} : memref<288x288xbf16, #tpu.memory_space<vmem>>, vector<32x288xbf16>,
    %c0_171 = arith.constant 0 : index
    %c36_172 = arith.constant 36 : index
    %147 = vector.load %arg13[%c0_171, %c36_172] : memref<32x342xbf16, #tpu.memory_space<vmem>>, vector<32x288xbf16>
    %c192_173 = arith.constant 192 : index
    %c0_174 = arith.constant 0 : index
    %148 = vector.load %arg14[%c192_173, %c0_174] : memref<288x288xbf16, #tpu.memory_space<vmem>>, vector<32x288xbf16>
    tpu.vector_store %arg14[%c192_173, %c0_174], %147 {strides = array<i32>} : memref<288x288xbf16, #tpu.memory_space<vmem>>, vector<32x288xbf16>,
    %c0_175 = arith.constant 0 : index
    %c37_176 = arith.constant 37 : index
    %149 = vector.load %arg13[%c0_175, %c37_176] : memref<32x342xbf16, #tpu.memory_space<vmem>>, vector<32x288xbf16>
    %c224_177 = arith.constant 224 : index
    %c0_178 = arith.constant 0 : index
    %150 = vector.load %arg14[%c224_177, %c0_178] : memref<288x288xbf16, #tpu.memory_space<vmem>>, vector<32x288xbf16>
    tpu.vector_store %arg14[%c224_177, %c0_178], %149 {strides = array<i32>} : memref<288x288xbf16, #tpu.memory_space<vmem>>, vector<32x288xbf16>,
    %c0_179 = arith.constant 0 : index
    %c38_180 = arith.constant 38 : index
    %151 = vector.load %arg13[%c0_179, %c38_180] : memref<32x342xbf16, #tpu.memory_space<vmem>>, vector<32x288xbf16>
    %c256_181 = arith.constant 256 : index
    %c0_182 = arith.constant 0 : index
    %152 = vector.load %arg14[%c256_181, %c0_182] : memref<288x288xbf16, #tpu.memory_space<vmem>>, vector<32x288xbf16>
    tpu.vector_store %arg14[%c256_181, %c0_182], %151 {strides = array<i32>} : memref<288x288xbf16, #tpu.memory_space<vmem>>, vector<32x288xbf16>,
    %c1_183 = arith.constant 1 : index
    %c0_184 = arith.constant 0 : index
    %c0_185 = arith.constant 0 : index
    %153 = vector.load %arg6[%c1_183, %c0_184, %c0_185] : memref<2x32x288xbf16, #tpu.memory_space<vmem>>, vector<1x32x288xbf16>
    %154 = vector.shape_cast %153 : vector<1x32x288xbf16> to vector<32x288xbf16>
    %c0_186 = arith.constant 0 : index
    %c0_187 = arith.constant 0 : index
    %155 = vector.load %arg14[%c0_186, %c0_187] : memref<288x288xbf16, #tpu.memory_space<vmem>>, vector<288x288xbf16>
    %cst_188 = arith.constant dense<0.000000e+00> : vector<32x288xf32>
    %156 = tpu.matmul %154, %155, %cst_188 {dimension_numbers = #tpu.dot_dimension_numbers<[1], [0], [0], [1], [0, 0, 1, 1], [], []>} : vector<32x288xbf16>, vector<288x288xbf16>, vector<32x288xf32> -> vector<32x288xf32>
    %c1_189 = arith.constant 1 : index
    %c0_190 = arith.constant 0 : index
    %c0_191 = arith.constant 0 : index
    %157 = vector.load %arg7[%c1_189, %c0_190, %c0_191] : memref<2x32x1xf32, #tpu.memory_space<vmem>>, vector<1x32x1xf32>
    %158 = vector.shape_cast %157 : vector<1x32x1xf32> to vector<32x1xf32>
    %159 = vector.broadcast %158 : vector<32x1xf32> to vector<32x288xf32>
    %160 = arith.addf %156, %159 : vector<32x288xf32>
    %cst_192 = arith.constant 0.000000e+00 : f32
    %161 = vector.broadcast %cst_192 : f32 to vector<32x288xf32>
    %162 = arith.maximumf %160, %161 : vector<32x288xf32>
    %cst_193 = arith.constant 0.000000e+00 : f32
    %163 = vector.shape_cast %18 : vector<1x288xi1> to vector<1x288xi1>
    %164 = vector.broadcast %163 : vector<1x288xi1> to vector<32x288xi1>
    %165 = vector.broadcast %cst_193 : f32 to vector<32x288xf32>
    %166 = arith.select %164, %162, %165 : vector<32x288xi1>, vector<32x288xf32>
    %167 = arith.truncf %166 : vector<32x288xf32> to vector<32x288xbf16>
    %c0_194 = arith.constant 0 : index
    %c19_195 = arith.constant 19 : index
    %168 = vector.load %arg13[%c0_194, %c19_195] : memref<32x342xbf16, #tpu.memory_space<vmem>>, vector<32x288xbf16>
    tpu.vector_store %arg13[%c0_194, %c19_195], %167 {strides = array<i32>} : memref<32x342xbf16, #tpu.memory_space<vmem>>, vector<32x288xbf16>,
    %c0_196 = arith.constant 0 : index
    %c0_197 = arith.constant 0 : index
    %169 = vector.load %arg13[%c0_196, %c0_197] : memref<32x342xbf16, #tpu.memory_space<vmem>>, vector<32x288xbf16>
    %c0_198 = arith.constant 0 : index
    %c0_199 = arith.constant 0 : index
    %170 = vector.load %arg14[%c0_198, %c0_199] : memref<288x288xbf16, #tpu.memory_space<vmem>>, vector<32x288xbf16>
    tpu.vector_store %arg14[%c0_198, %c0_199], %169 {strides = array<i32>} : memref<288x288xbf16, #tpu.memory_space<vmem>>, vector<32x288xbf16>,
    %c0_200 = arith.constant 0 : index
    %c1_201 = arith.constant 1 : index
    %171 = vector.load %arg13[%c0_200, %c1_201] : memref<32x342xbf16, #tpu.memory_space<vmem>>, vector<32x288xbf16>
    %c32_202 = arith.constant 32 : index
    %c0_203 = arith.constant 0 : index
    %172 = vector.load %arg14[%c32_202, %c0_203] : memref<288x288xbf16, #tpu.memory_space<vmem>>, vector<32x288xbf16>
    tpu.vector_store %arg14[%c32_202, %c0_203], %171 {strides = array<i32>} : memref<288x288xbf16, #tpu.memory_space<vmem>>, vector<32x288xbf16>,
    %c0_204 = arith.constant 0 : index
    %c2_205 = arith.constant 2 : index
    %173 = vector.load %arg13[%c0_204, %c2_205] : memref<32x342xbf16, #tpu.memory_space<vmem>>, vector<32x288xbf16>
    %c64_206 = arith.constant 64 : index
    %c0_207 = arith.constant 0 : index
    %174 = vector.load %arg14[%c64_206, %c0_207] : memref<288x288xbf16, #tpu.memory_space<vmem>>, vector<32x288xbf16>
    tpu.vector_store %arg14[%c64_206, %c0_207], %173 {strides = array<i32>} : memref<288x288xbf16, #tpu.memory_space<vmem>>, vector<32x288xbf16>,
    %c0_208 = arith.constant 0 : index
    %c18_209 = arith.constant 18 : index
    %175 = vector.load %arg13[%c0_208, %c18_209] : memref<32x342xbf16, #tpu.memory_space<vmem>>, vector<32x288xbf16>
    %c96_210 = arith.constant 96 : index
    %c0_211 = arith.constant 0 : index
    %176 = vector.load %arg14[%c96_210, %c0_211] : memref<288x288xbf16, #tpu.memory_space<vmem>>, vector<32x288xbf16>
    tpu.vector_store %arg14[%c96_210, %c0_211], %175 {strides = array<i32>} : memref<288x288xbf16, #tpu.memory_space<vmem>>, vector<32x288xbf16>,
    %c0_212 = arith.constant 0 : index
    %c19_213 = arith.constant 19 : index
    %177 = vector.load %arg13[%c0_212, %c19_213] : memref<32x342xbf16, #tpu.memory_space<vmem>>, vector<32x288xbf16>
    %c128_214 = arith.constant 128 : index
    %c0_215 = arith.constant 0 : index
    %178 = vector.load %arg14[%c128_214, %c0_215] : memref<288x288xbf16, #tpu.memory_space<vmem>>, vector<32x288xbf16>
    tpu.vector_store %arg14[%c128_214, %c0_215], %177 {strides = array<i32>} : memref<288x288xbf16, #tpu.memory_space<vmem>>, vector<32x288xbf16>,
    %c0_216 = arith.constant 0 : index
    %c20_217 = arith.constant 20 : index
    %179 = vector.load %arg13[%c0_216, %c20_217] : memref<32x342xbf16, #tpu.memory_space<vmem>>, vector<32x288xbf16>
    %c160_218 = arith.constant 160 : index
    %c0_219 = arith.constant 0 : index
    %180 = vector.load %arg14[%c160_218, %c0_219] : memref<288x288xbf16, #tpu.memory_space<vmem>>, vector<32x288xbf16>
    tpu.vector_store %arg14[%c160_218, %c0_219], %179 {strides = array<i32>} : memref<288x288xbf16, #tpu.memory_space<vmem>>, vector<32x288xbf16>,
    %c0_220 = arith.constant 0 : index
    %c36_221 = arith.constant 36 : index
    %181 = vector.load %arg13[%c0_220, %c36_221] : memref<32x342xbf16, #tpu.memory_space<vmem>>, vector<32x288xbf16>
    %c192_222 = arith.constant 192 : index
    %c0_223 = arith.constant 0 : index
    %182 = vector.load %arg14[%c192_222, %c0_223] : memref<288x288xbf16, #tpu.memory_space<vmem>>, vector<32x288xbf16>
    tpu.vector_store %arg14[%c192_222, %c0_223], %181 {strides = array<i32>} : memref<288x288xbf16, #tpu.memory_space<vmem>>, vector<32x288xbf16>,
    %c0_224 = arith.constant 0 : index
    %c37_225 = arith.constant 37 : index
    %183 = vector.load %arg13[%c0_224, %c37_225] : memref<32x342xbf16, #tpu.memory_space<vmem>>, vector<32x288xbf16>
    %c224_226 = arith.constant 224 : index
    %c0_227 = arith.constant 0 : index
    %184 = vector.load %arg14[%c224_226, %c0_227] : memref<288x288xbf16, #tpu.memory_space<vmem>>, vector<32x288xbf16>
    tpu.vector_store %arg14[%c224_226, %c0_227], %183 {strides = array<i32>} : memref<288x288xbf16, #tpu.memory_space<vmem>>, vector<32x288xbf16>,
    %c0_228 = arith.constant 0 : index
    %c38_229 = arith.constant 38 : index
    %185 = vector.load %arg13[%c0_228, %c38_229] : memref<32x342xbf16, #tpu.memory_space<vmem>>, vector<32x288xbf16>
    %c256_230 = arith.constant 256 : index
    %c0_231 = arith.constant 0 : index
    %186 = vector.load %arg14[%c256_230, %c0_231] : memref<288x288xbf16, #tpu.memory_space<vmem>>, vector<32x288xbf16>
    tpu.vector_store %arg14[%c256_230, %c0_231], %185 {strides = array<i32>} : memref<288x288xbf16, #tpu.memory_space<vmem>>, vector<32x288xbf16>,
    %c1_232 = arith.constant 1 : index
    %c0_233 = arith.constant 0 : index
    %c0_234 = arith.constant 0 : index
    %187 = vector.load %arg8[%c1_232, %c0_233, %c0_234] : memref<2x32x288xbf16, #tpu.memory_space<vmem>>, vector<1x32x288xbf16>
    %188 = vector.shape_cast %187 : vector<1x32x288xbf16> to vector<32x288xbf16>
    %c0_235 = arith.constant 0 : index
    %c0_236 = arith.constant 0 : index
    %189 = vector.load %arg14[%c0_235, %c0_236] : memref<288x288xbf16, #tpu.memory_space<vmem>>, vector<288x288xbf16>
    %cst_237 = arith.constant dense<0.000000e+00> : vector<32x288xf32>
    %190 = tpu.matmul %188, %189, %cst_237 {dimension_numbers = #tpu.dot_dimension_numbers<[1], [0], [0], [1], [0, 0, 1, 1], [], []>} : vector<32x288xbf16>, vector<288x288xbf16>, vector<32x288xf32> -> vector<32x288xf32>
    %c1_238 = arith.constant 1 : index
    %c0_239 = arith.constant 0 : index
    %c0_240 = arith.constant 0 : index
    %191 = vector.load %arg9[%c1_238, %c0_239, %c0_240] : memref<2x32x1xf32, #tpu.memory_space<vmem>>, vector<1x32x1xf32>
    %192 = vector.shape_cast %191 : vector<1x32x1xf32> to vector<32x1xf32>
    %193 = vector.broadcast %192 : vector<32x1xf32> to vector<32x288xf32>
    %194 = arith.addf %190, %193 : vector<32x288xf32>
    %c0_241 = arith.constant 0 : index
    %c0_242 = arith.constant 0 : index
    %195 = vector.load %arg15[%c0_241, %c0_242] : memref<32x288xf32, #tpu.memory_space<vmem>>, vector<32x288xf32>
    %196 = arith.addf %194, %195 : vector<32x288xf32>
    %c0_243 = arith.constant 0 : index
    %c0_244 = arith.constant 0 : index
    %197 = vector.load %arg16[%c0_243, %c0_244] : memref<32x288xf32, #tpu.memory_space<vmem>>, vector<32x288xf32>
    %198 = arith.addf %196, %197 : vector<32x288xf32>
    %cst_245 = arith.constant 0.000000e+00 : f32
    %199 = vector.shape_cast %18 : vector<1x288xi1> to vector<1x288xi1>
    %200 = vector.broadcast %199 : vector<1x288xi1> to vector<32x288xi1>
    %201 = vector.broadcast %cst_245 : f32 to vector<32x288xf32>
    %202 = arith.select %200, %198, %201 : vector<32x288xi1>, vector<32x288xf32>
    %203 = arith.truncf %202 : vector<32x288xf32> to vector<32x288xbf16>
    %c0_246 = arith.constant 0 : index
    %c19_247 = arith.constant 19 : index
    %204 = vector.load %arg13[%c0_246, %c19_247] : memref<32x342xbf16, #tpu.memory_space<vmem>>, vector<32x288xbf16>
    tpu.vector_store %arg13[%c0_246, %c19_247], %203 {strides = array<i32>} : memref<32x342xbf16, #tpu.memory_space<vmem>>, vector<32x288xbf16>,
    %c0_248 = arith.constant 0 : index
    %c0_249 = arith.constant 0 : index
    %205 = vector.load %arg13[%c0_248, %c0_249] : memref<32x342xbf16, #tpu.memory_space<vmem>>, vector<32x288xbf16>
    %c0_250 = arith.constant 0 : index
    %c0_251 = arith.constant 0 : index
    %206 = vector.load %arg14[%c0_250, %c0_251] : memref<288x288xbf16, #tpu.memory_space<vmem>>, vector<32x288xbf16>
    tpu.vector_store %arg14[%c0_250, %c0_251], %205 {strides = array<i32>} : memref<288x288xbf16, #tpu.memory_space<vmem>>, vector<32x288xbf16>,
    %c0_252 = arith.constant 0 : index
    %c1_253 = arith.constant 1 : index
    %207 = vector.load %arg13[%c0_252, %c1_253] : memref<32x342xbf16, #tpu.memory_space<vmem>>, vector<32x288xbf16>
    %c32_254 = arith.constant 32 : index
    %c0_255 = arith.constant 0 : index
    %208 = vector.load %arg14[%c32_254, %c0_255] : memref<288x288xbf16, #tpu.memory_space<vmem>>, vector<32x288xbf16>
    tpu.vector_store %arg14[%c32_254, %c0_255], %207 {strides = array<i32>} : memref<288x288xbf16, #tpu.memory_space<vmem>>, vector<32x288xbf16>,
    %c0_256 = arith.constant 0 : index
    %c2_257 = arith.constant 2 : index
    %209 = vector.load %arg13[%c0_256, %c2_257] : memref<32x342xbf16, #tpu.memory_space<vmem>>, vector<32x288xbf16>
    %c64_258 = arith.constant 64 : index
    %c0_259 = arith.constant 0 : index
    %210 = vector.load %arg14[%c64_258, %c0_259] : memref<288x288xbf16, #tpu.memory_space<vmem>>, vector<32x288xbf16>
    tpu.vector_store %arg14[%c64_258, %c0_259], %209 {strides = array<i32>} : memref<288x288xbf16, #tpu.memory_space<vmem>>, vector<32x288xbf16>,
    %c0_260 = arith.constant 0 : index
    %c18_261 = arith.constant 18 : index
    %211 = vector.load %arg13[%c0_260, %c18_261] : memref<32x342xbf16, #tpu.memory_space<vmem>>, vector<32x288xbf16>
    %c96_262 = arith.constant 96 : index
    %c0_263 = arith.constant 0 : index
    %212 = vector.load %arg14[%c96_262, %c0_263] : memref<288x288xbf16, #tpu.memory_space<vmem>>, vector<32x288xbf16>
    tpu.vector_store %arg14[%c96_262, %c0_263], %211 {strides = array<i32>} : memref<288x288xbf16, #tpu.memory_space<vmem>>, vector<32x288xbf16>,
    %c0_264 = arith.constant 0 : index
    %c19_265 = arith.constant 19 : index
    %213 = vector.load %arg13[%c0_264, %c19_265] : memref<32x342xbf16, #tpu.memory_space<vmem>>, vector<32x288xbf16>
    %c128_266 = arith.constant 128 : index
    %c0_267 = arith.constant 0 : index
    %214 = vector.load %arg14[%c128_266, %c0_267] : memref<288x288xbf16, #tpu.memory_space<vmem>>, vector<32x288xbf16>
    tpu.vector_store %arg14[%c128_266, %c0_267], %213 {strides = array<i32>} : memref<288x288xbf16, #tpu.memory_space<vmem>>, vector<32x288xbf16>,
    %c0_268 = arith.constant 0 : index
    %c20_269 = arith.constant 20 : index
    %215 = vector.load %arg13[%c0_268, %c20_269] : memref<32x342xbf16, #tpu.memory_space<vmem>>, vector<32x288xbf16>
    %c160_270 = arith.constant 160 : index
    %c0_271 = arith.constant 0 : index
    %216 = vector.load %arg14[%c160_270, %c0_271] : memref<288x288xbf16, #tpu.memory_space<vmem>>, vector<32x288xbf16>
    tpu.vector_store %arg14[%c160_270, %c0_271], %215 {strides = array<i32>} : memref<288x288xbf16, #tpu.memory_space<vmem>>, vector<32x288xbf16>,
    %c0_272 = arith.constant 0 : index
    %c36_273 = arith.constant 36 : index
    %217 = vector.load %arg13[%c0_272, %c36_273] : memref<32x342xbf16, #tpu.memory_space<vmem>>, vector<32x288xbf16>
    %c192_274 = arith.constant 192 : index
    %c0_275 = arith.constant 0 : index
    %218 = vector.load %arg14[%c192_274, %c0_275] : memref<288x288xbf16, #tpu.memory_space<vmem>>, vector<32x288xbf16>
    tpu.vector_store %arg14[%c192_274, %c0_275], %217 {strides = array<i32>} : memref<288x288xbf16, #tpu.memory_space<vmem>>, vector<32x288xbf16>,
    %c0_276 = arith.constant 0 : index
    %c37_277 = arith.constant 37 : index
    %219 = vector.load %arg13[%c0_276, %c37_277] : memref<32x342xbf16, #tpu.memory_space<vmem>>, vector<32x288xbf16>
    %c224_278 = arith.constant 224 : index
    %c0_279 = arith.constant 0 : index
    %220 = vector.load %arg14[%c224_278, %c0_279] : memref<288x288xbf16, #tpu.memory_space<vmem>>, vector<32x288xbf16>
    tpu.vector_store %arg14[%c224_278, %c0_279], %219 {strides = array<i32>} : memref<288x288xbf16, #tpu.memory_space<vmem>>, vector<32x288xbf16>,
    %c0_280 = arith.constant 0 : index
    %c38_281 = arith.constant 38 : index
    %221 = vector.load %arg13[%c0_280, %c38_281] : memref<32x342xbf16, #tpu.memory_space<vmem>>, vector<32x288xbf16>
    %c256_282 = arith.constant 256 : index
    %c0_283 = arith.constant 0 : index
    %222 = vector.load %arg14[%c256_282, %c0_283] : memref<288x288xbf16, #tpu.memory_space<vmem>>, vector<32x288xbf16>
    tpu.vector_store %arg14[%c256_282, %c0_283], %221 {strides = array<i32>} : memref<288x288xbf16, #tpu.memory_space<vmem>>, vector<32x288xbf16>,
    %c0_284 = arith.constant 0 : index
    %c0_285 = arith.constant 0 : index
    %223 = vector.load %arg10[%c0_284, %c0_285] : memref<8x288xbf16, #tpu.memory_space<vmem>>, vector<8x288xbf16>
    %c0_286 = arith.constant 0 : index
    %c0_287 = arith.constant 0 : index
    %224 = vector.load %arg14[%c0_286, %c0_287] : memref<288x288xbf16, #tpu.memory_space<vmem>>, vector<288x288xbf16>
    %cst_288 = arith.constant dense<0.000000e+00> : vector<8x288xf32>
    %225 = tpu.matmul %223, %224, %cst_288 {dimension_numbers = #tpu.dot_dimension_numbers<[1], [0], [0], [1], [0, 0, 1, 1], [], []>} : vector<8x288xbf16>, vector<288x288xbf16>, vector<8x288xf32> -> vector<8x288xf32>
    %226 = vector.extract_strided_slice %225 {offsets = [0, 0], sizes = [1, 288], strides = [1, 1]} : vector<8x288xf32> to vector<1x288xf32>
    %c0_289 = arith.constant 0 : index
    %c0_290 = arith.constant 0 : index
    %227 = vector.load %arg11[%c0_289, %c0_290] : memref<1x1xf32, #tpu.memory_space<vmem>>, vector<1x1xf32>
    %228 = vector.broadcast %227 : vector<1x1xf32> to vector<1x288xf32>
    %229 = arith.addf %226, %228 : vector<1x288xf32>
    %c0_291 = arith.constant 0 : index
    %c0_292 = arith.constant 0 : index
    %c0_293 = arith.constant 0 : index
    %230 = vector.load %arg1[%c0_291, %c0_292, %c0_293] : memref<1x1x288xf32, #tpu.memory_space<vmem>>, vector<1x1x288xf32>
    %231 = vector.shape_cast %230 : vector<1x1x288xf32> to vector<1x288xf32>
    %232 = arith.addf %229, %231 : vector<1x288xf32>
    %c0_294 = arith.constant 0 : index
    %c0_295 = arith.constant 0 : index
    %c0_296 = arith.constant 0 : index
    %233 = vector.load %arg12[%c0_294, %c0_295, %c0_296] : memref<1x1x288xf32, #tpu.memory_space<vmem>>, vector<1x1x288xf32>
    %234 = vector.shape_cast %233 : vector<1x1x288xf32> to vector<1x288xf32>
    %235 = vector.shape_cast %232 : vector<1x288xf32> to vector<1x1x288xf32>
    tpu.vector_store %arg12[%c0_294, %c0_295, %c0_296], %235 {strides = array<i32>} : memref<1x1x288xf32, #tpu.memory_space<vmem>>, vector<1x1x288xf32>,
    return
  }
  func.func @transform_0(%arg0: i32) -> (i32, i32, i32) {
    %c0_i32 = arith.constant 0 : i32
    %c0_i32_0 = arith.constant 0 : i32
    %c0_i32_1 = arith.constant 0 : i32
    return %arg0, %c0_i32, %c0_i32_0 : i32, i32, i32
  }
  func.func @transform_1(%arg0: i32) -> (i32, i32, i32) {
    %c0_i32 = arith.constant 0 : i32
    %c0_i32_0 = arith.constant 0 : i32
    %c0_i32_1 = arith.constant 0 : i32
    return %arg0, %c0_i32, %c0_i32_0 : i32, i32, i32
  }
  func.func @transform_2(%arg0: i32) -> (i32, i32, i32) {
    %c0_i32 = arith.constant 0 : i32
    %c0_i32_0 = arith.constant 0 : i32
    %c0_i32_1 = arith.constant 0 : i32
    return %arg0, %c0_i32, %c0_i32_0 : i32, i32, i32
  }
  func.func @transform_3(%arg0: i32) -> (i32, i32) {
    %c0_i32 = arith.constant 0 : i32
    %c0_i32_0 = arith.constant 0 : i32
    %c0_i32_1 = arith.constant 0 : i32
    return %c0_i32, %c0_i32_0 : i32, i32
  }
  func.func @transform_4(%arg0: i32) -> (i32, i32) {
    %c0_i32 = arith.constant 0 : i32
    %c0_i32_0 = arith.constant 0 : i32
    %c0_i32_1 = arith.constant 0 : i32
    return %c0_i32, %c0_i32_0 : i32, i32
  }
  func.func @transform_5(%arg0: i32) -> (i32, i32, i32) {
    %c0_i32 = arith.constant 0 : i32
    %c0_i32_0 = arith.constant 0 : i32
    %c0_i32_1 = arith.constant 0 : i32
    %c0_i32_2 = arith.constant 0 : i32
    return %c0_i32, %c0_i32_0, %c0_i32_1 : i32, i32, i32
  }
  func.func @transform_6(%arg0: i32) -> (i32, i32, i32) {
    %c0_i32 = arith.constant 0 : i32
    %c0_i32_0 = arith.constant 0 : i32
    %c0_i32_1 = arith.constant 0 : i32
    %c0_i32_2 = arith.constant 0 : i32
    return %c0_i32, %c0_i32_0, %c0_i32_1 : i32, i32, i32
  }
  func.func @transform_7(%arg0: i32) -> (i32, i32, i32) {
    %c0_i32 = arith.constant 0 : i32
    %c0_i32_0 = arith.constant 0 : i32
    %c0_i32_1 = arith.constant 0 : i32
    %c0_i32_2 = arith.constant 0 : i32
    return %c0_i32, %c0_i32_0, %c0_i32_1 : i32, i32, i32
  }
  func.func @transform_8(%arg0: i32) -> (i32, i32, i32) {
    %c0_i32 = arith.constant 0 : i32
    %c0_i32_0 = arith.constant 0 : i32
    %c0_i32_1 = arith.constant 0 : i32
    %c0_i32_2 = arith.constant 0 : i32
    return %c0_i32, %c0_i32_0, %c0_i32_1 : i32, i32, i32
  }
  func.func @transform_9(%arg0: i32) -> (i32, i32) {
    %c0_i32 = arith.constant 0 : i32
    %c0_i32_0 = arith.constant 0 : i32
    %c0_i32_1 = arith.constant 0 : i32
    return %c0_i32, %c0_i32_0 : i32, i32
  }
  func.func @transform_10(%arg0: i32) -> (i32, i32) {
    %c0_i32 = arith.constant 0 : i32
    %c0_i32_0 = arith.constant 0 : i32
    %c0_i32_1 = arith.constant 0 : i32
    return %c0_i32, %c0_i32_0 : i32, i32
  }
  func.func @transform_11(%arg0: i32) -> (i32, i32, i32) {
    %c0_i32 = arith.constant 0 : i32
    %c0_i32_0 = arith.constant 0 : i32
    %c0_i32_1 = arith.constant 0 : i32
    return %arg0, %c0_i32, %c0_i32_0 : i32, i32, i32
  }
}

</mosaic_0001>

<bundles_post_ra>
// kernel: boostnet_fmd_forward.1
= control target key start
LH: loop header
LB: loop body
LE: loop exit
PB: predicated region body
PF: predicated region fallthrough
CT: control target
= control target key end

     0   :  { %s11088_s0 = inlined_call_operand.vmem [shape: f32[2,1,288], index: 0, kind: input, shape index: {}]   ;;  %s11089_s1 = inlined_call_operand.vmem [shape: f32[2,1,288], index: 1, kind: input, shape index: {}]   ;;  %s11090_s2 = inlined_call_operand.vmem [shape: f32[2,1,288], index: 2, kind: input, shape index: {}]   ;;  %s11091_s3 = inlined_call_operand.vmem [shape: bf16[32,72], index: 3, kind: input, shape index: {}]   ;;  %s11092_s4 = inlined_call_operand.vmem [shape: f32[32,1], index: 4, kind: input, shape index: {}]   ;;  %s11093_s5 = inlined_call_operand.vmem [shape: bf16[2,32,288], index: 5, kind: input, shape index: {}]   ;;  %s11094_s6 = inlined_call_operand.vmem [shape: f32[2,32,1], index: 6, kind: input, shape index: {}]   ;;  %s11095_s7 = inlined_call_operand.hbm [shape: bf16[2,32,288], index: 7, kind: input, shape index: {}]   ;;  %s11096_s8 = inlined_call_operand.vmem [shape: f32[2,32,1], index: 8, kind: input, shape index: {}]   ;;  %s11097_s9 = inlined_call_operand.vmem [shape: bf16[8,288], index: 9, kind: input, shape index: {}]   ;;  %s11098_s10 = inlined_call_operand.<no memory space> [shape: f32[1,1], index: 10, kind: input, shape index: {}]   ;;  %s11099_s11 = inlined_call_operand.vmem [shape: f32[2,1,288], index: 11, kind: output, shape index: {}]  }
   0x1   :  { %v16_v0 = vstv %s11098_s10 }
   0x2   :  { %17 = vst [vmem:[#allocation6] sm:$0x1] %v16_v0 }
   0x3   :  { %18 = vsyncpa [#allocation8], 0  ;;  %s8872_s19 = smov 0  }
   0x4 LB: > { %s324_s22 = sshll.u32 %s11095_s7, 4  ;;  %s7121_s23 = sadd.s32 4294967295, %s8794_s19   ;;  %s8794_s19 = sphi %s8872_s19, %s24_s19   ;;  %s325_s22 = int_to_ptr.hbm [resolvable:$true] %s324_s22 }
   0x5   : > { %p7123_p0 = scmp.ge.s32.totalorder %s8794_s19, 1  ;;  %p301_p1 = scmp.lt.s32.totalorder %s8794_s19, 3 }
   0x6   : > { %p8728_p2 = scmp.eq.s32.totalorder %s7121_s23, 0  ;;  %s8796_s10 = smov [#allocation7]  }
   0x7   : > { %p302_p3 = pnand %p7123_p0, %p301_p1  ;;  %s326_s24 = sshll.u32 %s8796_s10, 4  ;;  %s327_s24 = int_to_ptr.vmem [resolvable:$true] %s326_s24 }
   0x8   : > { %s8797_s25 = smov 192   ;;  %s8798_s26 = smov 12  }
   0x9   : > { %p8724_p4 = pneg %p302_p3  ;;  %372 = sbr.rel (%p302_p3) target bundleno = 3400 (0xd48), region = 64 }
   0xb   : > { %p8725_p5 = pnand %p8728_p2, %p8724_p4 }
   0xd   : > { %8727 = dma.hbm_to_vmem [thread:$0]  (!%p8725_p5), %s325_s22, 1536, %s327_s24, [#allocation8], %s8797_s25, %s8797_s25, %s8798_s26  }
   0xe   : > { %8789 = dma.done.wait (%p8728_p2), [#allocation8], 1536  }
   0xf   : > { %8791 = vsyncadd (%p8728_p2), [#allocation8], 4294965760  ;;  %p419_p6 = scmp.lt.s32.totalorder %s7121_s23, 1  ;;  %vm545_vm0 = vcmask 289792   ;;  %v8799_v1 = vmov 0   ;;  %vm11101_vm1 = vcmask 1040384  }
  0x10   : > { %546 = vst.msk [vmem:[#allocation2] sm:$0xf] %vm545_vm0, %v8799_v1  ;;  %8752 = vset.pattern.permute.xlu1 %v8799_v1  ;;  %8751 = vset.pattern.permute.xlu0 %v8799_v1  ;;  %vm11100_vm2 = vcmask 1041408   ;;  %vm587_vm3 = vcmask 1042432   ;;  %s8800_s18 = smov 19   ;;  %vm550_vm4 = vcmask 699792  }
  0x11   : > { %s11228_s23 = smov (!%p419_p6, %s7121_s23), 1  ;;  %547 = vst.msk [vmem:[#allocation2 + $0xc] sm:$0xf] %vm545_vm0, %v8799_v1  ;;  %8753 = vset.pattern.permute.xlu2 %v8799_v1  ;;  %vm605_vm5 = vcmask 1043608   ;;  %vm606_vm6 = vcmask 1047556   ;;  %vm600_vm7 = vcmask 154624  }
  0x12   : > { %s8888_s27 = smul.u32 3, %s11228_s23  ;;  %548 = vst.msk [vmem:[#allocation2 + $0x18] sm:$0xf] %vm545_vm0, %v8799_v1  ;;  %vm8922_vm8 = vmor %vm606_vm6, %vm605_vm5  ;;  %vm609_vm9 = vcmask 412672   ;;  %s8801_s20 = smov 90   ;;  %vm614_vm10 = vcmask 257024  }
  0x13   : > { %549 = vst.msk [vmem:[#allocation2 + $0x24] sm:$0xf] %vm545_vm0, %v8799_v1  ;;  %s8802_s21 = smov 91   ;;  %s8803_s22 = smov 92   ;;  %vm626_vm11 = vcmask 1043456   ;;  %vm11106_vm12 = vcmask 752640  }
  0x14   : > { %s8896_s30 = scalar_lea.vmem %s11088_s0, %s8888_s27  ;;  %s426_s14 = scalar_lea.vmem %s11089_s1, %s8888_s27  ;;  %551 = vst.msk [vmem:[#allocation2 + $0x8] sm:$0xf] %vm550_vm4, %v8799_v1  ;;  %vm11102_vm13 = vcmask 736256   ;;  %vm11103_vm14 = vcmask 891904   ;;  %vm11105_vm15 = vcmask 744448   ;;  %vm11104_vm0 = vcmask 883712  }
  0x15   : > { %s430_s17 = scalar_lea.vmem %s11090_s2, %s8888_s27  ;;  %v555_v2 = vld [vmem:[%s8896_s30] sm:$0x7]  ;;  %552 = vst.msk [vmem:[#allocation2 + $0x14] sm:$0xf] %vm550_vm4, %v8799_v1  ;;  %s8804_s23 = smov 109   ;;  %vm11107_vm5 = vcmask 1039360  }
  0x16   : > { %v556_v3 = vld [vmem:[%s426_s14] sm:$0x7]  ;;  %v559_v5 = vperm.slane %v555_v2, 0  ;;  %v560_v6 = vperm.slane %v555_v2, 1  ;;  %v561_v11 = vperm.slane %v555_v2, 2  ;;  %s8805_s10 = smov 126  }
  0x17   : > { %v557_v4 = vld [vmem:[%s430_s17] sm:$0x7]  ;;  %v566_v7 = vperm.slane %v556_v3, 0  ;;  %v567_v8 = vperm.slane %v556_v3, 1  ;;  %v568_v12 = vperm.slane %v556_v3, 2  ;;  %s8806_s24 = smov 108  }
  0x18   : > { %v573_v9 = vperm.slane %v557_v4, 0  ;;  %v574_v10 = vperm.slane %v557_v4, 1  ;;  %v575_v15 = vperm.slane %v557_v4, 2  ;;  %553 = vst.msk [vmem:[#allocation2 + $0x20] sm:$0xf] %vm550_vm4, %v8799_v1  ;;  %s8807_s25 = smov 110  }
  0x19   : > { %v580_v13 = vsel %vm11101_vm1, %v559_v5, %v566_v7  ;;  %v581_v14 = vsel %vm11101_vm1, %v560_v6, %v567_v8  ;;  %v582_v18 = vsel %vm11101_vm1, %v561_v11, %v568_v12  ;;  %554 = vst.msk [vmem:[#allocation2 + $0x2c] sm:$0xf] %vm550_vm4, %v8799_v1  ;;  %s8808_s26 = smov 127   ;;  %vm645_vm4 = vcmask 1031168  }
  0x1a   : > { %v584_v16 = vsel %vm11100_vm2, %v580_v13, %v573_v9  ;;  %v585_v17 = vsel %vm11100_vm2, %v581_v14, %v574_v10  ;;  %v586_v22 = vsel %vm11100_vm2, %v582_v18, %v575_v15  ;;  %vm881_vm6 = vcmask 588800  }
  0x1b   : > { %v588_v19 = vsel %vm587_vm3, %v584_v16, 0.0  ;;  %v589_v20 = vsel %vm587_vm3, %v585_v17, 0.0  ;;  %v590_v23 = vsel %vm587_vm3, %v586_v22, 0.0  ;;  %vm662_vm3 = vcmask 900096  }
  0x1c   : > { %v591_v21 = vpack.c.bf16 %v589_v20, %v588_v19  ;;  %v592_v24 = vpack.c.bf16 %v590_v23, %v590_v23 }
  0x1e   : > { %595 = vrot.lane.b32.xlu0 %v591_v21, %s8800_s18 }
  0x26   : > { %597 = vrot.lane.b32.xlu0 %v592_v24, %s8800_s18 }
  0x90   : > { %v596_v25 = vpop.permute.xlu0 %595 }
  0x91   : > { %v599_v27 = vrot.slane %v596_v25, 4 }
  0x93   : > { %v601_v28 = vsel %vm600_vm7, %v599_v27, %v596_v25 }
  0x94   : > { %608 = vst.msk [vmem:[#allocation2] sm:$0xff] %vm8922_vm8, %v601_v28 }
  0x98   : > { %v598_v29 = vpop.permute.xlu0 %597 }
  0x99   : > { %v602_v30 = vsel %vm600_vm7, %v599_v27, %v598_v29 }
  0x9a   : > { %610 = vst.msk [vmem:[#allocation2 + $0x8] sm:$0xf] %vm609_vm9, %v602_v30 }
  0x9b   : > { %v736_v31 = vld [vmem:[#allocation2] sm:$0xff] }
  0x9c   : > { %740 = vrot.lane.b32.xlu1 %v736_v31, %s8801_s20  ;;  %723 = vrot.lane.b32.xlu0 %v736_v31, %s8802_s21  ;;  %613 = vst [vmem:[#allocation3] sm:$0xff] %v736_v31 }
  0x9d   : > { %706 = vrot.lane.b32.xlu2 %v736_v31, %s8803_s22 }
  0xa1   : > { %v612_v32 = vld [vmem:[#allocation2 + $0x8] sm:$0xf] }
  0xa2   : > { %v737_v33 = vld [vmem:[#allocation2 + $0x8] sm:$0xf]  ;;  %615 = vst.msk [vmem:[#allocation3 + $0x8] sm:$0xf] %vm614_vm10, %v612_v32 }
  0xa3   : > { %v669_v34 = vld [vmem:[#allocation2 + $0x8] sm:$0xf] }
  0xa4   : > { %742 = vrot.lane.b32.xlu1 %v737_v33, %s8801_s20  ;;  %674 = vrot.lane.b32.xlu0 %v669_v34, %s8804_s23  ;;  %v703_v35 = vld [vmem:[#allocation2 + $0x8] sm:$0xf] }
  0xa5   : > { %708 = vrot.lane.b32.xlu2 %v703_v35, %s8803_s22  ;;  %v720_v36 = vld [vmem:[#allocation2 + $0x8] sm:$0xf] }
  0xa6   : > { %v652_v37 = vld [vmem:[#allocation2 + $0x8] sm:$0xf] }
  0xa7   : > { %v686_v38 = vld [vmem:[#allocation2 + $0x8] sm:$0xf] }
  0xa8   : > { %v635_v39 = vld [vmem:[#allocation2 + $0x8] sm:$0xf] }
  0xa9   : > { %v617_v40 = vld [vmem:[#allocation2 + $0x8] sm:$0xf] }
  0xac   : > { %725 = vrot.lane.b32.xlu1 %v720_v36, %s8802_s21  ;;  %638 = vrot.lane.b32.xlu0 %v736_v31, %s8805_s10 }
  0xad   : > { %672 = vrot.lane.b32.xlu2 %v736_v31, %s8804_s23 }
  0xb4   : > { %689 = vrot.lane.b32.xlu1 %v736_v31, %s8806_s24  ;;  %657 = vrot.lane.b32.xlu0 %v652_v37, %s8807_s25 }
  0xb5   : > { %691 = vrot.lane.b32.xlu2 %v686_v38, %s8806_s24 }
  0xbc   : > { %640 = vrot.lane.b32.xlu1 %v635_v39, %s8805_s10 }
  0xbd   : > { %655 = vrot.lane.b32.xlu2 %v736_v31, %s8807_s25 }
  0xc4   : > { %620 = vrot.lane.b32.xlu1 %v736_v31, %s8808_s26 }
  0xc5   : > { %622 = vrot.lane.b32.xlu2 %v617_v40, %s8808_s26 }
  0xf7   : > { %v707_v41 = vpop.permute.xlu2 %706 }
  0xf8   : > { %v710_v43 = vrot.slane %v707_v41, 4 }
  0xff   : > { %v709_v42 = vpop.permute.xlu2 %708 }
 0x100   : > { %v711_v44 = vrot.slane %v709_v42, 4  ;;  %718 = vst.msk [vmem:[#allocation3 + $0x50] sm:$0xf] %vm614_vm10, %v709_v42 }
 0x102   : > { %v712_v45 = vsel %vm626_vm11, %v710_v43, %v711_v44  ;;  %v778_v44 = vld [vmem:[%s11092_s4 + $0x18] sm:$0xff] }
 0x103   : > { %v714_v46 = vsel %vm11106_vm12, %v707_v41, %v712_v45  ;;  %796 = vperm.xlu1 %8752, %v778_v44  }
 0x104   : > { %717 = vst [vmem:[#allocation3 + $0x48] sm:$0xff] %v714_v46 }
 0x107   : > { %v673_v47 = vpop.permute.xlu2 %672  ;;  %v7182_v19 = vld [vmem:[#allocation3 + $0x50] sm:$0xf] }
 0x108   : > { %v676_v53 = vrot.slane %v673_v47, 4 }
 0x10b   : > { %v7174_v28 = vld [vmem:[#allocation3 + $0x48] sm:$0xf]  ;;  %v8422_v33 = vld [vmem:[#allocation3 + $0x4c] sm:$0xf] }
 0x10e   : > { %v741_v48 = vpop.permute.xlu1 %740  ;;  %v724_v49 = vpop.permute.xlu0 %723 }
 0x10f   : > { %v692_v50 = vpop.permute.xlu2 %691  ;;  %v744_v54 = vrot.slane %v741_v48, 4  ;;  %v727_v6 = vrot.slane %v724_v49, 4 }
 0x110   : > { %701 = vst.msk [vmem:[#allocation3 + $0x44] sm:$0xf] %vm614_vm10, %v692_v50  ;;  %v694_v16 = vrot.slane %v692_v50, 4 }
 0x116   : > { %v743_v51 = vpop.permute.xlu1 %742  ;;  %v675_v52 = vpop.permute.xlu0 %674 }
 0x117   : > { %v745_v55 = vrot.slane %v743_v51, 4  ;;  %752 = vst.msk [vmem:[#allocation3 + $0x68] sm:$0xf] %vm614_vm10, %v743_v51  ;;  %v677_v56 = vrot.slane %v675_v52, 4  ;;  %v656_v57 = vpop.permute.xlu2 %655  ;;  %v8421_v37 = vld [vmem:[#allocation3 + $0x40] sm:$0xf0] }
 0x118   : > { %684 = vst.msk [vmem:[#allocation3 + $0x38] sm:$0xf] %vm614_vm10, %v675_v52  ;;  %v659_v21 = vrot.slane %v656_v57, 4 }
 0x119   : > { %v746_v58 = vsel %vm626_vm11, %v744_v54, %v745_v55  ;;  %v678_v59 = vsel %vm626_vm11, %v676_v53, %v677_v56 }
 0x11a   : > { %v748_v60 = vsel %vm11102_vm13, %v741_v48, %v746_v58  ;;  %v680_v61 = vsel %vm11103_vm14, %v673_v47, %v678_v59  ;;  %v777_v58 = vld [vmem:[%s11092_s4 + $0x10] sm:$0xff]  ;;  %v775_v59 = vld [vmem:[%s11092_s4] sm:$0xff] }
 0x11b   : > { %683 = vst [vmem:[#allocation3 + $0x30] sm:$0xff] %v680_v61  ;;  %v851_v62 = vunpack.c.l.b16 %v748_v60  ;;  %v852_v63 = vunpack.c.h.b16 %v748_v60  ;;  %791 = vperm.xlu0 %8751, %v777_v58   ;;  %781 = vperm.xlu2 %8753, %v775_v59  }
 0x11d   : > { %v866_v0 = vpack.c.b16 %v851_v62, %v851_v62  ;;  %v867_v2 = vpack.c.b16 %v852_v63, %v852_v63 }
 0x11e   : > { %v726_v3 = vpop.permute.xlu1 %725  ;;  %v639_v4 = vpop.permute.xlu0 %638  ;;  %v774_v5 = vld [vmem:[#allocation3 + $0x68] sm:$0xf] }
 0x11f   : > { %v728_v7 = vrot.slane %v726_v3, 4  ;;  %735 = vst.msk [vmem:[#allocation3 + $0x5c] sm:$0xf] %vm614_vm10, %v726_v3  ;;  %v8959_v8 = vpop.permute.xlu2 %622  ;;  %v853_v9 = vunpack.c.l.b16 %v774_v5  ;;  %v890_v10 = vsel %vm626_vm11, %v866_v0, 0  ;;  %v893_v11 = vsel %vm626_vm11, %v867_v2, 0 }
 0x120   : > { %633 = vst.msk [vmem:[#allocation3 + $0x14] sm:$0xf] %vm614_vm10, %v8959_v8  ;;  %901 = vmatpush.bf16.msra.mxu0 %v890_v10  ;;  %920 = vmatpush.bf16.msra.mxu1 %v893_v11  ;;  %v7170_v29 = vld [vmem:[#allocation3 + $0x38] sm:$0xf]  ;;  %v642_v40 = vrot.slane %v639_v4, 4  ;;  %v625_v54 = vrot.slane %v8959_v8, 4 }
 0x121   : > { %v729_v12 = vsel %vm626_vm11, %v727_v6, %v728_v7  ;;  %v868_v13 = vpack.c.b16 %v853_v9, %v853_v9  ;;  %v7171_v38 = vor.u32 %v8421_v37, %v7170_v29  ;;  %v7146_v6 = vld [vmem:[#allocation3 + $0x8] sm:$0xf]  ;;  %v8411_v8 = vld [vmem:[%s11091_s3] sm:$0xff]  ;;  %v7138_v9 = vld [vmem:[#allocation3] sm:$0xf] }
 0x122   : > { %v731_v14 = vsel %vm11105_vm15, %v724_v49, %v729_v12  ;;  %v7162_v43 = vld [vmem:[#allocation3 + $0x30] sm:$0xf]  ;;  %v8419_v47 = vld [vmem:[#allocation3 + $0x34] sm:$0xf]  ;;  %v8413_v11 = vld [vmem:[#allocation3 + $0x4] sm:$0xf] }
 0x123   : > { %734 = vst [vmem:[#allocation3 + $0x54] sm:$0xff] %v731_v14  ;;  %v896_v15 = vsel %vm626_vm11, %v868_v13, 0 }
 0x124   : > { %939 = vmatpush.bf16.msra.mxu2 %v896_v15  ;;  %v8412_v15 = vld [vmem:[%s11091_s3 + $0x8] sm:$0xff] }
 0x126   : > { %v690_v17 = vpop.permute.xlu1 %689  ;;  %v658_v18 = vpop.permute.xlu0 %657  ;;  %v8424_v20 = vld [vmem:[#allocation3 + $0x58] sm:$0xf0] }
 0x127   : > { %v693_v22 = vrot.slane %v690_v17, 4  ;;  %v660_v23 = vrot.slane %v658_v18, 4  ;;  %667 = vst.msk [vmem:[#allocation3 + $0x2c] sm:$0xf] %vm614_vm10, %v658_v18  ;;  %v7183_v24 = vor.u32 %v8424_v20, %v7182_v19  ;;  %v8415_v62 = vld [vmem:[#allocation3 + $0x10] sm:$0xf0] }
 0x128   : > { %v7147_v7 = vor.u32 %v8415_v62, %v7146_v6 }
 0x129   : > { %v695_v25 = vsel %vm626_vm11, %v693_v22, %v694_v16  ;;  %v661_v27 = vsel %vm626_vm11, %v659_v21, %v660_v23  ;;  %940 = vmatpush.bf16.msra.mxu2 %v7183_v24  ;;  %v436_v16 = vlaneseq }
 0x12a   : > { %v697_v30 = vsel %vm11104_vm0, %v690_v17, %v695_v25  ;;  %v663_v31 = vsel %vm662_vm3, %v656_v57, %v661_v27  ;;  %v8423_v32 = vld [vmem:[#allocation3 + $0x50] sm:$0xf0]  ;;  %v7176_v34 = vld [vmem:[#allocation3 + $0x54] sm:$0xf0] }
 0x12b   : > { %700 = vst [vmem:[#allocation3 + $0x3c] sm:$0xff] %v697_v30  ;;  %v7175_v35 = vor.u32 %v8423_v32, %v7174_v28  ;;  %v7179_v36 = vor.u32 %v8422_v33, %v7176_v34  ;;  %v776_v57 = vld [vmem:[%s11092_s4 + $0x8] sm:$0xff]  ;;  %v8998_v17 = vand.u32 127, %v436_v16 }
 0x12c   : > { %666 = vst [vmem:[#allocation3 + $0x24] sm:$0xff] %v663_v31  ;;  %786 = vperm.xlu1 %8752, %v776_v57  }
 0x12d   : > { %902 = vmatpush.bf16.msra.mxu0 %v7175_v35  ;;  %921 = vmatpush.bf16.msra.mxu1 %v7179_v36  ;;  %v9001_v18 = vadd.s32 256, %v8998_v17  ;;  %v9005_v20 = vadd.s32 128, %v8998_v17  ;;  %v443_v23 = vand.u32 65535, %v8998_v17  ;;  %v444_v25 = vshrl.u32 %v8998_v17, 16 }
 0x12e   : > { %941 = vmatpush.bf16.msra.mxu2 %v7171_v38  ;;  %v641_v39 = vpop.permute.xlu1 %640  ;;  %v8418_v53 = vld [vmem:[#allocation3 + $0x28] sm:$0xf0] }
 0x12f   : > { %v643_v41 = vrot.slane %v641_v39, 4  ;;  %650 = vst.msk [vmem:[#allocation3 + $0x20] sm:$0xf] %vm614_vm10, %v641_v39  ;;  %v501_v19 = vand.u32 65535, %v9001_v18  ;;  %v502_v21 = vshrl.u32 %v9001_v18, 16  ;;  %v472_v24 = vand.u32 65535, %v9005_v20 }
 0x130   : > { %v447_v27 = vmul.u32 58254, %v443_v23  ;;  %v473_v28 = vshrl.u32 %v9005_v20, 16  ;;  %v446_v33 = vmul.u32 14564, %v443_v23  ;;  %v448_v34 = vmul.u32 14564, %v444_v25 }
 0x131   : > { %v644_v42 = vsel %vm626_vm11, %v642_v40, %v643_v41  ;;  %v505_v22 = vmul.u32 58254, %v501_v19  ;;  %v476_v29 = vmul.u32 58254, %v472_v24  ;;  %v504_v30 = vmul.u32 14564, %v501_v19 }
 0x132   : > { %v646_v45 = vsel %vm645_vm4, %v639_v4, %v644_v42  ;;  %v8420_v46 = vld [vmem:[#allocation3 + $0x38] sm:$0xf0]  ;;  %v7164_v48 = vld [vmem:[#allocation3 + $0x3c] sm:$0xf0]  ;;  %v506_v31 = vmul.u32 14564, %v502_v21  ;;  %v450_v35 = vshll.u32 %v447_v27, 16 }
 0x133   : > { %649 = vst [vmem:[#allocation3 + $0x18] sm:$0xff] %v646_v45  ;;  %v7163_v49 = vor.u32 %v8420_v46, %v7162_v43  ;;  %v7167_v50 = vor.u32 %v8419_v47, %v7164_v48  ;;  %v8417_v61 = vld [vmem:[#allocation3 + $0x20] sm:$0xf0]  ;;  %v7152_v3 = vld [vmem:[#allocation3 + $0x24] sm:$0xf0]  ;;  %v508_v32 = vshll.u32 %v505_v22, 16 }
 0x134   : > { %v475_v36 = vmul.u32 14564, %v472_v24  ;;  %v477_v37 = vmul.u32 14564, %v473_v28  ;;  %v479_v38 = vshll.u32 %v476_v29, 16  ;;  %v510_v39 = vshll.u32 %v506_v31, 16 }
 0x135   : > { %903 = vmatpush.bf16.msra.mxu0 %v7163_v49  ;;  %922 = vmatpush.bf16.msra.mxu1 %v7167_v50  ;;  %v514_v40 = vadd.s32 %v508_v32, %v504_v30  ;;  %v452_v41 = vshll.u32 %v448_v34, 16  ;;  %vm454_vm2 = vc.u32 %v446_v33, %v450_v35  ;;  %v456_v42 = vadd.s32 %v450_v35, %v446_v33 }
 0x136   : > { %v621_v51 = vpop.permute.xlu1 %620  ;;  %v7158_v52 = vld [vmem:[#allocation3 + $0x20] sm:$0xf]  ;;  %v507_v43 = vmul.u32 58254, %v502_v21  ;;  %v481_v44 = vshll.u32 %v477_v37, 16  ;;  %vm483_vm1 = vc.u32 %v475_v36, %v479_v38  ;;  %v485_v45 = vadd.s32 %v479_v38, %v475_v36 }
 0x137   : > { %v624_v55 = vrot.slane %v621_v51, 4  ;;  %v7159_v56 = vor.u32 %v8418_v53, %v7158_v52  ;;  %v449_v47 = vmul.u32 58254, %v444_v25  ;;  %vm516_vm13 = vc.u32 %v514_v40, %v510_v39 }
 0x138   : > { %v455_v48 = vsel %vm454_vm2, 1, %v8799_v1  ;;  %v478_v49 = vmul.u32 58254, %v473_v28  ;;  %vm458_vm14 = vc.u32 %v456_v42, %v452_v41  ;;  %v484_v50 = vsel %vm483_vm1, 1, %v8799_v1 }
 0x139   : > { %v627_v60 = vsel %vm626_vm11, %v624_v55, %v625_v54  ;;  %942 = vmatpush.bf16.msra.mxu2 %v7159_v56  ;;  %vm487_vm0 = vc.u32 %v485_v45, %v481_v44  ;;  %v517_v52 = vsel %vm516_vm13, 1, %v8799_v1  ;;  %v457_v53 = vadd.s32 %v455_v48, %v449_v47 }
 0x13a   : > { %v629_v63 = vsel %vm11107_vm5, %v621_v51, %v627_v60  ;;  %v7150_v0 = vld [vmem:[#allocation3 + $0x18] sm:$0xf]  ;;  %v8416_v2 = vld [vmem:[#allocation3 + $0x1c] sm:$0xf]  ;;  %v459_v54 = vsel %vm458_vm14, 1, %v8799_v1  ;;  %v486_v55 = vadd.s32 %v484_v50, %v478_v49  ;;  %v488_v56 = vsel %vm487_vm0, 1, %v8799_v1 }
 0x13b   : > { %632 = vst [vmem:[#allocation3 + $0xc] sm:$0xff] %v629_v63  ;;  %v7151_v4 = vor.u32 %v8417_v61, %v7150_v0  ;;  %v7155_v5 = vor.u32 %v8416_v2, %v7152_v3  ;;  %v509_v57 = vshrl.u32 %v505_v22, 16  ;;  %v451_v59 = vshrl.u32 %v447_v27, 16 }
 0x13c   : > { %v461_v60 = vadd.s32 %v459_v54, %v457_v53  ;;  %v480_v61 = vshrl.u32 %v476_v29, 16  ;;  %v490_v62 = vadd.s32 %v488_v56, %v486_v55  ;;  %v511_v63 = vshrl.u32 %v506_v31, 16 }
 0x13d   : > { %904 = vmatpush.bf16.msra.mxu0 %v7151_v4  ;;  %923 = vmatpush.bf16.msra.mxu1 %v7155_v5  ;;  %v453_v2 = vshrl.u32 %v448_v34, 16  ;;  %v482_v4 = vshrl.u32 %v477_v37, 16 }
 0x13e   : > { %943 = vmatpush.bf16.msra.mxu2 %v7147_v7  ;;  %v462_v3 = vadd.s32 %v461_v60, %v451_v59  ;;  %v491_v5 = vadd.s32 %v490_v62, %v480_v61 }
 0x140   : > { %v463_v7 = vadd.s32 %v462_v3, %v453_v2 }
 0x141   : > { %7188 = vmatmul.msk.bf16.vlgmr.msra.gmra.mxu2 %vm881_vm6, %v8411_v8 }
 0x142   : > { %v8414_v10 = vld [vmem:[#allocation3 + $0x8] sm:$0xf0]  ;;  %v7140_v12 = vld [vmem:[#allocation3 + $0xc] sm:$0xf0] }
 0x143   : > { %v7139_v13 = vor.u32 %v8414_v10, %v7138_v9  ;;  %v7143_v14 = vor.u32 %v8413_v11, %v7140_v12  ;;  %v464_v10 = vshrl.u32 %v463_v7, 4 }
 0x145   : > { %905 = vmatpush.bf16.msra.mxu0 %v7139_v13  ;;  %924 = vmatpush.bf16.msra.mxu1 %v7143_v14 }
 0x148   : > { %7184 = vmatmul.msk.bf16.vlgmr.msra.gmra.mxu0 %vm881_vm6, %v8411_v8  ;;  %7186 = vmatmul.msk.bf16.vlgmr.msra.gmra.mxu1 %vm881_vm6, %v8411_v8  ;;  %v492_v8 = vadd.s32 %v491_v5, %v482_v4 }
 0x14a   : > { %v493_v11 = vshrl.u32 %v492_v8, 4 }
 0x14c   : > { %v494_v13 = vmul.u32 18, %v493_v11 }
 0x14e   : > { %v495_v19 = vsub.s32 %v9005_v20, %v494_v13 }
 0x150   : > { %vm528_vm0 = vcmp.ne.s32.totalorder %v495_v19, 0  ;;  %v537_v24 = vadd.s32 18, %v495_v19 }
 0x151   : > { %7189 = vmatmul.msk.bf16.gmra.mxu2 %vm881_vm6, %v8412_v15 }
 0x158   : > { %7185 = vmatmul.msk.bf16.gmra.mxu0 %vm881_vm6, %v8412_v15  ;;  %7187 = vmatmul.msk.bf16.gmra.mxu1 %vm881_vm6, %v8412_v15  ;;  %vm512_vm6 = vc.u32 %v504_v30, %v508_v32 }
 0x159   : > { %v513_v46 = vsel %vm512_vm6, 1, %v8799_v1  ;;  %v465_v1 = vmul.u32 18, %v464_v10  ;;  %vm531_vm6 = vcmp.lt.s32.totalorder %v495_v19, 0 }
 0x15a   : > { %v515_v51 = vadd.s32 %v513_v46, %v507_v43  ;;  %vm534_vm5 = vmand %vm531_vm6, %vm528_vm0  ;;  %vm11121_vm0 = vcmask 883712  }
 0x15b   : > { %v466_v15 = vsub.s32 %v8998_v17, %v465_v1  ;;  %v540_v28 = vsel %vm534_vm5, %v537_v24, %v495_v19  ;;  %vm11119_vm5 = vcmask 752640  }
 0x15c   : > { %v519_v58 = vadd.s32 %v517_v52, %v515_v51 }
 0x15d   : > { %vm527_vm13 = vcmp.ne.s32.totalorder %v466_v15, 0  ;;  %vm530_vm14 = vcmp.lt.s32.totalorder %v466_v15, 0  ;;  %v536_v23 = vadd.s32 18, %v466_v15 }
 0x15e   : > { %v520_v0 = vadd.s32 %v519_v58, %v509_v57  ;;  %vm9021_vm12 = vmand %vm530_vm14, %vm527_vm13  ;;  %vm11120_vm14 = vcmask 744448  }
 0x15f   : > { %v539_v27 = vsel %vm9021_vm12, %v536_v23, %v466_v15  ;;  %vm11118_vm12 = vcmask 1039360  }
 0x160   : > { %v521_v6 = vadd.s32 %v520_v0, %v511_v63  ;;  %vm9033_vm13 = vcmp.lt.s32.totalorder %v539_v27, 16  ;;  %vm11122_vm6 = vmmov %vm11118_vm12 }
 0x162   : > { %v522_v9 = vshrl.u32 %v521_v6, 4 }
 0x164   : > { %v523_v12 = vmul.u32 18, %v522_v9 }
 0x166   : > { %v524_v14 = vsub.s32 %v9001_v18, %v523_v12 }
 0x168   : > { %vm529_vm1 = vcmp.ne.s32.totalorder %v524_v14, 0  ;;  %vm532_vm2 = vcmp.lt.s32.totalorder %v524_v14, 0  ;;  %v538_v21 = vadd.s32 18, %v524_v14 }
 0x169   : > { %vm535_vm15 = vmand %vm532_vm2, %vm529_vm1  ;;  %vm1047_vm2 = vcmask 261120  }
 0x16a   : > { %v541_v18 = vsel %vm535_vm15, %v538_v21, %v524_v14  ;;  %vm9037_vm15 = vcmp.lt.s32.totalorder %v540_v28, 16 }
 0x16b   : > { %vm9029_vm1 = vcmp.lt.s32.totalorder %v541_v18, 16 }
 0x175   : > { %v9025_v25 = vpop.permute.xlu1 %796  ;;  %v782_v17 = vpop.permute.xlu2 %781 }
 0x18d   : > { %v792_v59 = vpop.permute.xlu0 %791 }
 0x19e   : > { %v787_v44 = vpop.permute.xlu1 %786 }
 0x1c4   : > { %v945_v20 = vpop.f32.mrf.mxu2 }
 0x1c5   : > { %v946_v29 = vadd.f32 %v945_v20, %v782_v17  ;;  %v907_v30 = vpop.f32.mrf.mxu0  ;;  %v926_v31 = vpop.f32.mrf.mxu1 }
 0x1c6   : > { %v908_v33 = vadd.f32 %v907_v30, %v782_v17  ;;  %v927_v34 = vadd.f32 %v926_v31, %v782_v17 }
 0x1c7   : > { %v957_v35 = vmax.f32 %v946_v29, 0.0 }
 0x1c8   : > { %v955_v38 = vmax.f32 %v908_v33, 0.0  ;;  %v956_v39 = vmax.f32 %v927_v34, 0.0 }
 0x1c9   : > { %v975_v40 = vsel %vm9029_vm1, %v957_v35, 0.0 }
 0x1ca   : > { %1048 = vst.msk [vmem:[#allocation4 + $0x10] sm:$0xff] %vm1047_vm2, %v975_v40  ;;  %v973_v41 = vsel %vm9033_vm13, %v955_v38, 0.0  ;;  %v974_v42 = vsel %vm9037_vm15, %v956_v39, 0.0  ;;  %v986_v43 = vpack.c.bf16 %v975_v40, %v975_v40 }
 0x1cb   : > { %1060 = vst.msk [vmem:[#allocation5 + $0x10] sm:$0xff] %vm1047_vm2, %v975_v40  ;;  %v985_v45 = vpack.c.bf16 %v974_v42, %v973_v41 }
 0x1cc   : > { %1045 = vst [vmem:[#allocation4] sm:$0xff] %v973_v41  ;;  %v947_v46 = vpop.f32.mrf.mxu2  ;;  %1003 = vrot.lane.b32.xlu2 %v986_v43, %s8800_s18 }
 0x1cd   : > { %1058 = vst [vmem:[#allocation5] sm:$0xff] %v973_v41  ;;  %v948_v47 = vadd.f32 %v947_v46, %v787_v44  ;;  %v909_v48 = vpop.f32.mrf.mxu0  ;;  %v928_v49 = vpop.f32.mrf.mxu1  ;;  %1001 = vrot.lane.b32.xlu0 %v985_v45, %s8800_s18 }
 0x1ce   : > { %1046 = vst [vmem:[#allocation4 + $0x8] sm:$0xff] %v974_v42  ;;  %v910_v50 = vadd.f32 %v909_v48, %v787_v44  ;;  %v929_v51 = vadd.f32 %v928_v49, %v787_v44 }
 0x1cf   : > { %1059 = vst [vmem:[#allocation5 + $0x8] sm:$0xff] %v974_v42  ;;  %v960_v52 = vmax.f32 %v948_v47, 0.0 }
 0x1d0   : > { %v958_v53 = vmax.f32 %v910_v50, 0.0  ;;  %v959_v54 = vmax.f32 %v929_v51, 0.0 }
 0x1d1   : > { %v978_v55 = vsel %vm9029_vm1, %v960_v52, 0.0 }
 0x1d2   : > { %v976_v56 = vsel %vm9033_vm13, %v958_v53, 0.0  ;;  %v977_v57 = vsel %vm9037_vm15, %v959_v54, 0.0  ;;  %v988_v58 = vpack.c.bf16 %v978_v55, %v978_v55  ;;  %1051 = vst.msk [vmem:[#allocation4 + $0x28] sm:$0xff] %vm1047_vm2, %v978_v55 }
 0x1d3   : > { %1049 = vst [vmem:[#allocation4 + $0x18] sm:$0xff] %v976_v56  ;;  %v987_v60 = vpack.c.bf16 %v977_v57, %v976_v56 }
 0x1d4   : > { %1061 = vst [vmem:[#allocation5 + $0x18] sm:$0xff] %v976_v56  ;;  %v950_v61 = vpop.f32.mrf.mxu2 }
 0x1d5   : > { %1050 = vst [vmem:[#allocation4 + $0x20] sm:$0xff] %v977_v57  ;;  %v951_v62 = vadd.f32 %v950_v61, %v792_v59  ;;  %v912_v63 = vpop.f32.mrf.mxu0  ;;  %v931_v0 = vpop.f32.mrf.mxu1  ;;  %1005 = vrot.lane.b32.xlu1 %v987_v60, %s8800_s18  ;;  %1007 = vrot.lane.b32.xlu0 %v988_v58, %s8800_s18 }
 0x1d6   : > { %1062 = vst [vmem:[#allocation5 + $0x20] sm:$0xff] %v977_v57  ;;  %v913_v2 = vadd.f32 %v912_v63, %v792_v59  ;;  %v932_v3 = vadd.f32 %v931_v0, %v792_v59 }
 0x1d7   : > { %v963_v4 = vmax.f32 %v951_v62, 0.0  ;;  %1063 = vst.msk [vmem:[#allocation5 + $0x28] sm:$0xff] %vm1047_vm2, %v978_v55 }
 0x1d8   : > { %v961_v5 = vmax.f32 %v913_v2, 0.0  ;;  %v962_v6 = vmax.f32 %v932_v3, 0.0 }
 0x1d9   : > { %v981_v7 = vsel %vm9029_vm1, %v963_v4, 0.0 }
 0x1da   : > { %v979_v8 = vsel %vm9033_vm13, %v961_v5, 0.0  ;;  %v980_v9 = vsel %vm9037_vm15, %v962_v6, 0.0  ;;  %v990_v10 = vpack.c.bf16 %v981_v7, %v981_v7  ;;  %1054 = vst.msk [vmem:[#allocation4 + $0x40] sm:$0xff] %vm1047_vm2, %v981_v7 }
 0x1db   : > { %1052 = vst [vmem:[#allocation4 + $0x30] sm:$0xff] %v979_v8  ;;  %v989_v11 = vpack.c.bf16 %v980_v9, %v979_v8 }
 0x1dc   : > { %1064 = vst [vmem:[#allocation5 + $0x30] sm:$0xff] %v979_v8  ;;  %v952_v12 = vpop.f32.mrf.mxu2 }
 0x1dd   : > { %1053 = vst [vmem:[#allocation4 + $0x38] sm:$0xff] %v980_v9  ;;  %v914_v1 = vpop.f32.mrf.mxu0  ;;  %v933_v13 = vpop.f32.mrf.mxu1  ;;  %v953_v14 = vadd.f32 %v952_v12, %v9025_v25  ;;  %1009 = vrot.lane.b32.xlu2 %v989_v11, %s8800_s18  ;;  %1011 = vrot.lane.b32.xlu1 %v990_v10, %s8800_s18 }
 0x1de   : > { %1065 = vst [vmem:[#allocation5 + $0x38] sm:$0xff] %v980_v9  ;;  %v915_v15 = vadd.f32 %v914_v1, %v9025_v25  ;;  %v934_v19 = vadd.f32 %v933_v13, %v9025_v25 }
 0x1df   : > { %v966_v21 = vmax.f32 %v953_v14, 0.0  ;;  %1066 = vst.msk [vmem:[#allocation5 + $0x40] sm:$0xff] %vm1047_vm2, %v981_v7 }
 0x1e0   : > { %v964_v22 = vmax.f32 %v915_v15, 0.0  ;;  %v965_v23 = vmax.f32 %v934_v19, 0.0 }
 0x1e1   : > { %v984_v24 = vsel %vm9029_vm1, %v966_v21, 0.0 }
 0x1e2   : > { %v982_v17 = vsel %vm9033_vm13, %v964_v22, 0.0  ;;  %v983_v18 = vsel %vm9037_vm15, %v965_v23, 0.0  ;;  %1057 = vst.msk [vmem:[#allocation4 + $0x58] sm:$0xff] %vm1047_vm2, %v984_v24  ;;  %v992_v20 = vpack.c.bf16 %v984_v24, %v984_v24 }
 0x1e3   : > { %1055 = vst [vmem:[#allocation4 + $0x48] sm:$0xff] %v982_v17  ;;  %v991_v27 = vpack.c.bf16 %v983_v18, %v982_v17 }
 0x1e4   : > { %1067 = vst [vmem:[#allocation5 + $0x48] sm:$0xff] %v982_v17 }
 0x1e5   : > { %1056 = vst [vmem:[#allocation4 + $0x50] sm:$0xff] %v983_v18  ;;  %1015 = vrot.lane.b32.xlu2 %v992_v20, %s8800_s18  ;;  %1013 = vrot.lane.b32.xlu0 %v991_v27, %s8800_s18 }
 0x1e6   : > { %1068 = vst [vmem:[#allocation5 + $0x50] sm:$0xff] %v983_v18 }
 0x1e7   : > { %1069 = vst.msk [vmem:[#allocation5 + $0x58] sm:$0xff] %vm1047_vm2, %v984_v24 }
 0x226   : > { %v1004_v25 = vpop.permute.xlu2 %1003 }
 0x237   : > { %v1010_v28 = vpop.permute.xlu2 %1009 }
 0x238   : > { %v1019_v29 = vrot.slane %v1010_v28, 4 }
 0x23a   : > { %v1025_v30 = vsel %vm600_vm7, %v1019_v29, %v1010_v28 }
 0x23b   : > { %1041 = vst.msk [vmem:[#allocation2 + $0x18] sm:$0xff] %vm8922_vm8, %v1025_v30 }
 0x23f   : > { %v1002_v31 = vpop.permute.xlu0 %1001  ;;  %v1016_v56 = vpop.permute.xlu2 %1015 }
 0x240   : > { %v1017_v33 = vrot.slane %v1002_v31, 4 }
 0x242   : > { %v9087_v34 = vld [vmem:[#allocation2 + $0x18] sm:$0xff]  ;;  %v1021_v35 = vsel %vm600_vm7, %v1017_v33, %v1002_v31  ;;  %v1022_v38 = vsel %vm600_vm7, %v1017_v33, %v1004_v25 }
 0x243   : > { %1082 = vst [vmem:[#allocation3 + $0x18] sm:$0xff] %v9087_v34 }
 0x244   : > { %1037 = vst.msk [vmem:[#allocation2] sm:$0xff] %vm8922_vm8, %v1021_v35 }
 0x245   : > { %1038 = vst.msk [vmem:[#allocation2 + $0x8] sm:$0xf] %vm609_vm9, %v1022_v38 }
 0x247   : > { %v1006_v39 = vpop.permute.xlu1 %1005  ;;  %v1008_v40 = vpop.permute.xlu0 %1007 }
 0x248   : > { %v1018_v41 = vrot.slane %v1006_v39, 4 }
 0x24a   : > { %v1023_v42 = vsel %vm600_vm7, %v1018_v41, %v1006_v39  ;;  %v1024_v43 = vsel %vm600_vm7, %v1018_v41, %v1008_v40 }
 0x24b   : > { %1039 = vst.msk [vmem:[#allocation2 + $0xc] sm:$0xff] %vm8922_vm8, %v1023_v42  ;;  %v9099_v44 = vld [vmem:[#allocation2] sm:$0xff] }
 0x24c   : > { %1040 = vst.msk [vmem:[#allocation2 + $0x14] sm:$0xf] %vm609_vm9, %v1024_v43  ;;  %v1215_v45 = vld [vmem:[#allocation2 + $0x8] sm:$0xf]  ;;  %1230 = vrot.lane.b32.xlu2 %v9099_v44, %s8807_s25  ;;  %1166 = vrot.lane.b32.xlu1 %v9099_v44, %s8805_s10 }
 0x24d   : > { %1232 = vrot.lane.b32.xlu0 %v1215_v45, %s8807_s25  ;;  %1078 = vst [vmem:[#allocation3] sm:$0xff] %v9099_v44  ;;  %v1071_v48 = vld [vmem:[#allocation2 + $0x8] sm:$0xf] }
 0x24e   : > { %v1151_v50 = vld [vmem:[#allocation2 + $0x8] sm:$0xf]  ;;  %1079 = vst.msk [vmem:[#allocation3 + $0x8] sm:$0xf] %vm614_vm10, %v1071_v48 }
 0x24f   : > { %v1012_v46 = vpop.permute.xlu1 %1011  ;;  %v1087_v52 = vld [vmem:[#allocation2 + $0x8] sm:$0xf] }
 0x250   : > { %v1026_v47 = vsel %vm600_vm7, %v1019_v29, %v1012_v46  ;;  %v1471_v59 = vld [vmem:[#allocation2 + $0x8] sm:$0xf] }
 0x251   : > { %1042 = vst.msk [vmem:[#allocation2 + $0x20] sm:$0xf] %vm609_vm9, %v1026_v47  ;;  %v1407_v61 = vld [vmem:[#allocation2 + $0x8] sm:$0xf] }
 0x252   : > { %v9110_v49 = vld [vmem:[#allocation2 + $0xc] sm:$0xff]  ;;  %v1343_v63 = vld [vmem:[#allocation2 + $0x8] sm:$0xf] }
 0x253   : > { %1080 = vst [vmem:[#allocation3 + $0xc] sm:$0xff] %v9110_v49  ;;  %v1073_v51 = vld [vmem:[#allocation2 + $0x14] sm:$0xf]  ;;  %v1279_v35 = vld [vmem:[#allocation2 + $0x8] sm:$0xf] }
 0x254   : > { %1081 = vst.msk [vmem:[#allocation3 + $0x14] sm:$0xf] %vm614_vm10, %v1073_v51  ;;  %1168 = vrot.lane.b32.xlu2 %v1151_v50, %s8805_s10  ;;  %1104 = vrot.lane.b32.xlu1 %v1087_v52, %s8808_s26  ;;  %v1217_v0 = vld [vmem:[#allocation2 + $0x14] sm:$0xf] }
 0x255   : > { %1102 = vrot.lane.b32.xlu0 %v9099_v44, %s8808_s26  ;;  %v1153_v2 = vld [vmem:[#allocation2 + $0x14] sm:$0xf] }
 0x256   : > { %v1089_v3 = vld [vmem:[#allocation2 + $0x14] sm:$0xf] }
 0x257   : > { %v1014_v53 = vpop.permute.xlu0 %1013  ;;  %v1473_v4 = vld [vmem:[#allocation2 + $0x14] sm:$0xf] }
 0x258   : > { %v1020_v54 = vrot.slane %v1014_v53, 4  ;;  %v1075_v55 = vld [vmem:[#allocation2 + $0x20] sm:$0xf]  ;;  %v1409_v5 = vld [vmem:[#allocation2 + $0x14] sm:$0xf] }
 0x259   : > { %1083 = vst.msk [vmem:[#allocation3 + $0x20] sm:$0xf] %vm614_vm10, %v1075_v55  ;;  %v1345_v6 = vld [vmem:[#allocation2 + $0x14] sm:$0xf]  ;;  %v1219_v7 = vld [vmem:[#allocation2 + $0x20] sm:$0xf] }
 0x25a   : > { %v1027_v57 = vsel %vm600_vm7, %v1020_v54, %v1014_v53  ;;  %v1028_v58 = vsel %vm600_vm7, %v1020_v54, %v1016_v56  ;;  %v1155_v8 = vld [vmem:[#allocation2 + $0x20] sm:$0xf] }
 0x25b   : > { %1043 = vst.msk [vmem:[#allocation2 + $0x24] sm:$0xff] %vm8922_vm8, %v1027_v57  ;;  %v1091_v9 = vld [vmem:[#allocation2 + $0x20] sm:$0xf] }
 0x25c   : > { %1044 = vst.msk [vmem:[#allocation2 + $0x2c] sm:$0xf] %vm609_vm9, %v1028_v58  ;;  %1486 = vrot.lane.b32.xlu2 %v9099_v44, %s8802_s21  ;;  %1422 = vrot.lane.b32.xlu1 %v9099_v44, %s8803_s22  ;;  %v1475_v10 = vld [vmem:[#allocation2 + $0x20] sm:$0xf] }
 0x25d   : > { %1488 = vrot.lane.b32.xlu0 %v1471_v59, %s8802_s21  ;;  %v1411_v11 = vld [vmem:[#allocation2 + $0x20] sm:$0xf] }
 0x25e   : > { %v1347_v12 = vld [vmem:[#allocation2 + $0x20] sm:$0xf] }
 0x25f   : > { %v1283_v13 = vld [vmem:[#allocation2 + $0x20] sm:$0xf] }
 0x260   : > { %v1539_v23 = vld [vmem:[#allocation2 + $0x20] sm:$0xf] }
 0x262   : > { %v9130_v60 = vld [vmem:[#allocation2 + $0x24] sm:$0xff] }
 0x263   : > { %v1077_v62 = vld [vmem:[#allocation2 + $0x2c] sm:$0xf]  ;;  %1084 = vst [vmem:[#allocation3 + $0x24] sm:$0xff] %v9130_v60 }
 0x264   : > { %1085 = vst.msk [vmem:[#allocation3 + $0x2c] sm:$0xf] %vm614_vm10, %v1077_v62  ;;  %1424 = vrot.lane.b32.xlu2 %v1407_v61, %s8803_s22  ;;  %1360 = vrot.lane.b32.xlu1 %v1343_v63, %s8806_s24  ;;  %v1221_v15 = vld [vmem:[#allocation2 + $0x2c] sm:$0xf] }
 0x265   : > { %1358 = vrot.lane.b32.xlu0 %v9099_v44, %s8806_s24  ;;  %v1157_v19 = vld [vmem:[#allocation2 + $0x2c] sm:$0xf] }
 0x266   : > { %v1093_v22 = vld [vmem:[#allocation2 + $0x2c] sm:$0xf] }
 0x267   : > { %v1477_v46 = vld [vmem:[#allocation2 + $0x2c] sm:$0xf] }
 0x268   : > { %v1413_v58 = vld [vmem:[#allocation2 + $0x2c] sm:$0xf] }
 0x26c   : > { %1234 = vrot.lane.b32.xlu1 %v9110_v49, %s8807_s25  ;;  %1236 = vrot.lane.b32.xlu2 %v1217_v0, %s8807_s25 }
 0x26d   : > { %1170 = vrot.lane.b32.xlu0 %v9110_v49, %s8805_s10 }
 0x274   : > { %1106 = vrot.lane.b32.xlu2 %v9110_v49, %s8808_s26  ;;  %1172 = vrot.lane.b32.xlu1 %v1153_v2, %s8805_s10 }
 0x275   : > { %1108 = vrot.lane.b32.xlu0 %v1089_v3, %s8808_s26 }
 0x27c   : > { %1492 = vrot.lane.b32.xlu2 %v1473_v4, %s8802_s21  ;;  %1490 = vrot.lane.b32.xlu1 %v9110_v49, %s8802_s21  ;;  %v1349_v4 = vld [vmem:[#allocation2 + $0x2c] sm:$0xf] }
 0x27d   : > { %1426 = vrot.lane.b32.xlu0 %v9110_v49, %s8803_s22 }
 0x284   : > { %1362 = vrot.lane.b32.xlu2 %v9110_v49, %s8806_s24  ;;  %1428 = vrot.lane.b32.xlu1 %v1409_v5, %s8803_s22  ;;  %v1281_v5 = vld [vmem:[#allocation2 + $0x14] sm:$0xf] }
 0x285   : > { %1364 = vrot.lane.b32.xlu0 %v1345_v6, %s8806_s24 }
 0x28c   : > { %1240 = vrot.lane.b32.xlu2 %v1219_v7, %s8807_s25  ;;  %1238 = vrot.lane.b32.xlu1 %v9087_v34, %s8807_s25 }
 0x28d   : > { %1174 = vrot.lane.b32.xlu0 %v9087_v34, %s8805_s10 }
 0x294   : > { %1110 = vrot.lane.b32.xlu2 %v9087_v34, %s8808_s26  ;;  %1176 = vrot.lane.b32.xlu1 %v1155_v8, %s8805_s10 }
 0x295   : > { %1112 = vrot.lane.b32.xlu0 %v1091_v9, %s8808_s26 }
 0x29c   : > { %1496 = vrot.lane.b32.xlu2 %v1475_v10, %s8802_s21  ;;  %1494 = vrot.lane.b32.xlu1 %v9087_v34, %s8802_s21 }
 0x29d   : > { %1430 = vrot.lane.b32.xlu0 %v9087_v34, %s8803_s22 }
 0x2a4   : > { %1366 = vrot.lane.b32.xlu2 %v9087_v34, %s8806_s24  ;;  %1432 = vrot.lane.b32.xlu1 %v1411_v11, %s8803_s22 }
 0x2a5   : > { %1368 = vrot.lane.b32.xlu0 %v1347_v12, %s8806_s24  ;;  %v1541_v12 = vld [vmem:[#allocation2 + $0x2c] sm:$0xf] }
 0x2a6   : > { %v1231_v1 = vpop.permute.xlu2 %1230 }
 0x2a7   : > { %v1246_v25 = vrot.slane %v1231_v1, 4 }
 0x2ac   : > { %1304 = vrot.lane.b32.xlu2 %v1283_v13, %s8804_s23  ;;  %1302 = vrot.lane.b32.xlu1 %v9087_v34, %s8804_s23 }
 0x2ad   : > { %1242 = vrot.lane.b32.xlu0 %v9130_v60, %s8807_s25 }
 0x2ae   : > { %v1169_v14 = vpop.permute.xlu2 %1168 }
 0x2af   : > { %1207 = vst.msk [vmem:[#allocation3 + $0x68] sm:$0xf] %vm614_vm10, %v1169_v14  ;;  %v1183_v18 = vrot.slane %v1169_v14, 4 }
 0x2b4   : > { %1244 = vrot.lane.b32.xlu1 %v1221_v15, %s8807_s25  ;;  %1178 = vrot.lane.b32.xlu2 %v9130_v60, %s8805_s10 }
 0x2b5   : > { %1180 = vrot.lane.b32.xlu0 %v1157_v19, %s8805_s10 }
 0x2b6   : > { %v1487_v21 = vpop.permute.xlu2 %1486 }
 0x2b7   : > { %v1502_v52 = vrot.slane %v1487_v21, 4 }
 0x2bc   : > { %1116 = vrot.lane.b32.xlu2 %v1093_v22, %s8808_s26  ;;  %1114 = vrot.lane.b32.xlu1 %v9130_v60, %s8808_s26 }
 0x2bd   : > { %1560 = vrot.lane.b32.xlu0 %v1539_v23, %s8801_s20 }
 0x2be   : > { %v1425_v24 = vpop.permute.xlu2 %1424  ;;  %v1167_v17 = vpop.permute.xlu1 %1166 }
 0x2bf   : > { %1463 = vst.msk [vmem:[#allocation3 + $0x128] sm:$0xf] %vm614_vm10, %v1425_v24  ;;  %v1182_v20 = vrot.slane %v1167_v17, 4  ;;  %v1233_v27 = vpop.permute.xlu0 %1232  ;;  %v1439_v48 = vrot.slane %v1425_v24, 4 }
 0x2c0   : > { %v1247_v28 = vrot.slane %v1233_v27, 4  ;;  %1271 = vst.msk [vmem:[#allocation3 + $0x98] sm:$0xf] %vm614_vm10, %v1233_v27  ;;  %v1535_v27 = vld [vmem:[#allocation2 + $0x8] sm:$0xf] }
 0x2c1   : > { %v1190_v29 = vsel %vm626_vm11, %v1182_v20, %v1183_v18 }
 0x2c2   : > { %v1191_v30 = vsel %vm645_vm4, %v1167_v17, %v1190_v29  ;;  %v1254_v31 = vsel %vm626_vm11, %v1246_v25, %v1247_v28 }
 0x2c3   : > { %1206 = vst [vmem:[#allocation3 + $0x60] sm:$0xff] %v1191_v30  ;;  %v1255_v33 = vsel %vm662_vm3, %v1231_v1, %v1254_v31  ;;  %v1285_v1 = vld [vmem:[#allocation2 + $0x2c] sm:$0xf] }
 0x2c4   : > { %1270 = vst [vmem:[#allocation3 + $0x90] sm:$0xff] %v1255_v33  ;;  %1558 = vrot.lane.b32.xlu2 %v9087_v34, %s8801_s20  ;;  %1296 = vrot.lane.b32.xlu1 %v1279_v35, %s8804_s23  ;;  %v1680_v35 = vld [vmem:[%s11094_s6 + $0x10] sm:$0xff] }
 0x2c5   : > { %1294 = vrot.lane.b32.xlu0 %v9099_v44, %s8804_s23 }
 0x2c6   : > { %v1105_v38 = vpop.permute.xlu1 %1104  ;;  %v1237_v39 = vpop.permute.xlu2 %1236 }
 0x2c7   : > { %v1119_v40 = vrot.slane %v1105_v38, 4  ;;  %1143 = vst.msk [vmem:[#allocation3 + $0x38] sm:$0xf] %vm614_vm10, %v1105_v38  ;;  %v1103_v41 = vpop.permute.xlu0 %1102  ;;  %v1249_v7 = vrot.slane %v1237_v39, 4 }
 0x2c8   : > { %1273 = vst.msk [vmem:[#allocation3 + $0xa4] sm:$0xf] %vm614_vm10, %v1237_v39  ;;  %v1118_v42 = vrot.slane %v1103_v41, 4  ;;  %v1537_v39 = vld [vmem:[#allocation2 + $0x14] sm:$0xf] }
 0x2ca   : > { %v1126_v43 = vsel %vm626_vm11, %v1118_v42, %v1119_v40 }
 0x2cb   : > { %v1127_v45 = vsel %vm11118_vm12, %v1103_v41, %v1126_v43  ;;  %vm11123_vm12 = vmmov %vm11120_vm14 }
 0x2cc   : > { %1142 = vst [vmem:[#allocation3 + $0x30] sm:$0xff] %v1127_v45  ;;  %1298 = vrot.lane.b32.xlu2 %v9110_v49, %s8804_s23  ;;  %1500 = vrot.lane.b32.xlu1 %v1477_v46, %s8802_s21 }
 0x2cd   : > { %1498 = vrot.lane.b32.xlu0 %v9130_v60, %s8802_s21 }
 0x2ce   : > { %v1423_v34 = vpop.permute.xlu1 %1422  ;;  %v1107_v47 = vpop.permute.xlu2 %1106 }
 0x2cf   : > { %v1438_v50 = vrot.slane %v1423_v34, 4  ;;  %v1489_v51 = vpop.permute.xlu0 %1488  ;;  %v1120_v22 = vrot.slane %v1107_v47, 4 }
 0x2d0   : > { %v1503_v53 = vrot.slane %v1489_v51, 4  ;;  %1527 = vst.msk [vmem:[#allocation3 + $0x158] sm:$0xf] %vm614_vm10, %v1489_v51 }
 0x2d1   : > { %v1446_v54 = vsel %vm626_vm11, %v1438_v50, %v1439_v48  ;;  %v1678_v48 = vld [vmem:[%s11094_s6] sm:$0xff] }
 0x2d2   : > { %v1447_v55 = vsel %vm11119_vm5, %v1423_v34, %v1446_v54  ;;  %v1510_v56 = vsel %vm626_vm11, %v1502_v52, %v1503_v53 }
 0x2d3   : > { %1462 = vst [vmem:[#allocation3 + $0x120] sm:$0xff] %v1447_v55  ;;  %v1511_v57 = vsel %vm11120_vm14, %v1487_v21, %v1510_v56  ;;  %vm11124_vm14 = vmmov %vm11121_vm0 }
 0x2d4   : > { %1526 = vst [vmem:[#allocation3 + $0x150] sm:$0xff] %v1511_v57  ;;  %1434 = vrot.lane.b32.xlu2 %v9130_v60, %s8803_s22  ;;  %1550 = vrot.lane.b32.xlu1 %v9099_v44, %s8801_s20 }
 0x2d5   : > { %1436 = vrot.lane.b32.xlu0 %v1413_v58, %s8803_s22 }
 0x2d6   : > { %v1361_v59 = vpop.permute.xlu1 %1360  ;;  %v1493_v61 = vpop.permute.xlu2 %1492 }
 0x2d7   : > { %v1375_v62 = vrot.slane %v1361_v59, 4  ;;  %1399 = vst.msk [vmem:[#allocation3 + $0xf8] sm:$0xf] %vm614_vm10, %v1361_v59  ;;  %v1359_v63 = vpop.permute.xlu0 %1358  ;;  %v1505_v29 = vrot.slane %v1493_v61, 4 }
 0x2d8   : > { %1529 = vst.msk [vmem:[#allocation3 + $0x164] sm:$0xf] %vm614_vm10, %v1493_v61  ;;  %v1374_v0 = vrot.slane %v1359_v63, 4 }
 0x2da   : > { %v1382_v2 = vsel %vm626_vm11, %v1374_v0, %v1375_v62 }
 0x2db   : > { %v1383_v3 = vsel %vm11121_vm0, %v1359_v63, %v1382_v2  ;;  %vm11125_vm0 = vmmov %vm11122_vm6 }
 0x2dc   : > { %1398 = vst [vmem:[#allocation3 + $0xf0] sm:$0xff] %v1383_v3  ;;  %1372 = vrot.lane.b32.xlu2 %v1349_v4, %s8806_s24  ;;  %1370 = vrot.lane.b32.xlu1 %v9130_v60, %s8806_s24 }
 0x2dd   : > { %1300 = vrot.lane.b32.xlu0 %v1281_v5, %s8804_s23 }
 0x2de   : > { %v1235_v44 = vpop.permute.xlu1 %1234  ;;  %v9226_v6 = vpop.permute.xlu2 %1362 }
 0x2df   : > { %v1248_v8 = vrot.slane %v1235_v44, 4  ;;  %v1171_v9 = vpop.permute.xlu0 %1170  ;;  %v1376_v45 = vrot.slane %v9226_v6, 4 }
 0x2e0   : > { %v1184_v15 = vrot.slane %v1171_v9, 4 }
 0x2e1   : > { %v1256_v10 = vsel %vm626_vm11, %v1248_v8, %v1249_v7 }
 0x2e2   : > { %v1257_v11 = vsel %vm662_vm3, %v1235_v44, %v1256_v10 }
 0x2e3   : > { %1272 = vst [vmem:[#allocation3 + $0x9c] sm:$0xff] %v1257_v11 }
 0x2e4   : > { %1564 = vrot.lane.b32.xlu2 %v1541_v12, %s8801_s20  ;;  %1308 = vrot.lane.b32.xlu1 %v1285_v1, %s8804_s23 }
 0x2e5   : > { %1306 = vrot.lane.b32.xlu0 %v9130_v60, %s8804_s23 }
 0x2e6   : > { %v1241_v13 = vpop.permute.xlu2 %1240  ;;  %v1173_v14 = vpop.permute.xlu1 %1172 }
 0x2e7   : > { %1275 = vst.msk [vmem:[#allocation3 + $0xb0] sm:$0xf] %vm614_vm10, %v1241_v13  ;;  %v1185_v19 = vrot.slane %v1173_v14, 4  ;;  %v1109_v21 = vpop.permute.xlu0 %1108  ;;  %v1251_v55 = vrot.slane %v1241_v13, 4 }
 0x2e8   : > { %1209 = vst.msk [vmem:[#allocation3 + $0x74] sm:$0xf] %vm614_vm10, %v1173_v14  ;;  %v1121_v23 = vrot.slane %v1109_v21, 4 }
 0x2e9   : > { %v1192_v24 = vsel %vm626_vm11, %v1184_v15, %v1185_v19  ;;  %1145 = vst.msk [vmem:[#allocation3 + $0x44] sm:$0xf] %vm614_vm10, %v1109_v21 }
 0x2ea   : > { %v1193_v17 = vsel %vm645_vm4, %v1171_v9, %v1192_v24  ;;  %v1128_v18 = vsel %vm626_vm11, %v1120_v22, %v1121_v23 }
 0x2eb   : > { %1208 = vst [vmem:[#allocation3 + $0x6c] sm:$0xff] %v1193_v17  ;;  %v1129_v20 = vsel %vm11122_vm6, %v1107_v47, %v1128_v18  ;;  %v1679_v47 = vld [vmem:[%s11094_s6 + $0x8] sm:$0xff]  ;;  %vm11126_vm6 = vmmov %vm11123_vm12 }
 0x2ec   : > { %1144 = vst [vmem:[#allocation3 + $0x3c] sm:$0xff] %v1129_v20  ;;  %1552 = vrot.lane.b32.xlu2 %v1535_v27, %s8801_s20  ;;  %1562 = vrot.lane.b32.xlu1 %v9130_v60, %s8801_s20  ;;  %v1681_v60 = vld [vmem:[%s11094_s6 + $0x18] sm:$0xff] }
 0x2ed   : > { %1554 = vrot.lane.b32.xlu0 %v9110_v49, %s8801_s20 }
 0x2ee   : > { %v1111_v25 = vpop.permute.xlu2 %1110  ;;  %v1491_v28 = vpop.permute.xlu1 %1490 }
 0x2ef   : > { %v1504_v30 = vrot.slane %v1491_v28, 4  ;;  %v1427_v31 = vpop.permute.xlu0 %1426  ;;  %v1122_v3 = vrot.slane %v1111_v25, 4 }
 0x2f0   : > { %v1440_v41 = vrot.slane %v1427_v31, 4 }
 0x2f1   : > { %v1512_v33 = vsel %vm626_vm11, %v1504_v30, %v1505_v29 }
 0x2f2   : > { %v1513_v38 = vsel %vm11123_vm12, %v1491_v28, %v1512_v33  ;;  %vm11127_vm12 = vmmov %vm11119_vm5 }
 0x2f3   : > { %1528 = vst [vmem:[#allocation3 + $0x15c] sm:$0xff] %v1513_v38 }
 0x2f4   : > { %1694 = vperm.xlu2 %8753, %v1680_v35   ;;  %1556 = vrot.lane.b32.xlu1 %v1537_v39, %s8801_s20 }
 0x2f5   : > { %1699 = vperm.xlu0 %8751, %v1681_v60  }
 0x2f6   : > { %v1497_v49 = vpop.permute.xlu2 %1496  ;;  %v1429_v40 = vpop.permute.xlu1 %1428 }
 0x2f7   : > { %1531 = vst.msk [vmem:[#allocation3 + $0x170] sm:$0xf] %vm614_vm10, %v1497_v49  ;;  %v1441_v42 = vrot.slane %v1429_v40, 4  ;;  %v1365_v43 = vpop.permute.xlu0 %1364  ;;  %v1507_v10 = vrot.slane %v1497_v49, 4 }
 0x2f8   : > { %1465 = vst.msk [vmem:[#allocation3 + $0x134] sm:$0xf] %vm614_vm10, %v1429_v40  ;;  %v1377_v46 = vrot.slane %v1365_v43, 4 }
 0x2f9   : > { %v1448_v34 = vsel %vm626_vm11, %v1440_v41, %v1441_v42  ;;  %1401 = vst.msk [vmem:[#allocation3 + $0x104] sm:$0xf] %vm614_vm10, %v1365_v43 }
 0x2fa   : > { %v1449_v50 = vsel %vm11119_vm5, %v1427_v31, %v1448_v34  ;;  %v1384_v51 = vsel %vm626_vm11, %v1376_v45, %v1377_v46  ;;  %vm11128_vm5 = vmmov %vm11124_vm14 }
 0x2fb   : > { %1464 = vst [vmem:[#allocation3 + $0x12c] sm:$0xff] %v1449_v50  ;;  %v1385_v52 = vsel %vm11124_vm14, %v9226_v6, %v1384_v51  ;;  %vm11129_vm14 = vcmask 891904  }
 0x2fc   : > { %1400 = vst [vmem:[#allocation3 + $0xfc] sm:$0xff] %v1385_v52  ;;  %1689 = vperm.xlu2 %8753, %v1679_v47   ;;  %1684 = vperm.xlu1 %8752, %v1678_v48  }
 0x2fe   : > { %v1367_v53 = vpop.permute.xlu2 %1366  ;;  %v1239_v54 = vpop.permute.xlu1 %1238 }
 0x2ff   : > { %v1250_v56 = vrot.slane %v1239_v54, 4  ;;  %v1175_v57 = vpop.permute.xlu0 %1174  ;;  %v1378_v23 = vrot.slane %v1367_v53, 4 }
 0x300   : > { %v1186_v63 = vrot.slane %v1175_v57, 4 }
 0x301   : > { %v1258_v58 = vsel %vm626_vm11, %v1250_v56, %v1251_v55 }
 0x302   : > { %v1259_v59 = vsel %vm662_vm3, %v1239_v54, %v1258_v58 }
 0x303   : > { %1274 = vst [vmem:[#allocation3 + $0xa8] sm:$0xff] %v1259_v59 }
 0x306   : > { %v1305_v61 = vpop.permute.xlu2 %1304  ;;  %v1177_v62 = vpop.permute.xlu1 %1176 }
 0x307   : > { %1339 = vst.msk [vmem:[#allocation3 + $0xe0] sm:$0xf] %vm614_vm10, %v1305_v61  ;;  %v1187_v0 = vrot.slane %v1177_v62, 4  ;;  %v1113_v2 = vpop.permute.xlu0 %1112  ;;  %v1315_v29 = vrot.slane %v1305_v61, 4 }
 0x308   : > { %1211 = vst.msk [vmem:[#allocation3 + $0x80] sm:$0xf] %vm614_vm10, %v1177_v62  ;;  %v1123_v4 = vrot.slane %v1113_v2, 4 }
 0x309   : > { %v1194_v5 = vsel %vm626_vm11, %v1186_v63, %v1187_v0  ;;  %1147 = vst.msk [vmem:[#allocation3 + $0x50] sm:$0xf] %vm614_vm10, %v1113_v2 }
 0x30a   : > { %v1195_v44 = vsel %vm645_vm4, %v1175_v57, %v1194_v5  ;;  %v1130_v6 = vsel %vm626_vm11, %v1122_v3, %v1123_v4  ;;  %v7300_v56 = vld [vmem:[#allocation3 + $0xa8] sm:$0xf]  ;;  %v8452_v61 = vld [vmem:[#allocation3 + $0xac] sm:$0xf]  ;;  %v8450_v3 = vld [vmem:[#allocation3 + $0x98] sm:$0xf0] }
 0x30b   : > { %1210 = vst [vmem:[#allocation3 + $0x78] sm:$0xff] %v1195_v44  ;;  %v1131_v7 = vsel %vm11125_vm0, %v1111_v25, %v1130_v6  ;;  %v7290_v4 = vld [vmem:[#allocation3 + $0x9c] sm:$0xf0]  ;;  %v7288_v6 = vld [vmem:[#allocation3 + $0x90] sm:$0xf] }
 0x30c   : > { %1146 = vst [vmem:[#allocation3 + $0x48] sm:$0xff] %v1131_v7  ;;  %v8449_v7 = vld [vmem:[#allocation3 + $0x94] sm:$0xf] }
 0x30e   : > { %v1495_v8 = vpop.permute.xlu1 %1494  ;;  %v1179_v9 = vpop.permute.xlu2 %1178 }
 0x30f   : > { %v1506_v11 = vrot.slane %v1495_v8, 4  ;;  %v1431_v12 = vpop.permute.xlu0 %1430  ;;  %v1188_v41 = vrot.slane %v1179_v9, 4 }
 0x310   : > { %v1442_v19 = vrot.slane %v1431_v12, 4 }
 0x311   : > { %v1514_v1 = vsel %vm626_vm11, %v1506_v11, %v1507_v10  ;;  %v7289_v10 = vor.u32 %v8450_v3, %v7288_v6  ;;  %v7293_v11 = vor.u32 %v8449_v7, %v7290_v4  ;;  %v8432_v4 = vld [vmem:[#allocation3 + $0x8] sm:$0xf0] }
 0x312   : > { %v1515_v13 = vsel %vm11126_vm6, %v1495_v8, %v1514_v1  ;;  %vm11130_vm6 = vcmask 736256  }
 0x313   : > { %1530 = vst [vmem:[#allocation3 + $0x168] sm:$0xff] %v1515_v13 }
 0x316   : > { %v1433_v14 = vpop.permute.xlu1 %1432  ;;  %v1117_v15 = vpop.permute.xlu2 %1116 }
 0x317   : > { %v1443_v21 = vrot.slane %v1433_v14, 4  ;;  %1467 = vst.msk [vmem:[#allocation3 + $0x140] sm:$0xf] %vm614_vm10, %v1433_v14  ;;  %v1369_v22 = vpop.permute.xlu0 %1368  ;;  %v1125_v50 = vrot.slane %v1117_v15, 4 }
 0x318   : > { %1149 = vst.msk [vmem:[#allocation3 + $0x5c] sm:$0xf] %vm614_vm10, %v1117_v15  ;;  %v1379_v24 = vrot.slane %v1369_v22, 4  ;;  %v7276_v15 = vld [vmem:[#allocation3 + $0x78] sm:$0xf] }
 0x319   : > { %v1450_v17 = vsel %vm626_vm11, %v1442_v19, %v1443_v21  ;;  %1403 = vst.msk [vmem:[#allocation3 + $0x110] sm:$0xf] %vm614_vm10, %v1369_v22  ;;  %v8446_v19 = vld [vmem:[#allocation3 + $0x7c] sm:$0xf] }
 0x31a   : > { %v1451_v18 = vsel %vm11127_vm12, %v1431_v12, %v1450_v17  ;;  %v1386_v20 = vsel %vm626_vm11, %v1378_v23, %v1379_v24  ;;  %vm11131_vm12 = vmmov %vm11129_vm14  ;;  %v8444_v24 = vld [vmem:[#allocation3 + $0x68] sm:$0xf0]  ;;  %v7266_v17 = vld [vmem:[#allocation3 + $0x6c] sm:$0xf0] }
 0x31b   : > { %1466 = vst [vmem:[#allocation3 + $0x138] sm:$0xff] %v1451_v18  ;;  %v1387_v27 = vsel %vm11128_vm5, %v1367_v53, %v1386_v20  ;;  %vm11132_vm5 = vcmask 744448   ;;  %v7396_v7 = vld [vmem:[#allocation3 + $0x168] sm:$0xf] }
 0x31c   : > { %1402 = vst [vmem:[#allocation3 + $0x108] sm:$0xff] %v1387_v27  ;;  %v7264_v27 = vld [vmem:[#allocation3 + $0x60] sm:$0xf] }
 0x31e   : > { %v1303_v25 = vpop.permute.xlu1 %1302  ;;  %v1559_v28 = vpop.permute.xlu2 %1558 }
 0x31f   : > { %v1314_v30 = vrot.slane %v1303_v25, 4  ;;  %v1243_v31 = vpop.permute.xlu0 %1242  ;;  %v1570_v53 = vrot.slane %v1559_v28, 4 }
 0x320   : > { %v1252_v39 = vrot.slane %v1243_v31, 4 }
 0x321   : > { %v1322_v33 = vsel %vm626_vm11, %v1314_v30, %v1315_v29  ;;  %v7265_v30 = vor.u32 %v8444_v24, %v7264_v27 }
 0x322   : > { %v1323_v35 = vsel %vm11129_vm14, %v1303_v25, %v1322_v33  ;;  %v8443_v25 = vld [vmem:[#allocation3 + $0x64] sm:$0xf]  ;;  %vm11133_vm14 = vmmov %vm11130_vm6 }
 0x323   : > { %1338 = vst [vmem:[#allocation3 + $0xd8] sm:$0xff] %v1323_v35 }
 0x326   : > { %v1245_v38 = vpop.permute.xlu1 %1244  ;;  %v9290_v60 = vpop.permute.xlu2 %1298 }
 0x327   : > { %v1253_v49 = vrot.slane %v1245_v38, 4  ;;  %1277 = vst.msk [vmem:[#allocation3 + $0xbc] sm:$0xf] %vm614_vm10, %v1245_v38  ;;  %v1181_v40 = vpop.permute.xlu0 %1180 }
 0x328   : > { %v1189_v42 = vrot.slane %v1181_v40, 4  ;;  %1213 = vst.msk [vmem:[#allocation3 + $0x8c] sm:$0xf] %vm614_vm10, %v1181_v40  ;;  %v8440_v40 = vld [vmem:[#allocation3 + $0x4c] sm:$0xf] }
 0x329   : > { %v1260_v43 = vsel %vm626_vm11, %v1252_v39, %v1253_v49  ;;  %v7252_v49 = vld [vmem:[#allocation3 + $0x48] sm:$0xf] }
 0x32a   : > { %v1261_v45 = vsel %vm662_vm3, %v1243_v31, %v1260_v43  ;;  %v1196_v46 = vsel %vm626_vm11, %v1188_v41, %v1189_v42  ;;  %v7269_v31 = vor.u32 %v8443_v25, %v7266_v17 }
 0x32b   : > { %1276 = vst [vmem:[#allocation3 + $0xb4] sm:$0xff] %v1261_v45  ;;  %v1197_v34 = vsel %vm645_vm4, %v1179_v9, %v1196_v46  ;;  %v8438_v45 = vld [vmem:[#allocation3 + $0x38] sm:$0xf0]  ;;  %v7242_v46 = vld [vmem:[#allocation3 + $0x3c] sm:$0xf0] }
 0x32c   : > { %1212 = vst [vmem:[#allocation3 + $0x84] sm:$0xff] %v1197_v34 }
 0x32e   : > { %v9298_v47 = vpop.permute.xlu2 %1434  ;;  %v1115_v48 = vpop.permute.xlu1 %1114 }
 0x32f   : > { %v1124_v51 = vrot.slane %v1115_v48, 4  ;;  %v1561_v52 = vpop.permute.xlu0 %1560 }
 0x330   : > { %v1571_v54 = vrot.slane %v1561_v52, 4  ;;  %1595 = vst.msk [vmem:[#allocation3 + $0x1a0] sm:$0xf] %vm614_vm10, %v1561_v52  ;;  %v7228_v52 = vld [vmem:[#allocation3 + $0x18] sm:$0xf] }
 0x331   : > { %v1132_v55 = vsel %vm626_vm11, %v1124_v51, %v1125_v50  ;;  %v7240_v50 = vld [vmem:[#allocation3 + $0x30] sm:$0xf]  ;;  %v8437_v51 = vld [vmem:[#allocation3 + $0x34] sm:$0xf] }
 0x332   : > { %v1133_v57 = vsel %vm11125_vm0, %v1115_v48, %v1132_v55  ;;  %v1578_v58 = vsel %vm626_vm11, %v1570_v53, %v1571_v54  ;;  %v8453_v59 = vld [vmem:[#allocation3 + $0xb0] sm:$0xf0]  ;;  %v7302_v62 = vld [vmem:[#allocation3 + $0xb4] sm:$0xf0]  ;;  %v8434_v53 = vld [vmem:[#allocation3 + $0x1c] sm:$0xf] }
 0x333   : > { %1148 = vst [vmem:[#allocation3 + $0x54] sm:$0xff] %v1133_v57  ;;  %v1579_v63 = vsel %vm11130_vm6, %v1559_v28, %v1578_v58  ;;  %v7301_v0 = vor.u32 %v8453_v59, %v7300_v56  ;;  %v7305_v2 = vor.u32 %v8452_v61, %v7302_v62  ;;  %v8447_v12 = vld [vmem:[#allocation3 + $0x80] sm:$0xf0]  ;;  %v7278_v13 = vld [vmem:[#allocation3 + $0x84] sm:$0xf0]  ;;  %v7241_v57 = vor.u32 %v8438_v45, %v7240_v50 }
 0x334   : > { %1594 = vst [vmem:[#allocation3 + $0x198] sm:$0xff] %v1579_v63  ;;  %v7277_v22 = vor.u32 %v8447_v12, %v7276_v15  ;;  %v7281_v23 = vor.u32 %v8446_v19, %v7278_v13  ;;  %v7245_v58 = vor.u32 %v8437_v51, %v7242_v46  ;;  %v8435_v59 = vld [vmem:[#allocation3 + $0x20] sm:$0xf0]  ;;  %v1444_v61 = vrot.slane %v9298_v47, 4  ;;  %v7230_v63 = vld [vmem:[#allocation3 + $0x24] sm:$0xf0] }
 0x335   : > { %2026 = vmatpush.bf16.msra.mxu3 %v7301_v0  ;;  %2083 = vmatpush.bf16.msrb.mxu2 %v7305_v2  ;;  %vm11134_vm0 = vcmask 752640   ;;  %v7229_v6 = vor.u32 %v8435_v59, %v7228_v52  ;;  %v8474_v12 = vld [vmem:[#allocation3 + $0x158] sm:$0xf0]  ;;  %vm11135_vm6 = vcmask 883712   ;;  %v7372_v45 = vld [vmem:[#allocation3 + $0x138] sm:$0xf] }
 0x336   : > { %v9305_v5 = vpop.permute.xlu2 %1372  ;;  %v1297_v44 = vpop.permute.xlu1 %1296  ;;  %v7392_v50 = vld [vmem:[#allocation3 + $0x158] sm:$0xf]  ;;  %v8468_v52 = vld [vmem:[#allocation3 + $0x128] sm:$0xf0] }
 0x337   : > { %1405 = vst.msk [vmem:[#allocation3 + $0x11c] sm:$0xf] %vm614_vm10, %v9305_v5  ;;  %v1311_v8 = vrot.slane %v1297_v44, 4  ;;  %v1295_v9 = vpop.permute.xlu0 %1294  ;;  %v1381_v24 = vrot.slane %v9305_v5, 4  ;;  %v7386_v5 = vld [vmem:[#allocation3 + $0x15c] sm:$0xf0] }
 0x338   : > { %1335 = vst.msk [vmem:[#allocation3 + $0xc8] sm:$0xf] %vm614_vm10, %v1297_v44  ;;  %v1310_v1 = vrot.slane %v1295_v9, 4 }
 0x339   : > { %2027 = vmatpush.bf16.msra.mxu3 %v7289_v10  ;;  %2084 = vmatpush.bf16.msrb.mxu2 %v7293_v11  ;;  %v7216_v10 = vld [vmem:[#allocation3] sm:$0xf] }
 0x33a   : > { %v1318_v14 = vsel %vm626_vm11, %v1310_v1, %v1311_v8  ;;  %v8441_v33 = vld [vmem:[#allocation3 + $0x50] sm:$0xf0]  ;;  %v7254_v38 = vld [vmem:[#allocation3 + $0x54] sm:$0xf0]  ;;  %v7218_v1 = vld [vmem:[#allocation3 + $0xc] sm:$0xf0]  ;;  %v7217_v19 = vor.u32 %v8432_v4, %v7216_v10 }
 0x33b   : > { %v1319_v21 = vsel %vm11131_vm12, %v1295_v9, %v1318_v14  ;;  %v7253_v42 = vor.u32 %v8441_v33, %v7252_v49  ;;  %v7257_v43 = vor.u32 %v8440_v40, %v7254_v38  ;;  %v7233_v9 = vor.u32 %v8434_v53, %v7230_v63  ;;  %v7192_v14 = vld [vmem:[%s11093_s5] sm:$0xf]  ;;  %v7380_v63 = vld [vmem:[#allocation3 + $0x140] sm:$0xf]  ;;  %v7348_v4 = vld [vmem:[#allocation3 + $0x108] sm:$0xf] }
 0x33c   : > { %1334 = vst [vmem:[#allocation3 + $0xc0] sm:$0xff] %v1319_v21  ;;  %v7384_v21 = vld [vmem:[#allocation3 + $0x150] sm:$0xf] }
 0x33d   : > { %2028 = vmatpush.bf16.msra.mxu3 %v7277_v22  ;;  %2085 = vmatpush.bf16.msrb.mxu2 %v7281_v23  ;;  %v8431_v22 = vld [vmem:[#allocation3 + $0x4] sm:$0xf]  ;;  %v7385_v27 = vor.u32 %v8474_v12, %v7384_v21  ;;  %v7404_v33 = vld [vmem:[#allocation3 + $0x170] sm:$0xf]  ;;  %v8462_v12 = vld [vmem:[#allocation3 + $0xf8] sm:$0xf0] }
 0x33e   : > { %v9312_v18 = vpop.permute.xlu2 %1564  ;;  %v1501_v20 = vpop.permute.xlu1 %1500  ;;  %v7221_v25 = vor.u32 %v8431_v22, %v7218_v1 }
 0x33f   : > { %1597 = vst.msk [vmem:[#allocation3 + $0x1ac] sm:$0xf] %vm614_vm10, %v9312_v18  ;;  %v1509_v28 = vrot.slane %v1501_v20, 4  ;;  %v1499_v29 = vpop.permute.xlu0 %1498  ;;  %v1573_v21 = vrot.slane %v9312_v18, 4  ;;  %v7324_v18 = vld [vmem:[#allocation3 + $0xd8] sm:$0xf] }
 0x340   : > { %1533 = vst.msk [vmem:[#allocation3 + $0x17c] sm:$0xf] %vm614_vm10, %v1501_v20  ;;  %v1508_v35 = vrot.slane %v1499_v29, 4 }
 0x341   : > { %2029 = vmatpush.bf16.msra.mxu3 %v7265_v30  ;;  %2086 = vmatpush.bf16.msrb.mxu2 %v7269_v31 }
 0x342   : > { %v1516_v39 = vsel %vm626_vm11, %v1508_v35, %v1509_v28  ;;  %v8476_v28 = vld [vmem:[#allocation3 + $0x16c] sm:$0xf] }
 0x343   : > { %v1517_v41 = vsel %vm11132_vm5, %v1499_v29, %v1516_v39  ;;  %v1312_v29 = vrot.slane %v9290_v60, 4  ;;  %vm11136_vm5 = vmmov %vm11131_vm12 }
 0x344   : > { %1532 = vst [vmem:[#allocation3 + $0x174] sm:$0xff] %v1517_v41  ;;  %v8473_v41 = vld [vmem:[#allocation3 + $0x154] sm:$0xf] }
 0x345   : > { %2030 = vmatpush.bf16.msra.mxu3 %v7253_v42  ;;  %2087 = vmatpush.bf16.msrb.mxu2 %v7257_v43  ;;  %v8475_v42 = vld [vmem:[#allocation3 + $0x160] sm:$0xf0] }
 0x346   : > { %v1553_v34 = vpop.permute.xlu2 %1552  ;;  %v1551_v48 = vpop.permute.xlu1 %1550  ;;  %v7393_v51 = vor.u32 %v8475_v42, %v7392_v50  ;;  %v8425_v50 = vld [vmem:[%s11093_s5 + $0x4] sm:$0xf] }
 0x347   : > { %v1567_v54 = vrot.slane %v1553_v34, 4  ;;  %1591 = vst.msk [vmem:[#allocation3 + $0x188] sm:$0xf] %vm614_vm10, %v1553_v34  ;;  %v1566_v55 = vrot.slane %v1551_v48, 4  ;;  %v1437_v56 = vpop.permute.xlu0 %1436  ;;  %v8478_v23 = vld [vmem:[#allocation3 + $0x178] sm:$0xf0] }
 0x348   : > { %v1445_v62 = vrot.slane %v1437_v56, 4  ;;  %1469 = vst.msk [vmem:[#allocation3 + $0x14c] sm:$0xf] %vm614_vm10, %v1437_v56  ;;  %v7405_v39 = vor.u32 %v8478_v23, %v7404_v33  ;;  %v7336_v23 = vld [vmem:[#allocation3 + $0xf0] sm:$0xf] }
 0x349   : > { %v1574_v0 = vsel %vm626_vm11, %v1566_v55, %v1567_v54  ;;  %2031 = vmatpush.bf16.msra.mxu3 %v7241_v57  ;;  %2088 = vmatpush.bf16.msrb.mxu2 %v7245_v58  ;;  %v7360_v55 = vld [vmem:[#allocation3 + $0x120] sm:$0xf]  ;;  %v8470_v58 = vld [vmem:[#allocation3 + $0x13c] sm:$0xf]  ;;  %v8461_v33 = vld [vmem:[#allocation3 + $0xf4] sm:$0xf] }
 0x34a   : > { %v1575_v2 = vsel %vm11133_vm14, %v1551_v48, %v1574_v0  ;;  %v1452_v3 = vsel %vm626_vm11, %v1444_v61, %v1445_v62  ;;  %v7389_v48 = vor.u32 %v8473_v41, %v7386_v5  ;;  %v7361_v61 = vor.u32 %v8468_v52, %v7360_v55  ;;  %v7344_v41 = vld [vmem:[#allocation3 + $0xf8] sm:$0xf] }
 0x34b   : > { %1590 = vst [vmem:[#allocation3 + $0x180] sm:$0xff] %v1575_v2  ;;  %v1453_v44 = vsel %vm11134_vm0, %v9298_v47, %v1452_v3  ;;  %v8477_v8 = vld [vmem:[#allocation3 + $0x170] sm:$0xf0]  ;;  %v7398_v13 = vld [vmem:[#allocation3 + $0x174] sm:$0xf0]  ;;  %vm11137_vm0 = vmmov %vm11133_vm14 }
 0x34c   : > { %1468 = vst [vmem:[#allocation3 + $0x144] sm:$0xff] %v1453_v44  ;;  %v7397_v11 = vor.u32 %v8477_v8, %v7396_v7  ;;  %v8426_v47 = vld [vmem:[%s11093_s5 + $0x8] sm:$0xf0]  ;;  %v7401_v31 = vor.u32 %v8476_v28, %v7398_v13  ;;  %v7362_v2 = vld [vmem:[#allocation3 + $0x12c] sm:$0xf0] }
 0x34d   : > { %2032 = vmatpush.bf16.msra.mxu3 %v7229_v6  ;;  %2089 = vmatpush.bf16.msrb.mxu2 %v7233_v9  ;;  %v9336_v35 = vor.u32 %v8426_v47, %v7192_v14  ;;  %v8469_v6 = vld [vmem:[#allocation3 + $0x130] sm:$0xf0]  ;;  %v8467_v9 = vld [vmem:[#allocation3 + $0x124] sm:$0xf]  ;;  %v7204_v14 = vld [vmem:[%s11093_s5 + $0x18] sm:$0xf] }
 0x34e   : > { %2045 = vmatpush.bf16.msrb.mxu0 %v7397_v11  ;;  %v1371_v15 = vpop.permute.xlu1 %1370  ;;  %v7365_v10 = vor.u32 %v8467_v9, %v7362_v2  ;;  %v7368_v11 = vld [vmem:[#allocation3 + $0x128] sm:$0xf]  ;;  %v8429_v47 = vld [vmem:[%s11093_s5 + $0x20] sm:$0xf0] }
 0x34f   : > { %v1380_v17 = vrot.slane %v1371_v15, 4  ;;  %v1301_v20 = vpop.permute.xlu0 %1300  ;;  %v8472_v56 = vld [vmem:[#allocation3 + $0x148] sm:$0xf0]  ;;  %v7369_v1 = vor.u32 %v8469_v6, %v7368_v11  ;;  %v7428_v11 = vld [vmem:[#allocation3 + $0x1a0] sm:$0xf] }
 0x350   : > { %v1313_v30 = vrot.slane %v1301_v20, 4  ;;  %1337 = vst.msk [vmem:[#allocation3 + $0xd4] sm:$0xf] %vm614_vm10, %v1301_v20  ;;  %v7381_v0 = vor.u32 %v8472_v56, %v7380_v63 }
 0x351   : > { %v1388_v38 = vsel %vm626_vm11, %v1380_v17, %v1381_v24  ;;  %2033 = vmatpush.bf16.msra.mxu3 %v7217_v19  ;;  %2090 = vmatpush.bf16.msrb.mxu2 %v7221_v25  ;;  %v8466_v19 = vld [vmem:[#allocation3 + $0x118] sm:$0xf0]  ;;  %v8464_v24 = vld [vmem:[#allocation3 + $0x10c] sm:$0xf]  ;;  %v7337_v17 = vor.u32 %v8462_v12, %v7336_v23  ;;  %v9355_v25 = vor.u32 %v8429_v47, %v7204_v14  ;;  %v7416_v14 = vld [vmem:[#allocation3 + $0x188] sm:$0xf] }
 0x352   : > { %v1389_v49 = vsel %vm11135_vm6, %v1371_v15, %v1388_v38  ;;  %v1320_v40 = vsel %vm626_vm11, %v1312_v29, %v1313_v30  ;;  %2046 = vmatpush.bf16.msrb.mxu0 %v7385_v27  ;;  %v7356_v27 = vld [vmem:[#allocation3 + $0x110] sm:$0xf]  ;;  %v7338_v30 = vld [vmem:[#allocation3 + $0xfc] sm:$0xf0]  ;;  %v8463_v38 = vld [vmem:[#allocation3 + $0x100] sm:$0xf0] }
 0x353   : > { %1404 = vst [vmem:[#allocation3 + $0x114] sm:$0xff] %v1389_v49  ;;  %v1321_v43 = vsel %vm11131_vm12, %v9290_v60, %v1320_v40  ;;  %v8471_v46 = vld [vmem:[#allocation3 + $0x140] sm:$0xf0]  ;;  %v7374_v53 = vld [vmem:[#allocation3 + $0x144] sm:$0xf0]  ;;  %v7357_v29 = vor.u32 %v8466_v19, %v7356_v27  ;;  %v7341_v40 = vor.u32 %v8461_v33, %v7338_v30  ;;  %v7345_v42 = vor.u32 %v8463_v38, %v7344_v41 }
 0x354   : > { %1336 = vst [vmem:[#allocation3 + $0xcc] sm:$0xff] %v1321_v43  ;;  %2034 = vmatmul.bf16.vlgmr.msra.gmra.mxu3 %v9336_v35  ;;  %2091 = vmatmul.bf16.vlgmr.msrb.gmra.mxu2 %v9336_v35  ;;  %v7373_v34 = vor.u32 %v8471_v46, %v7372_v45  ;;  %v7377_v62 = vor.u32 %v8470_v58, %v7374_v53  ;;  %v8458_v45 = vld [vmem:[#allocation3 + $0xdc] sm:$0xf]  ;;  %v7408_v19 = vld [vmem:[#allocation3 + $0x180] sm:$0xf]  ;;  %vm11138_vm6 = vcmask 1039360  }
 0x355   : > { %2102 = vmatpush.bf16.msrb.mxu3 %v7401_v31  ;;  %2159 = vmatpush.bf16.msra.mxu2 %v7405_v39  ;;  %v8454_v47 = vld [vmem:[#allocation3 + $0xb8] sm:$0xf0]  ;;  %v8428_v33 = vld [vmem:[%s11093_s5 + $0x1c] sm:$0xf]  ;;  %v7206_v38 = vld [vmem:[%s11093_s5 + $0x24] sm:$0xf0] }
 0x356   : > { %2047 = vmatpush.bf16.msrb.mxu0 %v7373_v34  ;;  %v1309_v54 = vpop.permute.xlu1 %1308  ;;  %vm11139_vm12 = vcmask 752640  }
 0x357   : > { %v1317_v60 = vrot.slane %v1309_v54, 4  ;;  %1341 = vst.msk [vmem:[#allocation3 + $0xec] sm:$0xf] %vm614_vm10, %v1309_v54  ;;  %v1307_v57 = vpop.permute.xlu0 %1306  ;;  %v7312_v54 = vld [vmem:[#allocation3 + $0xc0] sm:$0xf] }
 0x358   : > { %v1316_v59 = vrot.slane %v1307_v57, 4 }
 0x359   : > { %2103 = vmatpush.bf16.msrb.mxu3 %v7389_v48  ;;  %2160 = vmatpush.bf16.msra.mxu2 %v7393_v51  ;;  %v7194_v51 = vld [vmem:[%s11093_s5 + $0xc] sm:$0xf0] }
 0x35a   : > { %v1324_v3 = vsel %vm626_vm11, %v1316_v59, %v1317_v60  ;;  %2048 = vmatpush.bf16.msrb.mxu0 %v7361_v61  ;;  %v8465_v44 = vld [vmem:[#allocation3 + $0x110] sm:$0xf0]  ;;  %v7350_v13 = vld [vmem:[#allocation3 + $0x114] sm:$0xf0]  ;;  %v7332_v60 = vld [vmem:[#allocation3 + $0xe0] sm:$0xf]  ;;  %v7197_v61 = vor.u32 %v8425_v50, %v7194_v51 }
 0x35b   : > { %v1325_v7 = vsel %vm11136_vm5, %v1307_v57, %v1324_v3  ;;  %v7349_v8 = vor.u32 %v8465_v44, %v7348_v4  ;;  %v7353_v20 = vor.u32 %v8464_v24, %v7350_v13  ;;  %v8456_v43 = vld [vmem:[#allocation3 + $0xc8] sm:$0xf0]  ;;  %v7420_v57 = vld [vmem:[#allocation3 + $0x198] sm:$0xf]  ;;  %v7314_v63 = vld [vmem:[#allocation3 + $0xcc] sm:$0xf0] }
 0x35c   : > { %1340 = vst [vmem:[#allocation3 + $0xe4] sm:$0xff] %v1325_v7  ;;  %v7313_v55 = vor.u32 %v8456_v43, %v7312_v54  ;;  %v8457_v44 = vld [vmem:[#allocation3 + $0xd0] sm:$0xf0]  ;;  %v8479_v24 = vld [vmem:[#allocation3 + $0x184] sm:$0xf]  ;;  %vm11140_vm5 = vmmov %vm11139_vm12 }
 0x35d   : > { %2104 = vmatpush.bf16.msrb.mxu3 %v7377_v62  ;;  %2161 = vmatpush.bf16.msra.mxu2 %v7381_v0  ;;  %v8482_v62 = vld [vmem:[#allocation3 + $0x19c] sm:$0xf]  ;;  %v8484_v0 = vld [vmem:[#allocation3 + $0x1a8] sm:$0xf0]  ;;  %v7272_v43 = vld [vmem:[#allocation3 + $0x68] sm:$0xf] }
 0x35e   : > { %2049 = vmatpush.bf16.msrb.mxu0 %v7349_v8  ;;  %v1563_v15 = vpop.permute.xlu1 %1562  ;;  %v8460_v48 = vld [vmem:[#allocation3 + $0xe8] sm:$0xf0]  ;;  %v8455_v8 = vld [vmem:[#allocation3 + $0xc4] sm:$0xf]  ;;  %v7260_v50 = vld [vmem:[#allocation3 + $0x50] sm:$0xf] }
 0x35f   : > { %v1572_v22 = vrot.slane %v1563_v15, 4  ;;  %v1555_v5 = vpop.permute.xlu0 %1554  ;;  %v7333_v59 = vor.u32 %v8460_v48, %v7332_v60  ;;  %v7317_v9 = vor.u32 %v8455_v8, %v7314_v63  ;;  %v8430_v48 = vld [vmem:[%s11093_s5 + $0x28] sm:$0xf0]  ;;  %v7248_v54 = vld [vmem:[#allocation3 + $0x38] sm:$0xf] }
 0x360   : > { %v1568_v52 = vrot.slane %v1555_v5, 4  ;;  %v8436_v60 = vld [vmem:[#allocation3 + $0x28] sm:$0xf0] }
 0x361   : > { %2105 = vmatpush.bf16.msrb.mxu3 %v7365_v10  ;;  %2162 = vmatpush.bf16.msra.mxu2 %v7369_v1  ;;  %v1580_v28 = vsel %vm626_vm11, %v1572_v22, %v1573_v21  ;;  %v7320_v10 = vld [vmem:[#allocation3 + $0xc8] sm:$0xf]  ;;  %v7429_v1 = vor.u32 %v8484_v0, %v7428_v11  ;;  %v7200_v21 = vld [vmem:[%s11093_s5 + $0x8] sm:$0xf]  ;;  %v8427_v22 = vld [vmem:[%s11093_s5 + $0x10] sm:$0xf0] }
 0x362   : > { %v1581_v31 = vsel %vm11133_vm14, %v1563_v15, %v1580_v28  ;;  %2050 = vmatpush.bf16.msrb.mxu0 %v7337_v17  ;;  %v7321_v12 = vor.u32 %v8457_v44, %v7320_v10  ;;  %v7308_v28 = vld [vmem:[#allocation3 + $0xb0] sm:$0xf]  ;;  %v7201_v30 = vor.u32 %v8427_v22, %v7200_v21  ;;  %vm11141_vm14 = vmmov %vm11140_vm5 }
 0x363   : > { %1596 = vst [vmem:[#allocation3 + $0x1a4] sm:$0xff] %v1581_v31  ;;  %v8459_v39 = vld [vmem:[#allocation3 + $0xe0] sm:$0xf0]  ;;  %v7326_v46 = vld [vmem:[#allocation3 + $0xe4] sm:$0xf0] }
 0x364   : > { %2039 = vmatmul.bf16.gmra.mxu3 %v9355_v25  ;;  %2096 = vmatmul.bf16.gmra.mxu2 %v9355_v25  ;;  %v7325_v49 = vor.u32 %v8459_v39, %v7324_v18  ;;  %v7329_v56 = vor.u32 %v8458_v45, %v7326_v46  ;;  %v8451_v31 = vld [vmem:[#allocation3 + $0xa0] sm:$0xf0]  ;;  %v7296_v18 = vld [vmem:[#allocation3 + $0x98] sm:$0xf]  ;;  %v8442_v46 = vld [vmem:[#allocation3 + $0x58] sm:$0xf0] }
 0x365   : > { %2106 = vmatpush.bf16.msrb.mxu3 %v7353_v20  ;;  %2163 = vmatpush.bf16.msra.mxu2 %v7357_v29  ;;  %v7309_v29 = vor.u32 %v8454_v47, %v7308_v28  ;;  %v7297_v39 = vor.u32 %v8451_v31, %v7296_v18  ;;  %v7261_v51 = vor.u32 %v8442_v46, %v7260_v50 }
 0x366   : > { %2051 = vmatpush.bf16.msrb.mxu0 %v7325_v49  ;;  %v1557_v34 = vpop.permute.xlu1 %1556  ;;  %v8448_v49 = vld [vmem:[#allocation3 + $0x88] sm:$0xf0] }
 0x367   : > { %v1569_v53 = vrot.slane %v1557_v34, 4  ;;  %1593 = vst.msk [vmem:[#allocation3 + $0x194] sm:$0xf] %vm614_vm10, %v1557_v34  ;;  %v7212_v34 = vld [vmem:[%s11093_s5 + $0x20] sm:$0xf] }
 0x369   : > { %2107 = vmatpush.bf16.msrb.mxu3 %v7341_v40  ;;  %2164 = vmatpush.bf16.msra.mxu2 %v7345_v42  ;;  %v1576_v58 = vsel %vm626_vm11, %v1568_v52, %v1569_v53  ;;  %v7284_v40 = vld [vmem:[#allocation3 + $0x80] sm:$0xf]  ;;  %v8445_v42 = vld [vmem:[#allocation3 + $0x70] sm:$0xf0]  ;;  %v7213_v52 = vor.u32 %v8430_v48, %v7212_v34  ;;  %v8439_v53 = vld [vmem:[#allocation3 + $0x40] sm:$0xf0] }
 0x36a   : > { %v1577_v2 = vsel %vm11137_vm0, %v1555_v5, %v1576_v58  ;;  %2052 = vmatpush.bf16.msrb.mxu0 %v7313_v55  ;;  %v8483_v3 = vld [vmem:[#allocation3 + $0x1a0] sm:$0xf0]  ;;  %v7422_v4 = vld [vmem:[#allocation3 + $0x1a4] sm:$0xf0]  ;;  %v7209_v5 = vor.u32 %v8428_v33, %v7206_v38  ;;  %v7285_v41 = vor.u32 %v8448_v49, %v7284_v40  ;;  %v7273_v45 = vor.u32 %v8445_v42, %v7272_v43  ;;  %v8433_v58 = vld [vmem:[#allocation3 + $0x10] sm:$0xf0] }
 0x36b   : > { %1592 = vst [vmem:[#allocation3 + $0x18c] sm:$0xff] %v1577_v2  ;;  %v7421_v6 = vor.u32 %v8483_v3, %v7420_v57  ;;  %v7425_v7 = vor.u32 %v8482_v62, %v7422_v4  ;;  %v7249_v55 = vor.u32 %v8439_v53, %v7248_v54  ;;  %vm11142_vm0 = vcmask 744448  }
 0x36d   : > { %2108 = vmatpush.bf16.msrb.mxu3 %v7329_v56  ;;  %2165 = vmatpush.bf16.msra.mxu2 %v7333_v59  ;;  %v7236_v56 = vld [vmem:[#allocation3 + $0x20] sm:$0xf]  ;;  %v7224_v59 = vld [vmem:[#allocation3 + $0x8] sm:$0xf] }
 0x36e   : > { %2053 = vmatmul.bf16.vlgmr.msrb.gmra.mxu0 %v7197_v61  ;;  %2070 = vmatpush.bf16.msrb.mxu1 %v7421_v6  ;;  %v8481_v13 = vld [vmem:[#allocation3 + $0x190] sm:$0xf0]  ;;  %v7237_v57 = vor.u32 %v8436_v60, %v7236_v56 }
 0x36f   : > { %2127 = vmatpush.bf16.msra.mxu0 %v7425_v7  ;;  %v7417_v15 = vor.u32 %v8481_v13, %v7416_v14 }
 0x371   : > { %2109 = vmatpush.bf16.msrb.mxu3 %v7317_v9  ;;  %2166 = vmatpush.bf16.msra.mxu2 %v7321_v12  ;;  %v9396_v12 = vpop.permute.xlu2 %1694 }
 0x372   : > { %v8480_v23 = vld [vmem:[#allocation3 + $0x188] sm:$0xf0]  ;;  %v7410_v17 = vld [vmem:[#allocation3 + $0x18c] sm:$0xf0] }
 0x373   : > { %v7409_v20 = vor.u32 %v8480_v23, %v7408_v19  ;;  %v7413_v27 = vor.u32 %v8479_v24, %v7410_v17 }
 0x374   : > { %2110 = vmatmul.bf16.vlgmr.msrb.gmra.mxu3 %v7197_v61  ;;  %2167 = vmatmul.bf16.vlgmr.msra.gmra.mxu2 %v7197_v61  ;;  %v7225_v61 = vor.u32 %v8433_v58, %v7224_v59 }
 0x375   : > { %2184 = vmatpush.bf16.msra.mxu3 %v7429_v1  ;;  %2071 = vmatpush.bf16.msrb.mxu1 %v7409_v20  ;;  %v1685_v1 = vpop.permute.xlu1 %1684 }
 0x376   : > { %2128 = vmatpush.bf16.msra.mxu0 %v7413_v27 }
 0x378   : > { %7430 = vmatmul.msk.bf16.vlgmr.msrb.gmra.mxu1 %vm1047_vm2, %v7201_v30 }
 0x379   : > { %2185 = vmatpush.bf16.msra.mxu3 %v7417_v15  ;;  %2140 = vmatpush.bf16.msra.mxu1 %v7309_v29  ;;  %v1690_v24 = vpop.permute.xlu2 %1689 }
 0x37d   : > { %2141 = vmatpush.bf16.msra.mxu1 %v7297_v39 }
 0x37e   : > { %2058 = vmatmul.bf16.gmra.mxu0 %v7209_v5 }
 0x381   : > { %2142 = vmatpush.bf16.msra.mxu1 %v7285_v41 }
 0x384   : > { %2115 = vmatmul.bf16.gmra.mxu3 %v7209_v5  ;;  %2172 = vmatmul.bf16.gmra.mxu2 %v7209_v5 }
 0x385   : > { %2143 = vmatpush.bf16.msra.mxu1 %v7273_v45 }
 0x388   : > { %7431 = vmatmul.msk.bf16.gmra.mxu1 %vm1047_vm2, %v7213_v52 }
 0x389   : > { %2144 = vmatpush.bf16.msra.mxu1 %v7261_v51 }
 0x38d   : > { %2145 = vmatpush.bf16.msra.mxu1 %v7249_v55 }
 0x38e   : > { %7432 = vmatmul.msk.bf16.vlgmr.msra.gmra.mxu0 %vm1047_vm2, %v7201_v30 }
 0x391   : > { %2146 = vmatpush.bf16.msra.mxu1 %v7237_v57 }
 0x394   : > { %7434 = vmatmul.msk.bf16.vlgmr.msra.gmra.mxu3 %vm1047_vm2, %v7201_v30 }
 0x395   : > { %2147 = vmatpush.bf16.msra.mxu1 %v7225_v61  ;;  %v1700_v61 = vpop.permute.xlu0 %1699 }
 0x398   : > { %2148 = vmatmul.bf16.vlgmr.msra.gmra.mxu1 %v9336_v35 }
 0x39e   : > { %7433 = vmatmul.msk.bf16.gmra.mxu0 %vm1047_vm2, %v7213_v52 }
 0x3a4   : > { %7435 = vmatmul.msk.bf16.gmra.mxu3 %vm1047_vm2, %v7213_v52 }
 0x3a8   : > { %2153 = vmatmul.bf16.gmra.mxu1 %v9355_v25 }
 0x3d7   : > { %v2035_v62 = vpop.f32.mrf.mxu3  ;;  %v2092_v2 = vpop.f32.mrf.mxu2 }
 0x3d8   : > { %v2036_v14 = vadd.f32 %v2035_v62, %v1685_v1  ;;  %v2093_v15 = vadd.f32 %v2092_v2, %v1685_v1 }
 0x3df   : > { %v2037_v63 = vpop.f32.mrf.mxu3  ;;  %v2094_v6 = vpop.f32.mrf.mxu2 }
 0x3e0   : > { %v2038_v20 = vadd.f32 %v2037_v63, %v1690_v24  ;;  %v2095_v33 = vadd.f32 %v2094_v6, %v1690_v24 }
 0x3e7   : > { %v2040_v0 = vpop.f32.mrf.mxu3  ;;  %v2097_v10 = vpop.f32.mrf.mxu2 }
 0x3e8   : > { %v2041_v43 = vadd.f32 %v2040_v0, %v9396_v12  ;;  %v2098_v52 = vadd.f32 %v2097_v10, %v9396_v12 }
 0x3eb   : > { %v2054_v3 = vpop.f32.mrf.mxu0 }
 0x3ec   : > { %v2055_v25 = vadd.f32 %v2054_v3, %v2036_v14 }
 0x3ef   : > { %v2042_v4 = vpop.f32.mrf.mxu3  ;;  %v2099_v19 = vpop.f32.mrf.mxu2 }
 0x3f0   : > { %v2043_v63 = vadd.f32 %v2042_v4, %v1700_v61 }
 0x3f3   : > { %v2056_v44 = vpop.f32.mrf.mxu0 }
 0x3f4   : > { %v2057_v29 = vadd.f32 %v2056_v44, %v2038_v20 }
 0x3f5   : > { %v2073_v7 = vpop.f32.mrf.mxu1 }
 0x3f6   : > { %v2074_v21 = vadd.f32 %v2073_v7, %v2055_v25 }
 0x3f7   : > { %v2111_v8 = vpop.f32.mrf.mxu3  ;;  %v2168_v49 = vpop.f32.mrf.mxu2 }
 0x3f8   : > { %v2112_v23 = vadd.f32 %v2111_v8, %v2093_v15  ;;  %v2197_v27 = vmax.f32 %v2074_v21, 0.0 }
 0x3fa   : > { %v2209_v38 = vsel %vm9033_vm13, %v2197_v27, 0.0 }
 0x3fb   : > { %v2059_v9 = vpop.f32.mrf.mxu0 }
 0x3fc   : > { %v2060_v34 = vadd.f32 %v2059_v9, %v2041_v43  ;;  %v2100_v9 = vadd.f32 %v2099_v19, %v1700_v61 }
 0x3fd   : > { %v2075_v11 = vpop.f32.mrf.mxu1 }
 0x3fe   : > { %v2076_v18 = vadd.f32 %v2075_v11, %v2057_v29 }
 0x3ff   : > { %v2113_v35 = vpop.f32.mrf.mxu3  ;;  %v2170_v59 = vpop.f32.mrf.mxu2 }
 0x400   : > { %v2114_v41 = vadd.f32 %v2113_v35, %v2095_v33  ;;  %v2200_v45 = vmax.f32 %v2076_v18, 0.0 }
 0x402   : > { %v2212_v53 = vsel %vm9033_vm13, %v2200_v45, 0.0 }
 0x403   : > { %v2061_v13 = vpop.f32.mrf.mxu0 }
 0x404   : > { %v2062_v3 = vadd.f32 %v2061_v13, %v2043_v63 }
 0x405   : > { %v2078_v47 = vpop.f32.mrf.mxu1 }
 0x406   : > { %v2079_v54 = vadd.f32 %v2078_v47, %v2060_v34 }
 0x407   : > { %v2116_v22 = vpop.f32.mrf.mxu3 }
 0x408   : > { %v2117_v57 = vadd.f32 %v2116_v22, %v2098_v52  ;;  %v2203_v0 = vmax.f32 %v2079_v54, 0.0  ;;  %v2173_v22 = vpop.f32.mrf.mxu2 }
 0x40a   : > { %v2215_v10 = vsel %vm9033_vm13, %v2203_v0, 0.0 }
 0x40b   : > { %v2130_v17 = vpop.f32.mrf.mxu0 }
 0x40c   : > { %v2131_v28 = vadd.f32 %v2130_v17, %v2112_v23 }
 0x40d   : > { %v2080_v31 = vpop.f32.mrf.mxu1 }
 0x40e   : > { %v2198_v30 = vmax.f32 %v2131_v28, 0.0  ;;  %v2081_v11 = vadd.f32 %v2080_v31, %v2062_v3 }
 0x40f   : > { %v2118_v5 = vpop.f32.mrf.mxu3 }
 0x410   : > { %v2210_v39 = vsel %vm9037_vm15, %v2198_v30, 0.0  ;;  %v2119_v25 = vadd.f32 %v2118_v5, %v2100_v9  ;;  %v2206_v13 = vmax.f32 %v2081_v11, 0.0 }
 0x411   : > { %v2221_v40 = vpack.c.bf16 %v2210_v39, %v2209_v38 }
 0x412   : > { %v2218_v27 = vsel %vm9033_vm13, %v2206_v13, 0.0 }
 0x413   : > { %v2132_v42 = vpop.f32.mrf.mxu0  ;;  %2237 = vrot.lane.b32.xlu1 %v2221_v40, %s8800_s18 }
 0x414   : > { %v2133_v46 = vadd.f32 %v2132_v42, %v2114_v41 }
 0x415   : > { %v2149_v50 = vpop.f32.mrf.mxu1 }
 0x416   : > { %v2201_v48 = vmax.f32 %v2133_v46, 0.0  ;;  %v2150_v51 = vadd.f32 %v2149_v50, %v1685_v1 }
 0x417   : > { %v2187_v56 = vpop.f32.mrf.mxu3 }
 0x418   : > { %v2213_v55 = vsel %vm9037_vm15, %v2201_v48, 0.0  ;;  %v2169_v58 = vadd.f32 %v2168_v49, %v2150_v51  ;;  %v2175_v49 = vpop.f32.mrf.mxu2 }
 0x419   : > { %v2223_v60 = vpack.c.bf16 %v2213_v55, %v2212_v53 }
 0x41a   : > { %v2188_v6 = vadd.f32 %v2187_v56, %v2169_v58 }
 0x41b   : > { %v2135_v62 = vpop.f32.mrf.mxu0  ;;  %2241 = vrot.lane.b32.xlu2 %v2223_v60, %s8800_s18 }
 0x41c   : > { %v2136_v2 = vadd.f32 %v2135_v62, %v2117_v57  ;;  %v2199_v47 = vmax.f32 %v2188_v6, 0.0 }
 0x41d   : > { %v2151_v7 = vpop.f32.mrf.mxu1 }
 0x41e   : > { %v2204_v44 = vmax.f32 %v2136_v2, 0.0  ;;  %v2152_v8 = vadd.f32 %v2151_v7, %v1690_v24  ;;  %v2211_v19 = vsel %vm9029_vm1, %v2199_v47, 0.0 }
 0x41f   : > { %v2189_v1 = vpop.f32.mrf.mxu3  ;;  %v2222_v30 = vpack.c.bf16 %v2211_v19, %v2211_v19 }
 0x420   : > { %v2216_v35 = vsel %vm9037_vm15, %v2204_v44, 0.0  ;;  %v2171_v4 = vadd.f32 %v2170_v59, %v2152_v8 }
 0x421   : > { %v2225_v14 = vpack.c.bf16 %v2216_v35, %v2215_v10 }
 0x422   : > { %v2190_v24 = vadd.f32 %v2189_v1, %v2171_v4 }
 0x423   : > { %v2137_v15 = vpop.f32.mrf.mxu0  ;;  %2245 = vrot.lane.b32.xlu0 %v2225_v14, %s8800_s18 }
 0x424   : > { %v2138_v21 = vadd.f32 %v2137_v15, %v2119_v25  ;;  %v2202_v38 = vmax.f32 %v2190_v24, 0.0 }
 0x425   : > { %v2154_v17 = vpop.f32.mrf.mxu1 }
 0x426   : > { %v2207_v23 = vmax.f32 %v2138_v21, 0.0  ;;  %v2155_v20 = vadd.f32 %v2154_v17, %v9396_v12  ;;  %v2214_v12 = vsel %vm9029_vm1, %v2202_v38, 0.0 }
 0x427   : > { %v2192_v29 = vpop.f32.mrf.mxu3  ;;  %v2224_v46 = vpack.c.bf16 %v2214_v12, %v2214_v12 }
 0x428   : > { %v2219_v28 = vsel %vm9037_vm15, %v2207_v23, 0.0  ;;  %v2174_v31 = vadd.f32 %v2173_v22, %v2155_v20 }
 0x429   : > { %v2227_v33 = vpack.c.bf16 %v2219_v28, %v2218_v27 }
 0x42a   : > { %v2193_v18 = vadd.f32 %v2192_v29, %v2174_v31 }
 0x42b   : > { %2239 = vrot.lane.b32.xlu0 %v2222_v30, %s8800_s18  ;;  %2249 = vrot.lane.b32.xlu1 %v2227_v33, %s8800_s18 }
 0x42c   : > { %v2205_v39 = vmax.f32 %v2193_v18, 0.0 }
 0x42d   : > { %v2156_v5 = vpop.f32.mrf.mxu1 }
 0x42e   : > { %v2217_v40 = vsel %vm9029_vm1, %v2205_v39, 0.0  ;;  %v2157_v41 = vadd.f32 %v2156_v5, %v1700_v61 }
 0x42f   : > { %v2226_v42 = vpack.c.bf16 %v2217_v40, %v2217_v40  ;;  %v2194_v43 = vpop.f32.mrf.mxu3 }
 0x430   : > { %v2176_v45 = vadd.f32 %v2175_v49, %v2157_v41 }
 0x431   : > { %2247 = vrot.lane.b32.xlu2 %v2226_v42, %s8800_s18 }
 0x432   : > { %v2195_v34 = vadd.f32 %v2194_v43, %v2176_v45 }
 0x433   : > { %2243 = vrot.lane.b32.xlu1 %v2224_v46, %s8800_s18 }
 0x434   : > { %v2208_v48 = vmax.f32 %v2195_v34, 0.0 }
 0x436   : > { %v2220_v50 = vsel %vm9029_vm1, %v2208_v48, 0.0 }
 0x437   : > { %v2228_v51 = vpack.c.bf16 %v2220_v50, %v2220_v50 }
 0x439   : > { %2251 = vrot.lane.b32.xlu0 %v2228_v51, %s8800_s18 }
 0x475   : > { %v2242_v52 = vpop.permute.xlu2 %2241 }
 0x476   : > { %v2254_v53 = vrot.slane %v2242_v52, 4 }
 0x478   : > { %v2259_v54 = vsel %vm600_vm7, %v2254_v53, %v2242_v52 }
 0x479   : > { %2275 = vst.msk [vmem:[#allocation2 + $0xc] sm:$0xff] %vm8922_vm8, %v2259_v54 }
 0x480   : > { %v9436_v55 = vld [vmem:[#allocation2 + $0xc] sm:$0xff] }
 0x481   : > { %2291 = vst [vmem:[#allocation3 + $0xc] sm:$0xff] %v9436_v55 }
 0x485   : > { %v2238_v56 = vpop.permute.xlu1 %2237 }
 0x486   : > { %v2253_v60 = vrot.slane %v2238_v56, 4 }
 0x488   : > { %v2257_v57 = vsel %vm600_vm7, %v2253_v60, %v2238_v56 }
 0x489   : > { %2273 = vst.msk [vmem:[#allocation2] sm:$0xff] %vm8922_vm8, %v2257_v57 }
 0x48b   : > { %v2248_v62 = vpop.permute.xlu2 %2247 }
 0x490   : > { %v9442_v58 = vld [vmem:[#allocation2] sm:$0xff] }
 0x491   : > { %2377 = vrot.lane.b32.xlu2 %v9442_v58, %s8805_s10  ;;  %2441 = vrot.lane.b32.xlu0 %v9442_v58, %s8807_s25  ;;  %2289 = vst [vmem:[#allocation3] sm:$0xff] %v9442_v58 }
 0x492   : > { %2313 = vrot.lane.b32.xlu1 %v9442_v58, %s8808_s26 }
 0x495   : > { %v2246_v59 = vpop.permute.xlu0 %2245 }
 0x496   : > { %v2255_v61 = vrot.slane %v2246_v59, 4 }
 0x498   : > { %v2261_v63 = vsel %vm600_vm7, %v2255_v61, %v2246_v59  ;;  %v2262_v0 = vsel %vm600_vm7, %v2255_v61, %v2248_v62 }
 0x499   : > { %2277 = vst.msk [vmem:[#allocation2 + $0x18] sm:$0xff] %vm8922_vm8, %v2261_v63  ;;  %2633 = vrot.lane.b32.xlu2 %v9442_v58, %s8803_s22  ;;  %2697 = vrot.lane.b32.xlu0 %v9442_v58, %s8802_s21 }
 0x49a   : > { %2278 = vst.msk [vmem:[#allocation2 + $0x20] sm:$0xf] %vm609_vm9, %v2262_v0  ;;  %2381 = vrot.lane.b32.xlu1 %v9436_v55, %s8805_s10 }
 0x49d   : > { %v2250_v2 = vpop.permute.xlu1 %2249  ;;  %v2240_v3 = vpop.permute.xlu0 %2239 }
 0x49e   : > { %v2256_v44 = vrot.slane %v2250_v2, 4  ;;  %v2258_v6 = vsel %vm600_vm7, %v2253_v60, %v2240_v3 }
 0x49f   : > { %2274 = vst.msk [vmem:[#allocation2 + $0x8] sm:$0xf] %vm609_vm9, %v2258_v6 }
 0x4a0   : > { %v2263_v7 = vsel %vm600_vm7, %v2256_v44, %v2250_v2  ;;  %v9471_v8 = vld [vmem:[#allocation2 + $0x18] sm:$0xff] }
 0x4a1   : > { %2279 = vst.msk [vmem:[#allocation2 + $0x24] sm:$0xff] %vm8922_vm8, %v2263_v7  ;;  %2445 = vrot.lane.b32.xlu2 %v9436_v55, %s8807_s25  ;;  %2317 = vrot.lane.b32.xlu0 %v9436_v55, %s8808_s26  ;;  %v2286_v9 = vld [vmem:[#allocation2 + $0x20] sm:$0xf] }
 0x4a2   : > { %2637 = vrot.lane.b32.xlu1 %v9436_v55, %s8803_s22  ;;  %2293 = vst [vmem:[#allocation3 + $0x18] sm:$0xff] %v9471_v8  ;;  %v2430_v28 = vld [vmem:[#allocation2 + $0x20] sm:$0xf] }
 0x4a3   : > { %2294 = vst.msk [vmem:[#allocation3 + $0x20] sm:$0xf] %vm614_vm10, %v2286_v9  ;;  %v2366_v29 = vld [vmem:[#allocation2 + $0x20] sm:$0xf] }
 0x4a4   : > { %v2302_v30 = vld [vmem:[#allocation2 + $0x20] sm:$0xf] }
 0x4a5   : > { %v2244_v10 = vpop.permute.xlu1 %2243  ;;  %v2686_v33 = vld [vmem:[#allocation2 + $0x20] sm:$0xf] }
 0x4a6   : > { %v2260_v11 = vsel %vm600_vm7, %v2254_v53, %v2244_v10  ;;  %v2282_v1 = vld [vmem:[#allocation2 + $0x8] sm:$0xf]  ;;  %v2622_v38 = vld [vmem:[#allocation2 + $0x20] sm:$0xf] }
 0x4a7   : > { %2276 = vst.msk [vmem:[#allocation2 + $0x14] sm:$0xf] %vm609_vm9, %v2260_v11  ;;  %v2362_v15 = vld [vmem:[#allocation2 + $0x8] sm:$0xf]  ;;  %v2558_v18 = vld [vmem:[#allocation2 + $0x20] sm:$0xf] }
 0x4a8   : > { %v9479_v35 = vld [vmem:[#allocation2 + $0x24] sm:$0xff]  ;;  %2290 = vst.msk [vmem:[#allocation3 + $0x8] sm:$0xf] %vm614_vm10, %v2282_v1  ;;  %v2750_v40 = vld [vmem:[#allocation2 + $0x20] sm:$0xf] }
 0x4a9   : > { %2701 = vrot.lane.b32.xlu2 %v9436_v55, %s8802_s21  ;;  %2321 = vrot.lane.b32.xlu0 %v9471_v8, %s8808_s26  ;;  %2295 = vst [vmem:[#allocation3 + $0x24] sm:$0xff] %v9479_v35  ;;  %v2618_v13 = vld [vmem:[#allocation2 + $0x8] sm:$0xf]  ;;  %v2494_v7 = vld [vmem:[#allocation2 + $0x20] sm:$0xf] }
 0x4aa   : > { %2385 = vrot.lane.b32.xlu1 %v9471_v8, %s8805_s10  ;;  %v2298_v21 = vld [vmem:[#allocation2 + $0x8] sm:$0xf] }
 0x4ab   : > { %v2252_v14 = vpop.permute.xlu0 %2251  ;;  %v2426_v22 = vld [vmem:[#allocation2 + $0x8] sm:$0xf] }
 0x4ac   : > { %v2264_v25 = vsel %vm600_vm7, %v2256_v44, %v2252_v14  ;;  %v2682_v24 = vld [vmem:[#allocation2 + $0x8] sm:$0xf] }
 0x4ad   : > { %2280 = vst.msk [vmem:[#allocation2 + $0x2c] sm:$0xf] %vm609_vm9, %v2264_v25  ;;  %v2554_v46 = vld [vmem:[#allocation2 + $0x8] sm:$0xf] }
 0x4ae   : > { %v2284_v47 = vld [vmem:[#allocation2 + $0x14] sm:$0xf]  ;;  %v2746_v34 = vld [vmem:[#allocation2 + $0x8] sm:$0xf] }
 0x4af   : > { %2292 = vst.msk [vmem:[#allocation3 + $0x14] sm:$0xf] %vm614_vm10, %v2284_v47  ;;  %v2428_v19 = vld [vmem:[#allocation2 + $0x14] sm:$0xf] }
 0x4b0   : > { %v2364_v23 = vld [vmem:[#allocation2 + $0x14] sm:$0xf] }
 0x4b1   : > { %2449 = vrot.lane.b32.xlu2 %v9471_v8, %s8807_s25  ;;  %2577 = vrot.lane.b32.xlu0 %v9471_v8, %s8806_s24  ;;  %v2684_v17 = vld [vmem:[#allocation2 + $0x14] sm:$0xf] }
 0x4b2   : > { %2641 = vrot.lane.b32.xlu1 %v9471_v8, %s8803_s22  ;;  %v2620_v20 = vld [vmem:[#allocation2 + $0x14] sm:$0xf] }
 0x4b3   : > { %v2300_v27 = vld [vmem:[#allocation2 + $0x14] sm:$0xf] }
 0x4b4   : > { %v2288_v4 = vld [vmem:[#allocation2 + $0x2c] sm:$0xf]  ;;  %v2556_v52 = vld [vmem:[#allocation2 + $0x14] sm:$0xf] }
 0x4b5   : > { %2296 = vst.msk [vmem:[#allocation3 + $0x2c] sm:$0xf] %vm614_vm10, %v2288_v4  ;;  %v2432_v5 = vld [vmem:[#allocation2 + $0x2c] sm:$0xf]  ;;  %v2748_v57 = vld [vmem:[#allocation2 + $0x14] sm:$0xf] }
 0x4b6   : > { %v2368_v49 = vld [vmem:[#allocation2 + $0x2c] sm:$0xf]  ;;  %v2490_v4 = vld [vmem:[#allocation2 + $0x8] sm:$0xf] }
 0x4b7   : > { %v2304_v41 = vld [vmem:[#allocation2 + $0x2c] sm:$0xf] }
 0x4b8   : > { %v2688_v60 = vld [vmem:[#allocation2 + $0x2c] sm:$0xf] }
 0x4b9   : > { %2705 = vrot.lane.b32.xlu2 %v9471_v8, %s8802_s21  ;;  %2389 = vrot.lane.b32.xlu0 %v9479_v35, %s8805_s10  ;;  %v2624_v59 = vld [vmem:[#allocation2 + $0x2c] sm:$0xf] }
 0x4ba   : > { %2769 = vrot.lane.b32.xlu1 %v9471_v8, %s8801_s20  ;;  %v2560_v0 = vld [vmem:[#allocation2 + $0x2c] sm:$0xf] }
 0x4bb   : > { %v2752_v2 = vld [vmem:[#allocation2 + $0x2c] sm:$0xf] }
 0x4c1   : > { %2325 = vrot.lane.b32.xlu2 %v9479_v35, %s8808_s26  ;;  %2645 = vrot.lane.b32.xlu0 %v9479_v35, %s8803_s22 }
 0x4c2   : > { %2453 = vrot.lane.b32.xlu1 %v9479_v35, %s8807_s25 }
 0x4c9   : > { %2581 = vrot.lane.b32.xlu2 %v9479_v35, %s8806_s24  ;;  %2379 = vrot.lane.b32.xlu0 %v2362_v15, %s8805_s10 }
 0x4ca   : > { %2709 = vrot.lane.b32.xlu1 %v9479_v35, %s8802_s21 }
 0x4d1   : > { %2635 = vrot.lane.b32.xlu0 %v2618_v13, %s8803_s22  ;;  %2315 = vrot.lane.b32.xlu2 %v2298_v21, %s8808_s26 }
 0x4d2   : > { %2443 = vrot.lane.b32.xlu1 %v2426_v22, %s8807_s25 }
 0x4d9   : > { %2447 = vrot.lane.b32.xlu0 %v2428_v19, %s8807_s25  ;;  %2383 = vrot.lane.b32.xlu2 %v2364_v23, %s8805_s10 }
 0x4da   : > { %2699 = vrot.lane.b32.xlu1 %v2682_v24, %s8802_s21  ;;  %v2492_v24 = vld [vmem:[#allocation2 + $0x14] sm:$0xf] }
 0x4e1   : > { %2703 = vrot.lane.b32.xlu0 %v2684_v17, %s8802_s21  ;;  %2639 = vrot.lane.b32.xlu2 %v2620_v20, %s8803_s22 }
 0x4e2   : > { %2319 = vrot.lane.b32.xlu1 %v2300_v27, %s8808_s26 }
 0x4e9   : > { %2451 = vrot.lane.b32.xlu0 %v2430_v28, %s8807_s25  ;;  %2387 = vrot.lane.b32.xlu2 %v2366_v29, %s8805_s10 }
 0x4ea   : > { %2323 = vrot.lane.b32.xlu1 %v2302_v30, %s8808_s26 }
 0x4eb   : > { %v9528_v31 = vpop.permute.xlu2 %2377 }
 0x4ec   : > { %v2393_v27 = vrot.slane %v9528_v31, 4 }
 0x4f1   : > { %2707 = vrot.lane.b32.xlu0 %v2686_v33, %s8802_s21  ;;  %2643 = vrot.lane.b32.xlu2 %v2622_v38, %s8803_s22 }
 0x4f2   : > { %2579 = vrot.lane.b32.xlu1 %v2558_v18, %s8806_s24 }
 0x4f3   : > { %v9533_v39 = vpop.permute.xlu2 %2633 }
 0x4f9   : > { %2773 = vrot.lane.b32.xlu0 %v9479_v35, %s8801_s20  ;;  %2455 = vrot.lane.b32.xlu2 %v2432_v5, %s8807_s25  ;;  %v2889_v5 = vld [vmem:[%s11096_s8] sm:$0xff] }
 0x4fa   : > { %2391 = vrot.lane.b32.xlu1 %v2368_v49, %s8805_s10  ;;  %v2890_v49 = vld [vmem:[%s11096_s8 + $0x8] sm:$0xff] }
 0x4fb   : > { %v9539_v12 = vpop.permute.xlu2 %2445 }
 0x501   : > { %2771 = vrot.lane.b32.xlu2 %v2750_v40, %s8801_s20  ;;  %2327 = vrot.lane.b32.xlu0 %v2304_v41, %s8808_s26 }
 0x502   : > { %2573 = vrot.lane.b32.xlu1 %v9436_v55, %s8806_s24 }
 0x503   : > { %v9545_v42 = vpop.permute.xlu2 %2701  ;;  %v9547_v43 = vpop.permute.xlu0 %2441 }
 0x504   : > { %v2314_v45 = vpop.permute.xlu1 %2313 }
 0x505   : > { %v2329_v11 = vrot.slane %v2314_v45, 4 }
 0x509   : > { %2569 = vrot.lane.b32.xlu2 %v9442_v58, %s8806_s24  ;;  %2571 = vrot.lane.b32.xlu0 %v2554_v46, %s8806_s24 }
 0x50a   : > { %2763 = vrot.lane.b32.xlu1 %v2746_v34, %s8801_s20  ;;  %v2649_v34 = vrot.slane %v9533_v39, 4 }
 0x50b   : > { %v9553_v48 = vpop.permute.xlu2 %2449  ;;  %v9555_v50 = vpop.permute.xlu0 %2697 }
 0x50c   : > { %v2382_v51 = vpop.permute.xlu1 %2381 }
 0x50d   : > { %v2395_v13 = vrot.slane %v2382_v51, 4 }
 0x511   : > { %2575 = vrot.lane.b32.xlu2 %v2556_v52, %s8806_s24  ;;  %2761 = vrot.lane.b32.xlu0 %v9442_v58, %s8801_s20 }
 0x512   : > { %2513 = vrot.lane.b32.xlu1 %v9471_v8, %s8804_s23  ;;  %v2496_v8 = vld [vmem:[#allocation2 + $0x2c] sm:$0xf] }
 0x513   : > { %v9562_v53 = vpop.permute.xlu2 %2705  ;;  %v9564_v54 = vpop.permute.xlu0 %2317 }
 0x514   : > { %v9566_v56 = vpop.permute.xlu1 %2637 }
 0x515   : > { %v2651_v28 = vrot.slane %v9566_v56, 4 }
 0x519   : > { %2711 = vrot.lane.b32.xlu2 %v2688_v60, %s8802_s21  ;;  %2767 = vrot.lane.b32.xlu0 %v2748_v57, %s8801_s20 }
 0x51a   : > { %2647 = vrot.lane.b32.xlu1 %v2624_v59, %s8803_s22 }
 0x51b   : > { %v9571_v61 = vpop.permute.xlu2 %2325  ;;  %v9573_v62 = vpop.permute.xlu0 %2321 }
 0x51c   : > { %v9575_v63 = vpop.permute.xlu1 %2385 }
 0x521   : > { %2765 = vrot.lane.b32.xlu2 %v9436_v55, %s8801_s20  ;;  %2583 = vrot.lane.b32.xlu0 %v2560_v0, %s8806_s24 }
 0x522   : > { %2775 = vrot.lane.b32.xlu1 %v2752_v2, %s8801_s20 }
 0x523   : > { %v9581_v3 = vpop.permute.xlu2 %2581  ;;  %v9583_v44 = vpop.permute.xlu0 %2577 }
 0x524   : > { %v9585_v6 = vpop.permute.xlu1 %2641 }
 0x529   : > { %2515 = vrot.lane.b32.xlu2 %v2494_v7, %s8804_s23  ;;  %2517 = vrot.lane.b32.xlu0 %v9479_v35, %s8804_s23 }
 0x52a   : > { %2519 = vrot.lane.b32.xlu1 %v2496_v8, %s8804_s23 }
 0x52b   : > { %v2316_v9 = vpop.permute.xlu2 %2315  ;;  %v9591_v10 = vpop.permute.xlu0 %2389 }
 0x52c   : > { %v9593_v1 = vpop.permute.xlu1 %2769  ;;  %v2330_v14 = vrot.slane %v2316_v9, 4  ;;  %2354 = vst.msk [vmem:[#allocation3 + $0x38] sm:$0xf] %vm614_vm10, %v2316_v9 }
 0x52e   : > { %v2337_v25 = vsel %vm626_vm11, %v2329_v11, %v2330_v14 }
 0x52f   : > { %v2338_v47 = vsel %vm11138_vm6, %v2314_v45, %v2337_v25  ;;  %v2459_v25 = vrot.slane %v9539_v12, 4  ;;  %vm11143_vm6 = vmmov %vm11142_vm0 }
 0x530   : > { %2353 = vst [vmem:[#allocation3 + $0x30] sm:$0xff] %v2338_v47  ;;  %v2653_v47 = vrot.slane %v9585_v6, 4 }
 0x531   : > { %2505 = vrot.lane.b32.xlu2 %v9442_v58, %s8804_s23  ;;  %2507 = vrot.lane.b32.xlu0 %v2490_v4, %s8804_s23  ;;  %v2891_v58 = vld [vmem:[%s11096_s8 + $0x10] sm:$0xff] }
 0x532   : > { %2509 = vrot.lane.b32.xlu1 %v9436_v55, %s8804_s23  ;;  %v2892_v55 = vld [vmem:[%s11096_s8 + $0x18] sm:$0xff] }
 0x533   : > { %v2384_v35 = vpop.permute.xlu2 %2383  ;;  %v9603_v15 = vpop.permute.xlu0 %2645 }
 0x534   : > { %v9605_v21 = vpop.permute.xlu1 %2453  ;;  %v2396_v22 = vrot.slane %v2384_v35, 4  ;;  %2420 = vst.msk [vmem:[#allocation3 + $0x74] sm:$0xf] %vm614_vm10, %v2384_v35 }
 0x536   : > { %v2403_v19 = vsel %vm626_vm11, %v2395_v13, %v2396_v22  ;;  %v2713_v13 = vrot.slane %v9555_v50, 4 }
 0x537   : > { %v2404_v23 = vsel %vm645_vm4, %v2382_v51, %v2403_v19  ;;  %v2397_v51 = vrot.slane %v9575_v63, 4 }
 0x538   : > { %2419 = vst [vmem:[#allocation3 + $0x6c] sm:$0xff] %v2404_v23 }
 0x539   : > { %2511 = vrot.lane.b32.xlu2 %v2492_v24, %s8804_s23  ;;  %2905 = vperm.xlu0 %8751, %v2891_v58  }
 0x53a   : > { %2910 = vperm.xlu1 %8752, %v2892_v55  }
 0x53b   : > { %v2640_v17 = vpop.permute.xlu2 %2639  ;;  %v2380_v20 = vpop.permute.xlu0 %2379 }
 0x53c   : > { %v9619_v29 = vpop.permute.xlu1 %2709  ;;  %v2652_v30 = vrot.slane %v2640_v17, 4  ;;  %2676 = vst.msk [vmem:[#allocation3 + $0x134] sm:$0xf] %vm614_vm10, %v2640_v17  ;;  %v2394_v33 = vrot.slane %v2380_v20, 4 }
 0x53d   : > { %2418 = vst.msk [vmem:[#allocation3 + $0x68] sm:$0xf] %vm614_vm10, %v2380_v20  ;;  %v2715_v20 = vrot.slane %v9545_v42, 4 }
 0x53e   : > { %v2659_v38 = vsel %vm626_vm11, %v2651_v28, %v2652_v30  ;;  %v2401_v18 = vsel %vm626_vm11, %v2393_v27, %v2394_v33  ;;  %v2463_v27 = vrot.slane %v9605_v21, 4  ;;  %v2331_v33 = vrot.slane %v9564_v54, 4 }
 0x53f   : > { %v2660_v40 = vsel %vm11139_vm12, %v9566_v56, %v2659_v38  ;;  %v2402_v41 = vsel %vm645_vm4, %v9528_v31, %v2401_v18  ;;  %v2457_v56 = vrot.slane %v9547_v43, 4  ;;  %vm11144_vm12 = vcmask 1039360  }
 0x540   : > { %2675 = vst [vmem:[#allocation3 + $0x12c] sm:$0xff] %v2660_v40 }
 0x541   : > { %2417 = vst [vmem:[#allocation3 + $0x60] sm:$0xff] %v2402_v41  ;;  %2895 = vperm.xlu2 %8753, %v2889_v5   ;;  %2900 = vperm.xlu0 %8751, %v2890_v49  }
 0x543   : > { %v2388_v45 = vpop.permute.xlu2 %2387  ;;  %v2636_v46 = vpop.permute.xlu0 %2635 }
 0x544   : > { %v2444_v52 = vpop.permute.xlu1 %2443  ;;  %v2398_v60 = vrot.slane %v2388_v45, 4  ;;  %2422 = vst.msk [vmem:[#allocation3 + $0x80] sm:$0xf] %vm614_vm10, %v2388_v45  ;;  %v2650_v57 = vrot.slane %v2636_v46, 4 }
 0x545   : > { %v2458_v59 = vrot.slane %v2444_v52, 4  ;;  %2482 = vst.msk [vmem:[#allocation3 + $0x98] sm:$0xf] %vm614_vm10, %v2444_v52 }
 0x546   : > { %v2405_v31 = vsel %vm626_vm11, %v2397_v51, %v2398_v60  ;;  %v2657_v0 = vsel %vm626_vm11, %v2649_v34, %v2650_v57  ;;  %2674 = vst.msk [vmem:[#allocation3 + $0x128] sm:$0xf] %vm614_vm10, %v2636_v46  ;;  %v2461_v46 = vrot.slane %v9553_v48, 4  ;;  %v2781_v34 = vrot.slane %v9593_v1, 4 }
 0x547   : > { %v2465_v2 = vsel %vm626_vm11, %v2457_v56, %v2458_v59  ;;  %v2406_v7 = vsel %vm645_vm4, %v9575_v63, %v2405_v31  ;;  %v2658_v8 = vsel %vm11140_vm5, %v9533_v39, %v2657_v0  ;;  %v2333_v60 = vrot.slane %v9573_v62, 4 }
 0x548   : > { %v2466_v9 = vsel %vm662_vm3, %v9547_v43, %v2465_v2  ;;  %2421 = vst [vmem:[#allocation3 + $0x78] sm:$0xff] %v2406_v7  ;;  %vm11145_vm5 = vcmask 736256  }
 0x549   : > { %2481 = vst [vmem:[#allocation3 + $0x90] sm:$0xff] %v2466_v9 }
 0x54a   : > { %2673 = vst [vmem:[#allocation3 + $0x120] sm:$0xff] %v2658_v8  ;;  %v2717_v8 = vrot.slane %v9562_v53, 4 }
 0x54b   : > { %v2644_v11 = vpop.permute.xlu2 %2643  ;;  %v2448_v14 = vpop.permute.xlu0 %2447 }
 0x54c   : > { %v2700_v4 = vpop.permute.xlu1 %2699  ;;  %v2654_v35 = vrot.slane %v2644_v11, 4  ;;  %2678 = vst.msk [vmem:[#allocation3 + $0x140] sm:$0xf] %vm614_vm10, %v2644_v11  ;;  %v2460_v63 = vrot.slane %v2448_v14, 4 }
 0x54d   : > { %v2714_v39 = vrot.slane %v2700_v4, 4  ;;  %2738 = vst.msk [vmem:[#allocation3 + $0x158] sm:$0xf] %vm614_vm10, %v2700_v4 }
 0x54e   : > { %v2661_v43 = vsel %vm626_vm11, %v2653_v47, %v2654_v35  ;;  %v2467_v22 = vsel %vm626_vm11, %v2459_v25, %v2460_v63  ;;  %2484 = vst.msk [vmem:[#allocation3 + $0xa4] sm:$0xf] %vm614_vm10, %v2448_v14 }
 0x54f   : > { %v2721_v19 = vsel %vm626_vm11, %v2713_v13, %v2714_v39  ;;  %v2662_v58 = vsel %vm11141_vm14, %v9585_v6, %v2661_v43  ;;  %v2468_v23 = vsel %vm662_vm3, %v9539_v12, %v2467_v22  ;;  %vm11146_vm14 = vmmov %vm11144_vm12 }
 0x550   : > { %v2722_v55 = vsel %vm11142_vm0, %v9555_v50, %v2721_v19  ;;  %2677 = vst [vmem:[#allocation3 + $0x138] sm:$0xff] %v2662_v58 }
 0x551   : > { %2737 = vst [vmem:[#allocation3 + $0x150] sm:$0xff] %v2722_v55  ;;  %v7534_v55 = vld [vmem:[#allocation3 + $0x90] sm:$0xf] }
 0x552   : > { %2483 = vst [vmem:[#allocation3 + $0x9c] sm:$0xff] %v2468_v23 }
 0x553   : > { %v2456_v24 = vpop.permute.xlu2 %2455  ;;  %v2704_v17 = vpop.permute.xlu0 %2703 }
 0x554   : > { %v2320_v28 = vpop.permute.xlu1 %2319  ;;  %v2464_v30 = vrot.slane %v2456_v24, 4  ;;  %2488 = vst.msk [vmem:[#allocation3 + $0xbc] sm:$0xf] %vm614_vm10, %v2456_v24  ;;  %v2716_v6 = vrot.slane %v2704_v17, 4 }
 0x555   : > { %v2332_v12 = vrot.slane %v2320_v28, 4  ;;  %2356 = vst.msk [vmem:[#allocation3 + $0x44] sm:$0xf] %vm614_vm10, %v2320_v28 }
 0x556   : > { %v2471_v50 = vsel %vm626_vm11, %v2463_v27, %v2464_v30  ;;  %v2723_v38 = vsel %vm626_vm11, %v2715_v20, %v2716_v6  ;;  %2740 = vst.msk [vmem:[#allocation3 + $0x164] sm:$0xf] %vm614_vm10, %v2704_v17  ;;  %v8509_v17 = vld [vmem:[#allocation3 + $0x94] sm:$0xf] }
 0x557   : > { %v2339_v18 = vsel %vm626_vm11, %v2331_v33, %v2332_v12  ;;  %v2472_v5 = vsel %vm662_vm3, %v9605_v21, %v2471_v50  ;;  %v2724_v49 = vsel %vm11143_vm6, %v9545_v42, %v2723_v38  ;;  %vm11147_vm6 = vcmask 883712  }
 0x558   : > { %v2340_v40 = vsel %vm11144_vm12, %v9564_v54, %v2339_v18  ;;  %2487 = vst [vmem:[#allocation3 + $0xb4] sm:$0xff] %v2472_v5  ;;  %v2335_v12 = vrot.slane %v9571_v61, 4  ;;  %v2719_v50 = vrot.slane %v9619_v29, 4  ;;  %vm11148_vm12 = vmmov %vm11142_vm0 }
 0x559   : > { %2355 = vst [vmem:[#allocation3 + $0x3c] sm:$0xff] %v2340_v40  ;;  %v8510_v58 = vld [vmem:[#allocation3 + $0x98] sm:$0xf0]  ;;  %v7536_v23 = vld [vmem:[#allocation3 + $0x9c] sm:$0xf0] }
 0x55a   : > { %2739 = vst [vmem:[#allocation3 + $0x15c] sm:$0xff] %v2724_v49  ;;  %v7535_v20 = vor.u32 %v8510_v58, %v7534_v55  ;;  %v7539_v27 = vor.u32 %v8509_v17, %v7536_v23  ;;  %v7630_v55 = vld [vmem:[#allocation3 + $0x150] sm:$0xf] }
 0x55b   : > { %v2772_v41 = vpop.permute.xlu2 %2771  ;;  %v2452_v45 = vpop.permute.xlu0 %2451 }
 0x55c   : > { %v2324_v51 = vpop.permute.xlu1 %2323  ;;  %v2782_v52 = vrot.slane %v2772_v41, 4  ;;  %2806 = vst.msk [vmem:[#allocation3 + $0x1a0] sm:$0xf] %vm614_vm10, %v2772_v41  ;;  %v2462_v21 = vrot.slane %v2452_v45, 4 }
 0x55d   : > { %v2334_v42 = vrot.slane %v2324_v51, 4  ;;  %2358 = vst.msk [vmem:[#allocation3 + $0x50] sm:$0xf] %vm614_vm10, %v2324_v51  ;;  %v7522_v51 = vld [vmem:[#allocation3 + $0x78] sm:$0xf] }
 0x55e   : > { %v2789_v54 = vsel %vm626_vm11, %v2781_v34, %v2782_v52  ;;  %v2469_v57 = vsel %vm626_vm11, %v2461_v46, %v2462_v21  ;;  %2486 = vst.msk [vmem:[#allocation3 + $0xb0] sm:$0xf] %vm614_vm10, %v2452_v45  ;;  %v8506_v52 = vld [vmem:[#allocation3 + $0x7c] sm:$0xf] }
 0x55f   : > { %v2341_v56 = vsel %vm626_vm11, %v2333_v60, %v2334_v42  ;;  %v2790_v59 = vsel %vm11145_vm5, %v9593_v1, %v2789_v54  ;;  %v2470_v31 = vsel %vm662_vm3, %v9553_v48, %v2469_v57  ;;  %v2589_v1 = vrot.slane %v9583_v44, 4  ;;  %v8513_v4 = vld [vmem:[#allocation3 + $0xb0] sm:$0xf0]  ;;  %v7548_v35 = vld [vmem:[#allocation3 + $0xb4] sm:$0xf0]  ;;  %vm11149_vm5 = vmmov %vm11146_vm14 }
 0x560   : > { %v2342_v0 = vsel %vm11146_vm14, %v9573_v62, %v2341_v56  ;;  %2805 = vst [vmem:[#allocation3 + $0x198] sm:$0xff] %v2790_v59  ;;  %vm11150_vm14 = vmmov %vm11147_vm6  ;;  %v7510_v56 = vld [vmem:[#allocation3 + $0x60] sm:$0xf]  ;;  %v8503_v59 = vld [vmem:[#allocation3 + $0x64] sm:$0xf] }
 0x561   : > { %2357 = vst [vmem:[#allocation3 + $0x48] sm:$0xff] %v2342_v0  ;;  %v8504_v0 = vld [vmem:[#allocation3 + $0x68] sm:$0xf0] }
 0x562   : > { %2485 = vst [vmem:[#allocation3 + $0xa8] sm:$0xff] %v2470_v31 }
 0x563   : > { %v9695_v2 = vpop.permute.xlu2 %2569  ;;  %v2708_v7 = vpop.permute.xlu0 %2707 }
 0x564   : > { %v2580_v9 = vpop.permute.xlu1 %2579  ;;  %v2718_v11 = vrot.slane %v2708_v7, 4  ;;  %2742 = vst.msk [vmem:[#allocation3 + $0x170] sm:$0xf] %vm614_vm10, %v2708_v7 }
 0x565   : > { %v2590_v14 = vrot.slane %v2580_v9, 4  ;;  %2614 = vst.msk [vmem:[#allocation3 + $0x110] sm:$0xf] %vm614_vm10, %v2580_v9  ;;  %v7512_v9 = vld [vmem:[#allocation3 + $0x6c] sm:$0xf0] }
 0x566   : > { %v2725_v48 = vsel %vm626_vm11, %v2717_v8, %v2718_v11  ;;  %v7511_v11 = vor.u32 %v8504_v0, %v7510_v56 }
 0x567   : > { %v2597_v62 = vsel %vm626_vm11, %v2589_v1, %v2590_v14  ;;  %v2726_v25 = vsel %vm11142_vm0, %v9562_v53, %v2725_v48  ;;  %v7515_v1 = vor.u32 %v8503_v59, %v7512_v9  ;;  %vm11151_vm0 = vmmov %vm11147_vm6 }
 0x568   : > { %v2598_v47 = vsel %vm11147_vm6, %v9583_v44, %v2597_v62  ;;  %2741 = vst [vmem:[#allocation3 + $0x168] sm:$0xff] %v2726_v25  ;;  %v2399_v44 = vrot.slane %v9591_v10, 4  ;;  %vm11152_vm6 = vcmask 736256  }
 0x569   : > { %2613 = vst [vmem:[#allocation3 + $0x108] sm:$0xff] %v2598_v47  ;;  %v7546_v63 = vld [vmem:[#allocation3 + $0xa8] sm:$0xf]  ;;  %v8512_v13 = vld [vmem:[#allocation3 + $0xac] sm:$0xf] }
 0x56a   : > { %v7547_v39 = vor.u32 %v8513_v4, %v7546_v63  ;;  %v7551_v43 = vor.u32 %v8512_v13, %v7548_v35  ;;  %v7498_v47 = vld [vmem:[#allocation3 + $0x48] sm:$0xf]  ;;  %v8534_v35 = vld [vmem:[#allocation3 + $0x158] sm:$0xf0]  ;;  %v8500_v13 = vld [vmem:[#allocation3 + $0x4c] sm:$0xf] }
 0x56b   : > { %v2576_v22 = vpop.permute.xlu2 %2575  ;;  %v9707_v19 = vpop.permute.xlu0 %2773 }
 0x56c   : > { %3237 = vmatpush.bf16.msrb.mxu0 %v7547_v39  ;;  %3294 = vmatpush.bf16.msrb.mxu3 %v7551_v43  ;;  %2612 = vst.msk [vmem:[#allocation3 + $0x104] sm:$0xf] %vm614_vm10, %v2576_v22  ;;  %v2392_v53 = vpop.permute.xlu1 %2391  ;;  %v2588_v49 = vrot.slane %v2576_v22, 4 }
 0x56d   : > { %v2400_v24 = vrot.slane %v2392_v53, 4  ;;  %2424 = vst.msk [vmem:[#allocation3 + $0x8c] sm:$0xf] %vm614_vm10, %v2392_v53  ;;  %v8498_v53 = vld [vmem:[#allocation3 + $0x38] sm:$0xf0] }
 0x56f   : > { %v2407_v28 = vsel %vm626_vm11, %v2399_v44, %v2400_v24  ;;  %v7642_v62 = vld [vmem:[#allocation3 + $0x168] sm:$0xf]  ;;  %v7488_v44 = vld [vmem:[#allocation3 + $0x3c] sm:$0xf0] }
 0x570   : > { %v2408_v30 = vsel %vm645_vm4, %v9591_v10, %v2407_v28  ;;  %3238 = vmatpush.bf16.msrb.mxu0 %v7535_v20  ;;  %3295 = vmatpush.bf16.msrb.mxu3 %v7539_v27  ;;  %v7631_v27 = vor.u32 %v8534_v35, %v7630_v55  ;;  %v2591_v55 = vrot.slane %v9581_v3, 4 }
 0x571   : > { %2423 = vst [vmem:[#allocation3 + $0x84] sm:$0xff] %v2408_v30  ;;  %v7486_v30 = vld [vmem:[#allocation3 + $0x30] sm:$0xf] }
 0x573   : > { %v2712_v6 = vpop.permute.xlu2 %2711  ;;  %v2328_v33 = vpop.permute.xlu0 %2327 }
 0x574   : > { %v2720_v38 = vrot.slane %v2712_v6, 4  ;;  %2744 = vst.msk [vmem:[#allocation3 + $0x17c] sm:$0xf] %vm614_vm10, %v2712_v6  ;;  %v2574_v18 = vpop.permute.xlu1 %2573  ;;  %v2336_v5 = vrot.slane %v2328_v33, 4  ;;  %v8497_v6 = vld [vmem:[#allocation3 + $0x34] sm:$0xf] }
 0x575   : > { %v2587_v40 = vrot.slane %v2574_v18, 4  ;;  %2360 = vst.msk [vmem:[#allocation3 + $0x5c] sm:$0xf] %vm614_vm10, %v2328_v33 }
 0x576   : > { %v2727_v10 = vsel %vm626_vm11, %v2719_v50, %v2720_v38  ;;  %v2343_v41 = vsel %vm626_vm11, %v2335_v12, %v2336_v5  ;;  %v7487_v12 = vor.u32 %v8498_v53, %v7486_v30  ;;  %v7491_v50 = vor.u32 %v8497_v6, %v7488_v44  ;;  %v8495_v5 = vld [vmem:[#allocation3 + $0x20] sm:$0xf0] }
 0x577   : > { %v2728_v45 = vsel %vm11148_vm12, %v9619_v29, %v2727_v10  ;;  %v2595_v46 = vsel %vm626_vm11, %v2587_v40, %v2588_v49  ;;  %v2344_v34 = vsel %vm11149_vm5, %v9571_v61, %v2343_v41  ;;  %v2585_v61 = vrot.slane %v9695_v2, 4  ;;  %v7476_v49 = vld [vmem:[#allocation3 + $0x24] sm:$0xf0]  ;;  %v7474_v10 = vld [vmem:[#allocation3 + $0x18] sm:$0xf]  ;;  %vm11154_vm5 = vmmov %vm11152_vm6 }
 0x578   : > { %2743 = vst [vmem:[#allocation3 + $0x174] sm:$0xff] %v2728_v45  ;;  %v2596_v21 = vsel %vm11150_vm14, %v2574_v18, %v2595_v46  ;;  %v8507_v60 = vld [vmem:[#allocation3 + $0x80] sm:$0xf0]  ;;  %v7524_v42 = vld [vmem:[#allocation3 + $0x84] sm:$0xf0]  ;;  %vm11153_vm12 = vcmask 891904   ;;  %v7475_v45 = vor.u32 %v8495_v5, %v7474_v10 }
 0x579   : > { %2611 = vst [vmem:[#allocation3 + $0xfc] sm:$0xff] %v2596_v21  ;;  %v7523_v54 = vor.u32 %v8507_v60, %v7522_v51  ;;  %v7527_v57 = vor.u32 %v8506_v52, %v7524_v42  ;;  %v8494_v41 = vld [vmem:[#allocation3 + $0x1c] sm:$0xf]  ;;  %v8491_v51 = vld [vmem:[#allocation3 + $0x4] sm:$0xf]  ;;  %vm11155_vm14 = vcmask 752640  }
 0x57a   : > { %2359 = vst [vmem:[#allocation3 + $0x54] sm:$0xff] %v2344_v34  ;;  %v7479_v46 = vor.u32 %v8494_v41, %v7476_v49  ;;  %v7462_v34 = vld [vmem:[#allocation3] sm:$0xf]  ;;  %v8492_v60 = vld [vmem:[#allocation3 + $0x8] sm:$0xf0] }
 0x57b   : > { %3239 = vmatpush.bf16.msrb.mxu0 %v7523_v54  ;;  %3296 = vmatpush.bf16.msrb.mxu3 %v7527_v57  ;;  %v9727_v29 = vpop.permute.xlu2 %2765  ;;  %v2572_v31 = vpop.permute.xlu0 %2571  ;;  %v8538_v42 = vld [vmem:[#allocation3 + $0x178] sm:$0xf0]  ;;  %v7438_v54 = vld [vmem:[#allocation7] sm:$0xf]  ;;  %v7606_v41 = vld [vmem:[#allocation3 + $0x120] sm:$0xf] }
 0x57c   : > { %v2764_v7 = vpop.permute.xlu1 %2763  ;;  %v2586_v8 = vrot.slane %v2572_v31, 4  ;;  %2610 = vst.msk [vmem:[#allocation3 + $0xf8] sm:$0xf] %vm614_vm10, %v2572_v31  ;;  %v8486_v57 = vld [vmem:[#allocation7 + $0x8] sm:$0xf0]  ;;  %v2779_v56 = vrot.slane %v9727_v29, 4 }
 0x57d   : > { %2802 = vst.msk [vmem:[#allocation3 + $0x188] sm:$0xf] %vm614_vm10, %v2764_v7  ;;  %v8529_v10 = vld [vmem:[#allocation3 + $0x130] sm:$0xf0] }
 0x57e   : > { %v2593_v14 = vsel %vm626_vm11, %v2585_v61, %v2586_v8  ;;  %v2655_v61 = vrot.slane %v9603_v15, 4  ;;  %v7464_v8 = vld [vmem:[#allocation3 + $0xc] sm:$0xf0] }
 0x57f   : > { %v2594_v48 = vsel %vm11151_vm0, %v9695_v2, %v2593_v14  ;;  %3240 = vmatpush.bf16.msrb.mxu0 %v7511_v11  ;;  %3297 = vmatpush.bf16.msrb.mxu3 %v7515_v1  ;;  %v8537_v25 = vld [vmem:[#allocation3 + $0x170] sm:$0xf0]  ;;  %v2778_v2 = vrot.slane %v2764_v7, 4  ;;  %v7644_v0 = vld [vmem:[#allocation3 + $0x174] sm:$0xf0]  ;;  %v7463_v11 = vor.u32 %v8492_v60, %v7462_v34  ;;  %v7467_v1 = vor.u32 %v8491_v51, %v7464_v8 }
 0x580   : > { %2609 = vst [vmem:[#allocation3 + $0xf0] sm:$0xff] %v2594_v48  ;;  %v7643_v4 = vor.u32 %v8537_v25, %v7642_v62  ;;  %v8536_v14 = vld [vmem:[#allocation3 + $0x16c] sm:$0xf]  ;;  %v7650_v48 = vld [vmem:[#allocation3 + $0x170] sm:$0xf]  ;;  %v9747_v62 = vor.u32 %v8486_v57, %v7438_v54 }
 0x581   : > { %v8501_v63 = vld [vmem:[#allocation3 + $0x50] sm:$0xf0]  ;;  %v7500_v39 = vld [vmem:[#allocation3 + $0x54] sm:$0xf0]  ;;  %v7651_v35 = vor.u32 %v8538_v42, %v7650_v48  ;;  %v8528_v34 = vld [vmem:[#allocation3 + $0x128] sm:$0xf0] }
 0x582   : > { %v7499_v43 = vor.u32 %v8501_v63, %v7498_v47  ;;  %3256 = vmatpush.bf16.msrb.mxu1 %v7643_v4  ;;  %v7503_v22 = vor.u32 %v8500_v13, %v7500_v39  ;;  %v7647_v4 = vor.u32 %v8536_v14, %v7644_v0  ;;  %v7632_v13 = vld [vmem:[#allocation3 + $0x15c] sm:$0xf0]  ;;  %v8535_v39 = vld [vmem:[#allocation3 + $0x160] sm:$0xf0]  ;;  %v7608_v51 = vld [vmem:[#allocation3 + $0x12c] sm:$0xf0] }
 0x583   : > { %v2516_v58 = vpop.permute.xlu2 %2515  ;;  %v2762_v23 = vpop.permute.xlu0 %2761  ;;  %v8489_v54 = vld [vmem:[#allocation7 + $0x20] sm:$0xf0] }
 0x584   : > { %3241 = vmatpush.bf16.msrb.mxu0 %v7499_v43  ;;  %3298 = vmatpush.bf16.msrb.mxu3 %v7503_v22  ;;  %v2526_v24 = vrot.slane %v2516_v58, 4  ;;  %2550 = vst.msk [vmem:[#allocation3 + $0xe0] sm:$0xf] %vm614_vm10, %v2516_v58  ;;  %v2514_v17 = vpop.permute.xlu1 %2513  ;;  %v2777_v20 = vrot.slane %v2762_v23, 4  ;;  %v8533_v43 = vld [vmem:[#allocation3 + $0x154] sm:$0xf] }
 0x585   : > { %v2525_v28 = vrot.slane %v2514_v17, 4  ;;  %v7638_v22 = vld [vmem:[#allocation3 + $0x158] sm:$0xf]  ;;  %v7635_v58 = vor.u32 %v8533_v43, %v7632_v13  ;;  %v7554_v13 = vld [vmem:[#allocation3 + $0xb0] sm:$0xf] }
 0x586   : > { %v2785_v33 = vsel %vm626_vm11, %v2777_v20, %v2778_v2  ;;  %3257 = vmatpush.bf16.msrb.mxu1 %v7631_v27 }
 0x587   : > { %v2533_v38 = vsel %vm626_vm11, %v2525_v28, %v2526_v24  ;;  %v2786_v18 = vsel %vm11152_vm6, %v2762_v23, %v2785_v33  ;;  %v7639_v23 = vor.u32 %v8535_v39, %v7638_v22  ;;  %v7618_v33 = vld [vmem:[#allocation3 + $0x138] sm:$0xf]  ;;  %vm11156_vm6 = vmmov %vm11154_vm5  ;;  %v8523_v39 = vld [vmem:[#allocation3 + $0x100] sm:$0xf0] }
 0x588   : > { %v2534_v40 = vsel %vm11153_vm12, %v2514_v17, %v2533_v38  ;;  %2801 = vst [vmem:[#allocation3 + $0x180] sm:$0xff] %v2786_v18  ;;  %3242 = vmatpush.bf16.msrb.mxu0 %v7487_v12  ;;  %3299 = vmatpush.bf16.msrb.mxu3 %v7491_v50  ;;  %v2783_v17 = vrot.slane %v9707_v19, 4  ;;  %v8530_v12 = vld [vmem:[#allocation3 + $0x13c] sm:$0xf]  ;;  %v7614_v50 = vld [vmem:[#allocation3 + $0x128] sm:$0xf] }
 0x589   : > { %2549 = vst [vmem:[#allocation3 + $0xd8] sm:$0xff] %v2534_v40  ;;  %v7582_v43 = vld [vmem:[#allocation3 + $0xf0] sm:$0xf]  ;;  %v8521_v22 = vld [vmem:[#allocation3 + $0xf4] sm:$0xf] }
 0x58b   : > { %v9740_v52 = vpop.permute.xlu2 %2505  ;;  %v2768_v21 = vpop.permute.xlu0 %2767 }
 0x58c   : > { %3243 = vmatpush.bf16.msrb.mxu0 %v7475_v45  ;;  %3300 = vmatpush.bf16.msrb.mxu3 %v7479_v46  ;;  %v2648_v59 = vpop.permute.xlu1 %2647  ;;  %v2780_v31 = vrot.slane %v2768_v21, 4  ;;  %2804 = vst.msk [vmem:[#allocation3 + $0x194] sm:$0xf] %vm614_vm10, %v2768_v21  ;;  %v8527_v45 = vld [vmem:[#allocation3 + $0x124] sm:$0xf]  ;;  %v7615_v46 = vor.u32 %v8529_v10, %v7614_v50 }
 0x58d   : > { %v2656_v7 = vrot.slane %v2648_v59, 4  ;;  %2680 = vst.msk [vmem:[#allocation3 + $0x14c] sm:$0xf] %vm614_vm10, %v2648_v59  ;;  %v7602_v21 = vld [vmem:[#allocation3 + $0x110] sm:$0xf]  ;;  %v7611_v59 = vor.u32 %v8527_v45, %v7608_v51 }
 0x58e   : > { %v2787_v9 = vsel %vm626_vm11, %v2779_v56, %v2780_v31  ;;  %v7607_v56 = vor.u32 %v8528_v34, %v7606_v41 }
 0x58f   : > { %v2663_v25 = vsel %vm626_vm11, %v2655_v61, %v2656_v7  ;;  %v2788_v47 = vsel %vm11154_vm5, %v9727_v29, %v2787_v9  ;;  %v7666_v61 = vld [vmem:[#allocation3 + $0x198] sm:$0xf]  ;;  %v7594_v9 = vld [vmem:[#allocation3 + $0x108] sm:$0xf]  ;;  %vm11157_vm5 = vmmov %vm11153_vm12 }
 0x590   : > { %v2664_v63 = vsel %vm11155_vm14, %v9603_v15, %v2663_v25  ;;  %2803 = vst [vmem:[#allocation3 + $0x18c] sm:$0xff] %v2788_v47  ;;  %3244 = vmatpush.bf16.msrb.mxu0 %v7463_v11  ;;  %3301 = vmatpush.bf16.msrb.mxu3 %v7467_v1  ;;  %v7626_v15 = vld [vmem:[#allocation3 + $0x140] sm:$0xf]  ;;  %v8524_v47 = vld [vmem:[#allocation3 + $0x10c] sm:$0xf]  ;;  %vm11158_vm14 = vmmov %vm11157_vm5 }
 0x591   : > { %2679 = vst [vmem:[#allocation3 + $0x144] sm:$0xff] %v2664_v63 }
 0x593   : > { %3245 = vmatmul.bf16.vlgmr.msrb.gmra.mxu0 %v9747_v62  ;;  %3302 = vmatmul.bf16.vlgmr.msrb.gmra.mxu3 %v9747_v62  ;;  %v9756_v29 = vpop.permute.xlu2 %2511  ;;  %v2584_v53 = vpop.permute.xlu0 %2583 }
 0x594   : > { %3313 = vmatpush.bf16.msra.mxu0 %v7647_v4  ;;  %3370 = vmatpush.bf16.msra.mxu3 %v7651_v35  ;;  %2548 = vst.msk [vmem:[#allocation3 + $0xd4] sm:$0xf] %vm614_vm10, %v9756_v29  ;;  %v2776_v44 = vpop.permute.xlu1 %2775  ;;  %v2592_v2 = vrot.slane %v2584_v53, 4  ;;  %v8532_v24 = vld [vmem:[#allocation3 + $0x148] sm:$0xf0] }
 0x595   : > { %v2784_v20 = vrot.slane %v2776_v44, 4  ;;  %2808 = vst.msk [vmem:[#allocation3 + $0x1ac] sm:$0xf] %vm614_vm10, %v2776_v44  ;;  %v7627_v27 = vor.u32 %v8532_v24, %v7626_v15  ;;  %v7590_v4 = vld [vmem:[#allocation3 + $0xf8] sm:$0xf]  ;;  %v2521_v24 = vrot.slane %v9740_v52, 4 }
 0x596   : > { %v2599_v28 = vsel %vm626_vm11, %v2591_v55, %v2592_v2  ;;  %2616 = vst.msk [vmem:[#allocation3 + $0x11c] sm:$0xf] %vm614_vm10, %v2584_v53  ;;  %v8522_v15 = vld [vmem:[#allocation3 + $0xf8] sm:$0xf0]  ;;  %v8487_v2 = vld [vmem:[#allocation7 + $0x10] sm:$0xf0] }
 0x597   : > { %v2791_v30 = vsel %vm626_vm11, %v2783_v17, %v2784_v20  ;;  %v2600_v6 = vsel %vm11151_vm0, %v9581_v3, %v2599_v28  ;;  %v8540_v55 = vld [vmem:[#allocation3 + $0x188] sm:$0xf0]  ;;  %v7446_v44 = vld [vmem:[#allocation7 + $0x8] sm:$0xf]  ;;  %v2524_v28 = vrot.slane %v9756_v29, 4  ;;  %vm11159_vm0 = vcmask 744448  }
 0x598   : > { %3314 = vmatpush.bf16.msra.mxu0 %v7635_v58  ;;  %3371 = vmatpush.bf16.msra.mxu3 %v7639_v23  ;;  %v2792_v38 = vsel %vm11156_vm6, %v9707_v19, %v2791_v30  ;;  %2615 = vst [vmem:[#allocation3 + $0x114] sm:$0xff] %v2600_v6  ;;  %v8531_v18 = vld [vmem:[#allocation3 + $0x140] sm:$0xf0]  ;;  %v7620_v5 = vld [vmem:[#allocation3 + $0x144] sm:$0xf0]  ;;  %v7591_v23 = vor.u32 %v8523_v39, %v7590_v4  ;;  %vm11160_vm6 = vcmask 1039360  }
 0x599   : > { %2807 = vst [vmem:[#allocation3 + $0x1a4] sm:$0xff] %v2792_v38  ;;  %v7619_v49 = vor.u32 %v8531_v18, %v7618_v33  ;;  %v7623_v40 = vor.u32 %v8530_v12, %v7620_v5  ;;  %v7450_v19 = vld [vmem:[#allocation7 + $0x18] sm:$0xf]  ;;  %v8514_v58 = vld [vmem:[#allocation3 + $0xb8] sm:$0xf0]  ;;  %v7583_v38 = vor.u32 %v8522_v15, %v7582_v43  ;;  %v9784_v45 = vor.u32 %v8487_v2, %v7446_v44 }
 0x59a   : > { %v9772_v8 = vor.u32 %v8489_v54, %v7450_v19  ;;  %v7654_v6 = vld [vmem:[#allocation3 + $0x180] sm:$0xf]  ;;  %v7555_v33 = vor.u32 %v8514_v58, %v7554_v13  ;;  %v7570_v29 = vld [vmem:[#allocation3 + $0xd8] sm:$0xf]  ;;  %v8505_v43 = vld [vmem:[#allocation3 + $0x70] sm:$0xf0] }
 0x59b   : > { %3258 = vmatpush.bf16.msrb.mxu1 %v7619_v49  ;;  %v2518_v3 = vpop.permute.xlu0 %2517  ;;  %v7578_v12 = vld [vmem:[#allocation3 + $0xe0] sm:$0xf]  ;;  %v7655_v18 = vor.u32 %v8540_v55, %v7654_v6  ;;  %v8541_v15 = vld [vmem:[#allocation3 + $0x190] sm:$0xf0]  ;;  %v8502_v55 = vld [vmem:[#allocation3 + $0x58] sm:$0xf0] }
 0x59c   : > { %3372 = vmatpush.bf16.msra.mxu3 %v7627_v27  ;;  %3315 = vmatpush.bf16.msra.mxu0 %v7623_v40  ;;  %v2520_v60 = vpop.permute.xlu1 %2519  ;;  %v2527_v42 = vrot.slane %v2518_v3, 4  ;;  %v7584_v5 = vld [vmem:[#allocation3 + $0xfc] sm:$0xf0]  ;;  %v7458_v44 = vld [vmem:[#allocation7 + $0x20] sm:$0xf] }
 0x59d   : > { %v2528_v57 = vrot.slane %v2520_v60, 4  ;;  %2552 = vst.msk [vmem:[#allocation3 + $0xec] sm:$0xf] %vm614_vm10, %v2520_v60  ;;  %v8526_v31 = vld [vmem:[#allocation3 + $0x118] sm:$0xf0]  ;;  %v7587_v41 = vor.u32 %v8521_v22, %v7584_v5 }
 0x59e   : > { %v7603_v0 = vor.u32 %v8526_v31, %v7602_v21  ;;  %v7530_v31 = vld [vmem:[#allocation3 + $0x80] sm:$0xf] }
 0x59f   : > { %v2535_v7 = vsel %vm626_vm11, %v2527_v42, %v2528_v57  ;;  %3259 = vmatpush.bf16.msrb.mxu1 %v7607_v56  ;;  %v8525_v11 = vld [vmem:[#allocation3 + $0x110] sm:$0xf0]  ;;  %v7596_v1 = vld [vmem:[#allocation3 + $0x114] sm:$0xf0]  ;;  %v7674_v13 = vld [vmem:[#allocation3 + $0x1a0] sm:$0xf] }
 0x5a0   : > { %3373 = vmatpush.bf16.msra.mxu3 %v7615_v46  ;;  %3316 = vmatpush.bf16.msra.mxu0 %v7611_v59  ;;  %v2536_v14 = vsel %vm11153_vm12, %v2518_v3, %v2535_v7  ;;  %v7595_v48 = vor.u32 %v8525_v11, %v7594_v9  ;;  %v8543_v25 = vld [vmem:[#allocation3 + $0x1a0] sm:$0xf0]  ;;  %v7599_v63 = vor.u32 %v8524_v47, %v7596_v1  ;;  %v8518_v46 = vld [vmem:[#allocation3 + $0xdc] sm:$0xf]  ;;  %v8517_v57 = vld [vmem:[#allocation3 + $0xd0] sm:$0xf0] }
 0x5a1   : > { %2551 = vst [vmem:[#allocation3 + $0xe4] sm:$0xff] %v2536_v14  ;;  %v7667_v35 = vor.u32 %v8543_v25, %v7666_v61  ;;  %v8511_v3 = vld [vmem:[#allocation3 + $0xa0] sm:$0xf0]  ;;  %v8508_v59 = vld [vmem:[#allocation3 + $0x88] sm:$0xf0]  ;;  %vm11161_vm12 = vcmask 883712  }
 0x5a2   : > { %v8485_v61 = vld [vmem:[#allocation7 + $0x4] sm:$0xf]  ;;  %v7440_v7 = vld [vmem:[#allocation7 + $0xc] sm:$0xf0]  ;;  %v7531_v9 = vor.u32 %v8508_v59, %v7530_v31  ;;  %v7668_v14 = vld [vmem:[#allocation3 + $0x1a4] sm:$0xf0] }
 0x5a3   : > { %3250 = vmatmul.bf16.gmra.mxu0 %v9772_v8  ;;  %3307 = vmatmul.bf16.gmra.mxu3 %v9772_v8  ;;  %v2508_v53 = vpop.permute.xlu0 %2507  ;;  %v7518_v47 = vld [vmem:[#allocation3 + $0x68] sm:$0xf]  ;;  %v7443_v58 = vor.u32 %v8485_v61, %v7440_v7  ;;  %v8490_v2 = vld [vmem:[#allocation7 + $0x28] sm:$0xf0] }
 0x5a4   : > { %3374 = vmatpush.bf16.msra.mxu3 %v7603_v0  ;;  %3260 = vmatpush.bf16.msrb.mxu1 %v7595_v48  ;;  %v2510_v17 = vpop.permute.xlu1 %2509  ;;  %v2522_v20 = vrot.slane %v2508_v53, 4  ;;  %2546 = vst.msk [vmem:[#allocation3 + $0xc8] sm:$0xf] %vm614_vm10, %v2508_v53  ;;  %v8520_v27 = vld [vmem:[#allocation3 + $0xe8] sm:$0xf0]  ;;  %v7459_v6 = vor.u32 %v8490_v2, %v7458_v44 }
 0x5a5   : > { %3281 = vmatpush.bf16.msrb.mxu2 %v7667_v35  ;;  %3317 = vmatpush.bf16.msra.mxu0 %v7599_v63  ;;  %v2523_v30 = vrot.slane %v2510_v17, 4  ;;  %v7579_v49 = vor.u32 %v8520_v27, %v7578_v12  ;;  %v8544_v0 = vld [vmem:[#allocation3 + $0x1a8] sm:$0xf0]  ;;  %v8542_v63 = vld [vmem:[#allocation3 + $0x19c] sm:$0xf] }
 0x5a6   : > { %v2529_v50 = vsel %vm626_vm11, %v2521_v24, %v2522_v20  ;;  %v7671_v39 = vor.u32 %v8542_v63, %v7668_v14  ;;  %v7675_v22 = vor.u32 %v8544_v0, %v7674_v13  ;;  %v7656_v53 = vld [vmem:[#allocation3 + $0x18c] sm:$0xf0]  ;;  %v8539_v24 = vld [vmem:[#allocation3 + $0x184] sm:$0xf]  ;;  %v7494_v12 = vld [vmem:[#allocation3 + $0x38] sm:$0xf] }
 0x5a7   : > { %v2531_v40 = vsel %vm626_vm11, %v2523_v30, %v2524_v28  ;;  %v2530_v10 = vsel %vm11157_vm5, %v9740_v52, %v2529_v50  ;;  %v7542_v52 = vld [vmem:[#allocation3 + $0x98] sm:$0xf]  ;;  %v7659_v20 = vor.u32 %v8539_v24, %v7656_v53  ;;  %v7506_v27 = vld [vmem:[#allocation3 + $0x50] sm:$0xf]  ;;  %vm11162_vm5 = vmmov %vm11160_vm6 }
 0x5a8   : > { %3375 = vmatpush.bf16.msra.mxu3 %v7591_v23  ;;  %v2532_v34 = vsel %vm11158_vm14, %v2510_v17, %v2531_v40  ;;  %2545 = vst [vmem:[#allocation3 + $0xc0] sm:$0xff] %v2530_v10  ;;  %3261 = vmatpush.bf16.msrb.mxu1 %v7583_v38  ;;  %v8519_v51 = vld [vmem:[#allocation3 + $0xe0] sm:$0xf0]  ;;  %v7572_v21 = vld [vmem:[#allocation3 + $0xe4] sm:$0xf0]  ;;  %v7543_v19 = vor.u32 %v8511_v3, %v7542_v52  ;;  %v3408_v0 = vld [vmem:[#allocation4] sm:$0xff] }
 0x5a9   : > { %3282 = vmatpush.bf16.msrb.mxu2 %v7655_v18  ;;  %2547 = vst [vmem:[#allocation3 + $0xcc] sm:$0xff] %v2532_v34  ;;  %3318 = vmatpush.bf16.msra.mxu0 %v7587_v41  ;;  %v7571_v60 = vor.u32 %v8519_v51, %v7570_v29  ;;  %v7575_v42 = vor.u32 %v8518_v46, %v7572_v21  ;;  %v7662_v17 = vld [vmem:[#allocation3 + $0x188] sm:$0xf]  ;;  %v8496_v38 = vld [vmem:[#allocation3 + $0x28] sm:$0xf0]  ;;  %vm11163_vm14 = vmmov %vm11162_vm5 }
 0x5aa   : > { %v7519_v23 = vor.u32 %v8505_v43, %v7518_v47  ;;  %v7663_v28 = vor.u32 %v8541_v15, %v7662_v17  ;;  %v7507_v30 = vor.u32 %v8502_v55, %v7506_v27  ;;  %v7482_v18 = vld [vmem:[#allocation3 + $0x20] sm:$0xf]  ;;  %v7452_v40 = vld [vmem:[#allocation7 + $0x24] sm:$0xf0]  ;;  %v8493_v10 = vld [vmem:[#allocation3 + $0x10] sm:$0xf0] }
 0x5ab   : > { %v7566_v54 = vld [vmem:[#allocation3 + $0xc8] sm:$0xf]  ;;  %v7483_v5 = vor.u32 %v8496_v38, %v7482_v18  ;;  %v9800_v52 = vpop.permute.xlu0 %2905  ;;  %v3414_v15 = vld [vmem:[#allocation4 + $0x30] sm:$0xff] }
 0x5ac   : > { %3376 = vmatpush.bf16.msra.mxu3 %v7579_v49  ;;  %7676 = vmatmul.msk.bf16.vlgmr.msrb.gmra.mxu2 %vm1047_vm2, %v9784_v45  ;;  %v7567_v56 = vor.u32 %v8517_v57, %v7566_v54  ;;  %v8488_v49 = vld [vmem:[#allocation7 + $0x1c] sm:$0xf]  ;;  %v7470_v41 = vld [vmem:[#allocation3 + $0x8] sm:$0xf]  ;;  %v9814_v2 = vpop.permute.xlu1 %2910 }
 0x5ad   : > { %3351 = vmatpush.bf16.msra.mxu2 %v7555_v33  ;;  %3262 = vmatpush.bf16.msrb.mxu1 %v7571_v60  ;;  %v8499_v33 = vld [vmem:[#allocation3 + $0x40] sm:$0xf0]  ;;  %v7455_v29 = vor.u32 %v8488_v49, %v7452_v40  ;;  %v7471_v46 = vor.u32 %v8493_v10, %v7470_v41 }
 0x5ae   : > { %3319 = vmatpush.bf16.msra.mxu0 %v7575_v42  ;;  %v7495_v50 = vor.u32 %v8499_v33, %v7494_v12  ;;  %v3417_v33 = vld [vmem:[#allocation4 + $0x48] sm:$0xff] }
 0x5af   : > { %v7558_v11 = vld [vmem:[#allocation3 + $0xc0] sm:$0xf]  ;;  %v8515_v1 = vld [vmem:[#allocation3 + $0xc4] sm:$0xf] }
 0x5b0   : > { %3377 = vmatpush.bf16.msra.mxu3 %v7567_v56  ;;  %v8516_v48 = vld [vmem:[#allocation3 + $0xc8] sm:$0xf0]  ;;  %v7560_v25 = vld [vmem:[#allocation3 + $0xcc] sm:$0xf0] }
 0x5b1   : > { %3352 = vmatpush.bf16.msra.mxu2 %v7543_v19  ;;  %v7559_v4 = vor.u32 %v8516_v48, %v7558_v11  ;;  %v7563_v35 = vor.u32 %v8515_v1, %v7560_v25  ;;  %v2896_v19 = vpop.permute.xlu2 %2895 }
 0x5b3   : > { %3263 = vmatpush.bf16.msrb.mxu1 %v7559_v4  ;;  %3320 = vmatpush.bf16.msra.mxu0 %v7563_v35  ;;  %v2901_v7 = vpop.permute.xlu0 %2900  ;;  %v3411_v4 = vld [vmem:[#allocation4 + $0x18] sm:$0xff] }
 0x5b4   : > { %3378 = vmatmul.bf16.vlgmr.msra.gmra.mxu3 %v7443_v58 }
 0x5b5   : > { %3353 = vmatpush.bf16.msra.mxu2 %v7531_v9 }
 0x5b6   : > { %3264 = vmatmul.bf16.vlgmr.msrb.gmra.mxu1 %v7443_v58  ;;  %3321 = vmatmul.bf16.vlgmr.msra.gmra.mxu0 %v7443_v58 }
 0x5b7   : > { %3338 = vmatpush.bf16.msra.mxu1 %v7671_v39  ;;  %3395 = vmatpush.bf16.msrb.mxu0 %v7675_v22 }
 0x5b9   : > { %3354 = vmatpush.bf16.msra.mxu2 %v7519_v23 }
 0x5bb   : > { %3339 = vmatpush.bf16.msra.mxu1 %v7659_v20  ;;  %3396 = vmatpush.bf16.msrb.mxu0 %v7663_v28 }
 0x5bc   : > { %7677 = vmatmul.msk.bf16.gmra.mxu2 %vm1047_vm2, %v7459_v6 }
 0x5bd   : > { %3355 = vmatpush.bf16.msra.mxu2 %v7507_v30 }
 0x5c1   : > { %3356 = vmatpush.bf16.msra.mxu2 %v7495_v50 }
 0x5c4   : > { %3383 = vmatmul.bf16.gmra.mxu3 %v7455_v29 }
 0x5c5   : > { %3357 = vmatpush.bf16.msra.mxu2 %v7483_v5 }
 0x5c6   : > { %3269 = vmatmul.bf16.gmra.mxu1 %v7455_v29  ;;  %3326 = vmatmul.bf16.gmra.mxu0 %v7455_v29 }
 0x5c9   : > { %3358 = vmatpush.bf16.msra.mxu2 %v7471_v46 }
 0x5cc   : > { %3359 = vmatmul.bf16.vlgmr.msra.gmra.mxu2 %v9747_v62 }
 0x5d6   : > { %7678 = vmatmul.msk.bf16.vlgmr.msra.gmra.mxu1 %vm1047_vm2, %v9784_v45  ;;  %7680 = vmatmul.msk.bf16.vlgmr.msrb.gmra.mxu0 %vm1047_vm2, %v9784_v45 }
 0x5dc   : > { %3364 = vmatmul.bf16.gmra.mxu2 %v9772_v8 }
 0x5e6   : > { %7679 = vmatmul.msk.bf16.gmra.mxu1 %vm1047_vm2, %v7459_v6  ;;  %7681 = vmatmul.msk.bf16.gmra.mxu0 %vm1047_vm2, %v7459_v6 }
 0x610   : > { %v3246_v3 = vpop.f32.mrf.mxu0 }
 0x611   : > { %v3247_v54 = vadd.f32 %v3246_v3, %v2896_v19  ;;  %v3409_v3 = vld [vmem:[#allocation4 + $0x8] sm:$0xff] }
 0x616   : > { %v3303_v21 = vpop.f32.mrf.mxu3 }
 0x617   : > { %v3304_v50 = vadd.f32 %v3303_v21, %v2896_v19 }
 0x618   : > { %v3248_v34 = vpop.f32.mrf.mxu0 }
 0x619   : > { %v3249_v9 = vadd.f32 %v3248_v34, %v2901_v7  ;;  %v3410_v34 = vld [vmem:[#allocation4 + $0x10] sm:$0xff] }
 0x61e   : > { %v9798_v42 = vpop.f32.mrf.mxu3 }
 0x620   : > { %v3251_v51 = vpop.f32.mrf.mxu0 }
 0x621   : > { %v3252_v13 = vadd.f32 %v3251_v51, %v9800_v52 }
 0x626   : > { %v9802_v8 = vpop.f32.mrf.mxu3 }
 0x628   : > { %v3253_v60 = vpop.f32.mrf.mxu0 }
 0x629   : > { %v3254_v24 = vadd.f32 %v3253_v60, %v9814_v2 }
 0x62e   : > { %v9806_v35 = vpop.f32.mrf.mxu3 }
 0x62f   : > { %v3284_v62 = vpop.f32.mrf.mxu2 }
 0x633   : > { %v3265_v57 = vpop.f32.mrf.mxu1  ;;  %v3322_v45 = vpop.f32.mrf.mxu0 }
 0x634   : > { %v3266_v56 = vadd.f32 %v3265_v57, %v3247_v54  ;;  %v3323_v18 = vadd.f32 %v3322_v45, %v3304_v50 }
 0x636   : > { %v3285_v59 = vadd.f32 %v3284_v62, %v3266_v56 }
 0x637   : > { %v3286_v31 = vpop.f32.mrf.mxu2  ;;  %v3379_v44 = vpop.f32.mrf.mxu3 }
 0x638   : > { %v3420_v61 = vadd.f32 %v3408_v0, %v3285_v59 }
 0x63a   : > { %v3432_v11 = vsel %vm9033_vm13, %v3420_v61, 0.0 }
 0x63b   : > { %v3267_v1 = vpop.f32.mrf.mxu1  ;;  %v3324_v14 = vpop.f32.mrf.mxu0  ;;  %3504 = vst [vmem:[#allocation4] sm:$0xff] %v3432_v11 }
 0x63c   : > { %v3268_v48 = vadd.f32 %v3267_v1, %v3249_v9  ;;  %v3413_v9 = vld [vmem:[#allocation4 + $0x28] sm:$0xff] }
 0x63e   : > { %v3287_v25 = vadd.f32 %v3286_v31, %v3268_v48 }
 0x63f   : > { %v3289_v47 = vpop.f32.mrf.mxu2  ;;  %v3381_v49 = vpop.f32.mrf.mxu3 }
 0x640   : > { %v3423_v63 = vadd.f32 %v3411_v4, %v3287_v25 }
 0x642   : > { %v9811_v39 = vsel %vm9033_vm13, %v3423_v63, 0.0 }
 0x643   : > { %v3270_v43 = vpop.f32.mrf.mxu1  ;;  %v3327_v22 = vpop.f32.mrf.mxu0  ;;  %3507 = vst [vmem:[#allocation4 + $0x18] sm:$0xff] %v9811_v39 }
 0x644   : > { %v3271_v58 = vadd.f32 %v3270_v43, %v3252_v13 }
 0x646   : > { %v3290_v23 = vadd.f32 %v3289_v47, %v3271_v58 }
 0x647   : > { %v3291_v53 = vpop.f32.mrf.mxu2  ;;  %v3384_v1 = vpop.f32.mrf.mxu3 }
 0x648   : > { %v3426_v55 = vadd.f32 %v3414_v15, %v3290_v23 }
 0x64a   : > { %v9819_v17 = vsel %vm9033_vm13, %v3426_v55, 0.0 }
 0x64b   : > { %v3272_v20 = vpop.f32.mrf.mxu1  ;;  %v9821_v27 = vpop.f32.mrf.mxu0  ;;  %3510 = vst [vmem:[#allocation4 + $0x30] sm:$0xff] %v9819_v17 }
 0x64c   : > { %v3273_v28 = vadd.f32 %v3272_v20, %v3254_v24 }
 0x64e   : > { %v3292_v30 = vadd.f32 %v3291_v53, %v3273_v28 }
 0x64f   : > { %v3360_v6 = vpop.f32.mrf.mxu2 }
 0x650   : > { %v3361_v12 = vadd.f32 %v3360_v6, %v2896_v19  ;;  %v3429_v38 = vadd.f32 %v3417_v33, %v3292_v30  ;;  %v3306_v19 = vadd.f32 %v9798_v42, %v2901_v7  ;;  %v3386_v30 = vpop.f32.mrf.mxu3 }
 0x652   : > { %v3380_v5 = vadd.f32 %v3379_v44, %v3361_v12  ;;  %v9826_v40 = vsel %vm9033_vm13, %v3429_v38, 0.0  ;;  %v3325_v56 = vadd.f32 %v3324_v14, %v3306_v19  ;;  %v3309_v14 = vadd.f32 %v9802_v8, %v9800_v52  ;;  %v3416_v8 = vld [vmem:[#allocation4 + $0x40] sm:$0xff] }
 0x653   : > { %v3341_v10 = vpop.f32.mrf.mxu1  ;;  %v3398_v41 = vpop.f32.mrf.mxu0  ;;  %3513 = vst [vmem:[#allocation4 + $0x48] sm:$0xff] %v9826_v40 }
 0x654   : > { %v3342_v29 = vadd.f32 %v3341_v10, %v3323_v18  ;;  %v3399_v46 = vadd.f32 %v3398_v41, %v3380_v5  ;;  %v3328_v43 = vadd.f32 %v3327_v22, %v3309_v14  ;;  %v3419_v10 = vld [vmem:[#allocation4 + $0x58] sm:$0xff] }
 0x656   : > { %v3421_v51 = vadd.f32 %v3409_v3, %v3342_v29  ;;  %v3422_v60 = vadd.f32 %v3410_v34, %v3399_v46 }
 0x657   : > { %v3362_v62 = vpop.f32.mrf.mxu2 }
 0x658   : > { %v3363_v21 = vadd.f32 %v3362_v62, %v2901_v7  ;;  %v3433_v54 = vsel %vm9037_vm15, %v3421_v51, 0.0  ;;  %v9834_v57 = vsel %vm9029_vm1, %v3422_v60, 0.0  ;;  %v3412_v7 = vld [vmem:[#allocation4 + $0x20] sm:$0xff] }
 0x659   : > { %v3444_v45 = vpack.c.bf16 %v3433_v54, %v3432_v11  ;;  %3505 = vst [vmem:[#allocation4 + $0x8] sm:$0xff] %v3433_v54  ;;  %v3445_v46 = vpack.c.bf16 %v9834_v57, %v9834_v57 }
 0x65a   : > { %3506 = vst.msk [vmem:[#allocation4 + $0x10] sm:$0xff] %vm1047_vm2, %v9834_v57  ;;  %v3382_v59 = vadd.f32 %v3381_v49, %v3363_v21  ;;  %v3418_v49 = vld [vmem:[#allocation4 + $0x50] sm:$0xff] }
 0x65b   : > { %v3343_v31 = vpop.f32.mrf.mxu1  ;;  %v3400_v0 = vpop.f32.mrf.mxu0  ;;  %3460 = vrot.lane.b32.xlu2 %v3444_v45, %s8800_s18 }
 0x65c   : > { %v3344_v61 = vadd.f32 %v3343_v31, %v3325_v56  ;;  %v3401_v42 = vadd.f32 %v3400_v0, %v3382_v59 }
 0x65e   : > { %v3424_v48 = vadd.f32 %v3412_v7, %v3344_v61  ;;  %v3425_v25 = vadd.f32 %v3413_v9, %v3401_v42 }
 0x65f   : > { %v3365_v47 = vpop.f32.mrf.mxu2 }
 0x660   : > { %v3366_v11 = vadd.f32 %v3365_v47, %v9800_v52  ;;  %v3436_v4 = vsel %vm9037_vm15, %v3424_v48, 0.0  ;;  %v3437_v63 = vsel %vm9029_vm1, %v3425_v25, 0.0  ;;  %v3415_v52 = vld [vmem:[#allocation4 + $0x38] sm:$0xff] }
 0x661   : > { %v3446_v13 = vpack.c.bf16 %v3436_v4, %v9811_v39  ;;  %3508 = vst [vmem:[#allocation4 + $0x20] sm:$0xff] %v3436_v4  ;;  %v3311_v39 = vadd.f32 %v9806_v35, %v9814_v2  ;;  %v3447_v34 = vpack.c.bf16 %v3437_v63, %v3437_v63 }
 0x662   : > { %3509 = vst.msk [vmem:[#allocation4 + $0x28] sm:$0xff] %vm1047_vm2, %v3437_v63  ;;  %v3385_v58 = vadd.f32 %v3384_v1, %v3366_v11 }
 0x663   : > { %v3346_v23 = vpop.f32.mrf.mxu1  ;;  %v3403_v53 = vpop.f32.mrf.mxu0  ;;  %3464 = vrot.lane.b32.xlu0 %v3446_v13, %s8800_s18  ;;  %v3330_v50 = vadd.f32 %v9821_v27, %v3311_v39 }
 0x664   : > { %v3347_v15 = vadd.f32 %v3346_v23, %v3328_v43  ;;  %v3404_v55 = vadd.f32 %v3403_v53, %v3385_v58 }
 0x666   : > { %v3427_v44 = vadd.f32 %v3415_v52, %v3347_v15  ;;  %v3428_v24 = vadd.f32 %v3416_v8, %v3404_v55 }
 0x667   : > { %v3367_v20 = vpop.f32.mrf.mxu2 }
 0x668   : > { %v3368_v28 = vadd.f32 %v3367_v20, %v9814_v2  ;;  %v3439_v22 = vsel %vm9037_vm15, %v3427_v44, 0.0  ;;  %v3440_v6 = vsel %vm9029_vm1, %v3428_v24, 0.0 }
 0x669   : > { %v3448_v33 = vpack.c.bf16 %v3439_v22, %v9819_v17  ;;  %3511 = vst [vmem:[#allocation4 + $0x38] sm:$0xff] %v3439_v22  ;;  %v3449_v12 = vpack.c.bf16 %v3440_v6, %v3440_v6 }
 0x66a   : > { %3512 = vst.msk [vmem:[#allocation4 + $0x40] sm:$0xff] %vm1047_vm2, %v3440_v6  ;;  %v3387_v38 = vadd.f32 %v3386_v30, %v3368_v28 }
 0x66b   : > { %v3348_v18 = vpop.f32.mrf.mxu1  ;;  %v3405_v5 = vpop.f32.mrf.mxu0  ;;  %3468 = vrot.lane.b32.xlu1 %v3448_v33, %s8800_s18  ;;  %3470 = vrot.lane.b32.xlu0 %v3449_v12, %s8800_s18 }
 0x66c   : > { %v3349_v35 = vadd.f32 %v3348_v18, %v3330_v50  ;;  %v3406_v2 = vadd.f32 %v3405_v5, %v3387_v38 }
 0x66e   : > { %v3430_v41 = vadd.f32 %v3418_v49, %v3349_v35  ;;  %v3431_v29 = vadd.f32 %v3419_v10, %v3406_v2 }
 0x670   : > { %v3442_v17 = vsel %vm9037_vm15, %v3430_v41, 0.0  ;;  %v3443_v27 = vsel %vm9029_vm1, %v3431_v29, 0.0 }
 0x671   : > { %v3450_v3 = vpack.c.bf16 %v3442_v17, %v9826_v40  ;;  %3514 = vst [vmem:[#allocation4 + $0x50] sm:$0xff] %v3442_v17  ;;  %v3451_v51 = vpack.c.bf16 %v3443_v27, %v3443_v27 }
 0x672   : > { %3515 = vst.msk [vmem:[#allocation4 + $0x58] sm:$0xff] %vm1047_vm2, %v3443_v27 }
 0x673   : > { %3472 = vrot.lane.b32.xlu2 %v3450_v3, %s8800_s18  ;;  %3462 = vrot.lane.b32.xlu1 %v3445_v46, %s8800_s18 }
 0x67b   : > { %3474 = vrot.lane.b32.xlu1 %v3451_v51, %s8800_s18  ;;  %3466 = vrot.lane.b32.xlu2 %v3447_v34, %s8800_s18 }
 0x6b5   : > { %v3461_v60 = vpop.permute.xlu2 %3460 }
 0x6b6   : > { %v3476_v62 = vrot.slane %v3461_v60, 4 }
 0x6b8   : > { %v3480_v21 = vsel %vm600_vm7, %v3476_v62, %v3461_v60 }
 0x6b9   : > { %3496 = vst.msk [vmem:[#allocation2] sm:$0xff] %vm8922_vm8, %v3480_v21 }
 0x6c0   : > { %v9876_v40 = vld [vmem:[#allocation2] sm:$0xff] }
 0x6c1   : > { %3676 = vrot.lane.b32.xlu1 %v9876_v40, %s8807_s25  ;;  %3548 = vrot.lane.b32.xlu2 %v9876_v40, %s8808_s26  ;;  %3524 = vst [vmem:[#allocation3] sm:$0xff] %v9876_v40 }
 0x6c2   : > { %3612 = vrot.lane.b32.xlu0 %v9876_v40, %s8805_s10 }
 0x6c9   : > { %3932 = vrot.lane.b32.xlu1 %v9876_v40, %s8802_s21  ;;  %3804 = vrot.lane.b32.xlu2 %v9876_v40, %s8806_s24 }
 0x6ca   : > { %3868 = vrot.lane.b32.xlu0 %v9876_v40, %s8803_s22 }
 0x6cd   : > { %v3473_v19 = vpop.permute.xlu2 %3472 }
 0x6ce   : > { %v3479_v54 = vrot.slane %v3473_v19, 4 }
 0x6d0   : > { %v3486_v57 = vsel %vm600_vm7, %v3479_v54, %v3473_v19 }
 0x6d1   : > { %3502 = vst.msk [vmem:[#allocation2 + $0x24] sm:$0xff] %vm8922_vm8, %v3486_v57 }
 0x6d5   : > { %v3465_v45 = vpop.permute.xlu0 %3464  ;;  %v3467_v59 = vpop.permute.xlu2 %3466 }
 0x6d6   : > { %v3477_v56 = vrot.slane %v3465_v45, 4 }
 0x6d8   : > { %v3482_v31 = vsel %vm600_vm7, %v3477_v56, %v3465_v45  ;;  %v3483_v0 = vsel %vm600_vm7, %v3477_v56, %v3467_v59  ;;  %v9896_v61 = vld [vmem:[#allocation2 + $0x24] sm:$0xff] }
 0x6d9   : > { %3498 = vst.msk [vmem:[#allocation2 + $0xc] sm:$0xff] %vm8922_vm8, %v3482_v31 }
 0x6da   : > { %3499 = vst.msk [vmem:[#allocation2 + $0x14] sm:$0xf] %vm609_vm9, %v3483_v0 }
 0x6db   : > { %3530 = vst [vmem:[#allocation3 + $0x24] sm:$0xff] %v9896_v61 }
 0x6dd   : > { %v3469_v42 = vpop.permute.xlu1 %3468  ;;  %v3471_v9 = vpop.permute.xlu0 %3470 }
 0x6de   : > { %v3478_v7 = vrot.slane %v3469_v42, 4 }
 0x6e0   : > { %v3484_v1 = vsel %vm600_vm7, %v3478_v7, %v3469_v42  ;;  %v3485_v48 = vsel %vm600_vm7, %v3478_v7, %v3471_v9  ;;  %v9904_v25 = vld [vmem:[#allocation2 + $0xc] sm:$0xff] }
 0x6e1   : > { %3500 = vst.msk [vmem:[#allocation2 + $0x18] sm:$0xff] %vm8922_vm8, %v3484_v1  ;;  %3680 = vrot.lane.b32.xlu0 %v9904_v25, %s8807_s25  ;;  %3616 = vrot.lane.b32.xlu2 %v9904_v25, %s8805_s10  ;;  %v3519_v11 = vld [vmem:[#allocation2 + $0x14] sm:$0xf] }
 0x6e2   : > { %3501 = vst.msk [vmem:[#allocation2 + $0x20] sm:$0xf] %vm609_vm9, %v3485_v48  ;;  %3552 = vrot.lane.b32.xlu1 %v9904_v25, %s8808_s26  ;;  %v3599_v24 = vld [vmem:[#allocation2 + $0x14] sm:$0xf] }
 0x6e3   : > { %3526 = vst [vmem:[#allocation3 + $0xc] sm:$0xff] %v9904_v25  ;;  %v3535_v20 = vld [vmem:[#allocation2 + $0x14] sm:$0xf] }
 0x6e4   : > { %3527 = vst.msk [vmem:[#allocation3 + $0x14] sm:$0xf] %vm614_vm10, %v3519_v11  ;;  %v3663_v28 = vld [vmem:[#allocation2 + $0x14] sm:$0xf] }
 0x6e5   : > { %v3463_v47 = vpop.permute.xlu1 %3462  ;;  %v3855_v30 = vld [vmem:[#allocation2 + $0x14] sm:$0xf] }
 0x6e6   : > { %v3481_v14 = vsel %vm600_vm7, %v3476_v62, %v3463_v47  ;;  %v3791_v39 = vld [vmem:[#allocation2 + $0x14] sm:$0xf] }
 0x6e7   : > { %3497 = vst.msk [vmem:[#allocation2 + $0x8] sm:$0xf] %vm609_vm9, %v3481_v14  ;;  %v3919_v6 = vld [vmem:[#allocation2 + $0x14] sm:$0xf] }
 0x6e8   : > { %v9919_v4 = vld [vmem:[#allocation2 + $0x18] sm:$0xff]  ;;  %v3983_v9 = vld [vmem:[#allocation2 + $0x14] sm:$0xf] }
 0x6e9   : > { %3936 = vrot.lane.b32.xlu0 %v9904_v25, %s8802_s21  ;;  %3872 = vrot.lane.b32.xlu2 %v9904_v25, %s8803_s22  ;;  %3528 = vst [vmem:[#allocation3 + $0x18] sm:$0xff] %v9919_v4  ;;  %v3521_v63 = vld [vmem:[#allocation2 + $0x20] sm:$0xf] }
 0x6ea   : > { %3808 = vrot.lane.b32.xlu1 %v9904_v25, %s8806_s24  ;;  %3529 = vst.msk [vmem:[#allocation3 + $0x20] sm:$0xf] %vm614_vm10, %v3521_v63  ;;  %v3601_v33 = vld [vmem:[#allocation2 + $0x20] sm:$0xf] }
 0x6eb   : > { %v3537_v12 = vld [vmem:[#allocation2 + $0x20] sm:$0xf] }
 0x6ec   : > { %v3665_v50 = vld [vmem:[#allocation2 + $0x20] sm:$0xf] }
 0x6ed   : > { %v3475_v13 = vpop.permute.xlu1 %3474  ;;  %v3857_v18 = vld [vmem:[#allocation2 + $0x20] sm:$0xf] }
 0x6ee   : > { %v3487_v43 = vsel %vm600_vm7, %v3479_v54, %v3475_v13  ;;  %v3517_v58 = vld [vmem:[#allocation2 + $0x8] sm:$0xf]  ;;  %v3793_v5 = vld [vmem:[#allocation2 + $0x20] sm:$0xf] }
 0x6ef   : > { %3503 = vst.msk [vmem:[#allocation2 + $0x2c] sm:$0xf] %vm609_vm9, %v3487_v43  ;;  %v3533_v53 = vld [vmem:[#allocation2 + $0x8] sm:$0xf]  ;;  %v3921_v35 = vld [vmem:[#allocation2 + $0x20] sm:$0xf] }
 0x6f0   : > { %3525 = vst.msk [vmem:[#allocation3 + $0x8] sm:$0xf] %vm614_vm10, %v3517_v58  ;;  %v3661_v15 = vld [vmem:[#allocation2 + $0x8] sm:$0xf]  ;;  %v3985_v29 = vld [vmem:[#allocation2 + $0x20] sm:$0xf] }
 0x6f1   : > { %3684 = vrot.lane.b32.xlu0 %v9919_v4, %s8807_s25  ;;  %3620 = vrot.lane.b32.xlu2 %v9919_v4, %s8805_s10  ;;  %v3597_v55 = vld [vmem:[#allocation2 + $0x8] sm:$0xf]  ;;  %v3729_v60 = vld [vmem:[#allocation2 + $0x20] sm:$0xf] }
 0x6f2   : > { %3556 = vrot.lane.b32.xlu1 %v9919_v4, %s8808_s26  ;;  %v3789_v52 = vld [vmem:[#allocation2 + $0x8] sm:$0xf] }
 0x6f3   : > { %v3917_v8 = vld [vmem:[#allocation2 + $0x8] sm:$0xf] }
 0x6f4   : > { %v3853_v44 = vld [vmem:[#allocation2 + $0x8] sm:$0xf] }
 0x6f5   : > { %v3981_v31 = vld [vmem:[#allocation2 + $0x8] sm:$0xf] }
 0x6f6   : > { %v3523_v23 = vld [vmem:[#allocation2 + $0x2c] sm:$0xf] }
 0x6f7   : > { %3531 = vst.msk [vmem:[#allocation3 + $0x2c] sm:$0xf] %vm614_vm10, %v3523_v23  ;;  %v3667_v49 = vld [vmem:[#allocation2 + $0x2c] sm:$0xf] }
 0x6f8   : > { %v3603_v10 = vld [vmem:[#allocation2 + $0x2c] sm:$0xf] }
 0x6f9   : > { %3940 = vrot.lane.b32.xlu0 %v9919_v4, %s8802_s21  ;;  %3876 = vrot.lane.b32.xlu2 %v9919_v4, %s8803_s22  ;;  %v3539_v46 = vld [vmem:[#allocation2 + $0x2c] sm:$0xf] }
 0x6fa   : > { %3812 = vrot.lane.b32.xlu1 %v9919_v4, %s8806_s24  ;;  %v3923_v54 = vld [vmem:[#allocation2 + $0x2c] sm:$0xf] }
 0x6fb   : > { %v3859_v57 = vld [vmem:[#allocation2 + $0x2c] sm:$0xf] }
 0x6fc   : > { %v3795_v0 = vld [vmem:[#allocation2 + $0x2c] sm:$0xf] }
 0x6fd   : > { %v3731_v1 = vld [vmem:[#allocation2 + $0x2c] sm:$0xf] }
 0x6fe   : > { %v3987_v43 = vld [vmem:[#allocation2 + $0x2c] sm:$0xf] }
 0x701   : > { %3560 = vrot.lane.b32.xlu0 %v9896_v61, %s8808_s26  ;;  %3688 = vrot.lane.b32.xlu2 %v9896_v61, %s8807_s25 }
 0x702   : > { %3624 = vrot.lane.b32.xlu1 %v9896_v61, %s8805_s10 }
 0x709   : > { %3816 = vrot.lane.b32.xlu0 %v9896_v61, %s8806_s24  ;;  %3944 = vrot.lane.b32.xlu2 %v9896_v61, %s8802_s21 }
 0x70a   : > { %3880 = vrot.lane.b32.xlu1 %v9896_v61, %s8803_s22 }
 0x711   : > { %3550 = vrot.lane.b32.xlu0 %v3533_v53, %s8808_s26  ;;  %3678 = vrot.lane.b32.xlu2 %v3661_v15, %s8807_s25 }
 0x712   : > { %3614 = vrot.lane.b32.xlu1 %v3597_v55, %s8805_s10 }
 0x719   : > { %3806 = vrot.lane.b32.xlu0 %v3789_v52, %s8806_s24  ;;  %3934 = vrot.lane.b32.xlu2 %v3917_v8, %s8802_s21  ;;  %v7693_v8 = vld [vmem:[%s11094_s6 + $0x38] sm:$0xff] }
 0x71a   : > { %3870 = vrot.lane.b32.xlu1 %v3853_v44, %s8803_s22 }
 0x71b   : > { %v9966_v22 = vpop.permute.xlu2 %3548 }
 0x721   : > { %3618 = vrot.lane.b32.xlu0 %v3599_v24, %s8805_s10  ;;  %3554 = vrot.lane.b32.xlu2 %v3535_v20, %s8808_s26  ;;  %v3727_v24 = vld [vmem:[#allocation2 + $0x14] sm:$0xf] }
 0x722   : > { %3682 = vrot.lane.b32.xlu1 %v3663_v28, %s8807_s25 }
 0x723   : > { %v9974_v38 = vpop.permute.xlu2 %3804 }
 0x729   : > { %3874 = vrot.lane.b32.xlu0 %v3855_v30, %s8803_s22  ;;  %3810 = vrot.lane.b32.xlu2 %v3791_v39, %s8806_s24 }
 0x72a   : > { %3938 = vrot.lane.b32.xlu1 %v3919_v6, %s8802_s21 }
 0x731   : > { %3622 = vrot.lane.b32.xlu0 %v3601_v33, %s8805_s10  ;;  %3558 = vrot.lane.b32.xlu2 %v3537_v12, %s8808_s26  ;;  %v7690_v12 = vld [vmem:[%s11094_s6 + $0x20] sm:$0xff] }
 0x732   : > { %3686 = vrot.lane.b32.xlu1 %v3665_v50, %s8807_s25 }
 0x733   : > { %v3677_v17 = vpop.permute.xlu1 %3676 }
 0x734   : > { %v9981_v41 = vpop.permute.xlu0 %3612  ;;  %v3692_v11 = vrot.slane %v3677_v17, 4 }
 0x739   : > { %3878 = vrot.lane.b32.xlu0 %v3857_v18, %s8803_s22  ;;  %3814 = vrot.lane.b32.xlu2 %v3793_v5, %s8806_s24  ;;  %v7691_v18 = vld [vmem:[%s11094_s6 + $0x28] sm:$0xff] }
 0x73a   : > { %3942 = vrot.lane.b32.xlu1 %v3921_v35, %s8802_s21 }
 0x73b   : > { %v9979_v2 = vpop.permute.xlu2 %3616  ;;  %v3933_v51 = vpop.permute.xlu1 %3932 }
 0x73c   : > { %v9993_v3 = vpop.permute.xlu0 %3868  ;;  %v3948_v53 = vrot.slane %v3933_v51, 4 }
 0x741   : > { %3690 = vrot.lane.b32.xlu0 %v3667_v49, %s8807_s25  ;;  %3626 = vrot.lane.b32.xlu2 %v3603_v10, %s8805_s10  ;;  %v3564_v49 = vrot.slane %v9966_v22, 4 }
 0x742   : > { %4006 = vrot.lane.b32.xlu1 %v3985_v29, %s8801_s20 }
 0x743   : > { %v9986_v27 = vpop.permute.xlu2 %3872 }
 0x749   : > { %4004 = vrot.lane.b32.xlu0 %v9919_v4, %s8801_s20  ;;  %4008 = vrot.lane.b32.xlu2 %v9896_v61, %s8801_s20 }
 0x74a   : > { %3562 = vrot.lane.b32.xlu1 %v3539_v46, %s8808_s26 }
 0x74b   : > { %v9995_v34 = vpop.permute.xlu2 %3620 }
 0x751   : > { %3752 = vrot.lane.b32.xlu0 %v9896_v61, %s8804_s23  ;;  %3750 = vrot.lane.b32.xlu2 %v3729_v60, %s8804_s23 }
 0x752   : > { %3748 = vrot.lane.b32.xlu1 %v9919_v4, %s8804_s23 }
 0x753   : > { %v10002_v62 = vpop.permute.xlu2 %3876  ;;  %v10004_v21 = vpop.permute.xlu0 %3680 }
 0x754   : > { %v3553_v19 = vpop.permute.xlu1 %3552 }
 0x755   : > { %v3566_v30 = vrot.slane %v3553_v19, 4 }
 0x759   : > { %3946 = vrot.lane.b32.xlu0 %v3923_v54, %s8802_s21  ;;  %3882 = vrot.lane.b32.xlu2 %v3859_v57, %s8803_s22 }
 0x75a   : > { %4000 = vrot.lane.b32.xlu1 %v9904_v25, %s8801_s20 }
 0x75b   : > { %v10010_v45 = vpop.permute.xlu2 %3688  ;;  %v10012_v56 = vpop.permute.xlu0 %3936 }
 0x75c   : > { %v10014_v59 = vpop.permute.xlu1 %3808 }
 0x75d   : > { %v3822_v10 = vrot.slane %v10014_v59, 4 }
 0x761   : > { %3998 = vrot.lane.b32.xlu0 %v3981_v31, %s8801_s20  ;;  %3996 = vrot.lane.b32.xlu2 %v9876_v40, %s8801_s20 }
 0x762   : > { %3818 = vrot.lane.b32.xlu1 %v3795_v0, %s8806_s24 }
 0x763   : > { %v10020_v61 = vpop.permute.xlu2 %3944  ;;  %v10022_v42 = vpop.permute.xlu0 %3684 }
 0x764   : > { %v10024_v7 = vpop.permute.xlu1 %3556 }
 0x769   : > { %3740 = vrot.lane.b32.xlu0 %v9876_v40, %s8804_s23  ;;  %4002 = vrot.lane.b32.xlu2 %v3983_v9, %s8801_s20  ;;  %v3725_v40 = vld [vmem:[#allocation2 + $0x8] sm:$0xf] }
 0x76a   : > { %3754 = vrot.lane.b32.xlu1 %v3731_v1, %s8804_s23 }
 0x76b   : > { %v3679_v48 = vpop.permute.xlu2 %3678  ;;  %v10030_v47 = vpop.permute.xlu0 %3940 }
 0x76c   : > { %v3693_v14 = vrot.slane %v3679_v48, 4  ;;  %3717 = vst.msk [vmem:[#allocation3 + $0x98] sm:$0xf] %vm614_vm10, %v3679_v48  ;;  %v10033_v4 = vpop.permute.xlu1 %3812 }
 0x76e   : > { %v3700_v63 = vsel %vm626_vm11, %v3692_v11, %v3693_v14  ;;  %v3820_v11 = vrot.slane %v9974_v38, 4  ;;  %v3568_v14 = vrot.slane %v10024_v7, 4 }
 0x76f   : > { %v3701_v13 = vsel %vm662_vm3, %v3677_v17, %v3700_v63 }
 0x770   : > { %3716 = vst [vmem:[#allocation3 + $0x90] sm:$0xff] %v3701_v13 }
 0x771   : > { %4010 = vrot.lane.b32.xlu0 %v3987_v43, %s8801_s20  ;;  %3744 = vrot.lane.b32.xlu2 %v9904_v25, %s8804_s23  ;;  %v7692_v25 = vld [vmem:[%s11094_s6 + $0x30] sm:$0xff]  ;;  %v3884_v43 = vrot.slane %v9993_v3, 4 }
 0x772   : > { %3742 = vrot.lane.b32.xlu1 %v3725_v40, %s8804_s23 }
 0x773   : > { %v3935_v58 = vpop.permute.xlu2 %3934  ;;  %v10041_v23 = vpop.permute.xlu0 %3560 }
 0x774   : > { %v3949_v15 = vrot.slane %v3935_v58, 4  ;;  %3973 = vst.msk [vmem:[#allocation3 + $0x158] sm:$0xf] %vm614_vm10, %v3935_v58  ;;  %v10044_v55 = vpop.permute.xlu1 %3624 }
 0x776   : > { %v3956_v52 = vsel %vm626_vm11, %v3948_v53, %v3949_v15 }
 0x777   : > { %v3957_v44 = vsel %vm11159_vm0, %v3933_v51, %v3956_v52  ;;  %v3628_v51 = vrot.slane %v9981_v41, 4  ;;  %vm11164_vm0 = vmmov %vm11161_vm12 }
 0x778   : > { %3972 = vst [vmem:[#allocation3 + $0x150] sm:$0xff] %v3957_v44 }
 0x779   : > { %3746 = vrot.lane.b32.xlu0 %v3727_v24, %s8804_s23  ;;  %4147 = vperm.xlu2 %8753, %v7693_v8   ;;  %v3824_v24 = vrot.slane %v10033_v4, 4 }
 0x77a   : > { %4142 = vperm.xlu1 %8752, %v7692_v25   ;;  %v3630_v25 = vrot.slane %v9979_v2, 4 }
 0x77b   : > { %v3555_v20 = vpop.permute.xlu2 %3554  ;;  %v10055_v28 = vpop.permute.xlu0 %3816 }
 0x77c   : > { %v3567_v39 = vrot.slane %v3555_v20, 4  ;;  %3591 = vst.msk [vmem:[#allocation3 + $0x44] sm:$0xf] %vm614_vm10, %v3555_v20  ;;  %v10058_v6 = vpop.permute.xlu1 %3880 }
 0x77e   : > { %v3574_v33 = vsel %vm626_vm11, %v3566_v30, %v3567_v39  ;;  %v3694_v39 = vrot.slane %v10004_v21, 4 }
 0x77f   : > { %v3575_v50 = vsel %vm11160_vm6, %v3553_v19, %v3574_v33  ;;  %vm11165_vm6 = vcmask 752640  }
 0x780   : > { %3590 = vst [vmem:[#allocation3 + $0x3c] sm:$0xff] %v3575_v50 }
 0x781   : > { %4132 = vperm.xlu0 %8751, %v7690_v12  }
 0x782   : > { %4137 = vperm.xlu1 %8752, %v7691_v18  }
 0x783   : > { %v3811_v5 = vpop.permute.xlu2 %3810  ;;  %v3551_v35 = vpop.permute.xlu0 %3550 }
 0x784   : > { %v3823_v29 = vrot.slane %v3811_v5, 4  ;;  %3847 = vst.msk [vmem:[#allocation3 + $0x104] sm:$0xf] %vm614_vm10, %v3811_v5  ;;  %v3615_v17 = vpop.permute.xlu1 %3614  ;;  %v3565_v46 = vrot.slane %v3551_v35, 4 }
 0x785   : > { %v3629_v60 = vrot.slane %v3615_v17, 4  ;;  %3653 = vst.msk [vmem:[#allocation3 + $0x68] sm:$0xf] %vm614_vm10, %v3615_v17 }
 0x786   : > { %v3830_v19 = vsel %vm626_vm11, %v3822_v10, %v3823_v29  ;;  %v3572_v54 = vsel %vm626_vm11, %v3564_v49, %v3565_v46  ;;  %3589 = vst.msk [vmem:[#allocation3 + $0x38] sm:$0xf] %vm614_vm10, %v3551_v35  ;;  %v3886_v10 = vrot.slane %v9986_v27, 4  ;;  %v3634_v29 = vrot.slane %v10044_v55, 4 }
 0x787   : > { %v3831_v57 = vsel %vm11161_vm12, %v10014_v59, %v3830_v19  ;;  %v3636_v31 = vsel %vm626_vm11, %v3628_v51, %v3629_v60  ;;  %v3573_v0 = vsel %vm11162_vm5, %v9966_v22, %v3572_v54  ;;  %vm11166_vm12 = vmmov %vm11164_vm0  ;;  %v3950_v51 = vrot.slane %v10012_v56, 4 }
 0x788   : > { %3846 = vst [vmem:[#allocation3 + $0xfc] sm:$0xff] %v3831_v57  ;;  %v3637_v9 = vsel %vm645_vm4, %v9981_v41, %v3636_v31  ;;  %vm11167_vm5 = vmmov %vm11165_vm6 }
 0x789   : > { %3652 = vst [vmem:[#allocation3 + $0x60] sm:$0xff] %v3637_v9 }
 0x78a   : > { %3588 = vst [vmem:[#allocation3 + $0x30] sm:$0xff] %v3573_v0 }
 0x78b   : > { %v3559_v1 = vpop.permute.xlu2 %3558  ;;  %v3807_v48 = vpop.permute.xlu0 %3806 }
 0x78c   : > { %v3871_v63 = vpop.permute.xlu1 %3870  ;;  %v3569_v13 = vrot.slane %v3559_v1, 4  ;;  %3593 = vst.msk [vmem:[#allocation3 + $0x50] sm:$0xf] %vm614_vm10, %v3559_v1  ;;  %v3821_v59 = vrot.slane %v3807_v48, 4  ;;  %v3632_v1 = vrot.slane %v9995_v34, 4 }
 0x78d   : > { %v3885_v22 = vrot.slane %v3871_v63, 4  ;;  %3909 = vst.msk [vmem:[#allocation3 + $0x128] sm:$0xf] %vm614_vm10, %v3871_v63 }
 0x78e   : > { %v3576_v41 = vsel %vm626_vm11, %v3568_v14, %v3569_v13  ;;  %v3828_v40 = vsel %vm626_vm11, %v3820_v11, %v3821_v59  ;;  %3845 = vst.msk [vmem:[#allocation3 + $0xf8] sm:$0xf] %vm614_vm10, %v3807_v48 }
 0x78f   : > { %v3892_v58 = vsel %vm626_vm11, %v3884_v43, %v3885_v22  ;;  %v3577_v53 = vsel %vm11163_vm14, %v10024_v7, %v3576_v41  ;;  %v3829_v15 = vsel %vm11164_vm0, %v9974_v38, %v3828_v40  ;;  %vm11168_vm14 = vcmask 744448   ;;  %vm11169_vm0 = vmmov %vm11167_vm5 }
 0x790   : > { %v3893_v52 = vsel %vm11165_vm6, %v9993_v3, %v3892_v58  ;;  %3592 = vst [vmem:[#allocation3 + $0x48] sm:$0xff] %v3577_v53  ;;  %v3888_v22 = vrot.slane %v10002_v62, 4  ;;  %v3952_v58 = vrot.slane %v10030_v47, 4  ;;  %vm11170_vm6 = vmmov %vm11168_vm14 }
 0x791   : > { %3908 = vst [vmem:[#allocation3 + $0x120] sm:$0xff] %v3893_v52 }
 0x792   : > { %3844 = vst [vmem:[#allocation3 + $0xf0] sm:$0xff] %v3829_v15 }
 0x793   : > { %v3815_v8 = vpop.permute.xlu2 %3814  ;;  %v3619_v44 = vpop.permute.xlu0 %3618 }
 0x794   : > { %v3683_v20 = vpop.permute.xlu1 %3682  ;;  %v3825_v30 = vrot.slane %v3815_v8, 4  ;;  %3849 = vst.msk [vmem:[#allocation3 + $0x110] sm:$0xf] %vm614_vm10, %v3815_v8  ;;  %v3631_v7 = vrot.slane %v3619_v44, 4 }
 0x795   : > { %v3695_v38 = vrot.slane %v3683_v20, 4  ;;  %3719 = vst.msk [vmem:[#allocation3 + $0xa4] sm:$0xf] %vm614_vm10, %v3683_v20 }
 0x796   : > { %v3832_v3 = vsel %vm626_vm11, %v3824_v24, %v3825_v30  ;;  %v3638_v33 = vsel %vm626_vm11, %v3630_v25, %v3631_v7  ;;  %3655 = vst.msk [vmem:[#allocation3 + $0x74] sm:$0xf] %vm614_vm10, %v3619_v44  ;;  %v3698_v25 = vrot.slane %v10010_v45, 4  ;;  %v3890_v24 = vrot.slane %v10058_v6, 4 }
 0x797   : > { %v3702_v12 = vsel %vm626_vm11, %v3694_v39, %v3695_v38  ;;  %v3833_v50 = vsel %vm11166_vm12, %v10033_v4, %v3832_v3  ;;  %v3639_v18 = vsel %vm645_vm4, %v9979_v2, %v3638_v33  ;;  %vm11171_vm12 = vmmov %vm11169_vm0 }
 0x798   : > { %v3703_v5 = vsel %vm662_vm3, %v10004_v21, %v3702_v12  ;;  %3848 = vst [vmem:[#allocation3 + $0x108] sm:$0xff] %v3833_v50 }
 0x799   : > { %3718 = vst [vmem:[#allocation3 + $0x9c] sm:$0xff] %v3703_v5  ;;  %v3570_v5 = vrot.slane %v10041_v23, 4 }
 0x79a   : > { %3654 = vst [vmem:[#allocation3 + $0x6c] sm:$0xff] %v3639_v18 }
 0x79b   : > { %v3627_v35 = vpop.permute.xlu2 %3626  ;;  %v3875_v49 = vpop.permute.xlu0 %3874 }
 0x79c   : > { %v3939_v17 = vpop.permute.xlu1 %3938  ;;  %v3635_v46 = vrot.slane %v3627_v35, 4  ;;  %3659 = vst.msk [vmem:[#allocation3 + $0x8c] sm:$0xf] %vm614_vm10, %v3627_v35  ;;  %v3887_v4 = vrot.slane %v3875_v49, 4 }
 0x79d   : > { %v3951_v2 = vrot.slane %v3939_v17, 4  ;;  %3975 = vst.msk [vmem:[#allocation3 + $0x164] sm:$0xf] %vm614_vm10, %v3939_v17 }
 0x79e   : > { %v3642_v21 = vsel %vm626_vm11, %v3634_v29, %v3635_v46  ;;  %v3894_v60 = vsel %vm626_vm11, %v3886_v10, %v3887_v4  ;;  %3911 = vst.msk [vmem:[#allocation3 + $0x134] sm:$0xf] %vm614_vm10, %v3875_v49 }
 0x79f   : > { %v3958_v19 = vsel %vm626_vm11, %v3950_v51, %v3951_v2  ;;  %v3643_v54 = vsel %vm645_vm4, %v10044_v55, %v3642_v21  ;;  %v3895_v57 = vsel %vm11167_vm5, %v9986_v27, %v3894_v60  ;;  %v3696_v55 = vrot.slane %v10022_v42, 4 }
 0x7a0   : > { %v3959_v31 = vsel %vm11168_vm14, %v10012_v56, %v3958_v19  ;;  %3658 = vst [vmem:[#allocation3 + $0x84] sm:$0xff] %v3643_v54  ;;  %vm11172_vm5 = vcmask 736256   ;;  %vm11173_vm14 = vcmask 1039360   ;;  %v8570_v21 = vld [vmem:[#allocation3 + $0x98] sm:$0xf0] }
 0x7a1   : > { %3974 = vst [vmem:[#allocation3 + $0x15c] sm:$0xff] %v3959_v31  ;;  %v7794_v60 = vld [vmem:[#allocation3 + $0x9c] sm:$0xf0]  ;;  %v7792_v31 = vld [vmem:[#allocation3 + $0x90] sm:$0xf] }
 0x7a2   : > { %3910 = vst [vmem:[#allocation3 + $0x12c] sm:$0xff] %v3895_v57 }
 0x7a3   : > { %v10128_v0 = vpop.permute.xlu2 %4008  ;;  %v3623_v9 = vpop.permute.xlu0 %3622 }
 0x7a4   : > { %v3687_v48 = vpop.permute.xlu1 %3686  ;;  %v3633_v11 = vrot.slane %v3623_v9, 4  ;;  %3657 = vst.msk [vmem:[#allocation3 + $0x80] sm:$0xf] %vm614_vm10, %v3623_v9  ;;  %v8569_v9 = vld [vmem:[#allocation3 + $0x94] sm:$0xf] }
 0x7a5   : > { %v3697_v14 = vrot.slane %v3687_v48, 4  ;;  %3721 = vst.msk [vmem:[#allocation3 + $0xb0] sm:$0xf] %vm614_vm10, %v3687_v48  ;;  %v7793_v48 = vor.u32 %v8570_v21, %v7792_v31 }
 0x7a6   : > { %v3640_v27 = vsel %vm626_vm11, %v3632_v1, %v3633_v11  ;;  %v7797_v11 = vor.u32 %v8569_v9, %v7794_v60  ;;  %v8555_v9 = vld [vmem:[#allocation3 + $0x20] sm:$0xf0] }
 0x7a7   : > { %v3704_v56 = vsel %vm626_vm11, %v3696_v55, %v3697_v14  ;;  %v3641_v63 = vsel %vm645_vm4, %v9995_v34, %v3640_v27 }
 0x7a8   : > { %v3705_v13 = vsel %vm662_vm3, %v10022_v42, %v3704_v56  ;;  %3656 = vst [vmem:[#allocation3 + $0x78] sm:$0xff] %v3641_v63  ;;  %v8567_v63 = vld [vmem:[#allocation3 + $0x80] sm:$0xf0] }
 0x7a9   : > { %3720 = vst [vmem:[#allocation3 + $0xa8] sm:$0xff] %v3705_v13  ;;  %v7782_v13 = vld [vmem:[#allocation3 + $0x84] sm:$0xf0] }
 0x7ab   : > { %v10140_v59 = vpop.permute.xlu2 %3750  ;;  %v3879_v43 = vpop.permute.xlu0 %3878 }
 0x7ac   : > { %v3943_v41 = vpop.permute.xlu1 %3942  ;;  %3785 = vst.msk [vmem:[#allocation3 + $0xe0] sm:$0xf] %vm614_vm10, %v10140_v59  ;;  %v3889_v40 = vrot.slane %v3879_v43, 4 }
 0x7ad   : > { %v3953_v53 = vrot.slane %v3943_v41, 4  ;;  %3977 = vst.msk [vmem:[#allocation3 + $0x170] sm:$0xf] %vm614_vm10, %v3943_v41  ;;  %v8564_v41 = vld [vmem:[#allocation3 + $0x68] sm:$0xf0] }
 0x7ae   : > { %v3896_v34 = vsel %vm626_vm11, %v3888_v22, %v3889_v40  ;;  %3913 = vst.msk [vmem:[#allocation3 + $0x140] sm:$0xf] %vm614_vm10, %v3879_v43  ;;  %v7770_v40 = vld [vmem:[#allocation3 + $0x6c] sm:$0xf0] }
 0x7af   : > { %v3960_v42 = vsel %vm626_vm11, %v3952_v58, %v3953_v53  ;;  %v3897_v15 = vsel %vm11169_vm0, %v10002_v62, %v3896_v34  ;;  %v7780_v55 = vld [vmem:[#allocation3 + $0x78] sm:$0xf]  ;;  %v8566_v14 = vld [vmem:[#allocation3 + $0x7c] sm:$0xf]  ;;  %vm11174_vm0 = vcmask 891904   ;;  %v3954_v53 = vrot.slane %v10020_v61, 4 }
 0x7b0   : > { %v3961_v52 = vsel %vm11170_vm6, %v10030_v47, %v3960_v42  ;;  %3912 = vst [vmem:[#allocation3 + $0x138] sm:$0xff] %v3897_v15  ;;  %v8572_v29 = vld [vmem:[#allocation3 + $0xac] sm:$0xf]  ;;  %v7781_v43 = vor.u32 %v8567_v63, %v7780_v55  ;;  %v7785_v22 = vor.u32 %v8566_v14, %v7782_v13  ;;  %v7768_v58 = vld [vmem:[#allocation3 + $0x60] sm:$0xf] }
 0x7b1   : > { %3976 = vst [vmem:[#allocation3 + $0x168] sm:$0xff] %v3961_v52  ;;  %v8563_v15 = vld [vmem:[#allocation3 + $0x64] sm:$0xf]  ;;  %v8552_v55 = vld [vmem:[#allocation3 + $0x8] sm:$0xf0] }
 0x7b2   : > { %v8594_v14 = vld [vmem:[#allocation3 + $0x158] sm:$0xf0] }
 0x7b3   : > { %v3883_v8 = vpop.permute.xlu2 %3882  ;;  %v3691_v44 = vpop.permute.xlu0 %3690 }
 0x7b4   : > { %v4007_v20 = vpop.permute.xlu1 %4006  ;;  %v3891_v30 = vrot.slane %v3883_v8, 4  ;;  %3915 = vst.msk [vmem:[#allocation3 + $0x14c] sm:$0xf] %vm614_vm10, %v3883_v8  ;;  %v3699_v7 = vrot.slane %v3691_v44, 4 }
 0x7b5   : > { %4041 = vst.msk [vmem:[#allocation3 + $0x1a0] sm:$0xf] %vm614_vm10, %v4007_v20  ;;  %v4017_v12 = vrot.slane %v4007_v20, 4 }
 0x7b6   : > { %v3898_v62 = vsel %vm626_vm11, %v3890_v24, %v3891_v30  ;;  %v3706_v39 = vsel %vm626_vm11, %v3698_v25, %v3699_v7  ;;  %3723 = vst.msk [vmem:[#allocation3 + $0xbc] sm:$0xf] %vm614_vm10, %v3691_v44  ;;  %v7769_v44 = vor.u32 %v8564_v41, %v7768_v58  ;;  %v7773_v25 = vor.u32 %v8563_v15, %v7770_v40  ;;  %v7720_v41 = vld [vmem:[#allocation3] sm:$0xf]  ;;  %v7908_v58 = vld [vmem:[#allocation3 + $0x170] sm:$0xf] }
 0x7b7   : > { %v3899_v47 = vsel %vm11171_vm12, %v10058_v6, %v3898_v62  ;;  %v3707_v38 = vsel %vm662_vm3, %v10010_v45, %v3706_v39  ;;  %v7804_v45 = vld [vmem:[#allocation3 + $0xa8] sm:$0xf]  ;;  %vm11175_vm12 = vmmov %vm11172_vm5 }
 0x7b8   : > { %3914 = vst [vmem:[#allocation3 + $0x144] sm:$0xff] %v3899_v47  ;;  %v7756_v47 = vld [vmem:[#allocation3 + $0x48] sm:$0xf] }
 0x7b9   : > { %3722 = vst [vmem:[#allocation3 + $0xb4] sm:$0xff] %v3707_v38  ;;  %v8560_v38 = vld [vmem:[#allocation3 + $0x4c] sm:$0xf] }
 0x7bb   : > { %v10165_v3 = vpop.permute.xlu2 %3996  ;;  %v4005_v33 = vpop.permute.xlu0 %4004 }
 0x7bc   : > { %v3563_v50 = vpop.permute.xlu1 %3562  ;;  %v4016_v18 = vrot.slane %v4005_v33, 4 }
 0x7bd   : > { %v3571_v35 = vrot.slane %v3563_v50, 4  ;;  %3595 = vst.msk [vmem:[#allocation3 + $0x5c] sm:$0xf] %vm614_vm10, %v3563_v50  ;;  %v7744_v50 = vld [vmem:[#allocation3 + $0x30] sm:$0xf] }
 0x7be   : > { %v4024_v49 = vsel %vm626_vm11, %v4016_v18, %v4017_v12  ;;  %v8557_v18 = vld [vmem:[#allocation3 + $0x34] sm:$0xf] }
 0x7bf   : > { %v3578_v6 = vsel %vm626_vm11, %v3570_v5, %v3571_v35  ;;  %v4025_v10 = vsel %vm11172_vm5, %v4005_v33, %v4024_v49  ;;  %v8558_v35 = vld [vmem:[#allocation3 + $0x38] sm:$0xf0]  ;;  %v4012_v49 = vrot.slane %v10165_v3, 4 }
 0x7c0   : > { %v3579_v17 = vsel %vm11173_vm14, %v10041_v23, %v3578_v6  ;;  %4040 = vst [vmem:[#allocation3 + $0x198] sm:$0xff] %v4025_v10  ;;  %v8573_v46 = vld [vmem:[#allocation3 + $0xb0] sm:$0xf0]  ;;  %v7806_v4 = vld [vmem:[#allocation3 + $0xb4] sm:$0xf0]  ;;  %v3761_v23 = vrot.slane %v10140_v59, 4 }
 0x7c1   : > { %3594 = vst [vmem:[#allocation3 + $0x54] sm:$0xff] %v3579_v17  ;;  %v7805_v51 = vor.u32 %v8573_v46, %v7804_v45  ;;  %v7809_v2 = vor.u32 %v8572_v29, %v7806_v4  ;;  %v7746_v10 = vld [vmem:[#allocation3 + $0x3c] sm:$0xf0]  ;;  %v3826_v45 = vrot.slane %v10055_v28, 4  ;;  %v7745_v17 = vor.u32 %v8558_v35, %v7744_v50 }
 0x7c2   : > { %v7749_v46 = vor.u32 %v8557_v18, %v7746_v10  ;;  %vm11176_vm14 = vcmask 883712   ;;  %v8588_v18 = vld [vmem:[#allocation3 + $0x128] sm:$0xf0]  ;;  %v7864_v35 = vld [vmem:[#allocation3 + $0x120] sm:$0xf] }
 0x7c3   : > { %4474 = vmatpush.bf16.msrb.mxu1 %v7805_v51  ;;  %4531 = vmatpush.bf16.msra.mxu0 %v7809_v2  ;;  %v4003_v19 = vpop.permute.xlu2 %4002  ;;  %v10174_v54 = vpop.permute.xlu0 %3752  ;;  %v7732_v51 = vld [vmem:[#allocation3 + $0x18] sm:$0xf]  ;;  %v8554_v2 = vld [vmem:[#allocation3 + $0x1c] sm:$0xf] }
 0x7c4   : > { %v3749_v57 = vpop.permute.xlu1 %3748  ;;  %4039 = vst.msk [vmem:[#allocation3 + $0x194] sm:$0xf] %vm614_vm10, %v4003_v19  ;;  %v4015_v52 = vrot.slane %v4003_v19, 4  ;;  %v7900_v19 = vld [vmem:[#allocation3 + $0x168] sm:$0xf] }
 0x7c5   : > { %v3760_v1 = vrot.slane %v3749_v57, 4 }
 0x7c7   : > { %v3768_v27 = vsel %vm626_vm11, %v3760_v1, %v3761_v23  ;;  %4475 = vmatpush.bf16.msrb.mxu1 %v7793_v48  ;;  %4532 = vmatpush.bf16.msra.mxu0 %v7797_v11  ;;  %v7734_v1 = vld [vmem:[#allocation3 + $0x24] sm:$0xf0]  ;;  %v7733_v48 = vor.u32 %v8555_v9, %v7732_v51  ;;  %v8589_v9 = vld [vmem:[#allocation3 + $0x130] sm:$0xf0] }
 0x7c8   : > { %v3769_v56 = vsel %vm11174_vm0, %v3749_v57, %v3768_v27  ;;  %v8561_v20 = vld [vmem:[#allocation3 + $0x50] sm:$0xf0]  ;;  %v7758_v30 = vld [vmem:[#allocation3 + $0x54] sm:$0xf0]  ;;  %v7737_v11 = vor.u32 %v8554_v2, %v7734_v1  ;;  %v7888_v27 = vld [vmem:[#allocation3 + $0x150] sm:$0xf] }
 0x7c9   : > { %3784 = vst [vmem:[#allocation3 + $0xd8] sm:$0xff] %v3769_v56  ;;  %v7757_v33 = vor.u32 %v8561_v20, %v7756_v47  ;;  %v7761_v12 = vor.u32 %v8560_v38, %v7758_v30  ;;  %v7722_v56 = vld [vmem:[#allocation3 + $0xc] sm:$0xf0]  ;;  %v7889_v40 = vor.u32 %v8594_v14, %v7888_v27  ;;  %v7890_v30 = vld [vmem:[#allocation3 + $0x15c] sm:$0xf0] }
 0x7ca   : > { %v8593_v38 = vld [vmem:[#allocation3 + $0x154] sm:$0xf]  ;;  %v7852_v1 = vld [vmem:[#allocation3 + $0x108] sm:$0xf] }
 0x7cb   : > { %4476 = vmatpush.bf16.msrb.mxu1 %v7781_v43  ;;  %4533 = vmatpush.bf16.msra.mxu0 %v7785_v22  ;;  %v3947_v59 = vpop.permute.xlu0 %3946  ;;  %v8546_v43 = vld [vmem:[%s11093_s5 + $0x38] sm:$0xf0]  ;;  %v7872_v14 = vld [vmem:[#allocation3 + $0x128] sm:$0xf] }
 0x7cc   : > { %v4001_v34 = vpop.permute.xlu1 %4000  ;;  %v3955_v42 = vrot.slane %v3947_v59, 4  ;;  %3979 = vst.msk [vmem:[#allocation3 + $0x17c] sm:$0xf] %vm614_vm10, %v3947_v59  ;;  %v8551_v59 = vld [vmem:[#allocation3 + $0x4] sm:$0xf] }
 0x7cd   : > { %v4014_v8 = vrot.slane %v4001_v34, 4  ;;  %v7725_v15 = vor.u32 %v8551_v59, %v7722_v56  ;;  %v7873_v56 = vor.u32 %v8589_v9, %v7872_v14 }
 0x7ce   : > { %v3962_v24 = vsel %vm626_vm11, %v3954_v53, %v3955_v42  ;;  %v3762_v53 = vrot.slane %v10174_v54, 4  ;;  %v7721_v42 = vor.u32 %v8552_v55, %v7720_v41  ;;  %v8587_v55 = vld [vmem:[#allocation3 + $0x124] sm:$0xf] }
 0x7cf   : > { %v4022_v7 = vsel %vm626_vm11, %v4014_v8, %v4015_v52  ;;  %v3963_v62 = vsel %vm11170_vm6, %v10020_v61, %v3962_v24  ;;  %4477 = vmatpush.bf16.msrb.mxu1 %v7769_v44  ;;  %4534 = vmatpush.bf16.msra.mxu0 %v7773_v25  ;;  %v8596_v52 = vld [vmem:[#allocation3 + $0x16c] sm:$0xf]  ;;  %v8591_v24 = vld [vmem:[#allocation3 + $0x140] sm:$0xf0]  ;;  %vm11177_vm6 = vmmov %vm11172_vm5 }
 0x7d0   : > { %v4023_v39 = vsel %vm11175_vm12, %v4001_v34, %v4022_v7  ;;  %3978 = vst [vmem:[#allocation3 + $0x174] sm:$0xff] %v3963_v62  ;;  %v8595_v7 = vld [vmem:[#allocation3 + $0x160] sm:$0xf0]  ;;  %vm11178_vm12 = vmmov %vm11174_vm0 }
 0x7d1   : > { %4038 = vst [vmem:[#allocation3 + $0x18c] sm:$0xff] %v4023_v39  ;;  %v7876_v39 = vld [vmem:[#allocation3 + $0x138] sm:$0xf] }
 0x7d2   : > { %v7877_v47 = vor.u32 %v8591_v24, %v7876_v39 }
 0x7d3   : > { %4478 = vmatpush.bf16.msrb.mxu1 %v7757_v33  ;;  %4535 = vmatpush.bf16.msra.mxu0 %v7761_v12  ;;  %v3999_v5 = vpop.permute.xlu0 %3998  ;;  %v8598_v13 = vld [vmem:[#allocation3 + $0x178] sm:$0xf0]  ;;  %v7896_v33 = vld [vmem:[#allocation3 + $0x158] sm:$0xf]  ;;  %v7893_v12 = vor.u32 %v8593_v38, %v7890_v30  ;;  %v7842_v38 = vld [vmem:[#allocation3 + $0xfc] sm:$0xf0] }
 0x7d4   : > { %v3819_v6 = vpop.permute.xlu1 %3818  ;;  %v4013_v61 = vrot.slane %v3999_v5, 4  ;;  %4037 = vst.msk [vmem:[#allocation3 + $0x188] sm:$0xf] %vm614_vm10, %v3999_v5  ;;  %v7909_v44 = vor.u32 %v8598_v13, %v7908_v58  ;;  %v7897_v50 = vor.u32 %v8595_v7, %v7896_v33  ;;  %v8584_v58 = vld [vmem:[#allocation3 + $0x10c] sm:$0xf] }
 0x7d5   : > { %v3827_v29 = vrot.slane %v3819_v6, 4  ;;  %3851 = vst.msk [vmem:[#allocation3 + $0x11c] sm:$0xf] %vm614_vm10, %v3819_v6  ;;  %v8592_v6 = vld [vmem:[#allocation3 + $0x148] sm:$0xf0] }
 0x7d6   : > { %v4020_v4 = vsel %vm626_vm11, %v4012_v49, %v4013_v61  ;;  %v7878_v49 = vld [vmem:[#allocation3 + $0x144] sm:$0xf0]  ;;  %v8581_v7 = vld [vmem:[#allocation3 + $0xf4] sm:$0xf]  ;;  %v8583_v33 = vld [vmem:[#allocation3 + $0x100] sm:$0xf0] }
 0x7d7   : > { %v3834_v21 = vsel %vm626_vm11, %v3826_v45, %v3827_v29  ;;  %v4021_v60 = vsel %vm11172_vm5, %v10165_v3, %v4020_v4  ;;  %4479 = vmatpush.bf16.msrb.mxu1 %v7745_v17  ;;  %4536 = vmatpush.bf16.msra.mxu0 %v7749_v46  ;;  %v8597_v57 = vld [vmem:[#allocation3 + $0x170] sm:$0xf0]  ;;  %v7696_v3 = vld [vmem:[%s11093_s5 + $0x30] sm:$0xf]  ;;  %v7865_v46 = vor.u32 %v8588_v18, %v7864_v35  ;;  %v8590_v4 = vld [vmem:[#allocation3 + $0x13c] sm:$0xf] }
 0x7d8   : > { %v3835_v31 = vsel %vm11176_vm14, %v10055_v28, %v3834_v21  ;;  %4036 = vst [vmem:[#allocation3 + $0x180] sm:$0xff] %v4021_v60  ;;  %v7901_v23 = vor.u32 %v8597_v57, %v7900_v19  ;;  %v7902_v28 = vld [vmem:[#allocation3 + $0x174] sm:$0xf0]  ;;  %v10207_v25 = vor.u32 %v8546_v43, %v7696_v3  ;;  %v7884_v45 = vld [vmem:[#allocation3 + $0x140] sm:$0xf]  ;;  %v7881_v2 = vor.u32 %v8590_v4, %v7878_v49  ;;  %vm11179_vm5 = vmmov %vm11174_vm0 }
 0x7d9   : > { %3850 = vst [vmem:[#allocation3 + $0x114] sm:$0xff] %v3835_v31  ;;  %v7905_v8 = vor.u32 %v8596_v52, %v7902_v28  ;;  %v7885_v21 = vor.u32 %v8592_v6, %v7884_v45  ;;  %v7866_v31 = vld [vmem:[#allocation3 + $0x12c] sm:$0xf0]  ;;  %v8549_v43 = vld [vmem:[%s11093_s5 + $0x50] sm:$0xf0]  ;;  %vm11180_vm14 = vcmask 752640  }
 0x7da   : > { %4493 = vmatpush.bf16.msrb.mxu2 %v7901_v23  ;;  %v7869_v27 = vor.u32 %v8587_v55, %v7866_v31  ;;  %v7840_v3 = vld [vmem:[#allocation3 + $0xf0] sm:$0xf]  ;;  %v7704_v49 = vld [vmem:[%s11093_s5 + $0x38] sm:$0xf]  ;;  %v8547_v6 = vld [vmem:[%s11093_s5 + $0x40] sm:$0xf0] }
 0x7db   : > { %4480 = vmatpush.bf16.msrb.mxu1 %v7733_v48  ;;  %4537 = vmatpush.bf16.msra.mxu0 %v7737_v11  ;;  %v10200_v63 = vpop.permute.xlu0 %3740  ;;  %v3745_v48 = vpop.permute.xlu2 %3744  ;;  %v8545_v4 = vld [vmem:[%s11093_s5 + $0x34] sm:$0xf]  ;;  %v8602_v55 = vld [vmem:[#allocation3 + $0x19c] sm:$0xf] }
 0x7dc   : > { %v3755_v22 = vpop.permute.xlu1 %3754  ;;  %v3756_v29 = vrot.slane %v10200_v63, 4 }
 0x7dd   : > { %v3763_v34 = vrot.slane %v3755_v22, 4  ;;  %3787 = vst.msk [vmem:[#allocation3 + $0xec] sm:$0xf] %vm614_vm10, %v3755_v22  ;;  %v3758_v22 = vrot.slane %v3745_v48, 4 }
 0x7de   : > { %4494 = vmatpush.bf16.msrb.mxu2 %v7889_v40  ;;  %v8582_v40 = vld [vmem:[#allocation3 + $0xf8] sm:$0xf0] }
 0x7df   : > { %v3770_v20 = vsel %vm626_vm11, %v3762_v53, %v3763_v34  ;;  %4481 = vmatpush.bf16.msrb.mxu1 %v7721_v42  ;;  %4538 = vmatpush.bf16.msra.mxu0 %v7725_v15  ;;  %v7841_v59 = vor.u32 %v8582_v40, %v7840_v3  ;;  %v7860_v53 = vld [vmem:[#allocation3 + $0x110] sm:$0xf]  ;;  %v7912_v18 = vld [vmem:[#allocation3 + $0x180] sm:$0xf]  ;;  %v7800_v3 = vld [vmem:[#allocation3 + $0x98] sm:$0xf] }
 0x7e0   : > { %v3771_v62 = vsel %vm11174_vm0, %v10174_v54, %v3770_v20  ;;  %v4018_v54 = vrot.slane %v10128_v0, 4  ;;  %v8585_v60 = vld [vmem:[#allocation3 + $0x110] sm:$0xf0]  ;;  %v7854_v13 = vld [vmem:[#allocation3 + $0x114] sm:$0xf0]  ;;  %vm11181_vm0 = vcmask 1039360  }
 0x7e1   : > { %3786 = vst [vmem:[#allocation3 + $0xe4] sm:$0xff] %v3771_v62  ;;  %v7853_v11 = vor.u32 %v8585_v60, %v7852_v1  ;;  %v7857_v42 = vor.u32 %v8584_v58, %v7854_v13  ;;  %v7924_v20 = vld [vmem:[#allocation3 + $0x198] sm:$0xf]  ;;  %v7932_v13 = vld [vmem:[#allocation3 + $0x1a0] sm:$0xf] }
 0x7e2   : > { %4482 = vmatmul.bf16.vlgmr.msrb.gmra.mxu1 %v10207_v25  ;;  %4539 = vmatmul.bf16.vlgmr.msra.gmra.mxu0 %v10207_v25  ;;  %v7828_v62 = vld [vmem:[#allocation3 + $0xd8] sm:$0xf]  ;;  %v7788_v40 = vld [vmem:[#allocation3 + $0x80] sm:$0xf]  ;;  %v7920_v58 = vld [vmem:[#allocation3 + $0x188] sm:$0xf] }
 0x7e3   : > { %4550 = vmatpush.bf16.msra.mxu1 %v7905_v8  ;;  %4607 = vmatpush.bf16.msrb.mxu0 %v7909_v44  ;;  %v4011_v5 = vpop.permute.xlu0 %4010  ;;  %v7848_v44 = vld [vmem:[#allocation3 + $0xf8] sm:$0xf] }
 0x7e4   : > { %4495 = vmatpush.bf16.msrb.mxu2 %v7877_v47  ;;  %v3743_v61 = vpop.permute.xlu1 %3742  ;;  %v4019_v10 = vrot.slane %v4011_v5, 4  ;;  %4043 = vst.msk [vmem:[#allocation3 + $0x1ac] sm:$0xf] %vm614_vm10, %v4011_v5  ;;  %v8574_v5 = vld [vmem:[#allocation3 + $0xb8] sm:$0xf0] }
 0x7e5   : > { %v3757_v17 = vrot.slane %v3743_v61, 4  ;;  %3781 = vst.msk [vmem:[#allocation3 + $0xc8] sm:$0xf] %vm614_vm10, %v3743_v61  ;;  %v7812_v61 = vld [vmem:[#allocation3 + $0xb0] sm:$0xf] }
 0x7e6   : > { %v4026_v51 = vsel %vm626_vm11, %v4018_v54, %v4019_v10  ;;  %v8600_v54 = vld [vmem:[#allocation3 + $0x188] sm:$0xf0] }
 0x7e7   : > { %4551 = vmatpush.bf16.msra.mxu1 %v7893_v12  ;;  %4608 = vmatpush.bf16.msrb.mxu0 %v7897_v50  ;;  %v3764_v19 = vsel %vm626_vm11, %v3756_v29, %v3757_v17  ;;  %v4027_v57 = vsel %vm11177_vm6, %v10128_v0, %v4026_v51  ;;  %v7708_v0 = vld [vmem:[%s11093_s5 + $0x48] sm:$0xf]  ;;  %v7845_v12 = vor.u32 %v8581_v7, %v7842_v38  ;;  %v8580_v10 = vld [vmem:[#allocation3 + $0xe8] sm:$0xf0]  ;;  %v8578_v29 = vld [vmem:[#allocation3 + $0xdc] sm:$0xf] }
 0x7e8   : > { %4496 = vmatpush.bf16.msrb.mxu2 %v7865_v46  ;;  %v3765_v23 = vsel %vm11178_vm12, %v10200_v63, %v3764_v19  ;;  %4042 = vst [vmem:[#allocation3 + $0x1a4] sm:$0xff] %v4027_v57  ;;  %v8586_v63 = vld [vmem:[#allocation3 + $0x118] sm:$0xf0]  ;;  %v10232_v52 = vor.u32 %v8549_v43, %v7708_v0  ;;  %v8579_v8 = vld [vmem:[#allocation3 + $0xe0] sm:$0xf0]  ;;  %v7849_v50 = vor.u32 %v8583_v33, %v7848_v44  ;;  %vm11182_vm6 = vcmask 744448  }
 0x7e9   : > { %3780 = vst [vmem:[#allocation3 + $0xc0] sm:$0xff] %v3765_v23  ;;  %v7861_v15 = vor.u32 %v8586_v63, %v7860_v53  ;;  %v7829_v47 = vor.u32 %v8579_v8, %v7828_v62  ;;  %v7830_v35 = vld [vmem:[#allocation3 + $0xe4] sm:$0xf0]  ;;  %v7913_v45 = vor.u32 %v8600_v54, %v7912_v18  ;;  %v7836_v17 = vld [vmem:[#allocation3 + $0xe0] sm:$0xf]  ;;  %vm11183_vm12 = vmmov %vm11182_vm6 }
 0x7ea   : > { %v8571_v46 = vld [vmem:[#allocation3 + $0xa0] sm:$0xf0]  ;;  %v7833_v51 = vor.u32 %v8578_v29, %v7830_v35  ;;  %v7698_v57 = vld [vmem:[%s11093_s5 + $0x3c] sm:$0xf0]  ;;  %v7837_v31 = vor.u32 %v8580_v10, %v7836_v17  ;;  %v8565_v44 = vld [vmem:[#allocation3 + $0x70] sm:$0xf0] }
 0x7eb   : > { %4552 = vmatpush.bf16.msra.mxu1 %v7881_v2  ;;  %4609 = vmatpush.bf16.msrb.mxu0 %v7885_v21  ;;  %v3747_v28 = vpop.permute.xlu0 %3746  ;;  %v7813_v2 = vor.u32 %v8574_v5, %v7812_v61  ;;  %v10246_v21 = vor.u32 %v8547_v6, %v7704_v49  ;;  %v7801_v0 = vor.u32 %v8571_v46, %v7800_v3  ;;  %v8599_v43 = vld [vmem:[#allocation3 + $0x184] sm:$0xf]  ;;  %v7716_v7 = vld [vmem:[%s11093_s5 + $0x50] sm:$0xf]  ;;  %v8550_v62 = vld [vmem:[%s11093_s5 + $0x58] sm:$0xf0] }
 0x7ec   : > { %4497 = vmatpush.bf16.msrb.mxu2 %v7853_v11  ;;  %v3759_v41 = vrot.slane %v3747_v28, 4  ;;  %3783 = vst.msk [vmem:[#allocation3 + $0xd4] sm:$0xf] %vm614_vm10, %v3747_v28  ;;  %v7824_v28 = vld [vmem:[#allocation3 + $0xc8] sm:$0xf]  ;;  %v7701_v63 = vor.u32 %v8545_v4, %v7698_v57  ;;  %v7717_v38 = vor.u32 %v8550_v62, %v7716_v7 }
 0x7ed   : > { %v7752_v33 = vld [vmem:[#allocation3 + $0x38] sm:$0xf]  ;;  %v8559_v18 = vld [vmem:[#allocation3 + $0x40] sm:$0xf0]  ;;  %v8556_v49 = vld [vmem:[#allocation3 + $0x28] sm:$0xf0] }
 0x7ee   : > { %v3766_v34 = vsel %vm626_vm11, %v3758_v22, %v3759_v41  ;;  %v7753_v5 = vor.u32 %v8559_v18, %v7752_v33  ;;  %v7740_v6 = vld [vmem:[#allocation3 + $0x20] sm:$0xf]  ;;  %v7728_v61 = vld [vmem:[#allocation3 + $0x8] sm:$0xf]  ;;  %v8553_v10 = vld [vmem:[#allocation3 + $0x10] sm:$0xf0] }
 0x7ef   : > { %4553 = vmatpush.bf16.msra.mxu1 %v7869_v27  ;;  %4610 = vmatpush.bf16.msrb.mxu0 %v7873_v56  ;;  %v3767_v24 = vsel %vm11179_vm5, %v3745_v48, %v3766_v34  ;;  %v8603_v30 = vld [vmem:[#allocation3 + $0x1a0] sm:$0xf0]  ;;  %v7926_v19 = vld [vmem:[#allocation3 + $0x1a4] sm:$0xf0]  ;;  %v8604_v27 = vld [vmem:[#allocation3 + $0x1a8] sm:$0xf0]  ;;  %v7741_v54 = vor.u32 %v8556_v49, %v7740_v6 }
 0x7f0   : > { %4498 = vmatpush.bf16.msrb.mxu2 %v7841_v59  ;;  %3782 = vst [vmem:[#allocation3 + $0xcc] sm:$0xff] %v3767_v24  ;;  %v7925_v39 = vor.u32 %v8603_v30, %v7924_v20  ;;  %v7816_v60 = vld [vmem:[#allocation3 + $0xc0] sm:$0xf]  ;;  %v8575_v23 = vld [vmem:[#allocation3 + $0xc4] sm:$0xf]  ;;  %v7929_v56 = vor.u32 %v8602_v55, %v7926_v19  ;;  %v7933_v41 = vor.u32 %v8604_v27, %v7932_v13  ;;  %vm11184_vm5 = vmmov %vm11182_vm6 }
 0x7f1   : > { %v7914_v59 = vld [vmem:[#allocation3 + $0x18c] sm:$0xf0]  ;;  %v8568_v34 = vld [vmem:[#allocation3 + $0x88] sm:$0xf0]  ;;  %v7776_v24 = vld [vmem:[#allocation3 + $0x68] sm:$0xf] }
 0x7f2   : > { %4487 = vmatmul.bf16.gmra.mxu1 %v10232_v52  ;;  %4544 = vmatmul.bf16.gmra.mxu0 %v10232_v52  ;;  %v7917_v53 = vor.u32 %v8599_v43, %v7914_v59  ;;  %v7777_v20 = vor.u32 %v8565_v44, %v7776_v24  ;;  %v8562_v30 = vld [vmem:[#allocation3 + $0x58] sm:$0xf0] }
 0x7f3   : > { %4554 = vmatpush.bf16.msra.mxu1 %v7857_v42  ;;  %4611 = vmatpush.bf16.msrb.mxu0 %v7861_v15  ;;  %v8577_v14 = vld [vmem:[#allocation3 + $0xd0] sm:$0xf0]  ;;  %v7789_v42 = vor.u32 %v8568_v34, %v7788_v40 }
 0x7f4   : > { %4499 = vmatpush.bf16.msrb.mxu2 %v7829_v47  ;;  %4518 = vmatpush.bf16.msrb.mxu3 %v7925_v39  ;;  %v7825_v22 = vor.u32 %v8577_v14, %v7824_v28  ;;  %v8601_v15 = vld [vmem:[#allocation3 + $0x190] sm:$0xf0]  ;;  %v7764_v39 = vld [vmem:[#allocation3 + $0x50] sm:$0xf]  ;;  %v4133_v14 = vpop.permute.xlu0 %4132 }
 0x7f5   : > { %v7921_v8 = vor.u32 %v8601_v15, %v7920_v58  ;;  %v7765_v47 = vor.u32 %v8562_v30, %v7764_v39 }
 0x7f7   : > { %4555 = vmatpush.bf16.msra.mxu1 %v7845_v12  ;;  %4612 = vmatpush.bf16.msrb.mxu0 %v7849_v50  ;;  %v8576_v9 = vld [vmem:[#allocation3 + $0xc8] sm:$0xf0]  ;;  %v7818_v1 = vld [vmem:[#allocation3 + $0xcc] sm:$0xf0]  ;;  %v8548_v12 = vld [vmem:[%s11093_s5 + $0x4c] sm:$0xf] }
 0x7f8   : > { %4519 = vmatpush.bf16.msrb.mxu3 %v7913_v45  ;;  %v7817_v48 = vor.u32 %v8576_v9, %v7816_v60  ;;  %v7821_v11 = vor.u32 %v8575_v23, %v7818_v1  ;;  %v7710_v50 = vld [vmem:[%s11093_s5 + $0x54] sm:$0xf0]  ;;  %v7729_v45 = vor.u32 %v8553_v10, %v7728_v61 }
 0x7f9   : > { %v7713_v35 = vor.u32 %v8548_v12, %v7710_v50 }
 0x7fa   : > { %4500 = vmatpush.bf16.msrb.mxu2 %v7817_v48 }
 0x7fb   : > { %4556 = vmatpush.bf16.msra.mxu1 %v7833_v51  ;;  %4613 = vmatpush.bf16.msrb.mxu0 %v7837_v31 }
 0x7fc   : > { %4588 = vmatpush.bf16.msra.mxu3 %v7813_v2 }
 0x7fd   : > { %7934 = vmatmul.msk.bf16.vlgmr.msrb.gmra.mxu3 %vm1047_vm2, %v10246_v21  ;;  %4501 = vmatmul.bf16.vlgmr.msrb.gmra.mxu2 %v7701_v63 }
 0x7fe   : > { %4575 = vmatpush.bf16.msra.mxu2 %v7929_v56 }
 0x7ff   : > { %4557 = vmatpush.bf16.msra.mxu1 %v7821_v11  ;;  %4614 = vmatpush.bf16.msrb.mxu0 %v7825_v22  ;;  %v4143_v11 = vpop.permute.xlu1 %4142 }
 0x800   : > { %4589 = vmatpush.bf16.msra.mxu3 %v7801_v0 }
 0x802   : > { %4576 = vmatpush.bf16.msra.mxu2 %v7917_v53  ;;  %4558 = vmatmul.bf16.vlgmr.msra.gmra.mxu1 %v7701_v63 }
 0x803   : > { %4632 = vmatpush.bf16.msrb.mxu1 %v7933_v41  ;;  %4615 = vmatmul.bf16.vlgmr.msrb.gmra.mxu0 %v7701_v63 }
 0x804   : > { %4590 = vmatpush.bf16.msra.mxu3 %v7789_v42 }
 0x807   : > { %4633 = vmatpush.bf16.msrb.mxu1 %v7921_v8  ;;  %v4138_v22 = vpop.permute.xlu1 %4137 }
 0x808   : > { %4591 = vmatpush.bf16.msra.mxu3 %v7777_v20 }
 0x80c   : > { %4592 = vmatpush.bf16.msra.mxu3 %v7765_v47 }
 0x80d   : > { %7935 = vmatmul.msk.bf16.gmra.mxu3 %vm1047_vm2, %v7717_v38  ;;  %4506 = vmatmul.bf16.gmra.mxu2 %v7713_v35 }
 0x810   : > { %4593 = vmatpush.bf16.msra.mxu3 %v7753_v5 }
 0x812   : > { %4563 = vmatmul.bf16.gmra.mxu1 %v7713_v35 }
 0x813   : > { %4620 = vmatmul.bf16.gmra.mxu0 %v7713_v35 }
 0x814   : > { %4594 = vmatpush.bf16.msra.mxu3 %v7741_v54 }
 0x818   : > { %4595 = vmatpush.bf16.msra.mxu3 %v7729_v45 }
 0x81d   : > { %4596 = vmatmul.bf16.vlgmr.msra.gmra.mxu3 %v10207_v25  ;;  %7936 = vmatmul.msk.bf16.vlgmr.msra.gmra.mxu2 %vm1047_vm2, %v10246_v21 }
 0x822   : > { %7938 = vmatmul.msk.bf16.vlgmr.msrb.gmra.mxu1 %vm1047_vm2, %v10246_v21 }
 0x82d   : > { %4601 = vmatmul.bf16.gmra.mxu3 %v10232_v52  ;;  %7937 = vmatmul.msk.bf16.gmra.mxu2 %vm1047_vm2, %v7717_v38 }
 0x832   : > { %7939 = vmatmul.msk.bf16.gmra.mxu1 %vm1047_vm2, %v7717_v38 }
 0x85f   : > { %v4483_v29 = vpop.f32.mrf.mxu1  ;;  %v4540_v4 = vpop.f32.mrf.mxu0 }
 0x860   : > { %v4484_v3 = vadd.f32 %v4483_v29, %v4133_v14  ;;  %v4541_v63 = vadd.f32 %v4540_v4, %v4133_v14 }
 0x867   : > { %v4485_v17 = vpop.f32.mrf.mxu1  ;;  %v4542_v2 = vpop.f32.mrf.mxu0 }
 0x868   : > { %v4486_v40 = vadd.f32 %v4485_v17, %v4138_v22  ;;  %v4543_v24 = vadd.f32 %v4542_v2, %v4138_v22  ;;  %v4148_v17 = vpop.permute.xlu2 %4147 }
 0x86f   : > { %v4488_v46 = vpop.f32.mrf.mxu1  ;;  %v4545_v57 = vpop.f32.mrf.mxu0 }
 0x870   : > { %v4489_v62 = vadd.f32 %v4488_v46, %v4143_v11  ;;  %v4546_v61 = vadd.f32 %v4545_v57, %v4143_v11 }
 0x877   : > { %v4490_v51 = vpop.f32.mrf.mxu1  ;;  %v10274_v1 = vpop.f32.mrf.mxu0 }
 0x878   : > { %v4491_v2 = vadd.f32 %v4490_v51, %v4148_v17 }
 0x87f   : > { %v4559_v25 = vpop.f32.mrf.mxu1 }
 0x880   : > { %v4521_v60 = vpop.f32.mrf.mxu3  ;;  %v4502_v19 = vpop.f32.mrf.mxu2  ;;  %v4560_v59 = vadd.f32 %v4559_v25, %v4541_v63 }
 0x881   : > { %v4616_v56 = vpop.f32.mrf.mxu0  ;;  %v4503_v28 = vadd.f32 %v4502_v19, %v4484_v3 }
 0x883   : > { %v4522_v43 = vadd.f32 %v4521_v60, %v4503_v28 }
 0x885   : > { %v4645_v34 = vmax.f32 %v4522_v43, 0.0 }
 0x887   : > { %v4561_v9 = vpop.f32.mrf.mxu1  ;;  %v4657_v30 = vsel %vm9033_vm13, %v4645_v34, 0.0 }
 0x888   : > { %v4523_v31 = vpop.f32.mrf.mxu3  ;;  %v4504_v23 = vpop.f32.mrf.mxu2  ;;  %v4562_v38 = vadd.f32 %v4561_v9, %v4543_v24 }
 0x889   : > { %v4618_v53 = vpop.f32.mrf.mxu0  ;;  %v4505_v42 = vadd.f32 %v4504_v23, %v4486_v40 }
 0x88b   : > { %v4524_v20 = vadd.f32 %v4523_v31, %v4505_v42 }
 0x88d   : > { %v4648_v50 = vmax.f32 %v4524_v20, 0.0 }
 0x88f   : > { %v4564_v52 = vpop.f32.mrf.mxu1  ;;  %v4660_v10 = vsel %vm9033_vm13, %v4648_v50, 0.0 }
 0x890   : > { %v4526_v21 = vpop.f32.mrf.mxu3  ;;  %v4507_v48 = vpop.f32.mrf.mxu2  ;;  %v4565_v60 = vadd.f32 %v4564_v52, %v4546_v61 }
 0x891   : > { %v4508_v33 = vadd.f32 %v4507_v48, %v4489_v62  ;;  %v4621_v5 = vpop.f32.mrf.mxu0 }
 0x893   : > { %v4527_v6 = vadd.f32 %v4526_v21, %v4508_v33 }
 0x895   : > { %v4651_v31 = vmax.f32 %v4527_v6, 0.0 }
 0x897   : > { %v10278_v27 = vpop.f32.mrf.mxu1 }
 0x898   : > { %v10276_v55 = vpop.f32.mrf.mxu3  ;;  %v4509_v0 = vpop.f32.mrf.mxu2 }
 0x899   : > { %v4510_v23 = vadd.f32 %v4509_v0, %v4491_v2  ;;  %v4623_v52 = vpop.f32.mrf.mxu0 }
 0x89f   : > { %v4635_v41 = vpop.f32.mrf.mxu1 }
 0x8a0   : > { %v4597_v13 = vpop.f32.mrf.mxu3  ;;  %v4578_v58 = vpop.f32.mrf.mxu2 }
 0x8a1   : > { %v4579_v15 = vadd.f32 %v4578_v58, %v4560_v59  ;;  %v4598_v35 = vadd.f32 %v4597_v13, %v4133_v14  ;;  %v4663_v13 = vsel %vm9033_vm13, %v4651_v31, 0.0 }
 0x8a3   : > { %v4646_v8 = vmax.f32 %v4579_v15, 0.0  ;;  %v4617_v25 = vadd.f32 %v4616_v56, %v4598_v35  ;;  %v4529_v56 = vadd.f32 %v10276_v55, %v4510_v23 }
 0x8a5   : > { %v4658_v7 = vsel %vm9037_vm15, %v4646_v8, 0.0  ;;  %v4636_v48 = vadd.f32 %v4635_v41, %v4617_v25  ;;  %v4654_v55 = vmax.f32 %v4529_v56, 0.0 }
 0x8a6   : > { %v4669_v39 = vpack.c.bf16 %v4658_v7, %v4657_v30 }
 0x8a7   : > { %v4637_v47 = vpop.f32.mrf.mxu1  ;;  %v4647_v59 = vmax.f32 %v4636_v48, 0.0 }
 0x8a8   : > { %v4599_v44 = vpop.f32.mrf.mxu3  ;;  %v4580_v12 = vpop.f32.mrf.mxu2  ;;  %4685 = vrot.lane.b32.xlu0 %v4669_v39, %s8800_s18 }
 0x8a9   : > { %v4581_v18 = vadd.f32 %v4580_v12, %v4562_v38  ;;  %v4600_v14 = vadd.f32 %v4599_v44, %v4138_v22  ;;  %v4659_v8 = vsel %vm9029_vm1, %v4647_v59, 0.0 }
 0x8aa   : > { %v4670_v30 = vpack.c.bf16 %v4659_v8, %v4659_v8 }
 0x8ab   : > { %v4649_v49 = vmax.f32 %v4581_v18, 0.0 }
 0x8ad   : > { %v4661_v45 = vsel %vm9037_vm15, %v4649_v49, 0.0 }
 0x8ae   : > { %v4671_v46 = vpack.c.bf16 %v4661_v45, %v4660_v10 }
 0x8af   : > { %v4640_v4 = vpop.f32.mrf.mxu1 }
 0x8b0   : > { %v4602_v54 = vpop.f32.mrf.mxu3  ;;  %v4583_v9 = vpop.f32.mrf.mxu2  ;;  %4689 = vrot.lane.b32.xlu1 %v4671_v46, %s8800_s18 }
 0x8b1   : > { %v4603_v29 = vadd.f32 %v4602_v54, %v4143_v11  ;;  %v4584_v57 = vadd.f32 %v4583_v9, %v4565_v60  ;;  %v4548_v11 = vadd.f32 %v10274_v1, %v4148_v17  ;;  %v4619_v1 = vadd.f32 %v4618_v53, %v4600_v14 }
 0x8b3   : > { %v4622_v19 = vadd.f32 %v4621_v5, %v4603_v29  ;;  %v4652_v3 = vmax.f32 %v4584_v57, 0.0  ;;  %v4567_v40 = vadd.f32 %v10278_v27, %v4548_v11  ;;  %v4638_v44 = vadd.f32 %v4637_v47, %v4619_v1 }
 0x8b4   : > { %v4666_v27 = vsel %vm9033_vm13, %v4654_v55, 0.0 }
 0x8b5   : > { %v4641_v21 = vadd.f32 %v4640_v4, %v4622_v19  ;;  %v4664_v63 = vsel %vm9037_vm15, %v4652_v3, 0.0  ;;  %v4650_v62 = vmax.f32 %v4638_v44, 0.0 }
 0x8b6   : > { %v4673_v41 = vpack.c.bf16 %v4664_v63, %v4663_v13 }
 0x8b7   : > { %v4653_v28 = vmax.f32 %v4641_v21, 0.0  ;;  %v4642_v42 = vpop.f32.mrf.mxu1  ;;  %v4662_v38 = vsel %vm9029_vm1, %v4650_v62, 0.0 }
 0x8b8   : > { %v4604_v51 = vpop.f32.mrf.mxu3  ;;  %v4585_v34 = vpop.f32.mrf.mxu2  ;;  %4693 = vrot.lane.b32.xlu2 %v4673_v41, %s8800_s18  ;;  %v4672_v33 = vpack.c.bf16 %v4662_v38, %v4662_v38 }
 0x8b9   : > { %v4665_v0 = vsel %vm9029_vm1, %v4653_v28, 0.0  ;;  %v4605_v43 = vadd.f32 %v4604_v51, %v4148_v17  ;;  %v4586_v15 = vadd.f32 %v4585_v34, %v4567_v40 }
 0x8ba   : > { %v4674_v22 = vpack.c.bf16 %v4665_v0, %v4665_v0 }
 0x8bb   : > { %v4624_v58 = vadd.f32 %v4623_v52, %v4605_v43  ;;  %v4655_v24 = vmax.f32 %v4586_v15, 0.0 }
 0x8bc   : > { %4695 = vrot.lane.b32.xlu1 %v4674_v22, %s8800_s18 }
 0x8bd   : > { %v4643_v20 = vadd.f32 %v4642_v42, %v4624_v58  ;;  %v4667_v53 = vsel %vm9037_vm15, %v4655_v24, 0.0 }
 0x8be   : > { %v4675_v7 = vpack.c.bf16 %v4667_v53, %v4666_v27 }
 0x8bf   : > { %v4656_v39 = vmax.f32 %v4643_v20, 0.0 }
 0x8c0   : > { %4687 = vrot.lane.b32.xlu2 %v4670_v30, %s8800_s18  ;;  %4697 = vrot.lane.b32.xlu0 %v4675_v7, %s8800_s18 }
 0x8c1   : > { %v4668_v47 = vsel %vm9029_vm1, %v4656_v39, 0.0 }
 0x8c2   : > { %v4676_v12 = vpack.c.bf16 %v4668_v47, %v4668_v47 }
 0x8c8   : > { %4699 = vrot.lane.b32.xlu2 %v4676_v12, %s8800_s18  ;;  %4691 = vrot.lane.b32.xlu0 %v4672_v33, %s8800_s18 }
 0x912   : > { %v4694_v50 = vpop.permute.xlu2 %4693 }
 0x913   : > { %v4703_v18 = vrot.slane %v4694_v50, 4 }
 0x915   : > { %v4709_v5 = vsel %vm600_vm7, %v4703_v18, %v4694_v50 }
 0x916   : > { %4725 = vst.msk [vmem:[#allocation2 + $0x18] sm:$0xff] %vm8922_vm8, %v4709_v5 }
 0x91a   : > { %v4686_v35 = vpop.permute.xlu0 %4685  ;;  %v4688_v6 = vpop.permute.xlu2 %4687 }
 0x91b   : > { %v4701_v49 = vrot.slane %v4686_v35, 4 }
 0x91d   : > { %v4705_v54 = vsel %vm600_vm7, %v4701_v49, %v4686_v35  ;;  %v4706_v61 = vsel %vm600_vm7, %v4701_v49, %v4688_v6  ;;  %v10320_v10 = vld [vmem:[#allocation2 + $0x18] sm:$0xff] }
 0x91e   : > { %4721 = vst.msk [vmem:[#allocation2] sm:$0xff] %vm8922_vm8, %v4705_v54 }
 0x91f   : > { %4722 = vst.msk [vmem:[#allocation2 + $0x8] sm:$0xf] %vm609_vm9, %v4706_v61 }
 0x920   : > { %4741 = vst [vmem:[#allocation3 + $0x18] sm:$0xff] %v10320_v10 }
 0x922   : > { %v4690_v45 = vpop.permute.xlu1 %4689  ;;  %v4700_v9 = vpop.permute.xlu2 %4699 }
 0x923   : > { %v4702_v29 = vrot.slane %v4690_v45, 4 }
 0x925   : > { %v4707_v17 = vsel %vm600_vm7, %v4702_v29, %v4690_v45  ;;  %v10327_v46 = vld [vmem:[#allocation2] sm:$0xff] }
 0x926   : > { %4723 = vst.msk [vmem:[#allocation2 + $0xc] sm:$0xff] %vm8922_vm8, %v4707_v17  ;;  %4889 = vrot.lane.b32.xlu2 %v10327_v46, %s8807_s25  ;;  %4825 = vrot.lane.b32.xlu1 %v10327_v46, %s8805_s10  ;;  %v4730_v2 = vld [vmem:[#allocation2 + $0x8] sm:$0xf] }
 0x927   : > { %4761 = vrot.lane.b32.xlu0 %v10327_v46, %s8808_s26  ;;  %4737 = vst [vmem:[#allocation3] sm:$0xff] %v10327_v46  ;;  %v4810_v13 = vld [vmem:[#allocation2 + $0x8] sm:$0xf] }
 0x928   : > { %4738 = vst.msk [vmem:[#allocation3 + $0x8] sm:$0xf] %vm614_vm10, %v4730_v2  ;;  %v4746_v51 = vld [vmem:[#allocation2 + $0x8] sm:$0xf] }
 0x929   : > { %v4874_v52 = vld [vmem:[#allocation2 + $0x8] sm:$0xf] }
 0x92a   : > { %v5066_v56 = vld [vmem:[#allocation2 + $0x8] sm:$0xf] }
 0x92b   : > { %v5130_v43 = vld [vmem:[#allocation2 + $0x8] sm:$0xf] }
 0x92c   : > { %v5002_v53 = vld [vmem:[#allocation2 + $0x8] sm:$0xf] }
 0x92d   : > { %v10341_v25 = vld [vmem:[#allocation2 + $0xc] sm:$0xff]  ;;  %v4938_v50 = vld [vmem:[#allocation2 + $0x8] sm:$0xf] }
 0x92e   : > { %v4696_v4 = vpop.permute.xlu1 %4695  ;;  %5145 = vrot.lane.b32.xlu2 %v10327_v46, %s8802_s21  ;;  %5081 = vrot.lane.b32.xlu1 %v10327_v46, %s8803_s22  ;;  %4739 = vst [vmem:[#allocation3 + $0xc] sm:$0xff] %v10341_v25 }
 0x92f   : > { %v4710_v60 = vsel %vm600_vm7, %v4703_v18, %v4696_v4  ;;  %5017 = vrot.lane.b32.xlu0 %v10327_v46, %s8806_s24 }
 0x930   : > { %4726 = vst.msk [vmem:[#allocation2 + $0x20] sm:$0xf] %vm609_vm9, %v4710_v60 }
 0x932   : > { %v4698_v19 = vpop.permute.xlu0 %4697 }
 0x933   : > { %v4704_v31 = vrot.slane %v4698_v19, 4 }
 0x935   : > { %v4711_v23 = vsel %vm600_vm7, %v4704_v31, %v4698_v19  ;;  %v4712_v57 = vsel %vm600_vm7, %v4704_v31, %v4700_v9 }
 0x936   : > { %4727 = vst.msk [vmem:[#allocation2 + $0x24] sm:$0xff] %vm8922_vm8, %v4711_v23  ;;  %4765 = vrot.lane.b32.xlu2 %v10341_v25, %s8808_s26  ;;  %4893 = vrot.lane.b32.xlu1 %v10341_v25, %s8807_s25 }
 0x937   : > { %4728 = vst.msk [vmem:[#allocation2 + $0x2c] sm:$0xf] %vm609_vm9, %v4712_v57  ;;  %4829 = vrot.lane.b32.xlu0 %v10341_v25, %s8805_s10  ;;  %v4734_v21 = vld [vmem:[#allocation2 + $0x20] sm:$0xf] }
 0x938   : > { %4742 = vst.msk [vmem:[#allocation3 + $0x20] sm:$0xf] %vm614_vm10, %v4734_v21  ;;  %v4878_v59 = vld [vmem:[#allocation2 + $0x20] sm:$0xf] }
 0x939   : > { %v4814_v1 = vld [vmem:[#allocation2 + $0x20] sm:$0xf] }
 0x93a   : > { %v4692_v48 = vpop.permute.xlu0 %4691  ;;  %v4750_v58 = vld [vmem:[#allocation2 + $0x20] sm:$0xf] }
 0x93b   : > { %v4708_v14 = vsel %vm600_vm7, %v4702_v29, %v4692_v48  ;;  %v5134_v42 = vld [vmem:[#allocation2 + $0x20] sm:$0xf] }
 0x93c   : > { %4724 = vst.msk [vmem:[#allocation2 + $0x14] sm:$0xf] %vm609_vm9, %v4708_v14  ;;  %v5070_v55 = vld [vmem:[#allocation2 + $0x20] sm:$0xf] }
 0x93d   : > { %v10364_v3 = vld [vmem:[#allocation2 + $0x24] sm:$0xff]  ;;  %v5006_v15 = vld [vmem:[#allocation2 + $0x20] sm:$0xf] }
 0x93e   : > { %4769 = vrot.lane.b32.xlu2 %v10320_v10, %s8808_s26  ;;  %5149 = vrot.lane.b32.xlu1 %v10341_v25, %s8802_s21  ;;  %4743 = vst [vmem:[#allocation3 + $0x24] sm:$0xff] %v10364_v3  ;;  %v4736_v28 = vld [vmem:[#allocation2 + $0x2c] sm:$0xf]  ;;  %v4942_v38 = vld [vmem:[#allocation2 + $0x20] sm:$0xf] }
 0x93f   : > { %5085 = vrot.lane.b32.xlu0 %v10341_v25, %s8803_s22  ;;  %4744 = vst.msk [vmem:[#allocation3 + $0x2c] sm:$0xf] %vm614_vm10, %v4736_v28  ;;  %v4880_v44 = vld [vmem:[#allocation2 + $0x2c] sm:$0xf]  ;;  %v5198_v31 = vld [vmem:[#allocation2 + $0x20] sm:$0xf] }
 0x940   : > { %v4816_v24 = vld [vmem:[#allocation2 + $0x2c] sm:$0xf] }
 0x941   : > { %v4752_v27 = vld [vmem:[#allocation2 + $0x2c] sm:$0xf] }
 0x942   : > { %v5136_v6 = vld [vmem:[#allocation2 + $0x2c] sm:$0xf] }
 0x943   : > { %v4732_v11 = vld [vmem:[#allocation2 + $0x14] sm:$0xf]  ;;  %v5072_v54 = vld [vmem:[#allocation2 + $0x2c] sm:$0xf] }
 0x944   : > { %4740 = vst.msk [vmem:[#allocation3 + $0x14] sm:$0xf] %vm614_vm10, %v4732_v11  ;;  %v4876_v63 = vld [vmem:[#allocation2 + $0x14] sm:$0xf]  ;;  %v5008_v19 = vld [vmem:[#allocation2 + $0x2c] sm:$0xf] }
 0x945   : > { %v4812_v0 = vld [vmem:[#allocation2 + $0x14] sm:$0xf]  ;;  %v5200_v21 = vld [vmem:[#allocation2 + $0x2c] sm:$0xf] }
 0x946   : > { %5025 = vrot.lane.b32.xlu2 %v10320_v10, %s8806_s24  ;;  %4897 = vrot.lane.b32.xlu1 %v10320_v10, %s8807_s25  ;;  %v5132_v41 = vld [vmem:[#allocation2 + $0x14] sm:$0xf] }
 0x947   : > { %4833 = vrot.lane.b32.xlu0 %v10320_v10, %s8805_s10  ;;  %v5068_v22 = vld [vmem:[#allocation2 + $0x14] sm:$0xf] }
 0x948   : > { %v4748_v40 = vld [vmem:[#allocation2 + $0x14] sm:$0xf] }
 0x949   : > { %v5004_v30 = vld [vmem:[#allocation2 + $0x14] sm:$0xf] }
 0x94a   : > { %v4940_v49 = vld [vmem:[#allocation2 + $0x14] sm:$0xf] }
 0x94e   : > { %5153 = vrot.lane.b32.xlu1 %v10320_v10, %s8802_s21  ;;  %4837 = vrot.lane.b32.xlu2 %v10364_v3, %s8805_s10 }
 0x94f   : > { %5089 = vrot.lane.b32.xlu0 %v10320_v10, %s8803_s22 }
 0x956   : > { %4827 = vrot.lane.b32.xlu2 %v4810_v13, %s8805_s10  ;;  %4773 = vrot.lane.b32.xlu1 %v10364_v3, %s8808_s26 }
 0x957   : > { %4901 = vrot.lane.b32.xlu0 %v10364_v3, %s8807_s25 }
 0x95e   : > { %5093 = vrot.lane.b32.xlu2 %v10364_v3, %s8803_s22  ;;  %4763 = vrot.lane.b32.xlu1 %v4746_v51, %s8808_s26 }
 0x95f   : > { %4891 = vrot.lane.b32.xlu0 %v4874_v52, %s8807_s25  ;;  %v4944_v52 = vld [vmem:[#allocation2 + $0x2c] sm:$0xf] }
 0x966   : > { %5083 = vrot.lane.b32.xlu2 %v5066_v56, %s8803_s22  ;;  %5029 = vrot.lane.b32.xlu1 %v10364_v3, %s8806_s24 }
 0x967   : > { %5157 = vrot.lane.b32.xlu0 %v10364_v3, %s8802_s21 }
 0x96e   : > { %4895 = vrot.lane.b32.xlu2 %v4876_v63, %s8807_s25  ;;  %4831 = vrot.lane.b32.xlu1 %v4812_v0, %s8805_s10 }
 0x96f   : > { %5147 = vrot.lane.b32.xlu0 %v5130_v43, %s8802_s21 }
 0x976   : > { %5151 = vrot.lane.b32.xlu2 %v5132_v41, %s8802_s21  ;;  %5087 = vrot.lane.b32.xlu1 %v5068_v22, %s8803_s22  ;;  %v7942_v22 = vld [vmem:[%s11096_s8 + $0x30] sm:$0xff] }
 0x977   : > { %4767 = vrot.lane.b32.xlu0 %v4748_v40, %s8808_s26 }
 0x97e   : > { %4899 = vrot.lane.b32.xlu2 %v4878_v59, %s8807_s25  ;;  %4835 = vrot.lane.b32.xlu1 %v4814_v1, %s8805_s10  ;;  %v5196_v59 = vld [vmem:[#allocation2 + $0x14] sm:$0xf] }
 0x97f   : > { %4771 = vrot.lane.b32.xlu0 %v4750_v58, %s8808_s26 }
 0x980   : > { %v10410_v34 = vpop.permute.xlu2 %4889 }
 0x986   : > { %5155 = vrot.lane.b32.xlu2 %v5134_v42, %s8802_s21  ;;  %5091 = vrot.lane.b32.xlu1 %v5070_v55, %s8803_s22 }
 0x987   : > { %5027 = vrot.lane.b32.xlu0 %v5006_v15, %s8806_s24 }
 0x988   : > { %v10415_v8 = vpop.permute.xlu2 %5145 }
 0x98e   : > { %5021 = vrot.lane.b32.xlu2 %v10341_v25, %s8806_s24  ;;  %4903 = vrot.lane.b32.xlu1 %v4880_v44, %s8807_s25 }
 0x98f   : > { %4839 = vrot.lane.b32.xlu0 %v4816_v24, %s8805_s10 }
 0x990   : > { %v10421_v20 = vpop.permute.xlu2 %4765 }
 0x996   : > { %4775 = vrot.lane.b32.xlu2 %v4752_v27, %s8808_s26  ;;  %5019 = vrot.lane.b32.xlu1 %v5002_v53, %s8806_s24  ;;  %v4905_v27 = vrot.slane %v10410_v34, 4 }
 0x997   : > { %5023 = vrot.lane.b32.xlu0 %v5004_v30, %s8806_s24 }
 0x998   : > { %v10426_v7 = vpop.permute.xlu2 %4769  ;;  %v4826_v62 = vpop.permute.xlu1 %4825 }
 0x999   : > { %v10428_v39 = vpop.permute.xlu0 %4761  ;;  %v4841_v29 = vrot.slane %v4826_v62, 4 }
 0x99a   : > { %v4777_v42 = vrot.slane %v10428_v39, 4 }
 0x99e   : > { %4963 = vrot.lane.b32.xlu2 %v4942_v38, %s8804_s23  ;;  %4961 = vrot.lane.b32.xlu1 %v10320_v10, %s8804_s23  ;;  %v7941_v38 = vld [vmem:[%s11096_s8 + $0x28] sm:$0xff] }
 0x99f   : > { %4965 = vrot.lane.b32.xlu0 %v10364_v3, %s8804_s23 }
 0x9a0   : > { %v10435_v47 = vpop.permute.xlu2 %5025  ;;  %v5082_v33 = vpop.permute.xlu1 %5081 }
 0x9a1   : > { %v10437_v12 = vpop.permute.xlu0 %5017  ;;  %v5097_v28 = vrot.slane %v5082_v33, 4 }
 0x9a6   : > { %4953 = vrot.lane.b32.xlu2 %v10327_v46, %s8804_s23  ;;  %4957 = vrot.lane.b32.xlu1 %v10341_v25, %s8804_s23 }
 0x9a7   : > { %4955 = vrot.lane.b32.xlu0 %v4938_v50, %s8804_s23 }
 0x9a8   : > { %v4894_v18 = vpop.permute.xlu1 %4893  ;;  %v10444_v5 = vpop.permute.xlu2 %4837 }
 0x9a9   : > { %v10446_v35 = vpop.permute.xlu0 %4829  ;;  %v4907_v63 = vrot.slane %v4894_v18, 4 }
 0x9ae   : > { %4959 = vrot.lane.b32.xlu2 %v4940_v49, %s8804_s23  ;;  %5159 = vrot.lane.b32.xlu1 %v5136_v6, %s8802_s21 }
 0x9af   : > { %5095 = vrot.lane.b32.xlu0 %v5072_v54, %s8803_s22 }
 0x9b0   : > { %v10451_v61 = vpop.permute.xlu1 %5149  ;;  %v4828_v45 = vpop.permute.xlu2 %4827 }
 0x9b1   : > { %v4842_v17 = vrot.slane %v4828_v45, 4  ;;  %4866 = vst.msk [vmem:[#allocation3 + $0x68] sm:$0xf] %vm614_vm10, %v4828_v45  ;;  %v10454_v4 = vpop.permute.xlu0 %5085  ;;  %v5163_v55 = vrot.slane %v10451_v61, 4 }
 0x9b3   : > { %v4849_v2 = vsel %vm626_vm11, %v4841_v29, %v4842_v17 }
 0x9b4   : > { %v4850_v60 = vsel %vm645_vm4, %v4826_v62, %v4849_v2 }
 0x9b5   : > { %4865 = vst [vmem:[#allocation3 + $0x60] sm:$0xff] %v4850_v60 }
 0x9b6   : > { %5031 = vrot.lane.b32.xlu2 %v5008_v19, %s8806_s24  ;;  %5219 = vrot.lane.b32.xlu1 %v5198_v31, %s8801_s20  ;;  %v4843_v19 = vrot.slane %v10446_v35, 4 }
 0x9b7   : > { %5217 = vrot.lane.b32.xlu0 %v10320_v10, %s8801_s20 }
 0x9b8   : > { %v10462_v9 = vpop.permute.xlu1 %4897  ;;  %v10464_v23 = vpop.permute.xlu2 %5093 }
 0x9b9   : > { %v10466_v57 = vpop.permute.xlu0 %4833  ;;  %v4909_v29 = vrot.slane %v10462_v9, 4 }
 0x9be   : > { %5221 = vrot.lane.b32.xlu2 %v10364_v3, %s8801_s20  ;;  %5209 = vrot.lane.b32.xlu1 %v10327_v46, %s8801_s20  ;;  %v5194_v3 = vld [vmem:[#allocation2 + $0x8] sm:$0xf] }
 0x9bf   : > { %5223 = vrot.lane.b32.xlu0 %v5200_v21, %s8801_s20 }
 0x9c0   : > { %v10473_v48 = vpop.permute.xlu1 %5153  ;;  %v5084_v14 = vpop.permute.xlu2 %5083 }
 0x9c1   : > { %v5098_v10 = vrot.slane %v5084_v14, 4  ;;  %5122 = vst.msk [vmem:[#allocation3 + $0x128] sm:$0xf] %vm614_vm10, %v5084_v14  ;;  %v10476_v11 = vpop.permute.xlu0 %5089  ;;  %v5165_v31 = vrot.slane %v10473_v48, 4 }
 0x9c3   : > { %v5105_v13 = vsel %vm626_vm11, %v5097_v28, %v5098_v10  ;;  %v5161_v10 = vrot.slane %v10415_v8, 4 }
 0x9c4   : > { %v5106_v51 = vsel %vm11180_vm14, %v5082_v33, %v5105_v13  ;;  %v7940_v33 = vld [vmem:[%s11096_s8 + $0x20] sm:$0xff] }
 0x9c5   : > { %5121 = vst [vmem:[#allocation3 + $0x120] sm:$0xff] %v5106_v51 }
 0x9c6   : > { %5211 = vrot.lane.b32.xlu2 %v5194_v3, %s8801_s20  ;;  %4967 = vrot.lane.b32.xlu1 %v4944_v52, %s8804_s23 }
 0x9c7   : > { %5213 = vrot.lane.b32.xlu0 %v10341_v25, %s8801_s20  ;;  %v7943_v25 = vld [vmem:[%s11096_s8 + $0x38] sm:$0xff] }
 0x9c8   : > { %v10484_v46 = vpop.permute.xlu1 %4773  ;;  %v4896_v56 = vpop.permute.xlu2 %4895 }
 0x9c9   : > { %v4908_v0 = vrot.slane %v4896_v56, 4  ;;  %4932 = vst.msk [vmem:[#allocation3 + $0xa4] sm:$0xf] %vm614_vm10, %v4896_v56  ;;  %v10487_v43 = vpop.permute.xlu0 %4901 }
 0x9cb   : > { %v4915_v41 = vsel %vm626_vm11, %v4907_v63, %v4908_v0 }
 0x9cc   : > { %v4916_v40 = vsel %vm662_vm3, %v4894_v18, %v4915_v41 }
 0x9cd   : > { %4931 = vst [vmem:[#allocation3 + $0x9c] sm:$0xff] %v4916_v40 }
 0x9ce   : > { %5355 = vperm.xlu2 %8753, %v7942_v22   ;;  %5215 = vrot.lane.b32.xlu1 %v5196_v59, %s8801_s20  ;;  %v5099_v22 = vrot.slane %v10454_v4, 4 }
 0x9cf   : > { %5360 = vperm.xlu0 %8751, %v7943_v25   ;;  %v4779_v25 = vrot.slane %v10421_v20, 4 }
 0x9d0   : > { %v4764_v1 = vpop.permute.xlu1 %4763  ;;  %v5152_v58 = vpop.permute.xlu2 %5151 }
 0x9d1   : > { %v4778_v15 = vrot.slane %v4764_v1, 4  ;;  %4802 = vst.msk [vmem:[#allocation3 + $0x38] sm:$0xf] %vm614_vm10, %v4764_v1  ;;  %v5164_v44 = vrot.slane %v5152_v58, 4  ;;  %v4892_v24 = vpop.permute.xlu0 %4891 }
 0x9d2   : > { %5188 = vst.msk [vmem:[#allocation3 + $0x164] sm:$0xf] %vm614_vm10, %v5152_v58  ;;  %v4906_v53 = vrot.slane %v4892_v24, 4 }
 0x9d3   : > { %v4785_v30 = vsel %vm626_vm11, %v4777_v42, %v4778_v15  ;;  %v5171_v62 = vsel %vm626_vm11, %v5163_v55, %v5164_v44  ;;  %4930 = vst.msk [vmem:[#allocation3 + $0x98] sm:$0xf] %vm614_vm10, %v4892_v24  ;;  %v4845_v15 = vrot.slane %v10466_v57, 4  ;;  %v4783_v44 = vrot.slane %v10484_v46, 4 }
 0x9d4   : > { %v4786_v50 = vsel %vm11181_vm0, %v10428_v39, %v4785_v30  ;;  %v5172_v18 = vsel %vm11182_vm6, %v10451_v61, %v5171_v62  ;;  %v4913_v49 = vsel %vm626_vm11, %v4905_v27, %v4906_v53  ;;  %vm11185_vm6 = vmmov %vm11181_vm0 }
 0x9d5   : > { %4801 = vst [vmem:[#allocation3 + $0x30] sm:$0xff] %v4786_v50  ;;  %v4914_v6 = vsel %vm662_vm3, %v10410_v34, %v4913_v49 }
 0x9d6   : > { %5187 = vst [vmem:[#allocation3 + $0x15c] sm:$0xff] %v5172_v18  ;;  %5350 = vperm.xlu2 %8753, %v7941_v38   ;;  %5345 = vperm.xlu1 %8752, %v7940_v33  }
 0x9d7   : > { %4929 = vst [vmem:[#allocation3 + $0x90] sm:$0xff] %v4914_v6 }
 0x9d8   : > { %v10519_v54 = vpop.permute.xlu1 %5029  ;;  %v4900_v45 = vpop.permute.xlu2 %4899 }
 0x9d9   : > { %v4910_v17 = vrot.slane %v4900_v45, 4  ;;  %4934 = vst.msk [vmem:[#allocation3 + $0xb0] sm:$0xf] %vm614_vm10, %v4900_v45  ;;  %v10523_v39 = vpop.permute.xlu0 %5157  ;;  %v5101_v45 = vrot.slane %v10476_v11, 4 }
 0x9db   : > { %v4917_v61 = vsel %vm626_vm11, %v4909_v29, %v4910_v17 }
 0x9dc   : > { %v4918_v2 = vsel %vm662_vm3, %v10462_v9, %v4917_v61 }
 0x9dd   : > { %4933 = vst [vmem:[#allocation3 + $0xa8] sm:$0xff] %v4918_v2 }
 0x9e0   : > { %v5156_v34 = vpop.permute.xlu2 %5155  ;;  %v4832_v60 = vpop.permute.xlu1 %4831 }
 0x9e1   : > { %v5166_v21 = vrot.slane %v5156_v34, 4  ;;  %5190 = vst.msk [vmem:[#allocation3 + $0x170] sm:$0xf] %vm614_vm10, %v5156_v34  ;;  %v4844_v14 = vrot.slane %v4832_v60, 4  ;;  %v5148_v28 = vpop.permute.xlu0 %5147 }
 0x9e2   : > { %4868 = vst.msk [vmem:[#allocation3 + $0x74] sm:$0xf] %vm614_vm10, %v4832_v60  ;;  %v5162_v13 = vrot.slane %v5148_v28, 4 }
 0x9e3   : > { %v5173_v51 = vsel %vm626_vm11, %v5165_v31, %v5166_v21  ;;  %v4851_v9 = vsel %vm626_vm11, %v4843_v19, %v4844_v14  ;;  %5186 = vst.msk [vmem:[#allocation3 + $0x158] sm:$0xf] %vm614_vm10, %v5148_v28  ;;  %v4911_v31 = vrot.slane %v10487_v43, 4  ;;  %v4847_v28 = vrot.slane %v10444_v5, 4 }
 0x9e4   : > { %v5174_v3 = vsel %vm11183_vm12, %v10473_v48, %v5173_v51  ;;  %v4852_v52 = vsel %vm645_vm4, %v10446_v35, %v4851_v9  ;;  %v5169_v56 = vsel %vm626_vm11, %v5161_v10, %v5162_v13  ;;  %vm11186_vm12 = vmmov %vm11181_vm0 }
 0x9e5   : > { %5189 = vst [vmem:[#allocation3 + $0x168] sm:$0xff] %v5174_v3  ;;  %v5170_v63 = vsel %vm11184_vm5, %v10415_v8, %v5169_v56  ;;  %vm11187_vm5 = vmmov %vm11180_vm14 }
 0x9e6   : > { %4867 = vst [vmem:[#allocation3 + $0x6c] sm:$0xff] %v4852_v52  ;;  %v5033_v52 = vrot.slane %v10437_v12, 4 }
 0x9e7   : > { %5185 = vst [vmem:[#allocation3 + $0x150] sm:$0xff] %v5170_v63 }
 0x9e8   : > { %v10543_v0 = vpop.permute.xlu2 %5021  ;;  %v5088_v41 = vpop.permute.xlu1 %5087 }
 0x9e9   : > { %v5100_v40 = vrot.slane %v5088_v41, 4  ;;  %5124 = vst.msk [vmem:[#allocation3 + $0x134] sm:$0xf] %vm614_vm10, %v5088_v41  ;;  %v4768_v48 = vpop.permute.xlu0 %4767  ;;  %v5035_v41 = vrot.slane %v10543_v0, 4 }
 0x9ea   : > { %v4780_v35 = vrot.slane %v4768_v48, 4  ;;  %4804 = vst.msk [vmem:[#allocation3 + $0x44] sm:$0xf] %vm614_vm10, %v4768_v48 }
 0x9eb   : > { %v5107_v59 = vsel %vm626_vm11, %v5099_v22, %v5100_v40 }
 0x9ec   : > { %v5108_v8 = vsel %vm11180_vm14, %v10454_v4, %v5107_v59  ;;  %v4787_v1 = vsel %vm626_vm11, %v4779_v25, %v4780_v35  ;;  %v4781_v4 = vrot.slane %v10426_v7, 4  ;;  %vm11188_vm14 = vcmask 883712   ;;  %v8632_v35 = vld [vmem:[#allocation3 + $0xac] sm:$0xf] }
 0x9ed   : > { %5123 = vst [vmem:[#allocation3 + $0x12c] sm:$0xff] %v5108_v8  ;;  %v4788_v58 = vsel %vm11181_vm0, %v10421_v20, %v4787_v1  ;;  %vm11189_vm0 = vmmov %vm11188_vm14 }
 0x9ee   : > { %4803 = vst [vmem:[#allocation3 + $0x3c] sm:$0xff] %v4788_v58 }
 0x9f0   : > { %v4776_v42 = vpop.permute.xlu2 %4775  ;;  %v4836_v55 = vpop.permute.xlu1 %4835 }
 0x9f1   : > { %v4784_v24 = vrot.slane %v4776_v42, 4  ;;  %4808 = vst.msk [vmem:[#allocation3 + $0x5c] sm:$0xf] %vm614_vm10, %v4776_v42  ;;  %v4846_v27 = vrot.slane %v4836_v55, 4  ;;  %v4772_v53 = vpop.permute.xlu0 %4771  ;;  %v8042_v42 = vld [vmem:[#allocation3 + $0x90] sm:$0xf] }
 0x9f2   : > { %4870 = vst.msk [vmem:[#allocation3 + $0x80] sm:$0xf] %vm614_vm10, %v4836_v55  ;;  %v4782_v30 = vrot.slane %v4772_v53, 4  ;;  %v8629_v55 = vld [vmem:[#allocation3 + $0x94] sm:$0xf] }
 0x9f3   : > { %v4791_v62 = vsel %vm626_vm11, %v4783_v44, %v4784_v24  ;;  %v4853_v20 = vsel %vm626_vm11, %v4845_v15, %v4846_v27  ;;  %4806 = vst.msk [vmem:[#allocation3 + $0x50] sm:$0xf] %vm614_vm10, %v4772_v53  ;;  %v8630_v15 = vld [vmem:[#allocation3 + $0x98] sm:$0xf0]  ;;  %v5039_v44 = vrot.slane %v10519_v54, 4 }
 0x9f4   : > { %v4792_v38 = vsel %vm11185_vm6, %v10484_v46, %v4791_v62  ;;  %v4854_v33 = vsel %vm645_vm4, %v10466_v57, %v4853_v20  ;;  %v4789_v50 = vsel %vm626_vm11, %v4781_v4, %v4782_v30  ;;  %v5037_v57 = vrot.slane %v10435_v47, 4  ;;  %vm11190_vm6 = vmmov %vm11189_vm0  ;;  %v8044_v53 = vld [vmem:[#allocation3 + $0x9c] sm:$0xf0] }
 0x9f5   : > { %4807 = vst [vmem:[#allocation3 + $0x54] sm:$0xff] %v4792_v38  ;;  %v4790_v18 = vsel %vm11186_vm12, %v10426_v7, %v4789_v50  ;;  %v8043_v27 = vor.u32 %v8630_v15, %v8042_v42  ;;  %v8047_v20 = vor.u32 %v8629_v55, %v8044_v53  ;;  %vm11191_vm12 = vmmov %vm11189_vm0  ;;  %v8615_v42 = vld [vmem:[#allocation3 + $0x20] sm:$0xf0]  ;;  %v5103_v55 = vrot.slane %v10464_v23, 4  ;;  %v7982_v53 = vld [vmem:[#allocation3 + $0x18] sm:$0xf] }
 0x9f6   : > { %4869 = vst [vmem:[#allocation3 + $0x78] sm:$0xff] %v4854_v33 }
 0x9f7   : > { %4805 = vst [vmem:[#allocation3 + $0x48] sm:$0xff] %v4790_v18 }
 0x9f8   : > { %v10570_v49 = vpop.permute.xlu2 %4963  ;;  %v5092_v6 = vpop.permute.xlu1 %5091 }
 0x9f9   : > { %4998 = vst.msk [vmem:[#allocation3 + $0xe0] sm:$0xf] %vm614_vm10, %v10570_v49  ;;  %v5102_v46 = vrot.slane %v5092_v6, 4  ;;  %v5028_v29 = vpop.permute.xlu0 %5027  ;;  %v4974_v4 = vrot.slane %v10570_v49, 4 }
 0x9fa   : > { %5126 = vst.msk [vmem:[#allocation3 + $0x140] sm:$0xf] %vm614_vm10, %v5092_v6  ;;  %v5038_v17 = vrot.slane %v5028_v29, 4 }
 0x9fb   : > { %v5109_v61 = vsel %vm626_vm11, %v5101_v45, %v5102_v46  ;;  %5062 = vst.msk [vmem:[#allocation3 + $0x110] sm:$0xf] %vm614_vm10, %v5028_v29 }
 0x9fc   : > { %v5110_v7 = vsel %vm11187_vm5, %v10476_v11, %v5109_v61  ;;  %v5045_v2 = vsel %vm626_vm11, %v5037_v57, %v5038_v17  ;;  %vm11192_vm5 = vcmask 891904   ;;  %v8624_v17 = vld [vmem:[#allocation3 + $0x68] sm:$0xf0]  ;;  %v8020_v61 = vld [vmem:[#allocation3 + $0x6c] sm:$0xf0] }
 0x9fd   : > { %5125 = vst [vmem:[#allocation3 + $0x138] sm:$0xff] %v5110_v7  ;;  %v5046_v34 = vsel %vm11188_vm14, %v10435_v47, %v5045_v2  ;;  %v8030_v45 = vld [vmem:[#allocation3 + $0x78] sm:$0xf]  ;;  %v8626_v46 = vld [vmem:[#allocation3 + $0x7c] sm:$0xf]  ;;  %vm11193_vm14 = vmmov %vm11192_vm5 }
 0x9fe   : > { %5061 = vst [vmem:[#allocation3 + $0x108] sm:$0xff] %v5046_v34  ;;  %v8018_v34 = vld [vmem:[#allocation3 + $0x60] sm:$0xf] }
 0xa00   : > { %v10584_v60 = vpop.permute.xlu2 %4953  ;;  %v4904_v19 = vpop.permute.xlu1 %4903 }
 0xa01   : > { %v4912_v21 = vrot.slane %v4904_v19, 4  ;;  %4936 = vst.msk [vmem:[#allocation3 + $0xbc] sm:$0xf] %vm614_vm10, %v4904_v19  ;;  %v4840_v14 = vpop.permute.xlu0 %4839  ;;  %v8623_v19 = vld [vmem:[#allocation3 + $0x64] sm:$0xf] }
 0xa02   : > { %v4848_v10 = vrot.slane %v4840_v14, 4  ;;  %4872 = vst.msk [vmem:[#allocation3 + $0x8c] sm:$0xf] %vm614_vm10, %v4840_v14 }
 0xa03   : > { %v4919_v11 = vsel %vm626_vm11, %v4911_v31, %v4912_v21  ;;  %v8621_v31 = vld [vmem:[#allocation3 + $0x50] sm:$0xf0] }
 0xa04   : > { %v4920_v47 = vsel %vm662_vm3, %v10487_v43, %v4919_v11  ;;  %v4855_v13 = vsel %vm626_vm11, %v4847_v28, %v4848_v10  ;;  %v8019_v28 = vor.u32 %v8624_v17, %v8018_v34  ;;  %v8023_v10 = vor.u32 %v8623_v19, %v8020_v61  ;;  %v8006_v11 = vld [vmem:[#allocation3 + $0x48] sm:$0xf] }
 0xa05   : > { %4935 = vst [vmem:[#allocation3 + $0xb4] sm:$0xff] %v4920_v47  ;;  %v4856_v51 = vsel %vm645_vm4, %v10444_v5, %v4855_v13  ;;  %v8054_v5 = vld [vmem:[#allocation3 + $0xa8] sm:$0xf]  ;;  %v8008_v47 = vld [vmem:[#allocation3 + $0x54] sm:$0xf0]  ;;  %v4969_v13 = vrot.slane %v10584_v60, 4 }
 0xa06   : > { %4871 = vst [vmem:[#allocation3 + $0x84] sm:$0xff] %v4856_v51  ;;  %v8150_v19 = vld [vmem:[#allocation3 + $0x168] sm:$0xf] }
 0xa08   : > { %v10596_v9 = vpop.permute.xlu2 %4959  ;;  %v5020_v3 = vpop.permute.xlu1 %5019 }
 0xa09   : > { %4996 = vst.msk [vmem:[#allocation3 + $0xd4] sm:$0xf] %vm614_vm10, %v10596_v9  ;;  %v5034_v56 = vrot.slane %v5020_v3, 4  ;;  %v5024_v63 = vpop.permute.xlu0 %5023 }
 0xa0a   : > { %5058 = vst.msk [vmem:[#allocation3 + $0xf8] sm:$0xf] %vm614_vm10, %v5020_v3  ;;  %v5036_v43 = vrot.slane %v5024_v63, 4  ;;  %v8620_v3 = vld [vmem:[#allocation3 + $0x4c] sm:$0xf] }
 0xa0b   : > { %v5041_v22 = vsel %vm626_vm11, %v5033_v52, %v5034_v56  ;;  %5060 = vst.msk [vmem:[#allocation3 + $0x104] sm:$0xf] %vm614_vm10, %v5024_v63 }
 0xa0c   : > { %v5042_v40 = vsel %vm11189_vm0, %v10437_v12, %v5041_v22  ;;  %v5043_v48 = vsel %vm626_vm11, %v5035_v41, %v5036_v43  ;;  %v8633_v25 = vld [vmem:[#allocation3 + $0xb0] sm:$0xf0]  ;;  %v8056_v59 = vld [vmem:[#allocation3 + $0xb4] sm:$0xf0]  ;;  %vm11194_vm0 = vmmov %vm11192_vm5  ;;  %v8007_v41 = vor.u32 %v8621_v31, %v8006_v11  ;;  %v8011_v43 = vor.u32 %v8620_v3, %v8008_v47 }
 0xa0d   : > { %5057 = vst [vmem:[#allocation3 + $0xf0] sm:$0xff] %v5042_v40  ;;  %v5044_v8 = vsel %vm11190_vm6, %v10543_v0, %v5043_v48  ;;  %v8055_v1 = vor.u32 %v8633_v25, %v8054_v5  ;;  %v8059_v58 = vor.u32 %v8632_v35, %v8056_v59  ;;  %v8627_v38 = vld [vmem:[#allocation3 + $0x80] sm:$0xf0]  ;;  %v8032_v33 = vld [vmem:[#allocation3 + $0x84] sm:$0xf0]  ;;  %v5167_v59 = vrot.slane %v10523_v39, 4 }
 0xa0e   : > { %5059 = vst [vmem:[#allocation3 + $0xfc] sm:$0xff] %v5044_v8  ;;  %v8031_v29 = vor.u32 %v8627_v38, %v8030_v45  ;;  %v8035_v57 = vor.u32 %v8626_v46, %v8032_v33  ;;  %v8618_v22 = vld [vmem:[#allocation3 + $0x38] sm:$0xf0]  ;;  %v7996_v5 = vld [vmem:[#allocation3 + $0x3c] sm:$0xf0]  ;;  %vm11195_vm6 = vcmask 744448  }
 0xa0f   : > { %5687 = vmatpush.bf16.msrb.mxu2 %v8055_v1  ;;  %5744 = vmatpush.bf16.msra.mxu1 %v8059_v58  ;;  %v7994_v25 = vld [vmem:[#allocation3 + $0x30] sm:$0xf]  ;;  %v8617_v35 = vld [vmem:[#allocation3 + $0x34] sm:$0xf]  ;;  %v8612_v38 = vld [vmem:[#allocation3 + $0x8] sm:$0xf0] }
 0xa10   : > { %v5032_v12 = vpop.permute.xlu2 %5031  ;;  %v4962_v24 = vpop.permute.xlu1 %4961  ;;  %v7999_v58 = vor.u32 %v8617_v35, %v7996_v5  ;;  %v7972_v33 = vld [vmem:[#allocation3 + $0xc] sm:$0xf0]  ;;  %v8146_v31 = vld [vmem:[#allocation3 + $0x158] sm:$0xf]  ;;  %v8134_v35 = vld [vmem:[#allocation3 + $0x140] sm:$0xf] }
 0xa11   : > { %v5040_v30 = vrot.slane %v5032_v12, 4  ;;  %5064 = vst.msk [vmem:[#allocation3 + $0x11c] sm:$0xf] %vm614_vm10, %v5032_v12  ;;  %v4973_v0 = vrot.slane %v4962_v24, 4  ;;  %v10613_v62 = vpop.permute.xlu0 %4965  ;;  %v8158_v45 = vld [vmem:[#allocation3 + $0x170] sm:$0xf] }
 0xa12   : > { %v8138_v3 = vld [vmem:[#allocation3 + $0x150] sm:$0xf] }
 0xa13   : > { %v5047_v50 = vsel %vm626_vm11, %v5039_v44, %v5040_v30  ;;  %v4981_v18 = vsel %vm626_vm11, %v4973_v0, %v4974_v4  ;;  %5688 = vmatpush.bf16.msrb.mxu2 %v8043_v27  ;;  %5745 = vmatpush.bf16.msra.mxu1 %v8047_v20  ;;  %v7984_v44 = vld [vmem:[#allocation3 + $0x24] sm:$0xf0]  ;;  %v8614_v4 = vld [vmem:[#allocation3 + $0x1c] sm:$0xf]  ;;  %v7983_v0 = vor.u32 %v8615_v42, %v7982_v53 }
 0xa14   : > { %v5048_v6 = vsel %vm11191_vm12, %v10519_v54, %v5047_v50  ;;  %v4982_v49 = vsel %vm11192_vm5, %v4962_v24, %v4981_v18  ;;  %v4972_v54 = vrot.slane %v10596_v9, 4  ;;  %vm11196_vm12 = vcmask 752640   ;;  %v7946_v50 = vld [vmem:[#allocation7 + $0x30] sm:$0xf]  ;;  %v8606_v18 = vld [vmem:[#allocation7 + $0x38] sm:$0xf0] }
 0xa15   : > { %5063 = vst [vmem:[#allocation3 + $0x114] sm:$0xff] %v5048_v6  ;;  %v7987_v20 = vor.u32 %v8614_v4, %v7984_v44  ;;  %v10645_v34 = vor.u32 %v8606_v18, %v7946_v50  ;;  %vm11197_vm5 = vcmask 736256   ;;  %v8126_v44 = vld [vmem:[#allocation3 + $0x138] sm:$0xf]  ;;  %v8122_v4 = vld [vmem:[#allocation3 + $0x128] sm:$0xf] }
 0xa16   : > { %4997 = vst [vmem:[#allocation3 + $0xd8] sm:$0xff] %v4982_v49  ;;  %v7970_v49 = vld [vmem:[#allocation3] sm:$0xf]  ;;  %v8609_v50 = vld [vmem:[#allocation7 + $0x50] sm:$0xf0] }
 0xa17   : > { %5689 = vmatpush.bf16.msrb.mxu2 %v8031_v29  ;;  %5746 = vmatpush.bf16.msra.mxu1 %v8035_v57  ;;  %v7971_v57 = vor.u32 %v8612_v38, %v7970_v49  ;;  %v8647_v49 = vld [vmem:[#allocation3 + $0x124] sm:$0xf] }
 0xa18   : > { %v10620_v7 = vpop.permute.xlu2 %5221  ;;  %v4958_v2 = vpop.permute.xlu1 %4957  ;;  %v8646_v38 = vld [vmem:[#allocation3 + $0x118] sm:$0xf0] }
 0xa19   : > { %v4971_v21 = vrot.slane %v4958_v2, 4  ;;  %v4956_v14 = vpop.permute.xlu0 %4955 }
 0xa1a   : > { %v4970_v51 = vrot.slane %v4956_v14, 4  ;;  %4994 = vst.msk [vmem:[#allocation3 + $0xc8] sm:$0xf] %vm614_vm10, %v4956_v14  ;;  %v8656_v14 = vld [vmem:[#allocation3 + $0x16c] sm:$0xf] }
 0xa1b   : > { %v4979_v52 = vsel %vm626_vm11, %v4971_v21, %v4972_v54  ;;  %5690 = vmatpush.bf16.msrb.mxu2 %v8019_v28  ;;  %5747 = vmatpush.bf16.msra.mxu1 %v8023_v10 }
 0xa1c   : > { %v4980_v56 = vsel %vm11193_vm14, %v4958_v2, %v4979_v52  ;;  %v4977_v9 = vsel %vm626_vm11, %v4969_v13, %v4970_v51  ;;  %v8655_v13 = vld [vmem:[#allocation3 + $0x160] sm:$0xf0]  ;;  %v8653_v52 = vld [vmem:[#allocation3 + $0x154] sm:$0xf]  ;;  %vm11198_vm14 = vmmov %vm11197_vm5 }
 0xa1d   : > { %4995 = vst [vmem:[#allocation3 + $0xcc] sm:$0xff] %v4980_v56  ;;  %v4978_v63 = vsel %vm11194_vm0, %v10584_v60, %v4977_v9  ;;  %v7995_v60 = vor.u32 %v8618_v22, %v7994_v25  ;;  %v8147_v51 = vor.u32 %v8655_v13, %v8146_v31  ;;  %vm11199_vm0 = vmmov %vm11197_vm5  ;;  %v8098_v31 = vld [vmem:[#allocation3 + $0xf8] sm:$0xf] }
 0xa1e   : > { %4993 = vst [vmem:[#allocation3 + $0xc0] sm:$0xff] %v4978_v63  ;;  %v8654_v63 = vld [vmem:[#allocation3 + $0x158] sm:$0xf0] }
 0xa1f   : > { %5691 = vmatpush.bf16.msrb.mxu2 %v8007_v41  ;;  %5748 = vmatpush.bf16.msra.mxu1 %v8011_v43  ;;  %v8140_v41 = vld [vmem:[#allocation3 + $0x15c] sm:$0xf0] }
 0xa20   : > { %v10630_v40 = vpop.permute.xlu2 %5211  ;;  %v5160_v48 = vpop.permute.xlu1 %5159  ;;  %v8143_v25 = vor.u32 %v8653_v52, %v8140_v41 }
 0xa21   : > { %5250 = vst.msk [vmem:[#allocation3 + $0x188] sm:$0xf] %vm614_vm10, %v10630_v40  ;;  %v5168_v8 = vrot.slane %v5160_v48, 4  ;;  %v5096_v1 = vpop.permute.xlu0 %5095  ;;  %v5226_v43 = vrot.slane %v10630_v40, 4 }
 0xa22   : > { %5192 = vst.msk [vmem:[#allocation3 + $0x17c] sm:$0xf] %vm614_vm10, %v5160_v48  ;;  %v5104_v15 = vrot.slane %v5096_v1, 4  ;;  %v8139_v48 = vor.u32 %v8654_v63, %v8138_v3  ;;  %v8092_v63 = vld [vmem:[#allocation3 + $0xfc] sm:$0xf0] }
 0xa23   : > { %v5175_v12 = vsel %vm626_vm11, %v5167_v59, %v5168_v8  ;;  %5128 = vst.msk [vmem:[#allocation3 + $0x14c] sm:$0xf] %vm614_vm10, %v5096_v1  ;;  %5692 = vmatpush.bf16.msrb.mxu2 %v7995_v60  ;;  %5749 = vmatpush.bf16.msra.mxu1 %v7999_v58  ;;  %v5231_v8 = vrot.slane %v10620_v7, 4 }
 0xa24   : > { %v5176_v24 = vsel %vm11195_vm6, %v10523_v39, %v5175_v12  ;;  %v5111_v27 = vsel %vm626_vm11, %v5103_v55, %v5104_v15  ;;  %v8611_v39 = vld [vmem:[#allocation3 + $0x4] sm:$0xf]  ;;  %v8649_v55 = vld [vmem:[#allocation3 + $0x130] sm:$0xf0]  ;;  %v8650_v12 = vld [vmem:[#allocation3 + $0x13c] sm:$0xf] }
 0xa25   : > { %5191 = vst [vmem:[#allocation3 + $0x174] sm:$0xff] %v5176_v24  ;;  %v5112_v30 = vsel %vm11196_vm12, %v10464_v23, %v5111_v27  ;;  %v7975_v17 = vor.u32 %v8611_v39, %v7972_v33  ;;  %v7958_v33 = vld [vmem:[#allocation7 + $0x48] sm:$0xf]  ;;  %v4975_v39 = vrot.slane %v10613_v62, 4  ;;  %vm11200_vm6 = vcmask 891904   ;;  %vm11201_vm12 = vmmov %vm11199_vm0 }
 0xa26   : > { %5127 = vst [vmem:[#allocation3 + $0x144] sm:$0xff] %v5112_v30  ;;  %v8123_v30 = vor.u32 %v8649_v55, %v8122_v4  ;;  %v8638_v55 = vld [vmem:[#allocation3 + $0xdc] sm:$0xf]  ;;  %v8635_v4 = vld [vmem:[#allocation3 + $0xc4] sm:$0xf] }
 0xa27   : > { %5693 = vmatpush.bf16.msrb.mxu2 %v7983_v0  ;;  %5750 = vmatpush.bf16.msra.mxu1 %v7987_v20  ;;  %v8648_v0 = vld [vmem:[#allocation3 + $0x128] sm:$0xf0]  ;;  %v8116_v20 = vld [vmem:[#allocation3 + $0x12c] sm:$0xf0] }
 0xa28   : > { %v5220_v6 = vpop.permute.xlu1 %5219 }
 0xa29   : > { %v5230_v46 = vrot.slane %v5220_v6, 4  ;;  %5254 = vst.msk [vmem:[#allocation3 + $0x1a0] sm:$0xf] %vm614_vm10, %v5220_v6  ;;  %v5218_v29 = vpop.permute.xlu0 %5217  ;;  %v8658_v23 = vld [vmem:[#allocation3 + $0x178] sm:$0xf0] }
 0xa2a   : > { %v5229_v61 = vrot.slane %v5218_v29, 4  ;;  %v8159_v2 = vor.u32 %v8658_v23, %v8158_v45  ;;  %v8652_v56 = vld [vmem:[#allocation3 + $0x148] sm:$0xf0]  ;;  %v8114_v6 = vld [vmem:[#allocation3 + $0x120] sm:$0xf] }
 0xa2b   : > { %5694 = vmatpush.bf16.msrb.mxu2 %v7971_v57  ;;  %5751 = vmatpush.bf16.msra.mxu1 %v7975_v17  ;;  %v8135_v60 = vor.u32 %v8652_v56, %v8134_v35  ;;  %v10661_v17 = vor.u32 %v8609_v50, %v7958_v33  ;;  %v8645_v23 = vld [vmem:[#allocation3 + $0x110] sm:$0xf0] }
 0xa2c   : > { %v5237_v54 = vsel %vm626_vm11, %v5229_v61, %v5230_v46  ;;  %v8657_v21 = vld [vmem:[#allocation3 + $0x170] sm:$0xf0]  ;;  %v8152_v28 = vld [vmem:[#allocation3 + $0x174] sm:$0xf0]  ;;  %v8119_v46 = vor.u32 %v8647_v49, %v8116_v20 }
 0xa2d   : > { %v5238_v10 = vsel %vm11197_vm5, %v5218_v29, %v5237_v54  ;;  %v8151_v11 = vor.u32 %v8657_v21, %v8150_v19  ;;  %v8155_v47 = vor.u32 %v8656_v14, %v8152_v28  ;;  %v8651_v59 = vld [vmem:[#allocation3 + $0x140] sm:$0xf0]  ;;  %v8128_v58 = vld [vmem:[#allocation3 + $0x144] sm:$0xf0]  ;;  %v8110_v29 = vld [vmem:[#allocation3 + $0x110] sm:$0xf] }
 0xa2e   : > { %5253 = vst [vmem:[#allocation3 + $0x198] sm:$0xff] %v5238_v10  ;;  %5695 = vmatmul.bf16.vlgmr.msrb.gmra.mxu2 %v10645_v34  ;;  %5752 = vmatmul.bf16.vlgmr.msra.gmra.mxu1 %v10645_v34  ;;  %v8127_v27 = vor.u32 %v8651_v59, %v8126_v44  ;;  %v8131_v53 = vor.u32 %v8650_v12, %v8128_v58  ;;  %v8104_v61 = vld [vmem:[#allocation3 + $0x114] sm:$0xf0]  ;;  %v8102_v19 = vld [vmem:[#allocation3 + $0x108] sm:$0xf] }
 0xa2f   : > { %5820 = vmatpush.bf16.msrb.mxu1 %v8159_v2  ;;  %5706 = vmatpush.bf16.msrb.mxu3 %v8151_v11  ;;  %v8111_v57 = vor.u32 %v8646_v38, %v8110_v29  ;;  %v8643_v54 = vld [vmem:[#allocation3 + $0x100] sm:$0xf0]  ;;  %v8644_v14 = vld [vmem:[#allocation3 + $0x10c] sm:$0xf]  ;;  %v8090_v28 = vld [vmem:[#allocation3 + $0xf0] sm:$0xf]  ;;  %v8103_v11 = vor.u32 %v8645_v23, %v8102_v19 }
 0xa30   : > { %5763 = vmatpush.bf16.msra.mxu2 %v8155_v47  ;;  %v5210_v9 = vpop.permute.xlu1 %5209  ;;  %v8642_v10 = vld [vmem:[#allocation3 + $0xf8] sm:$0xf0]  ;;  %v8099_v56 = vor.u32 %v8643_v54, %v8098_v31  ;;  %v8636_v12 = vld [vmem:[#allocation3 + $0xc8] sm:$0xf0]  ;;  %v7948_v38 = vld [vmem:[#allocation7 + $0x3c] sm:$0xf0] }
 0xa31   : > { %v5225_v22 = vrot.slane %v5210_v9, 4  ;;  %v5224_v5 = vpop.permute.xlu0 %5223  ;;  %v8091_v41 = vor.u32 %v8642_v10, %v8090_v28  ;;  %v8607_v23 = vld [vmem:[#allocation7 + $0x40] sm:$0xf0]  ;;  %v8170_v28 = vld [vmem:[#allocation3 + $0x188] sm:$0xf] }
 0xa32   : > { %v5232_v1 = vrot.slane %v5224_v5, 4  ;;  %5256 = vst.msk [vmem:[#allocation3 + $0x1ac] sm:$0xf] %vm614_vm10, %v5224_v5 }
 0xa33   : > { %5821 = vmatpush.bf16.msrb.mxu1 %v8147_v51  ;;  %v5233_v42 = vsel %vm626_vm11, %v5225_v22, %v5226_v43  ;;  %5707 = vmatpush.bf16.msrb.mxu3 %v8139_v48  ;;  %v8107_v51 = vor.u32 %v8644_v14, %v8104_v61  ;;  %v8086_v43 = vld [vmem:[#allocation3 + $0xe0] sm:$0xf] }
 0xa34   : > { %5764 = vmatpush.bf16.msra.mxu2 %v8143_v25  ;;  %v5234_v40 = vsel %vm11198_vm14, %v5210_v9, %v5233_v42  ;;  %v5239_v15 = vsel %vm626_vm11, %v5231_v8, %v5232_v1  ;;  %v8641_v9 = vld [vmem:[#allocation3 + $0xf4] sm:$0xf]  ;;  %v8078_v8 = vld [vmem:[#allocation3 + $0xd8] sm:$0xf]  ;;  %v8074_v1 = vld [vmem:[#allocation3 + $0xc8] sm:$0xf] }
 0xa35   : > { %5249 = vst [vmem:[#allocation3 + $0x180] sm:$0xff] %v5234_v40  ;;  %v5240_v24 = vsel %vm11199_vm0, %v10620_v7, %v5239_v15  ;;  %v8115_v7 = vor.u32 %v8648_v0, %v8114_v6  ;;  %v8174_v47 = vld [vmem:[#allocation3 + $0x198] sm:$0xf]  ;;  %v8095_v25 = vor.u32 %v8641_v9, %v8092_v63  ;;  %v8182_v6 = vld [vmem:[#allocation3 + $0x1a0] sm:$0xf] }
 0xa36   : > { %5255 = vst [vmem:[#allocation3 + $0x1a4] sm:$0xff] %v5240_v24  ;;  %v8068_v24 = vld [vmem:[#allocation3 + $0xcc] sm:$0xf0]  ;;  %v8625_v9 = vld [vmem:[#allocation3 + $0x70] sm:$0xf0] }
 0xa37   : > { %5822 = vmatpush.bf16.msrb.mxu1 %v8135_v60  ;;  %5708 = vmatpush.bf16.msrb.mxu3 %v8127_v27  ;;  %v8637_v60 = vld [vmem:[#allocation3 + $0xd0] sm:$0xf0]  ;;  %v8071_v50 = vor.u32 %v8635_v4, %v8068_v24  ;;  %v8608_v63 = vld [vmem:[#allocation7 + $0x4c] sm:$0xf] }
 0xa38   : > { %5765 = vmatpush.bf16.msra.mxu2 %v8131_v53  ;;  %v4968_v18 = vpop.permute.xlu1 %4967  ;;  %v8075_v27 = vor.u32 %v8637_v60, %v8074_v1  ;;  %v8066_v53 = vld [vmem:[#allocation3 + $0xc0] sm:$0xf]  ;;  %v8619_v1 = vld [vmem:[#allocation3 + $0x40] sm:$0xf0]  ;;  %v8002_v60 = vld [vmem:[#allocation3 + $0x38] sm:$0xf] }
 0xa39   : > { %v4976_v45 = vrot.slane %v4968_v18, 4  ;;  %5000 = vst.msk [vmem:[#allocation3 + $0xec] sm:$0xf] %vm614_vm10, %v4968_v18  ;;  %v5214_v3 = vpop.permute.xlu0 %5213  ;;  %v8664_v20 = vld [vmem:[#allocation3 + $0x1a8] sm:$0xf0]  ;;  %v8067_v33 = vor.u32 %v8636_v12, %v8066_v53 }
 0xa3a   : > { %v5227_v5 = vrot.slane %v5214_v3, 4  ;;  %v8662_v18 = vld [vmem:[#allocation3 + $0x19c] sm:$0xf] }
 0xa3b   : > { %5823 = vmatpush.bf16.msrb.mxu1 %v8123_v30  ;;  %v4983_v2 = vsel %vm626_vm11, %v4975_v39, %v4976_v45  ;;  %5709 = vmatpush.bf16.msrb.mxu3 %v8115_v7  ;;  %v8605_v30 = vld [vmem:[#allocation7 + $0x34] sm:$0xf]  ;;  %v8183_v39 = vor.u32 %v8664_v20, %v8182_v6  ;;  %v8634_v7 = vld [vmem:[#allocation3 + $0xb8] sm:$0xf0] }
 0xa3c   : > { %5766 = vmatpush.bf16.msra.mxu2 %v8119_v46  ;;  %v4984_v21 = vsel %vm11200_vm6, %v10613_v62, %v4983_v2  ;;  %v7951_v45 = vor.u32 %v8605_v30, %v7948_v38  ;;  %v7954_v46 = vld [vmem:[#allocation7 + $0x38] sm:$0xf]  ;;  %v8162_v29 = vld [vmem:[#allocation3 + $0x180] sm:$0xf] }
 0xa3d   : > { %4999 = vst [vmem:[#allocation3 + $0xe4] sm:$0xff] %v4984_v21  ;;  %v8663_v13 = vld [vmem:[#allocation3 + $0x1a0] sm:$0xf0]  ;;  %v8176_v0 = vld [vmem:[#allocation3 + $0x1a4] sm:$0xf0]  ;;  %v7955_v10 = vor.u32 %v8607_v23, %v7954_v46 }
 0xa3e   : > { %5700 = vmatmul.bf16.gmra.mxu2 %v10661_v17  ;;  %5757 = vmatmul.bf16.gmra.mxu1 %v10661_v17  ;;  %v8175_v52 = vor.u32 %v8663_v13, %v8174_v47  ;;  %v8179_v49 = vor.u32 %v8662_v18, %v8176_v0  ;;  %v8062_v21 = vld [vmem:[#allocation3 + $0xb0] sm:$0xf]  ;;  %v8050_v47 = vld [vmem:[#allocation3 + $0x98] sm:$0xf]  ;;  %v8631_v13 = vld [vmem:[#allocation3 + $0xa0] sm:$0xf0] }
 0xa3f   : > { %5824 = vmatpush.bf16.msrb.mxu1 %v8111_v57  ;;  %5710 = vmatpush.bf16.msrb.mxu3 %v8103_v11  ;;  %v8659_v57 = vld [vmem:[#allocation3 + $0x184] sm:$0xf]  ;;  %v8063_v14 = vor.u32 %v8634_v7, %v8062_v21 }
 0xa40   : > { %5767 = vmatpush.bf16.msra.mxu2 %v8107_v51  ;;  %5731 = vmatpush.bf16.msra.mxu0 %v8175_v52  ;;  %v5216_v62 = vpop.permute.xlu1 %5215  ;;  %v8640_v22 = vld [vmem:[#allocation3 + $0xe8] sm:$0xf0]  ;;  %v8051_v51 = vor.u32 %v8631_v13, %v8050_v47  ;;  %v8038_v52 = vld [vmem:[#allocation3 + $0x80] sm:$0xf] }
 0xa41   : > { %v5228_v48 = vrot.slane %v5216_v62, 4  ;;  %5252 = vst.msk [vmem:[#allocation3 + $0x194] sm:$0xf] %vm614_vm10, %v5216_v62  ;;  %v8087_v35 = vor.u32 %v8640_v22, %v8086_v43  ;;  %v7960_v62 = vld [vmem:[#allocation7 + $0x54] sm:$0xf0] }
 0xa42   : > { %v7963_v22 = vor.u32 %v8608_v63, %v7960_v62 }
 0xa43   : > { %5825 = vmatpush.bf16.msrb.mxu1 %v8099_v56  ;;  %v5235_v59 = vsel %vm626_vm11, %v5227_v5, %v5228_v48  ;;  %5711 = vmatpush.bf16.msrb.mxu3 %v8091_v41  ;;  %v8026_v41 = vld [vmem:[#allocation3 + $0x68] sm:$0xf]  ;;  %v8622_v5 = vld [vmem:[#allocation3 + $0x58] sm:$0xf0]  ;;  %v8014_v48 = vld [vmem:[#allocation3 + $0x50] sm:$0xf] }
 0xa44   : > { %5768 = vmatpush.bf16.msra.mxu2 %v8095_v25  ;;  %v5236_v58 = vsel %vm11201_vm12, %v5214_v3, %v5235_v59  ;;  %v8639_v42 = vld [vmem:[#allocation3 + $0xe0] sm:$0xf0]  ;;  %v8080_v40 = vld [vmem:[#allocation3 + $0xe4] sm:$0xf0]  ;;  %v8628_v3 = vld [vmem:[#allocation3 + $0x88] sm:$0xf0]  ;;  %v8027_v43 = vor.u32 %v8625_v9, %v8026_v41  ;;  %v8015_v59 = vor.u32 %v8622_v5, %v8014_v48 }
 0xa45   : > { %5251 = vst [vmem:[#allocation3 + $0x18c] sm:$0xff] %v5236_v58  ;;  %v8079_v15 = vor.u32 %v8639_v42, %v8078_v8  ;;  %v8083_v44 = vor.u32 %v8638_v55, %v8080_v40  ;;  %v8039_v56 = vor.u32 %v8628_v3, %v8038_v52  ;;  %v7966_v25 = vld [vmem:[#allocation7 + $0x50] sm:$0xf]  ;;  %v8003_v58 = vor.u32 %v8619_v1, %v8002_v60  ;;  %v8616_v42 = vld [vmem:[#allocation3 + $0x28] sm:$0xf0]  ;;  %v5859_v9 = vld [vmem:[#allocation4 + $0x8] sm:$0xff] }
 0xa46   : > { %v7990_v55 = vld [vmem:[#allocation3 + $0x20] sm:$0xf]  ;;  %v5883_v5 = vld [vmem:[#allocation5 + $0x8] sm:$0xff] }
 0xa47   : > { %5826 = vmatpush.bf16.msrb.mxu1 %v8087_v35  ;;  %5712 = vmatpush.bf16.msrb.mxu3 %v8079_v15  ;;  %v8610_v35 = vld [vmem:[#allocation7 + $0x58] sm:$0xf0]  ;;  %v7991_v40 = vor.u32 %v8616_v42, %v7990_v55  ;;  %v8613_v15 = vld [vmem:[#allocation3 + $0x10] sm:$0xf0] }
 0xa48   : > { %5769 = vmatpush.bf16.msra.mxu2 %v8083_v44  ;;  %v8661_v19 = vld [vmem:[#allocation3 + $0x190] sm:$0xf0]  ;;  %v7967_v8 = vor.u32 %v8610_v35, %v7966_v25  ;;  %v7978_v44 = vld [vmem:[#allocation3 + $0x8] sm:$0xf]  ;;  %v5346_v46 = vpop.permute.xlu1 %5345 }
 0xa49   : > { %v8171_v11 = vor.u32 %v8661_v19, %v8170_v28  ;;  %v7979_v12 = vor.u32 %v8613_v15, %v7978_v44  ;;  %v5858_v28 = vld [vmem:[#allocation4] sm:$0xff]  ;;  %v5861_v35 = vld [vmem:[#allocation4 + $0x18] sm:$0xff] }
 0xa4b   : > { %5827 = vmatpush.bf16.msrb.mxu1 %v8075_v27  ;;  %5713 = vmatpush.bf16.msrb.mxu3 %v8067_v33 }
 0xa4c   : > { %5770 = vmatpush.bf16.msra.mxu2 %v8071_v50  ;;  %v8660_v61 = vld [vmem:[#allocation3 + $0x188] sm:$0xf0]  ;;  %v8164_v2 = vld [vmem:[#allocation3 + $0x18c] sm:$0xf0] }
 0xa4d   : > { %v8163_v31 = vor.u32 %v8660_v61, %v8162_v29  ;;  %v8167_v54 = vor.u32 %v8659_v57, %v8164_v2 }
 0xa4e   : > { %5714 = vmatmul.bf16.vlgmr.msrb.gmra.mxu3 %v7951_v45  ;;  %5828 = vmatmul.bf16.vlgmr.msrb.gmra.mxu1 %v7951_v45 }
 0xa4f   : > { %5788 = vmatpush.bf16.msra.mxu3 %v8179_v49  ;;  %5771 = vmatmul.bf16.vlgmr.msra.gmra.mxu2 %v7951_v45 }
 0xa50   : > { %5845 = vmatpush.bf16.msrb.mxu2 %v8183_v39  ;;  %5732 = vmatpush.bf16.msra.mxu0 %v8163_v31 }
 0xa53   : > { %5789 = vmatpush.bf16.msra.mxu3 %v8167_v54  ;;  %8184 = vmatmul.msk.bf16.vlgmr.msra.gmra.mxu0 %vm1047_vm2, %v7955_v10 }
 0xa54   : > { %5801 = vmatpush.bf16.msrb.mxu0 %v8063_v14  ;;  %5846 = vmatpush.bf16.msrb.mxu2 %v8171_v11 }
 0xa58   : > { %5802 = vmatpush.bf16.msrb.mxu0 %v8051_v51 }
 0xa5c   : > { %5803 = vmatpush.bf16.msrb.mxu0 %v8039_v56  ;;  %v5882_v56 = vld [vmem:[#allocation5] sm:$0xff] }
 0xa5e   : > { %5719 = vmatmul.bf16.gmra.mxu3 %v7963_v22  ;;  %5833 = vmatmul.bf16.gmra.mxu1 %v7963_v22 }
 0xa5f   : > { %5776 = vmatmul.bf16.gmra.mxu2 %v7963_v22 }
 0xa60   : > { %5804 = vmatpush.bf16.msrb.mxu0 %v8027_v43 }
 0xa63   : > { %8185 = vmatmul.msk.bf16.gmra.mxu0 %vm1047_vm2, %v7967_v8 }
 0xa64   : > { %5805 = vmatpush.bf16.msrb.mxu0 %v8015_v59 }
 0xa68   : > { %5806 = vmatpush.bf16.msrb.mxu0 %v8003_v58 }
 0xa6c   : > { %5807 = vmatpush.bf16.msrb.mxu0 %v7991_v40 }
 0xa6e   : > { %8186 = vmatmul.msk.bf16.vlgmr.msra.gmra.mxu3 %vm1047_vm2, %v7955_v10 }
 0xa6f   : > { %8188 = vmatmul.msk.bf16.vlgmr.msrb.gmra.mxu2 %vm1047_vm2, %v7955_v10 }
 0xa70   : > { %5808 = vmatpush.bf16.msrb.mxu0 %v7979_v12 }
 0xa73   : > { %5809 = vmatmul.bf16.vlgmr.msrb.gmra.mxu0 %v10645_v34 }
 0xa7e   : > { %8187 = vmatmul.msk.bf16.gmra.mxu3 %vm1047_vm2, %v7967_v8 }
 0xa7f   : > { %8189 = vmatmul.msk.bf16.gmra.mxu2 %vm1047_vm2, %v7967_v8 }
 0xa83   : > { %5814 = vmatmul.bf16.gmra.mxu0 %v10661_v17  ;;  %v5356_v17 = vpop.permute.xlu2 %5355 }
 0xa8b   : > { %v5351_v54 = vpop.permute.xlu2 %5350 }
 0xaab   : > { %v5753_v4 = vpop.f32.mrf.mxu1 }
 0xaac   : > { %v5754_v21 = vadd.f32 %v5753_v4, %v5346_v46 }
 0xab1   : > { %v5696_v24 = vpop.f32.mrf.mxu2 }
 0xab2   : > { %v5697_v29 = vadd.f32 %v5696_v24, %v5346_v46  ;;  %v5885_v24 = vld [vmem:[#allocation5 + $0x18] sm:$0xff] }
 0xab3   : > { %v5755_v0 = vpop.f32.mrf.mxu1 }
 0xab4   : > { %v5756_v48 = vadd.f32 %v5755_v0, %v5351_v54 }
 0xab9   : > { %v5698_v27 = vpop.f32.mrf.mxu2 }
 0xaba   : > { %v5699_v14 = vadd.f32 %v5698_v27, %v5351_v54 }
 0xabb   : > { %v5758_v50 = vpop.f32.mrf.mxu1 }
 0xac1   : > { %v5701_v53 = vpop.f32.mrf.mxu2 }
 0xac2   : > { %v5702_v22 = vadd.f32 %v5701_v53, %v5356_v17  ;;  %v5862_v53 = vld [vmem:[#allocation4 + $0x20] sm:$0xff] }
 0xac3   : > { %v10681_v39 = vpop.f32.mrf.mxu1 }
 0xac9   : > { %v10679_v30 = vpop.f32.mrf.mxu2 }
 0xacb   : > { %v5829_v61 = vpop.f32.mrf.mxu1 }
 0xad0   : > { %v5734_v20 = vpop.f32.mrf.mxu0 }
 0xad1   : > { %v5715_v38 = vpop.f32.mrf.mxu3 }
 0xad2   : > { %v5772_v33 = vpop.f32.mrf.mxu2  ;;  %v5716_v23 = vadd.f32 %v5715_v38, %v5697_v29  ;;  %v5759_v38 = vadd.f32 %v5758_v50, %v5356_v17 }
 0xad3   : > { %v5773_v47 = vadd.f32 %v5772_v33, %v5754_v21  ;;  %v5831_v63 = vpop.f32.mrf.mxu1 }
 0xad4   : > { %v5735_v31 = vadd.f32 %v5734_v20, %v5716_v23  ;;  %v5361_v20 = vpop.permute.xlu0 %5360 }
 0xad6   : > { %v5870_v11 = vadd.f32 %v5858_v28, %v5735_v31 }
 0xad8   : > { %v5736_v18 = vpop.f32.mrf.mxu0  ;;  %v5894_v62 = vadd.f32 %v5882_v56, %v5870_v11  ;;  %v5865_v56 = vld [vmem:[#allocation4 + $0x38] sm:$0xff] }
 0xad9   : > { %v5717_v6 = vpop.f32.mrf.mxu3 }
 0xada   : > { %v5774_v34 = vpop.f32.mrf.mxu2  ;;  %v5718_v13 = vadd.f32 %v5717_v6, %v5699_v14  ;;  %v5906_v42 = vsel %vm9033_vm13, %v5894_v62, 0.0  ;;  %v5761_v62 = vadd.f32 %v10681_v39, %v5361_v20 }
 0xadb   : > { %v5775_v60 = vadd.f32 %v5774_v34, %v5756_v48  ;;  %v5834_v6 = vpop.f32.mrf.mxu1  ;;  %v5704_v34 = vadd.f32 %v10679_v30, %v5361_v20 }
 0xadc   : > { %v5737_v41 = vadd.f32 %v5736_v18, %v5718_v13  ;;  %v5886_v18 = vld [vmem:[#allocation5 + $0x20] sm:$0xff] }
 0xade   : > { %v5873_v1 = vadd.f32 %v5861_v35, %v5737_v41  ;;  %v5890_v35 = vld [vmem:[#allocation5 + $0x40] sm:$0xff] }
 0xae0   : > { %v5739_v49 = vpop.f32.mrf.mxu0  ;;  %v5897_v4 = vadd.f32 %v5885_v24, %v5873_v1 }
 0xae1   : > { %v5720_v45 = vpop.f32.mrf.mxu3 }
 0xae2   : > { %v5777_v7 = vpop.f32.mrf.mxu2  ;;  %v5721_v59 = vadd.f32 %v5720_v45, %v5702_v22  ;;  %v5864_v45 = vld [vmem:[#allocation4 + $0x30] sm:$0xff]  ;;  %v5909_v28 = vsel %vm9033_vm13, %v5897_v4, 0.0 }
 0xae3   : > { %v5778_v23 = vadd.f32 %v5777_v7, %v5759_v38 }
 0xae4   : > { %v5740_v27 = vadd.f32 %v5739_v49, %v5721_v59 }
 0xae6   : > { %v5876_v29 = vadd.f32 %v5864_v45, %v5740_v27 }
 0xae8   : > { %v10683_v57 = vpop.f32.mrf.mxu0 }
 0xae9   : > { %v5722_v2 = vpop.f32.mrf.mxu3 }
 0xaea   : > { %v10685_v19 = vpop.f32.mrf.mxu2  ;;  %v5723_v21 = vadd.f32 %v5722_v2, %v5704_v34  ;;  %v5860_v2 = vld [vmem:[#allocation4 + $0x10] sm:$0xff]  ;;  %v5869_v34 = vld [vmem:[#allocation4 + $0x58] sm:$0xff] }
 0xaec   : > { %v5742_v7 = vadd.f32 %v10683_v57, %v5723_v21 }
 0xaf0   : > { %v5810_v10 = vpop.f32.mrf.mxu0 }
 0xaf1   : > { %v5791_v51 = vpop.f32.mrf.mxu3  ;;  %v5811_v55 = vadd.f32 %v5810_v10, %v5346_v46 }
 0xaf2   : > { %v5848_v3 = vpop.f32.mrf.mxu2  ;;  %v5792_v52 = vadd.f32 %v5791_v51, %v5773_v47  ;;  %v5888_v47 = vld [vmem:[#allocation5 + $0x30] sm:$0xff] }
 0xaf3   : > { %v5830_v33 = vadd.f32 %v5829_v61, %v5811_v55 }
 0xaf4   : > { %v5871_v43 = vadd.f32 %v5859_v9, %v5792_v52  ;;  %v5900_v52 = vadd.f32 %v5888_v47, %v5876_v29 }
 0xaf5   : > { %v5849_v10 = vadd.f32 %v5848_v3, %v5830_v33  ;;  %v5889_v3 = vld [vmem:[#allocation5 + $0x38] sm:$0xff] }
 0xaf6   : > { %v5895_v25 = vadd.f32 %v5883_v5, %v5871_v43  ;;  %v5866_v43 = vld [vmem:[#allocation4 + $0x40] sm:$0xff]  ;;  %v5912_v57 = vsel %vm9033_vm13, %v5900_v52, 0.0 }
 0xaf7   : > { %v5872_v41 = vadd.f32 %v5860_v2, %v5849_v10 }
 0xaf8   : > { %v5812_v8 = vpop.f32.mrf.mxu0  ;;  %v5907_v58 = vsel %vm9037_vm15, %v5895_v25, 0.0  ;;  %v5780_v25 = vadd.f32 %v10685_v19, %v5761_v62 }
 0xaf9   : > { %v5793_v40 = vpop.f32.mrf.mxu3  ;;  %v5918_v44 = vpack.c.bf16 %v5907_v58, %v5906_v42  ;;  %v5813_v13 = vadd.f32 %v5812_v8, %v5351_v54  ;;  %v5867_v54 = vld [vmem:[#allocation4 + $0x48] sm:$0xff]  ;;  %v5836_v8 = vpop.f32.mrf.mxu1 }
 0xafa   : > { %v5850_v15 = vpop.f32.mrf.mxu2  ;;  %v5794_v12 = vadd.f32 %v5793_v40, %v5775_v60  ;;  %v5879_v1 = vadd.f32 %v5867_v54, %v5742_v7  ;;  %v5884_v60 = vld [vmem:[#allocation5 + $0x10] sm:$0xff] }
 0xafb   : > { %5934 = vrot.lane.b32.xlu1 %v5918_v44, %s8800_s18  ;;  %v5832_v22 = vadd.f32 %v5831_v63, %v5813_v13  ;;  %v5896_v55 = vadd.f32 %v5884_v60, %v5872_v41 }
 0xafc   : > { %v5874_v0 = vadd.f32 %v5862_v53, %v5794_v12  ;;  %v5891_v53 = vld [vmem:[#allocation5 + $0x48] sm:$0xff] }
 0xafd   : > { %v5851_v12 = vadd.f32 %v5850_v15, %v5832_v22  ;;  %v5903_v38 = vadd.f32 %v5891_v53, %v5879_v1  ;;  %v5908_v15 = vsel %vm9029_vm1, %v5896_v55, 0.0 }
 0xafe   : > { %v5898_v46 = vadd.f32 %v5886_v18, %v5874_v0  ;;  %v5868_v0 = vld [vmem:[#allocation4 + $0x50] sm:$0xff]  ;;  %v5919_v21 = vpack.c.bf16 %v5908_v15, %v5908_v15 }
 0xb00   : > { %v5815_v31 = vpop.f32.mrf.mxu0  ;;  %v5910_v49 = vsel %vm9037_vm15, %v5898_v46, 0.0 }
 0xb01   : > { %v5816_v14 = vadd.f32 %v5815_v31, %v5356_v17  ;;  %v5796_v50 = vpop.f32.mrf.mxu3  ;;  %v5920_v11 = vpack.c.bf16 %v5910_v49, %v5909_v28  ;;  %v5915_v31 = vsel %vm9033_vm13, %v5903_v38, 0.0  ;;  %v5887_v49 = vld [vmem:[#allocation5 + $0x28] sm:$0xff]  ;;  %vm11206_vm13 = vcmask 744448  }
 0xb02   : > { %v5853_v61 = vpop.f32.mrf.mxu2  ;;  %v5797_v30 = vadd.f32 %v5796_v50, %v5778_v23  ;;  %vm11212_vm12 = vmmov %vm11206_vm13 }
 0xb03   : > { %v5835_v51 = vadd.f32 %v5834_v6, %v5816_v14  ;;  %5938 = vrot.lane.b32.xlu2 %v5920_v11, %s8800_s18  ;;  %v5863_v6 = vld [vmem:[#allocation4 + $0x28] sm:$0xff]  ;;  %v5893_v14 = vld [vmem:[#allocation5 + $0x58] sm:$0xff] }
 0xb04   : > { %v5877_v9 = vadd.f32 %v5865_v56, %v5797_v30  ;;  %v5875_v45 = vadd.f32 %v5863_v6, %v5851_v12 }
 0xb05   : > { %v5854_v17 = vadd.f32 %v5853_v61, %v5835_v51 }
 0xb06   : > { %v5901_v5 = vadd.f32 %v5889_v3, %v5877_v9  ;;  %v5899_v10 = vadd.f32 %v5887_v49, %v5875_v45 }
 0xb07   : > { %v5878_v48 = vadd.f32 %v5866_v43, %v5854_v17 }
 0xb08   : > { %v5817_v59 = vpop.f32.mrf.mxu0  ;;  %v5913_v39 = vsel %vm9037_vm15, %v5901_v5, 0.0  ;;  %v5911_v61 = vsel %vm9029_vm1, %v5899_v10, 0.0 }
 0xb09   : > { %v5902_v58 = vadd.f32 %v5890_v35, %v5878_v48  ;;  %v5818_v42 = vadd.f32 %v5817_v59, %v5361_v20  ;;  %v5798_v63 = vpop.f32.mrf.mxu3  ;;  %v5922_v44 = vpack.c.bf16 %v5913_v39, %v5912_v57  ;;  %v5892_v20 = vld [vmem:[#allocation5 + $0x50] sm:$0xff]  ;;  %v5921_v11 = vpack.c.bf16 %v5911_v61, %v5911_v61 }
 0xb0a   : > { %v5855_v40 = vpop.f32.mrf.mxu2  ;;  %v5799_v24 = vadd.f32 %v5798_v63, %v5780_v25 }
 0xb0b   : > { %v5914_v19 = vsel %vm9029_vm1, %v5902_v58, 0.0  ;;  %v5837_v27 = vadd.f32 %v5836_v8, %v5818_v42  ;;  %5942 = vrot.lane.b32.xlu0 %v5922_v44, %s8800_s18 }
 0xb0c   : > { %v5923_v4 = vpack.c.bf16 %v5914_v19, %v5914_v19  ;;  %v5880_v33 = vadd.f32 %v5868_v0, %v5799_v24 }
 0xb0d   : > { %v5856_v18 = vadd.f32 %v5855_v40, %v5837_v27 }
 0xb0e   : > { %5944 = vrot.lane.b32.xlu2 %v5923_v4, %s8800_s18  ;;  %v5904_v46 = vadd.f32 %v5892_v20, %v5880_v33 }
 0xb0f   : > { %v5881_v29 = vadd.f32 %v5869_v34, %v5856_v18 }
 0xb10   : > { %v5916_v23 = vsel %vm9037_vm15, %v5904_v46, 0.0  ;;  %vm11207_vm15 = vmmov %vm11206_vm13 }
 0xb11   : > { %v5924_v28 = vpack.c.bf16 %v5916_v23, %v5915_v31  ;;  %v5905_v50 = vadd.f32 %v5893_v14, %v5881_v29 }
 0xb13   : > { %5936 = vrot.lane.b32.xlu0 %v5919_v21, %s8800_s18  ;;  %5946 = vrot.lane.b32.xlu1 %v5924_v28, %s8800_s18  ;;  %v5917_v37 = vsel %vm9029_vm1, %v5905_v50, 0.0 }
 0xb14   : > { %v5925_v47 = vpack.c.bf16 %v5917_v37, %v5917_v37 }
 0xb1b   : > { %5948 = vrot.lane.b32.xlu0 %v5925_v47, %s8800_s18  ;;  %5940 = vrot.lane.b32.xlu1 %v5921_v11, %s8800_s18 }
 0xb5d   : > { %v5939_v36 = vpop.permute.xlu2 %5938 }
 0xb5e   : > { %v5951_v13 = vrot.slane %v5939_v36, 4 }
 0xb60   : > { %v5956_v30 = vsel %vm600_vm7, %v5951_v13, %v5939_v36 }
 0xb61   : > { %5972 = vst.msk [vmem:[#allocation2 + $0xc] sm:$0xff] %vm8922_vm8, %v5956_v30 }
 0xb68   : > { %v10726_v51 = vld [vmem:[#allocation2 + $0xc] sm:$0xff]  ;;  %v5945_v17 = vpop.permute.xlu2 %5944 }
 0xb69   : > { %5988 = vst [vmem:[#allocation3 + $0xc] sm:$0xff] %v10726_v51 }
 0xb6d   : > { %v5935_v52 = vpop.permute.xlu1 %5934 }
 0xb6e   : > { %v5950_v32 = vrot.slane %v5935_v52, 4 }
 0xb70   : > { %v5954_v56 = vsel %vm600_vm7, %v5950_v32, %v5935_v52 }
 0xb71   : > { %5970 = vst.msk [vmem:[#allocation2] sm:$0xff] %vm8922_vm8, %v5954_v56 }
 0xb78   : > { %v10732_v7 = vld [vmem:[#allocation2] sm:$0xff] }
 0xb79   : > { %6074 = vrot.lane.b32.xlu2 %v10732_v7, %s8805_s10  ;;  %6138 = vrot.lane.b32.xlu0 %v10732_v7, %s8807_s25  ;;  %5986 = vst [vmem:[#allocation3] sm:$0xff] %v10732_v7 }
 0xb7a   : > { %6266 = vrot.lane.b32.xlu1 %v10732_v7, %s8806_s24 }
 0xb7d   : > { %v5943_v2 = vpop.permute.xlu0 %5942 }
 0xb7e   : > { %v5952_v9 = vrot.slane %v5943_v2, 4 }
 0xb80   : > { %v5958_v62 = vsel %vm600_vm7, %v5952_v9, %v5943_v2  ;;  %v5959_v41 = vsel %vm600_vm7, %v5952_v9, %v5945_v17 }
 0xb81   : > { %5974 = vst.msk [vmem:[#allocation2 + $0x18] sm:$0xff] %vm8922_vm8, %v5958_v62  ;;  %6010 = vrot.lane.b32.xlu2 %v10732_v7, %s8808_s26  ;;  %6394 = vrot.lane.b32.xlu0 %v10732_v7, %s8802_s21 }
 0xb82   : > { %5975 = vst.msk [vmem:[#allocation2 + $0x20] sm:$0xf] %vm609_vm9, %v5959_v41  ;;  %6078 = vrot.lane.b32.xlu1 %v10726_v51, %s8805_s10 }
 0xb85   : > { %v5947_v3 = vpop.permute.xlu1 %5946  ;;  %v5937_v43 = vpop.permute.xlu0 %5936 }
 0xb86   : > { %v5953_v22 = vrot.slane %v5947_v3, 4  ;;  %v5955_v5 = vsel %vm600_vm7, %v5950_v32, %v5937_v43 }
 0xb87   : > { %5971 = vst.msk [vmem:[#allocation2 + $0x8] sm:$0xf] %vm609_vm9, %v5955_v5 }
 0xb88   : > { %v5960_v48 = vsel %vm600_vm7, %v5953_v22, %v5947_v3  ;;  %v10761_v54 = vld [vmem:[#allocation2 + $0x18] sm:$0xff] }
 0xb89   : > { %5976 = vst.msk [vmem:[#allocation2 + $0x24] sm:$0xff] %vm8922_vm8, %v5960_v48  ;;  %6330 = vrot.lane.b32.xlu2 %v10732_v7, %s8803_s22  ;;  %6270 = vrot.lane.b32.xlu0 %v10726_v51, %s8806_s24  ;;  %v5983_v25 = vld [vmem:[#allocation2 + $0x20] sm:$0xf]  ;;  %vm11203_vm8 = vcmask 1039360  }
 0xb8a   : > { %6014 = vrot.lane.b32.xlu1 %v10726_v51, %s8808_s26  ;;  %5990 = vst [vmem:[#allocation3 + $0x18] sm:$0xff] %v10761_v54  ;;  %v5999_v4 = vld [vmem:[#allocation2 + $0x20] sm:$0xf]  ;;  %vm11205_vm1 = vmmov %vm11203_vm8 }
 0xb8b   : > { %5991 = vst.msk [vmem:[#allocation3 + $0x20] sm:$0xf] %vm614_vm10, %v5983_v25  ;;  %v6063_v38 = vld [vmem:[#allocation2 + $0x20] sm:$0xf]  ;;  %vm11211_vm6 = vmmov %vm11205_vm1 }
 0xb8c   : > { %v6255_v18 = vld [vmem:[#allocation2 + $0x20] sm:$0xf] }
 0xb8d   : > { %v5941_v35 = vpop.permute.xlu1 %5940  ;;  %v5949_v59 = vpop.permute.xlu0 %5948  ;;  %v6383_v20 = vld [vmem:[#allocation2 + $0x20] sm:$0xf] }
 0xb8e   : > { %v5957_v26 = vsel %vm600_vm7, %v5951_v13, %v5941_v35  ;;  %v5961_v8 = vsel %vm600_vm7, %v5953_v22, %v5949_v59  ;;  %v5979_v1 = vld [vmem:[#allocation2 + $0x8] sm:$0xf]  ;;  %v6127_v34 = vld [vmem:[#allocation2 + $0x20] sm:$0xf]  ;;  %vm11202_vm7 = vcmask 883712  }
 0xb8f   : > { %5973 = vst.msk [vmem:[#allocation2 + $0x14] sm:$0xf] %vm609_vm9, %v5957_v26  ;;  %v6251_v58 = vld [vmem:[#allocation2 + $0x8] sm:$0xf]  ;;  %v6319_v45 = vld [vmem:[#allocation2 + $0x20] sm:$0xf]  ;;  %vm11209_vm14 = vmmov %vm11202_vm7 }
 0xb90   : > { %5977 = vst.msk [vmem:[#allocation2 + $0x2c] sm:$0xf] %vm609_vm9, %v5961_v8  ;;  %v10771_v57 = vld [vmem:[#allocation2 + $0x24] sm:$0xff]  ;;  %v6447_v46 = vld [vmem:[#allocation2 + $0x20] sm:$0xf]  ;;  %vm11204_vm9 = vcmask 752640  }
 0xb91   : > { %6142 = vrot.lane.b32.xlu2 %v10726_v51, %s8807_s25  ;;  %6018 = vrot.lane.b32.xlu0 %v10761_v54, %s8808_s26  ;;  %5992 = vst [vmem:[#allocation3 + $0x24] sm:$0xff] %v10771_v57  ;;  %v6059_v42 = vld [vmem:[#allocation2 + $0x8] sm:$0xf]  ;;  %v6191_v29 = vld [vmem:[#allocation2 + $0x20] sm:$0xf]  ;;  %vm11208_vm5 = vmmov %vm11204_vm9 }
 0xb92   : > { %6334 = vrot.lane.b32.xlu1 %v10726_v51, %s8803_s22  ;;  %5987 = vst.msk [vmem:[#allocation3 + $0x8] sm:$0xf] %vm614_vm10, %v5979_v1  ;;  %v6123_v55 = vld [vmem:[#allocation2 + $0x8] sm:$0xf]  ;;  %vm11210_vm0 = vmmov %vm11208_vm5 }
 0xb93   : > { %v5995_v40 = vld [vmem:[#allocation2 + $0x8] sm:$0xf] }
 0xb94   : > { %v6379_v44 = vld [vmem:[#allocation2 + $0x8] sm:$0xf] }
 0xb95   : > { %v6315_v19 = vld [vmem:[#allocation2 + $0x8] sm:$0xf] }
 0xb96   : > { %v5981_v39 = vld [vmem:[#allocation2 + $0x14] sm:$0xf]  ;;  %v6443_v56 = vld [vmem:[#allocation2 + $0x8] sm:$0xf] }
 0xb97   : > { %v5985_v60 = vld [vmem:[#allocation2 + $0x2c] sm:$0xf]  ;;  %5989 = vst.msk [vmem:[#allocation3 + $0x14] sm:$0xf] %vm614_vm10, %v5981_v39  ;;  %v6061_v63 = vld [vmem:[#allocation2 + $0x14] sm:$0xf] }
 0xb98   : > { %5993 = vst.msk [vmem:[#allocation3 + $0x2c] sm:$0xf] %vm614_vm10, %v5985_v60  ;;  %v5997_v12 = vld [vmem:[#allocation2 + $0x14] sm:$0xf]  ;;  %v6129_v49 = vld [vmem:[#allocation2 + $0x2c] sm:$0xf] }
 0xb99   : > { %6398 = vrot.lane.b32.xlu2 %v10726_v51, %s8802_s21  ;;  %6274 = vrot.lane.b32.xlu0 %v10761_v54, %s8806_s24  ;;  %v6253_v24 = vld [vmem:[#allocation2 + $0x14] sm:$0xf]  ;;  %v6065_v14 = vld [vmem:[#allocation2 + $0x2c] sm:$0xf]  ;;  %v6187_v59 = vld [vmem:[#allocation2 + $0x8] sm:$0xf] }
 0xb9a   : > { %6082 = vrot.lane.b32.xlu1 %v10761_v54, %s8805_s10  ;;  %v6317_v27 = vld [vmem:[#allocation2 + $0x14] sm:$0xf]  ;;  %v6001_v61 = vld [vmem:[#allocation2 + $0x2c] sm:$0xf] }
 0xb9b   : > { %v6125_v53 = vld [vmem:[#allocation2 + $0x14] sm:$0xf]  ;;  %v6385_v37 = vld [vmem:[#allocation2 + $0x2c] sm:$0xf] }
 0xb9c   : > { %v6381_v33 = vld [vmem:[#allocation2 + $0x14] sm:$0xf]  ;;  %v6321_v13 = vld [vmem:[#allocation2 + $0x2c] sm:$0xf] }
 0xb9d   : > { %v6257_v2 = vld [vmem:[#allocation2 + $0x2c] sm:$0xf]  ;;  %v6445_v3 = vld [vmem:[#allocation2 + $0x14] sm:$0xf] }
 0xb9e   : > { %v6193_v41 = vld [vmem:[#allocation2 + $0x2c] sm:$0xf] }
 0xba1   : > { %6146 = vrot.lane.b32.xlu2 %v10761_v54, %s8807_s25  ;;  %6086 = vrot.lane.b32.xlu0 %v10771_v57, %s8805_s10 }
 0xba2   : > { %6402 = vrot.lane.b32.xlu1 %v10761_v54, %s8802_s21 }
 0xba9   : > { %6022 = vrot.lane.b32.xlu2 %v10771_v57, %s8808_s26  ;;  %6406 = vrot.lane.b32.xlu0 %v10771_v57, %s8802_s21 }
 0xbaa   : > { %6338 = vrot.lane.b32.xlu1 %v10761_v54, %s8803_s22 }
 0xbb1   : > { %6278 = vrot.lane.b32.xlu2 %v10771_v57, %s8806_s24  ;;  %6342 = vrot.lane.b32.xlu0 %v10771_v57, %s8803_s22 }
 0xbb2   : > { %6150 = vrot.lane.b32.xlu1 %v10771_v57, %s8807_s25 }
 0xbb9   : > { %6268 = vrot.lane.b32.xlu2 %v6251_v58, %s8806_s24  ;;  %6076 = vrot.lane.b32.xlu0 %v6059_v42, %s8805_s10  ;;  %v6998_v58 = vld [vmem:[#allocation6] sm:$0x1] }
 0xbba   : > { %6140 = vrot.lane.b32.xlu1 %v6123_v55, %s8807_s25  ;;  %v6189_v55 = vld [vmem:[#allocation2 + $0x14] sm:$0xf] }
 0xbc1   : > { %6080 = vrot.lane.b32.xlu2 %v6061_v63, %s8805_s10  ;;  %6012 = vrot.lane.b32.xlu0 %v5995_v40, %s8808_s26 }
 0xbc2   : > { %6396 = vrot.lane.b32.xlu1 %v6379_v44, %s8802_s21 }
 0xbc9   : > { %6016 = vrot.lane.b32.xlu2 %v5997_v12, %s8808_s26  ;;  %6332 = vrot.lane.b32.xlu0 %v6315_v19, %s8803_s22 }
 0xbca   : > { %6272 = vrot.lane.b32.xlu1 %v6253_v24, %s8806_s24 }
 0xbd1   : > { %6336 = vrot.lane.b32.xlu2 %v6317_v27, %s8803_s22  ;;  %6144 = vrot.lane.b32.xlu0 %v6125_v53, %s8807_s25 }
 0xbd2   : > { %6020 = vrot.lane.b32.xlu1 %v5999_v4, %s8808_s26 }
 0xbd3   : > { %v10819_v0 = vpop.permute.xlu2 %6074 }
 0xbd4   : > { %v6090_v4 = vrot.slane %v10819_v0, 4 }
 0xbd9   : > { %6084 = vrot.lane.b32.xlu2 %v6063_v38, %s8805_s10  ;;  %6400 = vrot.lane.b32.xlu0 %v6381_v33, %s8802_s21 }
 0xbda   : > { %6276 = vrot.lane.b32.xlu1 %v6255_v18, %s8806_s24 }
 0xbdb   : > { %v10824_v6 = vpop.permute.xlu2 %6010 }
 0xbe1   : > { %6404 = vrot.lane.b32.xlu2 %v6383_v20, %s8802_s21  ;;  %6148 = vrot.lane.b32.xlu0 %v6127_v34, %s8807_s25 }
 0xbe2   : > { %6470 = vrot.lane.b32.xlu1 %v10771_v57, %s8801_s20 }
 0xbe3   : > { %v10830_v15 = vpop.permute.xlu2 %6330 }
 0xbe9   : > { %6340 = vrot.lane.b32.xlu2 %v6319_v45, %s8803_s22  ;;  %6468 = vrot.lane.b32.xlu0 %v6447_v46, %s8801_s20 }
 0xbea   : > { %6212 = vrot.lane.b32.xlu1 %v6191_v29, %s8804_s23 }
 0xbeb   : > { %v10835_v23 = vpop.permute.xlu2 %6142  ;;  %v10837_v31 = vpop.permute.xlu0 %6138 }
 0xbec   : > { %v6267_v21 = vpop.permute.xlu1 %6266  ;;  %v6154_v34 = vrot.slane %v10837_v31, 4 }
 0xbed   : > { %v6282_v5 = vrot.slane %v6267_v21, 4 }
 0xbf1   : > { %6210 = vrot.lane.b32.xlu0 %v10761_v54, %s8804_s23  ;;  %6152 = vrot.lane.b32.xlu2 %v6129_v49, %s8807_s25 }
 0xbf2   : > { %6088 = vrot.lane.b32.xlu1 %v6065_v14, %s8805_s10  ;;  %s434_s10 = scalar_lea.vmem %s11099_s11, %s8888_s27 }
 0xbf3   : > { %v10843_v28 = vpop.permute.xlu2 %6398  ;;  %v10845_v10 = vpop.permute.xlu0 %6394 }
 0xbf4   : > { %v6079_v50 = vpop.permute.xlu1 %6078 }
 0xbf9   : > { %6466 = vrot.lane.b32.xlu2 %v10761_v54, %s8801_s20  ;;  %6024 = vrot.lane.b32.xlu0 %v6001_v61, %s8808_s26 }
 0xbfa   : > { %6408 = vrot.lane.b32.xlu1 %v6385_v37, %s8802_s21 }
 0xbfb   : > { %v10851_v11 = vpop.permute.xlu2 %6146  ;;  %v10853_v47 = vpop.permute.xlu0 %6270 }
 0xbfc   : > { %v6015_v36 = vpop.permute.xlu1 %6014 }
 0xbfd   : > { %v6028_v40 = vrot.slane %v6015_v36, 4 }
 0xc01   : > { %6214 = vrot.lane.b32.xlu2 %v10771_v57, %s8804_s23  ;;  %6462 = vrot.lane.b32.xlu0 %v10726_v51, %s8801_s20  ;;  %v6092_v57 = vrot.slane %v6079_v50, 4 }
 0xc02   : > { %6344 = vrot.lane.b32.xlu1 %v6321_v13, %s8803_s22 }
 0xc03   : > { %v10860_v30 = vpop.permute.xlu2 %6022  ;;  %v10862_v52 = vpop.permute.xlu0 %6018 }
 0xc04   : > { %v10864_v32 = vpop.permute.xlu1 %6334 }
 0xc05   : > { %v6348_v38 = vrot.slane %v10864_v32, 4 }
 0xc09   : > { %6460 = vrot.lane.b32.xlu2 %v6443_v56, %s8801_s20  ;;  %6280 = vrot.lane.b32.xlu0 %v6257_v2, %s8806_s24 }
 0xc0a   : > { %6458 = vrot.lane.b32.xlu1 %v10732_v7, %s8801_s20 }
 0xc0b   : > { %v10870_v9 = vpop.permute.xlu2 %6278  ;;  %v10872_v17 = vpop.permute.xlu0 %6274 }
 0xc0c   : > { %v10874_v62 = vpop.permute.xlu1 %6082 }
 0xc0d   : > { %v6094_v13 = vrot.slane %v10874_v62, 4 }
 0xc11   : > { %6202 = vrot.lane.b32.xlu2 %v10732_v7, %s8804_s23  ;;  %6216 = vrot.lane.b32.xlu0 %v6193_v41, %s8804_s23  ;;  %v6449_v7 = vld [vmem:[#allocation2 + $0x2c] sm:$0xf]  ;;  %v6410_v41 = vrot.slane %v10845_v10, 4 }
 0xc12   : > { %6464 = vrot.lane.b32.xlu1 %v6445_v3, %s8801_s20 }
 0xc13   : > { %v6269_v43 = vpop.permute.xlu2 %6268  ;;  %v10880_v22 = vpop.permute.xlu0 %6086 }
 0xc14   : > { %v10882_v48 = vpop.permute.xlu1 %6402  ;;  %v6283_v54 = vrot.slane %v6269_v43, 4  ;;  %6307 = vst.msk [vmem:[#allocation3 + $0xf8] sm:$0xf] %vm614_vm10, %v6269_v43 }
 0xc16   : > { %v6290_v25 = vsel %vm626_vm11, %v6282_v5, %v6283_v54 }
 0xc17   : > { %v6291_v35 = vsel %vm11202_vm7, %v6267_v21, %v6290_v25 }
 0xc18   : > { %6306 = vst [vmem:[#allocation3 + $0xf0] sm:$0xff] %v6291_v35 }
 0xc19   : > { %6472 = vrot.lane.b32.xlu2 %v6449_v7, %s8801_s20  ;;  %6204 = vrot.lane.b32.xlu0 %v6187_v59, %s8804_s23  ;;  %v6346_v59 = vrot.slane %v10830_v15, 4 }
 0xc1a   : > { %6206 = vrot.lane.b32.xlu1 %v10726_v51, %s8804_s23 }
 0xc1b   : > { %v6081_v26 = vpop.permute.xlu2 %6080  ;;  %v10891_v8 = vpop.permute.xlu0 %6406 }
 0xc1c   : > { %v10893_v1 = vpop.permute.xlu1 %6338  ;;  %v6093_v60 = vrot.slane %v6081_v26, 4  ;;  %6117 = vst.msk [vmem:[#allocation3 + $0x74] sm:$0xf] %vm614_vm10, %v6081_v26  ;;  %v6414_v26 = vrot.slane %v10882_v48, 4 }
 0xc1e   : > { %v6100_v39 = vsel %vm626_vm11, %v6092_v57, %v6093_v60 }
 0xc1f   : > { %v6101_v42 = vsel %vm645_vm4, %v6079_v50, %v6100_v39  ;;  %v6284_v39 = vrot.slane %v10853_v47, 4 }
 0xc20   : > { %6116 = vst [vmem:[#allocation3 + $0x6c] sm:$0xff] %v6101_v42 }
 0xc21   : > { %6208 = vrot.lane.b32.xlu2 %v6189_v55, %s8804_s23  ;;  %7001 = vperm.xlu0 %8751, %v6998_v58  }
 0xc23   : > { %v6017_v51 = vpop.permute.xlu2 %6016  ;;  %v10899_v63 = vpop.permute.xlu0 %6342 }
 0xc24   : > { %v10901_v44 = vpop.permute.xlu1 %6150  ;;  %v6029_v12 = vrot.slane %v6017_v51, 4  ;;  %6053 = vst.msk [vmem:[#allocation3 + $0x44] sm:$0xf] %vm614_vm10, %v6017_v51 }
 0xc26   : > { %v6036_v19 = vsel %vm626_vm11, %v6028_v40, %v6029_v12 }
 0xc27   : > { %v6037_v24 = vsel %vm11203_vm8, %v6015_v36, %v6036_v19  ;;  %v6026_v36 = vrot.slane %v10824_v6, 4  ;;  %vm11213_vm8 = vcmask 736256  }
 0xc28   : > { %6052 = vst [vmem:[#allocation3 + $0x3c] sm:$0xff] %v6037_v24  ;;  %v6156_v24 = vrot.slane %v10835_v23, 4 }
 0xc2b   : > { %v6337_v27 = vpop.permute.xlu2 %6336  ;;  %v6077_v53 = vpop.permute.xlu0 %6076 }
 0xc2c   : > { %v6349_v33 = vrot.slane %v6337_v27, 4  ;;  %6373 = vst.msk [vmem:[#allocation3 + $0x134] sm:$0xf] %vm614_vm10, %v6337_v27  ;;  %v6141_v18 = vpop.permute.xlu1 %6140  ;;  %v6091_v20 = vrot.slane %v6077_v53, 4  ;;  %v6350_v27 = vrot.slane %v10893_v1, 4 }
 0xc2d   : > { %v6155_v45 = vrot.slane %v6141_v18, 4  ;;  %6179 = vst.msk [vmem:[#allocation3 + $0x98] sm:$0xf] %vm614_vm10, %v6141_v18 }
 0xc2e   : > { %v6356_v46 = vsel %vm626_vm11, %v6348_v38, %v6349_v33  ;;  %v6098_v29 = vsel %vm626_vm11, %v6090_v4, %v6091_v20  ;;  %6115 = vst.msk [vmem:[#allocation3 + $0x68] sm:$0xf] %vm614_vm10, %v6077_v53  ;;  %v6030_v38 = vrot.slane %v10862_v52, 4 }
 0xc2f   : > { %v6357_v21 = vsel %vm11204_vm9, %v10864_v32, %v6356_v46  ;;  %v6162_v49 = vsel %vm626_vm11, %v6154_v34, %v6155_v45  ;;  %v6099_v14 = vsel %vm645_vm4, %v10819_v0, %v6098_v29  ;;  %vm11216_vm9 = vmmov %vm11212_vm12 }
 0xc30   : > { %6372 = vst [vmem:[#allocation3 + $0x12c] sm:$0xff] %v6357_v21  ;;  %v6163_v50 = vsel %vm662_vm3, %v10837_v31, %v6162_v49  ;;  %v6412_v21 = vrot.slane %v10843_v28, 4  ;;  %v6160_v49 = vrot.slane %v10901_v44, 4 }
 0xc31   : > { %6178 = vst [vmem:[#allocation3 + $0x90] sm:$0xff] %v6163_v50 }
 0xc32   : > { %6114 = vst [vmem:[#allocation3 + $0x60] sm:$0xff] %v6099_v14 }
 0xc33   : > { %v6085_v61 = vpop.permute.xlu2 %6084  ;;  %v6013_v37 = vpop.permute.xlu0 %6012 }
 0xc34   : > { %v6095_v56 = vrot.slane %v6085_v61, 4  ;;  %6119 = vst.msk [vmem:[#allocation3 + $0x80] sm:$0xf] %vm614_vm10, %v6085_v61  ;;  %v6397_v32 = vpop.permute.xlu1 %6396  ;;  %v6027_v2 = vrot.slane %v6013_v37, 4  ;;  %v6286_v61 = vrot.slane %v10872_v17, 4 }
 0xc35   : > { %v6411_v0 = vrot.slane %v6397_v32, 4  ;;  %6435 = vst.msk [vmem:[#allocation3 + $0x158] sm:$0xf] %vm614_vm10, %v6397_v32 }
 0xc36   : > { %v6102_v31 = vsel %vm626_vm11, %v6094_v13, %v6095_v56  ;;  %v6034_v3 = vsel %vm626_vm11, %v6026_v36, %v6027_v2  ;;  %6051 = vst.msk [vmem:[#allocation3 + $0x38] sm:$0xf] %vm614_vm10, %v6013_v37 }
 0xc37   : > { %v6103_v43 = vsel %vm645_vm4, %v10874_v62, %v6102_v31  ;;  %v6418_v5 = vsel %vm626_vm11, %v6410_v41, %v6411_v0  ;;  %v6035_v54 = vsel %vm11205_vm1, %v10824_v6, %v6034_v3  ;;  %v6158_v0 = vrot.slane %v10851_v11, 4 }
 0xc38   : > { %6118 = vst [vmem:[#allocation3 + $0x78] sm:$0xff] %v6103_v43  ;;  %v6419_v25 = vsel %vm11206_vm13, %v10845_v10, %v6418_v5  ;;  %vm11218_vm13 = vmmov %vm11210_vm0 }
 0xc39   : > { %6434 = vst [vmem:[#allocation3 + $0x150] sm:$0xff] %v6419_v25 }
 0xc3a   : > { %6050 = vst [vmem:[#allocation3 + $0x30] sm:$0xff] %v6035_v54 }
 0xc3b   : > { %v6405_v35 = vpop.permute.xlu2 %6404  ;;  %v6333_v7 = vpop.permute.xlu0 %6332 }
 0xc3c   : > { %v6415_v57 = vrot.slane %v6405_v35, 4  ;;  %6439 = vst.msk [vmem:[#allocation3 + $0x170] sm:$0xf] %vm614_vm10, %v6405_v35  ;;  %v6273_v62 = vpop.permute.xlu1 %6272  ;;  %v6347_v60 = vrot.slane %v6333_v7, 4 }
 0xc3d   : > { %v6285_v6 = vrot.slane %v6273_v62, 4  ;;  %6309 = vst.msk [vmem:[#allocation3 + $0x104] sm:$0xf] %vm614_vm10, %v6273_v62 }
 0xc3e   : > { %v6422_v10 = vsel %vm626_vm11, %v6414_v26, %v6415_v57  ;;  %v6354_v58 = vsel %vm626_vm11, %v6346_v59, %v6347_v60  ;;  %6371 = vst.msk [vmem:[#allocation3 + $0x128] sm:$0xf] %vm614_vm10, %v6333_v7 }
 0xc3f   : > { %v6423_v42 = vsel %vm11207_vm15, %v10882_v48, %v6422_v10  ;;  %v6292_v55 = vsel %vm626_vm11, %v6284_v39, %v6285_v6  ;;  %v6355_v51 = vsel %vm11208_vm5, %v10830_v15, %v6354_v58  ;;  %vm11219_vm15 = vmmov %vm11202_vm7 }
 0xc40   : > { %6438 = vst [vmem:[#allocation3 + $0x168] sm:$0xff] %v6423_v42  ;;  %v6293_v40 = vsel %vm11209_vm14, %v10853_v47, %v6292_v55  ;;  %v8264_v42 = vld [vmem:[#allocation3 + $0x90] sm:$0xf]  ;;  %v8683_v55 = vld [vmem:[#allocation3 + $0x94] sm:$0xf] }
 0xc41   : > { %6308 = vst [vmem:[#allocation3 + $0xfc] sm:$0xff] %v6293_v40 }
 0xc42   : > { %6370 = vst [vmem:[#allocation3 + $0x120] sm:$0xff] %v6355_v51 }
 0xc43   : > { %v6341_v12 = vpop.permute.xlu2 %6340  ;;  %v6145_v19 = vpop.permute.xlu0 %6144 }
 0xc44   : > { %v6351_v53 = vrot.slane %v6341_v12, 4  ;;  %6375 = vst.msk [vmem:[#allocation3 + $0x140] sm:$0xf] %vm614_vm10, %v6341_v12  ;;  %v6021_v48 = vpop.permute.xlu1 %6020  ;;  %v6157_v4 = vrot.slane %v6145_v19, 4 }
 0xc45   : > { %v6031_v15 = vrot.slane %v6021_v48, 4  ;;  %6055 = vst.msk [vmem:[#allocation3 + $0x50] sm:$0xf] %vm614_vm10, %v6021_v48 }
 0xc46   : > { %v6358_v47 = vsel %vm626_vm11, %v6350_v27, %v6351_v53  ;;  %v6164_v33 = vsel %vm626_vm11, %v6156_v24, %v6157_v4  ;;  %6181 = vst.msk [vmem:[#allocation3 + $0xa4] sm:$0xf] %vm614_vm10, %v6145_v19  ;;  %v6096_v27 = vrot.slane %v10880_v22, 4 }
 0xc47   : > { %v6359_v18 = vsel %vm11210_vm0, %v10893_v1, %v6358_v47  ;;  %v6038_v20 = vsel %vm626_vm11, %v6030_v38, %v6031_v15  ;;  %v6165_v34 = vsel %vm662_vm3, %v10835_v23, %v6164_v33 }
 0xc48   : > { %6374 = vst [vmem:[#allocation3 + $0x138] sm:$0xff] %v6359_v18  ;;  %v6039_v45 = vsel %vm11211_vm6, %v10862_v52, %v6038_v20  ;;  %v6032_v18 = vrot.slane %v10860_v30, 4 }
 0xc49   : > { %6054 = vst [vmem:[#allocation3 + $0x48] sm:$0xff] %v6039_v45  ;;  %v6416_v45 = vrot.slane %v10891_v8, 4 }
 0xc4a   : > { %6180 = vst [vmem:[#allocation3 + $0x9c] sm:$0xff] %v6165_v34 }
 0xc4b   : > { %v6153_v46 = vpop.permute.xlu2 %6152  ;;  %v6401_v29 = vpop.permute.xlu0 %6400 }
 0xc4c   : > { %v6277_v14 = vpop.permute.xlu1 %6276  ;;  %v6161_v50 = vrot.slane %v6153_v46, 4  ;;  %6185 = vst.msk [vmem:[#allocation3 + $0xbc] sm:$0xf] %vm614_vm10, %v6153_v46  ;;  %v6413_v1 = vrot.slane %v6401_v29, 4 }
 0xc4d   : > { %v6287_v23 = vrot.slane %v6277_v14, 4  ;;  %6311 = vst.msk [vmem:[#allocation3 + $0x110] sm:$0xf] %vm614_vm10, %v6277_v14  ;;  %v8680_v14 = vld [vmem:[#allocation3 + $0x7c] sm:$0xf] }
 0xc4e   : > { %v6168_v52 = vsel %vm626_vm11, %v6160_v49, %v6161_v50  ;;  %v6420_v37 = vsel %vm626_vm11, %v6412_v21, %v6413_v1  ;;  %6437 = vst.msk [vmem:[#allocation3 + $0x164] sm:$0xf] %vm614_vm10, %v6401_v29  ;;  %v8252_v49 = vld [vmem:[#allocation3 + $0x78] sm:$0xf] }
 0xc4f   : > { %v6294_v36 = vsel %vm626_vm11, %v6286_v61, %v6287_v23  ;;  %v6169_v13 = vsel %vm662_vm3, %v10901_v44, %v6168_v52  ;;  %v6421_v56 = vsel %vm11212_vm12, %v10843_v28, %v6420_v37  ;;  %v8240_v37 = vld [vmem:[#allocation3 + $0x60] sm:$0xf]  ;;  %vm11226_vm12 = vcmask 1041408  }
 0xc50   : > { %v6295_v32 = vsel %vm11202_vm7, %v10872_v17, %v6294_v36  ;;  %6184 = vst [vmem:[#allocation3 + $0xb4] sm:$0xff] %v6169_v13  ;;  %v8677_v36 = vld [vmem:[#allocation3 + $0x64] sm:$0xf] }
 0xc51   : > { %6310 = vst [vmem:[#allocation3 + $0x108] sm:$0xff] %v6295_v32  ;;  %v8684_v39 = vld [vmem:[#allocation3 + $0x98] sm:$0xf0]  ;;  %v8266_v6 = vld [vmem:[#allocation3 + $0x9c] sm:$0xf0] }
 0xc52   : > { %6436 = vst [vmem:[#allocation3 + $0x15c] sm:$0xff] %v6421_v56  ;;  %v8265_v19 = vor.u32 %v8684_v39, %v8264_v42  ;;  %v8269_v24 = vor.u32 %v8683_v55, %v8266_v6  ;;  %v8678_v32 = vld [vmem:[#allocation3 + $0x68] sm:$0xf0]  ;;  %v8216_v55 = vld [vmem:[#allocation3 + $0x30] sm:$0xf] }
 0xc53   : > { %v6467_v2 = vpop.permute.xlu2 %6466  ;;  %v6149_v41 = vpop.permute.xlu0 %6148 }
 0xc54   : > { %v10982_v31 = vpop.permute.xlu1 %6470  ;;  %v6159_v3 = vrot.slane %v6149_v41, 4  ;;  %6183 = vst.msk [vmem:[#allocation3 + $0xb0] sm:$0xf] %vm614_vm10, %v6149_v41  ;;  %v6478_v5 = vrot.slane %v6467_v2, 4  ;;  %v8242_v41 = vld [vmem:[#allocation3 + $0x6c] sm:$0xf0] }
 0xc56   : > { %v6166_v44 = vsel %vm626_vm11, %v6158_v0, %v6159_v3  ;;  %v6352_v0 = vrot.slane %v10899_v63, 4 }
 0xc57   : > { %v6167_v28 = vsel %vm662_vm3, %v10851_v11, %v6166_v44  ;;  %v8687_v7 = vld [vmem:[#allocation3 + $0xb0] sm:$0xf0]  ;;  %v8278_v62 = vld [vmem:[#allocation3 + $0xb4] sm:$0xf0]  ;;  %vm11214_vm3 = vcmask 891904   ;;  %v8241_v44 = vor.u32 %v8678_v32, %v8240_v37 }
 0xc58   : > { %6182 = vst [vmem:[#allocation3 + $0xa8] sm:$0xff] %v6167_v28  ;;  %v8245_v28 = vor.u32 %v8677_v36, %v8242_v41  ;;  %v8192_v32 = vld [vmem:[#allocation3] sm:$0xf]  ;;  %v8702_v41 = vld [vmem:[#allocation3 + $0x128] sm:$0xf0]  ;;  %vm11221_vm14 = vmmov %vm11214_vm3 }
 0xc59   : > { %vm11224_vm6 = vmmov %vm11214_vm3 }
 0xc5b   : > { %v10988_v43 = vpop.permute.xlu2 %6214  ;;  %v6469_v17 = vpop.permute.xlu0 %6468 }
 0xc5c   : > { %v6213_v54 = vpop.permute.xlu1 %6212  ;;  %v6479_v25 = vrot.slane %v6469_v17, 4  ;;  %6503 = vst.msk [vmem:[#allocation3 + $0x1a0] sm:$0xf] %vm614_vm10, %v6469_v17 }
 0xc5d   : > { %6247 = vst.msk [vmem:[#allocation3 + $0xe0] sm:$0xf] %vm614_vm10, %v6213_v54  ;;  %v6223_v51 = vrot.slane %v6213_v54, 4  ;;  %v8372_v54 = vld [vmem:[#allocation3 + $0x168] sm:$0xf] }
 0xc5e   : > { %v6486_v35 = vsel %vm626_vm11, %v6478_v5, %v6479_v25  ;;  %v8228_v5 = vld [vmem:[#allocation3 + $0x48] sm:$0xf]  ;;  %v8710_v25 = vld [vmem:[#allocation3 + $0x16c] sm:$0xf] }
 0xc5f   : > { %v6487_v59 = vsel %vm11213_vm8, %v6467_v2, %v6486_v35  ;;  %v8276_v26 = vld [vmem:[#allocation3 + $0xa8] sm:$0xf]  ;;  %v8686_v57 = vld [vmem:[#allocation3 + $0xac] sm:$0xf] }
 0xc60   : > { %6502 = vst [vmem:[#allocation3 + $0x198] sm:$0xff] %v6487_v59  ;;  %v8277_v11 = vor.u32 %v8687_v7, %v8276_v26  ;;  %v8281_v60 = vor.u32 %v8686_v57, %v8278_v62  ;;  %v8674_v26 = vld [vmem:[#allocation3 + $0x4c] sm:$0xf] }
 0xc62   : > { %6881 = vmatpush.bf16.msrb.mxu3 %v8277_v11  ;;  %6920 = vmatpush.bf16.msra.mxu1 %v8281_v60 }
 0xc63   : > { %v10994_v10 = vpop.permute.xlu2 %6460  ;;  %v6211_v58 = vpop.permute.xlu0 %6210 }
 0xc64   : > { %6499 = vst.msk [vmem:[#allocation3 + $0x188] sm:$0xf] %vm614_vm10, %v10994_v10  ;;  %v6089_v40 = vpop.permute.xlu1 %6088  ;;  %v6222_v12 = vrot.slane %v6211_v58, 4 }
 0xc65   : > { %v6097_v53 = vrot.slane %v6089_v40, 4  ;;  %6121 = vst.msk [vmem:[#allocation3 + $0x8c] sm:$0xf] %vm614_vm10, %v6089_v40 }
 0xc66   : > { %v6230_v48 = vsel %vm626_vm11, %v6222_v12, %v6223_v51  ;;  %6882 = vmatpush.bf16.msrb.mxu3 %v8265_v19  ;;  %6921 = vmatpush.bf16.msra.mxu1 %v8269_v24  ;;  %v8708_v51 = vld [vmem:[#allocation3 + $0x158] sm:$0xf0]  ;;  %v8671_v19 = vld [vmem:[#allocation3 + $0x34] sm:$0xf]  ;;  %v8218_v24 = vld [vmem:[#allocation3 + $0x3c] sm:$0xf0] }
 0xc67   : > { %v6104_v4 = vsel %vm626_vm11, %v6096_v27, %v6097_v53  ;;  %v6231_v38 = vsel %vm11214_vm3, %v6211_v58, %v6230_v48  ;;  %v8362_v27 = vld [vmem:[#allocation3 + $0x15c] sm:$0xf0] }
 0xc68   : > { %v6105_v15 = vsel %vm645_vm4, %v10880_v22, %v6104_v4  ;;  %6246 = vst [vmem:[#allocation3 + $0xd8] sm:$0xff] %v6231_v38  ;;  %vm11215_vm4 = vmmov %vm11205_vm1  ;;  %v8360_v4 = vld [vmem:[#allocation3 + $0x150] sm:$0xf]  ;;  %v6475_v38 = vrot.slane %v10994_v10, 4  ;;  %v8348_v10 = vld [vmem:[#allocation3 + $0x138] sm:$0xf] }
 0xc69   : > { %6120 = vst [vmem:[#allocation3 + $0x84] sm:$0xff] %v6105_v15  ;;  %vm11217_vm1 = vmmov %vm11213_vm8 }
 0xc6a   : > { %vm11220_vm5 = vmmov %vm11217_vm1 }
 0xc6b   : > { %v11005_v47 = vpop.permute.xlu2 %6202  ;;  %v6025_v33 = vpop.permute.xlu0 %6024  ;;  %vm11222_vm0 = vmmov %vm11217_vm1 }
 0xc6c   : > { %v6409_v20 = vpop.permute.xlu1 %6408  ;;  %v6033_v34 = vrot.slane %v6025_v33, 4  ;;  %6057 = vst.msk [vmem:[#allocation3 + $0x5c] sm:$0xf] %vm614_vm10, %v6025_v33 }
 0xc6d   : > { %v6417_v46 = vrot.slane %v6409_v20, 4  ;;  %6441 = vst.msk [vmem:[#allocation3 + $0x17c] sm:$0xf] %vm614_vm10, %v6409_v20  ;;  %v8707_v20 = vld [vmem:[#allocation3 + $0x154] sm:$0xf] }
 0xc6e   : > { %v6040_v29 = vsel %vm626_vm11, %v6032_v18, %v6033_v34  ;;  %v8361_v18 = vor.u32 %v8708_v51, %v8360_v4  ;;  %v8324_v51 = vld [vmem:[#allocation3 + $0x108] sm:$0xf] }
 0xc6f   : > { %v6424_v22 = vsel %vm626_vm11, %v6416_v45, %v6417_v46  ;;  %v6041_v21 = vsel %vm11215_vm4, %v10860_v30, %v6040_v29  ;;  %v6480_v30 = vrot.slane %v10982_v31, 4  ;;  %v8221_v45 = vor.u32 %v8671_v19, %v8218_v24  ;;  %v8204_v29 = vld [vmem:[#allocation3 + $0x18] sm:$0xf] }
 0xc70   : > { %v6425_v50 = vsel %vm11216_vm9, %v10891_v8, %v6424_v22  ;;  %6056 = vst [vmem:[#allocation3 + $0x54] sm:$0xff] %v6041_v21  ;;  %v8681_v1 = vld [vmem:[#allocation3 + $0x80] sm:$0xf0]  ;;  %v8254_v61 = vld [vmem:[#allocation3 + $0x84] sm:$0xf0]  ;;  %v8365_v46 = vor.u32 %v8707_v20, %v8362_v27 }
 0xc71   : > { %6440 = vst [vmem:[#allocation3 + $0x174] sm:$0xff] %v6425_v50  ;;  %v8253_v23 = vor.u32 %v8681_v1, %v8252_v49  ;;  %v8257_v52 = vor.u32 %v8680_v14, %v8254_v61  ;;  %v8669_v22 = vld [vmem:[#allocation3 + $0x20] sm:$0xf0]  ;;  %v8206_v21 = vld [vmem:[#allocation3 + $0x24] sm:$0xf0]  ;;  %v11043_v1 = vld [vmem:[%s11097_s9] sm:$0xff] }
 0xc72   : > { %v8704_v50 = vld [vmem:[#allocation3 + $0x13c] sm:$0xf]  ;;  %v8205_v37 = vor.u32 %v8669_v22, %v8204_v29 }
 0xc73   : > { %6883 = vmatpush.bf16.msrb.mxu3 %v8253_v23  ;;  %6922 = vmatpush.bf16.msra.mxu1 %v8257_v52  ;;  %v6473_v13 = vpop.permute.xlu2 %6472  ;;  %v11017_v56 = vpop.permute.xlu0 %6462 }
 0xc74   : > { %v6481_v2 = vrot.slane %v6473_v13, 4  ;;  %6505 = vst.msk [vmem:[#allocation3 + $0x1ac] sm:$0xf] %vm614_vm10, %v6473_v13  ;;  %v6345_v8 = vpop.permute.xlu1 %6344 }
 0xc75   : > { %v6353_v3 = vrot.slane %v6345_v8, 4  ;;  %6377 = vst.msk [vmem:[#allocation3 + $0x14c] sm:$0xf] %vm614_vm10, %v6345_v8  ;;  %v8336_v8 = vld [vmem:[#allocation3 + $0x120] sm:$0xf] }
 0xc76   : > { %v6488_v17 = vsel %vm626_vm11, %v6480_v30, %v6481_v2  ;;  %v8666_v30 = vld [vmem:[#allocation3 + $0x8] sm:$0xf0] }
 0xc77   : > { %v6489_v35 = vsel %vm11217_vm1, %v10982_v31, %v6488_v17  ;;  %v6360_v7 = vsel %vm626_vm11, %v6352_v0, %v6353_v3  ;;  %6884 = vmatpush.bf16.msrb.mxu3 %v8241_v44  ;;  %6923 = vmatpush.bf16.msra.mxu1 %v8245_v28  ;;  %v8675_v59 = vld [vmem:[#allocation3 + $0x50] sm:$0xf0]  ;;  %v8230_v57 = vld [vmem:[#allocation3 + $0x54] sm:$0xf0]  ;;  %v8672_v31 = vld [vmem:[#allocation3 + $0x38] sm:$0xf0]  ;;  %v6582_v44 = vunpack.c.l.b16 %v11043_v1 }
 0xc78   : > { %6504 = vst [vmem:[#allocation3 + $0x1a4] sm:$0xff] %v6489_v35  ;;  %v6361_v62 = vsel %vm11218_vm13, %v10899_v63, %v6360_v7  ;;  %v8229_v11 = vor.u32 %v8675_v59, %v8228_v5  ;;  %v8711_v60 = vld [vmem:[#allocation3 + $0x170] sm:$0xf0]  ;;  %v8233_v39 = vor.u32 %v8674_v26, %v8230_v57  ;;  %v8374_v6 = vld [vmem:[#allocation3 + $0x174] sm:$0xf0]  ;;  %v6288_v63 = vrot.slane %v10870_v9, 4 }
 0xc79   : > { %6376 = vst [vmem:[#allocation3 + $0x144] sm:$0xff] %v6361_v62  ;;  %v8373_v58 = vor.u32 %v8711_v60, %v8372_v54  ;;  %v8377_v42 = vor.u32 %v8710_v25, %v8374_v6  ;;  %v8217_v33 = vor.u32 %v8672_v31, %v8216_v55  ;;  %v8665_v0 = vld [vmem:[#allocation3 + $0x4] sm:$0xf]  ;;  %v8194_v3 = vld [vmem:[#allocation3 + $0xc] sm:$0xf0]  ;;  %v6224_v25 = vrot.slane %v10988_v43, 4 }
 0xc7a   : > { %v8701_v17 = vld [vmem:[#allocation3 + $0x124] sm:$0xf]  ;;  %v8338_v5 = vld [vmem:[#allocation3 + $0x12c] sm:$0xf0]  ;;  %v8712_v54 = vld [vmem:[#allocation3 + $0x178] sm:$0xf0]  ;;  %v8193_v59 = vor.u32 %v8666_v30, %v8192_v32  ;;  %v8197_v60 = vor.u32 %v8665_v0, %v8194_v3  ;;  %v11052_v31 = vpack.c.b16 %v6582_v44, %v6582_v44 }
 0xc7b   : > { %6885 = vmatpush.bf16.msrb.mxu3 %v8229_v11  ;;  %6894 = vmatpush.bf16.msra.mxu0 %v8373_v58  ;;  %v11029_v40 = vpop.permute.xlu2 %6208  ;;  %v6281_v12 = vpop.permute.xlu0 %6280  ;;  %v6476_v57 = vrot.slane %v11017_v56, 4  ;;  %v8337_v11 = vor.u32 %v8702_v41, %v8336_v8  ;;  %v8341_v58 = vor.u32 %v8701_v17, %v8338_v5  ;;  %v8716_v5 = vld [vmem:[#allocation3 + $0x19c] sm:$0xf] }
 0xc7c   : > { %6924 = vmatpush.bf16.msra.mxu1 %v8233_v39  ;;  %6933 = vmatpush.bf16.msra.mxu2 %v8377_v42  ;;  %6245 = vst.msk [vmem:[#allocation3 + $0xd4] sm:$0xf] %vm614_vm10, %v11029_v40  ;;  %v6459_v53 = vpop.permute.xlu1 %6458  ;;  %v6289_v48 = vrot.slane %v6281_v12, 4  ;;  %v8380_v39 = vld [vmem:[#allocation3 + $0x170] sm:$0xf] }
 0xc7d   : > { %v6474_v15 = vrot.slane %v6459_v53, 4  ;;  %6313 = vst.msk [vmem:[#allocation3 + $0x11c] sm:$0xf] %vm614_vm10, %v6281_v12  ;;  %v8396_v42 = vld [vmem:[#allocation3 + $0x198] sm:$0xf]  ;;  %v8381_v55 = vor.u32 %v8712_v54, %v8380_v39  ;;  %v6583_v39 = vunpack.c.h.b16 %v11043_v1 }
 0xc7e   : > { %v6296_v34 = vsel %vm626_vm11, %v6288_v63, %v6289_v48  ;;  %v8698_v63 = vld [vmem:[#allocation3 + $0x10c] sm:$0xf] }
 0xc7f   : > { %v6482_v49 = vsel %vm626_vm11, %v6474_v15, %v6475_v38  ;;  %v6297_v14 = vsel %vm11219_vm15, %v10870_v9, %v6296_v34  ;;  %6886 = vmatpush.bf16.msrb.mxu3 %v8217_v33  ;;  %6895 = vmatpush.bf16.msra.mxu0 %v8361_v18  ;;  %v8668_v9 = vld [vmem:[#allocation3 + $0x1c] sm:$0xf]  ;;  %v8717_v26 = vld [vmem:[#allocation3 + $0x1a0] sm:$0xf0]  ;;  %v8312_v34 = vld [vmem:[#allocation3 + $0xf0] sm:$0xf] }
 0xc80   : > { %v6483_v61 = vsel %vm11220_vm5, %v6459_v53, %v6482_v49  ;;  %6312 = vst [vmem:[#allocation3 + $0x114] sm:$0xff] %v6297_v14  ;;  %6925 = vmatpush.bf16.msra.mxu1 %v8221_v45  ;;  %6934 = vmatpush.bf16.msra.mxu2 %v8365_v46  ;;  %v8705_v23 = vld [vmem:[#allocation3 + $0x140] sm:$0xf0]  ;;  %v8350_v52 = vld [vmem:[#allocation3 + $0x144] sm:$0xf0]  ;;  %v8209_v2 = vor.u32 %v8668_v9, %v8206_v21  ;;  %v6221_v21 = vrot.slane %v11029_v40, 4 }
 0xc81   : > { %6498 = vst [vmem:[#allocation3 + $0x180] sm:$0xff] %v6483_v61  ;;  %v8349_v36 = vor.u32 %v8705_v23, %v8348_v10  ;;  %v8353_v13 = vor.u32 %v8704_v50, %v8350_v52  ;;  %v8397_v24 = vor.u32 %v8717_v26, %v8396_v42  ;;  %v8709_v15 = vld [vmem:[#allocation3 + $0x160] sm:$0xf0]  ;;  %v8696_v33 = vld [vmem:[#allocation3 + $0xf8] sm:$0xf0] }
 0xc82   : > { %v8314_v45 = vld [vmem:[#allocation3 + $0xfc] sm:$0xf0]  ;;  %v8706_v22 = vld [vmem:[#allocation3 + $0x148] sm:$0xf0]  ;;  %v8313_v14 = vor.u32 %v8696_v33, %v8312_v34  ;;  %v8695_v10 = vld [vmem:[#allocation3 + $0xf4] sm:$0xf] }
 0xc83   : > { %6887 = vmatpush.bf16.msrb.mxu3 %v8205_v37  ;;  %6896 = vmatpush.bf16.msra.mxu0 %v8349_v36  ;;  %v6217_v28 = vpop.permute.xlu0 %6216  ;;  %v8356_v50 = vld [vmem:[#allocation3 + $0x140] sm:$0xf]  ;;  %v8317_v23 = vor.u32 %v8695_v10, %v8314_v45  ;;  %v8300_v52 = vld [vmem:[#allocation3 + $0xd8] sm:$0xf]  ;;  %v8692_v37 = vld [vmem:[#allocation3 + $0xdc] sm:$0xf] }
 0xc84   : > { %6926 = vmatpush.bf16.msra.mxu1 %v8209_v2  ;;  %6935 = vmatpush.bf16.msra.mxu2 %v8353_v13  ;;  %v6465_v35 = vpop.permute.xlu1 %6464  ;;  %v6225_v7 = vrot.slane %v6217_v28, 4  ;;  %6249 = vst.msk [vmem:[#allocation3 + $0xec] sm:$0xf] %vm614_vm10, %v6217_v28  ;;  %v8344_v36 = vld [vmem:[#allocation3 + $0x128] sm:$0xf]  ;;  %v8357_v32 = vor.u32 %v8706_v22, %v8356_v50 }
 0xc85   : > { %v6477_v62 = vrot.slane %v6465_v35, 4  ;;  %6501 = vst.msk [vmem:[#allocation3 + $0x194] sm:$0xf] %vm614_vm10, %v6465_v35  ;;  %v6507_v9 = vld [vmem:[%s11097_s9 + $0x8] sm:$0xf] }
 0xc86   : > { %v6232_v6 = vsel %vm626_vm11, %v6224_v25, %v6225_v7  ;;  %v8398_v8 = vld [vmem:[#allocation3 + $0x1a4] sm:$0xf0]  ;;  %v8703_v25 = vld [vmem:[#allocation3 + $0x130] sm:$0xf0]  ;;  %v8682_v22 = vld [vmem:[#allocation3 + $0x88] sm:$0xf0] }
 0xc87   : > { %v6484_v12 = vsel %vm626_vm11, %v6476_v57, %v6477_v62  ;;  %v6233_v19 = vsel %vm11221_vm14, %v10988_v43, %v6232_v6  ;;  %6888 = vmatpush.bf16.msrb.mxu3 %v8193_v59  ;;  %6897 = vmatpush.bf16.msra.mxu0 %v8337_v11  ;;  %v8699_v27 = vld [vmem:[#allocation3 + $0x110] sm:$0xf0]  ;;  %v8326_v53 = vld [vmem:[#allocation3 + $0x114] sm:$0xf0]  ;;  %v8401_v54 = vor.u32 %v8716_v5, %v8398_v8  ;;  %v8700_v59 = vld [vmem:[#allocation3 + $0x118] sm:$0xf0] }
 0xc88   : > { %v6485_v48 = vsel %vm11222_vm0, %v11017_v56, %v6484_v12  ;;  %6248 = vst [vmem:[#allocation3 + $0xe4] sm:$0xff] %v6233_v19  ;;  %6927 = vmatpush.bf16.msra.mxu1 %v8197_v60  ;;  %6936 = vmatpush.bf16.msra.mxu2 %v8341_v58  ;;  %v8325_v4 = vor.u32 %v8699_v27, %v8324_v51  ;;  %v8368_v43 = vld [vmem:[#allocation3 + $0x158] sm:$0xf]  ;;  %v6218_v56 = vrot.slane %v11005_v47, 4  ;;  %v8384_v3 = vld [vmem:[#allocation3 + $0x180] sm:$0xf] }
 0xc89   : > { %v8329_v38 = vor.u32 %v8698_v63, %v8326_v53  ;;  %6500 = vst [vmem:[#allocation3 + $0x18c] sm:$0xff] %v6485_v48  ;;  %v8369_v18 = vor.u32 %v8709_v15, %v8368_v43  ;;  %v8345_v35 = vor.u32 %v8703_v25, %v8344_v36  ;;  %v8713_v26 = vld [vmem:[#allocation3 + $0x184] sm:$0xf]  ;;  %v8332_v62 = vld [vmem:[#allocation3 + $0x110] sm:$0xf]  ;;  %v6586_v15 = vpack.c.b16 %v6583_v39, %v6583_v39 }
 0xc8a   : > { %6889 = vmatmul.bf16.vlgmr.msrb.gmra.mxu3 %v11052_v31  ;;  %v8284_v60 = vld [vmem:[#allocation3 + $0xb0] sm:$0xf]  ;;  %v8333_v6 = vor.u32 %v8700_v59, %v8332_v62  ;;  %v8697_v19 = vld [vmem:[#allocation3 + $0x100] sm:$0xf0]  ;;  %v8688_v63 = vld [vmem:[#allocation3 + $0xb8] sm:$0xf0] }
 0xc8b   : > { %6913 = vmatpush.bf16.msra.mxu3 %v8397_v24  ;;  %6898 = vmatpush.bf16.msra.mxu0 %v8325_v4  ;;  %v6205_v20 = vpop.permute.xlu0 %6204  ;;  %v8404_v53 = vld [vmem:[#allocation3 + $0x1a0] sm:$0xf]  ;;  %v8285_v48 = vor.u32 %v8688_v63, %v8284_v60  ;;  %v8320_v4 = vld [vmem:[#allocation3 + $0xf8] sm:$0xf]  ;;  %v8685_v43 = vld [vmem:[#allocation3 + $0xa0] sm:$0xf0] }
 0xc8c   : > { %6972 = vmatpush.bf16.msrb.mxu1 %v8381_v55  ;;  %6937 = vmatpush.bf16.msra.mxu2 %v8329_v38  ;;  %v6207_v46 = vpop.permute.xlu1 %6206  ;;  %v6219_v29 = vrot.slane %v6205_v20, 4  ;;  %6243 = vst.msk [vmem:[#allocation3 + $0xc8] sm:$0xf] %vm614_vm10, %v6205_v20  ;;  %vm11223_vm10 = vmmov %vm11214_vm3  ;;  %v8718_v55 = vld [vmem:[#allocation3 + $0x1a8] sm:$0xf0]  ;;  %v8321_v1 = vor.u32 %v8697_v19, %v8320_v4 }
 0xc8d   : > { %6928 = vmatmul.bf16.vlgmr.msra.gmra.mxu1 %v11052_v31  ;;  %v6220_v49 = vrot.slane %v6207_v46, 4  ;;  %v8405_v38 = vor.u32 %v8718_v55, %v8404_v53  ;;  %v8715_v33 = vld [vmem:[#allocation3 + $0x190] sm:$0xf0]  ;;  %v8272_v20 = vld [vmem:[#allocation3 + $0x98] sm:$0xf] }
 0xc8e   : > { %v6226_v61 = vsel %vm626_vm11, %v6218_v56, %v6219_v29  ;;  %v8392_v34 = vld [vmem:[#allocation3 + $0x188] sm:$0xf]  ;;  %v8273_v45 = vor.u32 %v8685_v43, %v8272_v20  ;;  %v8308_v56 = vld [vmem:[#allocation3 + $0xe0] sm:$0xf]  ;;  %v8691_v10 = vld [vmem:[#allocation3 + $0xd0] sm:$0xf0] }
 0xc8f   : > { %v6228_v13 = vsel %vm626_vm11, %v6220_v49, %v6221_v21  ;;  %v6227_v40 = vsel %vm11223_vm10, %v11005_v47, %v6226_v61  ;;  %6899 = vmatpush.bf16.msra.mxu0 %v8313_v14  ;;  %v8693_v30 = vld [vmem:[#allocation3 + $0xe0] sm:$0xf0]  ;;  %v8302_v2 = vld [vmem:[#allocation3 + $0xe4] sm:$0xf0]  ;;  %v6584_v47 = vunpack.c.l.b16 %v6507_v9  ;;  %v8260_v49 = vld [vmem:[#allocation3 + $0x80] sm:$0xf] }
 0xc90   : > { %6973 = vmatpush.bf16.msrb.mxu1 %v8369_v18  ;;  %v6229_v41 = vsel %vm11224_vm6, %v6207_v46, %v6228_v13  ;;  %6242 = vst [vmem:[#allocation3 + $0xc0] sm:$0xff] %v6227_v40  ;;  %6938 = vmatpush.bf16.msra.mxu2 %v8317_v23  ;;  %v8301_v0 = vor.u32 %v8693_v30, %v8300_v52  ;;  %v8714_v44 = vld [vmem:[#allocation3 + $0x188] sm:$0xf0]  ;;  %v8386_v7 = vld [vmem:[#allocation3 + $0x18c] sm:$0xf0]  ;;  %vm7029_vm11 = vcmp.lt.s32.totalorder %v436_v16, 288 }
 0xc91   : > { %v8305_v28 = vor.u32 %v8692_v37, %v8302_v2  ;;  %6244 = vst [vmem:[#allocation3 + $0xcc] sm:$0xff] %v6229_v41  ;;  %v8385_v17 = vor.u32 %v8714_v44, %v8384_v3  ;;  %v8389_v57 = vor.u32 %v8713_v26, %v8386_v7  ;;  %v6587_v11 = vpack.c.b16 %v6584_v47, %v6584_v47  ;;  %v8694_v18 = vld [vmem:[#allocation3 + $0xe8] sm:$0xf0]  ;;  %v8248_v61 = vld [vmem:[#allocation3 + $0x68] sm:$0xf] }
 0xc92   : > { %v8393_v46 = vor.u32 %v8715_v33, %v8392_v34  ;;  %v8309_v29 = vor.u32 %v8694_v18, %v8308_v56  ;;  %v8261_v14 = vor.u32 %v8682_v22, %v8260_v49  ;;  %v8679_v23 = vld [vmem:[#allocation3 + $0x70] sm:$0xf0]  ;;  %v8676_v37 = vld [vmem:[#allocation3 + $0x58] sm:$0xf0]  ;;  %v8236_v36 = vld [vmem:[#allocation3 + $0x50] sm:$0xf] }
 0xc93   : > { %6900 = vmatpush.bf16.msra.mxu0 %v8301_v0  ;;  %6914 = vmatpush.bf16.msra.mxu3 %v8385_v17  ;;  %v8296_v21 = vld [vmem:[#allocation3 + $0xc8] sm:$0xf]  ;;  %v8249_v52 = vor.u32 %v8679_v23, %v8248_v61  ;;  %v8237_v9 = vor.u32 %v8676_v37, %v8236_v36  ;;  %v8224_v13 = vld [vmem:[#allocation3 + $0x38] sm:$0xf]  ;;  %v8673_v40 = vld [vmem:[#allocation3 + $0x40] sm:$0xf0]  ;;  %v7002_v60 = vpop.permute.xlu0 %7001 }
 0xc94   : > { %6974 = vmatpush.bf16.msrb.mxu1 %v8357_v32  ;;  %6939 = vmatpush.bf16.msra.mxu2 %v8305_v28  ;;  %v8297_v50 = vor.u32 %v8691_v10, %v8296_v21  ;;  %v8225_v32 = vor.u32 %v8673_v40, %v8224_v13  ;;  %v8670_v30 = vld [vmem:[#allocation3 + $0x28] sm:$0xf0]  ;;  %v8212_v2 = vld [vmem:[#allocation3 + $0x20] sm:$0xf]  ;;  %v8667_v41 = vld [vmem:[#allocation3 + $0x10] sm:$0xf0] }
 0xc95   : > { %v8213_v8 = vor.u32 %v8670_v30, %v8212_v2  ;;  %v8200_v0 = vld [vmem:[#allocation3 + $0x8] sm:$0xf] }
 0xc96   : > { %v8201_v3 = vor.u32 %v8667_v41, %v8200_v0 }
 0xc97   : > { %6952 = vmatpush.bf16.msrb.mxu3 %v8401_v54  ;;  %v8288_v58 = vld [vmem:[#allocation3 + $0xc0] sm:$0xf]  ;;  %v8689_v42 = vld [vmem:[#allocation3 + $0xc4] sm:$0xf] }
 0xc98   : > { %6975 = vmatpush.bf16.msrb.mxu1 %v8345_v35  ;;  %v8690_v51 = vld [vmem:[#allocation3 + $0xc8] sm:$0xf0]  ;;  %v8290_v12 = vld [vmem:[#allocation3 + $0xcc] sm:$0xf0] }
 0xc99   : > { %v8289_v24 = vor.u32 %v8690_v51, %v8288_v58  ;;  %v8293_v27 = vor.u32 %v8689_v42, %v8290_v12  ;;  %v7004_v58 = vperm.slane %v7002_v60, 0  ;;  %v7008_v42 = vld [vmem:[%s8896_s30] sm:$0x7] }
 0xc9a   : > { %8406 = vmatmul.msk.bf16.vlgmr.msra.gmra.mxu3 %vm1047_vm2, %v6587_v11  ;;  %v7011_v12 = vperm.slane %v7008_v42, 1  ;;  %v7012_v4 = vperm.slane %v7008_v42, 2 }
 0xc9b   : > { %6953 = vmatpush.bf16.msrb.mxu3 %v8389_v57  ;;  %6901 = vmatpush.bf16.msra.mxu0 %v8289_v24 }
 0xc9c   : > { %6976 = vmatpush.bf16.msrb.mxu1 %v8333_v6  ;;  %6940 = vmatpush.bf16.msra.mxu2 %v8293_v27 }
 0xc9e   : > { %6902 = vmatmul.bf16.vlgmr.msra.gmra.mxu0 %v6586_v15 }
 0xc9f   : > { %6959 = vmatpush.bf16.msrb.mxu0 %v8285_v48  ;;  %6941 = vmatmul.bf16.vlgmr.msra.gmra.mxu2 %v6586_v15 }
 0xca0   : > { %6991 = vmatpush.bf16.msrb.mxu2 %v8405_v38  ;;  %6977 = vmatpush.bf16.msrb.mxu1 %v8321_v1 }
 0xca3   : > { %6960 = vmatpush.bf16.msrb.mxu0 %v8273_v45 }
 0xca4   : > { %6992 = vmatpush.bf16.msrb.mxu2 %v8393_v46  ;;  %6978 = vmatpush.bf16.msrb.mxu1 %v8309_v29 }
 0xca7   : > { %6961 = vmatpush.bf16.msrb.mxu0 %v8261_v14 }
 0xca8   : > { %6979 = vmatpush.bf16.msrb.mxu1 %v8297_v50 }
 0xcaa   : > { %8407 = vmatmul.msk.bf16.vlgmr.msrb.gmra.mxu3 %vm1047_vm2, %v6587_v11 }
 0xcab   : > { %6962 = vmatpush.bf16.msrb.mxu0 %v8249_v52  ;;  %6980 = vmatmul.bf16.vlgmr.msrb.gmra.mxu1 %v6586_v15  ;;  %v7010_v15 = vperm.slane %v7008_v42, 0 }
 0xcaf   : > { %6963 = vmatpush.bf16.msrb.mxu0 %v8237_v9  ;;  %8408 = vmatmul.msk.bf16.vlgmr.msrb.gmra.mxu2 %vm1047_vm2, %v6587_v11  ;;  %vm11225_vm2 = vcmask 1040384  }
 0xcb3   : > { %6964 = vmatpush.bf16.msrb.mxu0 %v8225_v32 }
 0xcb7   : > { %6965 = vmatpush.bf16.msrb.mxu0 %v8213_v8 }
 0xcbb   : > { %6966 = vmatpush.bf16.msrb.mxu0 %v8201_v3 }
 0xcbe   : > { %6967 = vmatmul.bf16.vlgmr.msrb.gmra.mxu0 %v11052_v31 }
 0xd0a   : > { %v6929_v44 = vpop.f32.mrf.mxu1 }
 0xd0d   : > { %v6890_v28 = vpop.f32.mrf.mxu3 }
 0xd12   : > { %v6931_v17 = vpop.f32.mrf.mxu1 }
 0xd15   : > { %v6892_v5 = vpop.f32.mrf.mxu3 }
 0xd1b   : > { %v6903_v54 = vpop.f32.mrf.mxu0 }
 0xd1c   : > { %v6904_v31 = vadd.f32 %v6903_v54, %v6890_v28 }
 0xd1d   : > { %v6916_v25 = vpop.f32.mrf.mxu3 }
 0xd1e   : > { %v6917_v19 = vadd.f32 %v6916_v25, %v6904_v31 }
 0xd20   : > { %v7005_v38 = vadd.f32 %v7004_v58, %v6917_v19 }
 0xd22   : > { %v6942_v47 = vpop.f32.mrf.mxu2  ;;  %v7016_v18 = vadd.f32 %v7010_v15, %v7005_v38 }
 0xd23   : > { %v6905_v35 = vpop.f32.mrf.mxu0  ;;  %v6943_v11 = vadd.f32 %v6942_v47, %v6929_v44 }
 0xd25   : > { %v6918_v7 = vpop.f32.mrf.mxu3 }
 0xd28   : > { %v6981_v59 = vpop.f32.mrf.mxu1 }
 0xd2a   : > { %v6944_v26 = vpop.f32.mrf.mxu2 }
 0xd2d   : > { %v6955_v57 = vpop.f32.mrf.mxu3 }
 0xd2e   : > { %v6956_v6 = vadd.f32 %v6955_v57, %v6943_v11 }
 0xd30   : > { %v6983_v62 = vpop.f32.mrf.mxu1  ;;  %v7006_v51 = vadd.f32 %v7004_v58, %v6956_v6 }
 0xd32   : > { %v6994_v39 = vpop.f32.mrf.mxu2  ;;  %v7017_v53 = vadd.f32 %v7011_v12, %v7006_v51 }
 0xd34   : > { %v7022_v43 = vrot.slane %v7017_v53, 7 }
 0xd35   : > { %v6957_v55 = vpop.f32.mrf.mxu3 }
 0xd36   : > { %v7024_v45 = vsel %vm11225_vm2, %v7016_v18, %v7022_v43 }
 0xd3a   : > { %v6996_v63 = vpop.f32.mrf.mxu2 }
 0xd3b   : > { %v6968_v24 = vpop.f32.mrf.mxu0 }
 0xd3c   : > { %v6982_v27 = vadd.f32 %v6981_v59, %v6968_v24 }
 0xd3e   : > { %v6995_v48 = vadd.f32 %v6994_v39, %v6982_v27 }
 0xd40   : > { %v7007_v1 = vadd.f32 %v7004_v58, %v6995_v48 }
 0xd42   : > { %v7018_v33 = vadd.f32 %v7012_v4, %v7007_v1 }
 0xd43   : > { %v6970_v20 = vpop.f32.mrf.mxu0 }
 0xd44   : > { %v7023_v34 = vrot.slane %v7018_v33, 6 }
 0xd46   : > { %v7025_v56 = vsel %vm11226_vm12, %v7024_v45, %v7023_v34 }
 0xd47   : > { %7031 = vst.msk [vmem:[%s434_s10] sm:$0x7] %vm7029_vm11, %v7025_v56 }
 0xd48 PF: > { %s24_s19 = sadd.s32 1, %s8794_s19  }
 0xd49   : > { %p21_p7 = scmp.ge.s32.totalorder %s24_s19, 4  }
 0xd4b   :  { %23 = sbr.rel (!%p21_p7) target bundleno = 4 (0x4), region = 109 }
 0xd50   :  { %7051 = vsyncpa [#allocation8], 1 }
 0xd51   :  { %7053 = vsyncpa [#allocation8 + $0x1], 1 }

</bundles_post_ra>
